<compile_context>
chip_gen: v7x
topology: tpu7x:2x2x1
jax: 0.10.0
libtpu: 0.0.40
codegen_flags: <defaults>
</compile_context>

<pallas_src>
import math

import jax
import jax.numpy as jnp
from jax.experimental import pallas as pl
from jax.experimental.pallas import tpu as pltpu

_SQRT_HALF = 0.7071067811865476


def _erf_approx(x):
    # Abramowitz & Stegun 7.1.26 polynomial erf (max abs err ~1.5e-7, i.e.
    # float32-exact).  Used because lax.erf has no Mosaic lowering; PyTorch's
    # default nn.GELU() is the exact erf-based GELU.
    a1, a2, a3, a4, a5 = (0.254829592, -0.284496736, 1.421413741,
                          -1.453152027, 1.061405429)
    p = 0.3275911
    s = jnp.where(x >= 0.0, 1.0, -1.0)
    ax = jnp.abs(x)
    t = 1.0 / (1.0 + p * ax)
    poly = ((((a5 * t + a4) * t + a3) * t + a2) * t + a1) * t
    return s * (1.0 - poly * jnp.exp(-ax * ax))


def _gelu_exact(x):
    return 0.5 * x * (1.0 + _erf_approx(x * _SQRT_HALF))


def _round_up(x, m):
    return ((x + m - 1) // m) * m


# ---------------------------------------------------------------------------
# Pallas kernels
# ---------------------------------------------------------------------------
def _conv_gelu_pool_kernel(x_ref, w_ref, b_ref, o_ref):
    """One pooled output row per grid step: 4 tap matmuls (the 2x2 pool
    window positions), bias + exact GELU per tap, then a 4-way elementwise
    max (== MaxPool2d over the GELU'd conv output).  Lane-dense (Wo, 128)
    output store."""
    w = w_ref[...]
    b = b_ref[...]
    out = _gelu_exact(
        jnp.dot(x_ref[0, 0], w, preferred_element_type=jnp.float32) + b)
    for q in range(1, 4):
        tap = _gelu_exact(
            jnp.dot(x_ref[q, 0], w, preferred_element_type=jnp.float32) + b)
        out = jnp.maximum(out, tap)
    o_ref[0] = out.astype(o_ref.dtype)


def pallas_conv_gelu_pool(slab, w, bias):
    """Fused 3x3 'same' conv + bias + GELU + 2x2/stride-2 max-pool.

    slab: (4, B*Ho, Wo, Kp) im2col rows grouped by pool tap.
    w:    (Kp, 128)  weights, cout zero-padded to 128 lanes.
    bias: (1, 128).
    returns (B*Ho, Wo, 128) float32 (padded channels are exactly 0).
    """
    q, m, wo, kp = slab.shape
    n = w.shape[1]
    return pl.pallas_call(
        _conv_gelu_pool_kernel,
        out_shape=jax.ShapeDtypeStruct((m, wo, n), jnp.float32),
        grid=(m,),
        in_specs=[
            pl.BlockSpec((q, 1, wo, kp), lambda i: (0, i, 0, 0)),
            pl.BlockSpec((kp, n), lambda i: (0, 0)),
            pl.BlockSpec((1, n), lambda i: (0, 0)),
        ],
        out_specs=pl.BlockSpec((1, wo, n), lambda i: (i, 0, 0)),
        compiler_params=pltpu.CompilerParams(
            dimension_semantics=("parallel",)),
        cost_estimate=pl.CostEstimate(
            flops=2 * q * m * wo * kp * n,
            transcendentals=q * m * wo * n,
            bytes_accessed=4 * (q * m * wo * kp + kp * n + n + m * wo * n)),
    )(slab, w, bias)


def _mlp_kernel(x_ref, w1_ref, b1_ref, w2_ref, b2_ref, o_ref):
    h = _gelu_exact(
        jnp.dot(x_ref[...], w1_ref[...], preferred_element_type=jnp.float32)
        + b1_ref[...])
    o_ref[...] = (jnp.dot(h, w2_ref[...], preferred_element_type=jnp.float32)
                  + b2_ref[...]).astype(o_ref.dtype)


def pallas_mlp(x, w1, b1, w2, b2):
    """Fused fc1 + GELU + fc2 (hidden/output dims pre-padded lane-dense),
    tiled over batch rows; weight blocks are grid-invariant (stay in VMEM)."""
    b, k1 = x.shape
    n1 = w1.shape[1]
    n2 = w2.shape[1]
    tile_b = 256 if b >= 256 else _round_up(b, 8)
    b_pad = _round_up(b, tile_b)
    if b_pad != b:
        x = jnp.pad(x, ((0, b_pad - b), (0, 0)))
    out = pl.pallas_call(
        _mlp_kernel,
        out_shape=jax.ShapeDtypeStruct((b_pad, n2), jnp.float32),
        grid=(b_pad // tile_b,),
        in_specs=[
            pl.BlockSpec((tile_b, k1), lambda i: (i, 0)),
            pl.BlockSpec((k1, n1), lambda i: (0, 0)),
            pl.BlockSpec((1, n1), lambda i: (0, 0)),
            pl.BlockSpec((n1, n2), lambda i: (0, 0)),
            pl.BlockSpec((1, n2), lambda i: (0, 0)),
        ],
        out_specs=pl.BlockSpec((tile_b, n2), lambda i: (i, 0)),
        compiler_params=pltpu.CompilerParams(
            dimension_semantics=("parallel",)),
        cost_estimate=pl.CostEstimate(
            flops=2 * b_pad * (k1 * n1 + n1 * n2),
            transcendentals=b_pad * n1,
            bytes_accessed=4 * (b_pad * k1 + k1 * n1 + n1 + n1 * n2 + n2
                                + b_pad * n2)),
    )(x, w1, b1, w2, b2)
    return out[:b]


# ---------------------------------------------------------------------------
# Layout glue (XLA side, no compute)
# ---------------------------------------------------------------------------
# TODO(synk): im2col is still materialized by XLA (9x read amplification of
# the tiny conv inputs); a halo-DMA in-kernel im2col would remove it but needs
# manual overlapping-window copies.
def _pool_tap_im2col(x_nhwc, k_pad):
    """(B,H,W,C) -> (4, B*Ho, Wo, Kp): 3x3/'same' im2col rows, grouped by
    which of the 4 positions of each 2x2 pool window they feed."""
    b, h, w, c = x_nhwc.shape
    ho, wo = h // 2, w // 2
    xp = jnp.pad(x_nhwc, ((0, 0), (1, 1), (1, 1), (0, 0)))
    cols = [xp[:, kh:kh + h, kw:kw + w, :]
            for kh in range(3) for kw in range(3)]
    col = jnp.concatenate(cols, axis=-1)                       # (B,H,W,9C)
    k = 9 * c
    if k_pad > k:
        col = jnp.pad(col, ((0, 0), (0, 0), (0, 0), (0, k_pad - k)))
    col = col.reshape(b, ho, 2, wo, 2, k_pad)
    col = jnp.transpose(col, (2, 4, 0, 1, 3, 5))               # (2,2,B,Ho,Wo,Kp)
    return col.reshape(4, b * ho, wo, k_pad)


def _prep_conv(w_oihw, bias, k_pad, n_pad=128):
    cout, cin, kh, kw = w_oihw.shape
    w = jnp.transpose(w_oihw, (2, 3, 1, 0)).reshape(kh * kw * cin, cout)
    w = jnp.pad(w, ((0, k_pad - kh * kw * cin), (0, n_pad - cout)))
    b = jnp.pad(bias, (0, n_pad - cout)).reshape(1, n_pad)
    return w.astype(jnp.float32), b.astype(jnp.float32)


def _prep_fc(w_oi, bias, k_pad, n_pad):
    n, k = w_oi.shape
    w = jnp.pad(jnp.transpose(w_oi), ((0, k_pad - k), (0, n_pad - n)))
    b = jnp.pad(bias, (0, n_pad - n)).reshape(1, n_pad)
    return w.astype(jnp.float32), b.astype(jnp.float32)


def init_params(key):
    """PyTorch-layout synthetic parameters (default uniform init)."""
    ks = jax.random.split(key, 8)

    def u(k, shape, fan_in):
        bound = 1.0 / math.sqrt(fan_in)
        return jax.random.uniform(k, shape, jnp.float32, -bound, bound)

    return {
        "conv1_w": u(ks[0], (16, 3, 3, 3), 3 * 9),
        "conv1_b": u(ks[1], (16,), 3 * 9),
        "conv2_w": u(ks[2], (32, 16, 3, 3), 16 * 9),
        "conv2_b": u(ks[3], (32,), 16 * 9),
        "fc1_w": u(ks[4], (750, 32 * 7 * 7), 32 * 7 * 7),
        "fc1_b": u(ks[5], (750,), 32 * 7 * 7),
        "fc2_w": u(ks[6], (4, 750), 750),
        "fc2_b": u(ks[7], (4,), 750),
    }


def prepare_params(p):
    """One-time repack into kernel-friendly, lane-dense (zero-padded) layouts.
    fc1 hidden 750->768 and fc2 out 4->128: GELU(0)=0 and the padded fc2 rows
    are 0, so results are numerically identical."""
    w1, b1 = _prep_conv(p["conv1_w"], p["conv1_b"], k_pad=32)
    w2, b2 = _prep_conv(p["conv2_w"], p["conv2_b"], k_pad=144)
    wf1, bf1 = _prep_fc(p["fc1_w"], p["fc1_b"], k_pad=32 * 7 * 7, n_pad=768)
    wf2, bf2 = _prep_fc(p["fc2_w"], p["fc2_b"], k_pad=768, n_pad=128)
    return {"w1": w1, "b1": b1, "w2": w2, "b2": b2,
            "wf1": wf1, "bf1": bf1, "wf2": wf2, "bf2": bf2}


@jax.jit
def dqn_forward(x_nchw, kp):
    b, _, h, w = x_nchw.shape
    x = jnp.transpose(x_nchw, (0, 2, 3, 1)).astype(jnp.float32)   # NCHW->NHWC

    # stage 1: conv1 (3->16, k3, s1, p1) + GELU + 2x2 max-pool, fused kernel
    y = pallas_conv_gelu_pool(_pool_tap_im2col(x, k_pad=32),
                              kp["w1"], kp["b1"])                 # (B*14,14,128)
    y = y.reshape(b, h // 2, w // 2, 128)[:, :, :, :16]           # strip cout pad

    # stage 2: conv2 (16->32, k3, s1, p1) + GELU + 2x2 max-pool, fused kernel
    y = pallas_conv_gelu_pool(_pool_tap_im2col(y, k_pad=144),
                              kp["w2"], kp["b2"])                 # (B*7,7,128)
    y = y.reshape(b, h // 4, w // 4, 128)[:, :, :, :32]           # strip cout pad

    # flatten in PyTorch's NCHW x.view(B, -1) order: (C, H, W)
    flat = jnp.transpose(y, (0, 3, 1, 2)).reshape(b, 32 * (h // 4) * (w // 4))

    # fused fc1 + GELU + fc2 (hidden padded 750->768, out padded 4->128)
    out = pallas_mlp(flat, kp["wf1"], kp["bf1"], kp["wf2"], kp["bf2"])
    return out[:, :4]


if __name__ == "__main__":
    key = jax.random.PRNGKey(0)
    pkey, xkey = jax.random.split(key)
    params = prepare_params(init_params(pkey))
    # Spatial size must be 28x28 so the flattened feature is 32*7*7 (fc1's
    # expected input size in the PyTorch module).
    x = jax.random.normal(xkey, (2, 3, 28, 28), dtype=jnp.float32)
    out = dqn_forward(x, params)
    jax.block_until_ready(out)
    assert out.shape == (2, 4) and out.dtype == jnp.float32
    print("KERNEL_OK")
</pallas_src>

<mosaic_0001>
module attributes {stable_mosaic.version = 11 : i64} {
  func.func @_conv_gelu_pool_kernel(%arg0: i32, %arg1: memref<4x1x14x32xf32, #tpu.memory_space<vmem>>, %arg2: memref<32x128xf32, #tpu.memory_space<vmem>>, %arg3: memref<1x128xf32, #tpu.memory_space<vmem>>, %arg4: memref<1x14x128xf32, #tpu.memory_space<vmem>>) attributes {dimension_semantics = [#tpu.dimension_semantics<parallel>], iteration_bounds = array<i64: 28>, scalar_prefetch = 0 : i64, scratch_operands = 0 : i64, tpu.core_type = #tpu.core_type<tc>, window_params = [{transform_indices = @transform_0, window_bounds = array<i64: 4, 1, 14, 32>}, {pipeline_mode = #tpu.pipeline_mode<synchronous>, transform_indices = @transform_1, window_bounds = array<i64: 32, 128>}, {pipeline_mode = #tpu.pipeline_mode<synchronous>, transform_indices = @transform_2, window_bounds = array<i64: 1, 128>}, {transform_indices = @transform_3, window_bounds = array<i64: 1, 14, 128>}]} {
    %c0 = arith.constant 0 : index
    %c0_0 = arith.constant 0 : index
    %0 = vector.load %arg2[%c0, %c0_0] : memref<32x128xf32, #tpu.memory_space<vmem>>, vector<32x128xf32>
    %c0_1 = arith.constant 0 : index
    %c0_2 = arith.constant 0 : index
    %1 = vector.load %arg3[%c0_1, %c0_2] : memref<1x128xf32, #tpu.memory_space<vmem>>, vector<1x128xf32>
    %c0_3 = arith.constant 0 : index
    %c0_4 = arith.constant 0 : index
    %c0_5 = arith.constant 0 : index
    %c0_6 = arith.constant 0 : index
    %2 = vector.load %arg1[%c0_3, %c0_4, %c0_5, %c0_6] : memref<4x1x14x32xf32, #tpu.memory_space<vmem>>, vector<1x1x14x32xf32>
    %3 = vector.shape_cast %2 : vector<1x1x14x32xf32> to vector<14x32xf32>
    %cst = arith.constant dense<0.000000e+00> : vector<14x128xf32>
    %4 = tpu.matmul %3, %0, %cst {dimension_numbers = #tpu.dot_dimension_numbers<[1], [0], [0], [1], [0, 0, 1, 1], [], []>} : vector<14x32xf32>, vector<32x128xf32>, vector<14x128xf32> -> vector<14x128xf32>
    %5 = vector.broadcast %1 : vector<1x128xf32> to vector<14x128xf32>
    %6 = arith.addf %4, %5 : vector<14x128xf32>
    %cst_7 = arith.constant 5.000000e-01 : f32
    %7 = vector.broadcast %cst_7 : f32 to vector<14x128xf32>
    %8 = arith.mulf %7, %6 : vector<14x128xf32>
    %cst_8 = arith.constant 0.707106769 : f32
    %9 = vector.broadcast %cst_8 : f32 to vector<14x128xf32>
    %10 = arith.mulf %6, %9 : vector<14x128xf32>
    %cst_9 = arith.constant 0.000000e+00 : f32
    %11 = vector.broadcast %cst_9 : f32 to vector<14x128xf32>
    %12 = arith.cmpf oge, %10, %11 : vector<14x128xf32>
    %cst_10 = arith.constant 1.000000e+00 : f32
    %cst_11 = arith.constant -1.000000e+00 : f32
    %13 = vector.broadcast %cst_10 : f32 to vector<14x128xf32>
    %14 = vector.broadcast %cst_11 : f32 to vector<14x128xf32>
    %15 = arith.select %12, %13, %14 : vector<14x128xi1>, vector<14x128xf32>
    %16 = math.absf %10 : vector<14x128xf32>
    %cst_12 = arith.constant 0.327591091 : f32
    %17 = vector.broadcast %cst_12 : f32 to vector<14x128xf32>
    %18 = arith.mulf %17, %16 : vector<14x128xf32>
    %cst_13 = arith.constant 1.000000e+00 : f32
    %19 = vector.broadcast %cst_13 : f32 to vector<14x128xf32>
    %20 = arith.addf %19, %18 : vector<14x128xf32>
    %cst_14 = arith.constant 1.000000e+00 : f32
    %21 = vector.broadcast %cst_14 : f32 to vector<14x128xf32>
    %22 = arith.divf %21, %20 : vector<14x128xf32>
    %cst_15 = arith.constant 1.06140542 : f32
    %23 = vector.broadcast %cst_15 : f32 to vector<14x128xf32>
    %24 = arith.mulf %23, %22 : vector<14x128xf32>
    %cst_16 = arith.constant -1.45315206 : f32
    %25 = vector.broadcast %cst_16 : f32 to vector<14x128xf32>
    %26 = arith.addf %24, %25 : vector<14x128xf32>
    %27 = arith.mulf %26, %22 : vector<14x128xf32>
    %cst_17 = arith.constant 1.42141378 : f32
    %28 = vector.broadcast %cst_17 : f32 to vector<14x128xf32>
    %29 = arith.addf %27, %28 : vector<14x128xf32>
    %30 = arith.mulf %29, %22 : vector<14x128xf32>
    %cst_18 = arith.constant -0.284496725 : f32
    %31 = vector.broadcast %cst_18 : f32 to vector<14x128xf32>
    %32 = arith.addf %30, %31 : vector<14x128xf32>
    %33 = arith.mulf %32, %22 : vector<14x128xf32>
    %cst_19 = arith.constant 0.254829586 : f32
    %34 = vector.broadcast %cst_19 : f32 to vector<14x128xf32>
    %35 = arith.addf %33, %34 : vector<14x128xf32>
    %36 = arith.mulf %35, %22 : vector<14x128xf32>
    %cst_20 = arith.constant 0.000000e+00 : f32
    %37 = vector.broadcast %cst_20 : f32 to vector<14x128xf32>
    %38 = arith.subf %37, %16 : vector<14x128xf32>
    %39 = arith.mulf %38, %16 : vector<14x128xf32>
    %40 = math.exp %39 : vector<14x128xf32>
    %41 = arith.mulf %36, %40 : vector<14x128xf32>
    %cst_21 = arith.constant 1.000000e+00 : f32
    %42 = vector.broadcast %cst_21 : f32 to vector<14x128xf32>
    %43 = arith.subf %42, %41 : vector<14x128xf32>
    %44 = arith.mulf %15, %43 : vector<14x128xf32>
    %cst_22 = arith.constant 1.000000e+00 : f32
    %45 = vector.broadcast %cst_22 : f32 to vector<14x128xf32>
    %46 = arith.addf %45, %44 : vector<14x128xf32>
    %47 = arith.mulf %8, %46 : vector<14x128xf32>
    %c1 = arith.constant 1 : index
    %c0_23 = arith.constant 0 : index
    %c0_24 = arith.constant 0 : index
    %c0_25 = arith.constant 0 : index
    %48 = vector.load %arg1[%c1, %c0_23, %c0_24, %c0_25] : memref<4x1x14x32xf32, #tpu.memory_space<vmem>>, vector<1x1x14x32xf32>
    %49 = vector.shape_cast %48 : vector<1x1x14x32xf32> to vector<14x32xf32>
    %cst_26 = arith.constant dense<0.000000e+00> : vector<14x128xf32>
    %50 = tpu.matmul %49, %0, %cst_26 {dimension_numbers = #tpu.dot_dimension_numbers<[1], [0], [0], [1], [0, 0, 1, 1], [], []>} : vector<14x32xf32>, vector<32x128xf32>, vector<14x128xf32> -> vector<14x128xf32>
    %51 = vector.broadcast %1 : vector<1x128xf32> to vector<14x128xf32>
    %52 = arith.addf %50, %51 : vector<14x128xf32>
    %cst_27 = arith.constant 5.000000e-01 : f32
    %53 = vector.broadcast %cst_27 : f32 to vector<14x128xf32>
    %54 = arith.mulf %53, %52 : vector<14x128xf32>
    %cst_28 = arith.constant 0.707106769 : f32
    %55 = vector.broadcast %cst_28 : f32 to vector<14x128xf32>
    %56 = arith.mulf %52, %55 : vector<14x128xf32>
    %cst_29 = arith.constant 0.000000e+00 : f32
    %57 = vector.broadcast %cst_29 : f32 to vector<14x128xf32>
    %58 = arith.cmpf oge, %56, %57 : vector<14x128xf32>
    %cst_30 = arith.constant 1.000000e+00 : f32
    %cst_31 = arith.constant -1.000000e+00 : f32
    %59 = vector.broadcast %cst_30 : f32 to vector<14x128xf32>
    %60 = vector.broadcast %cst_31 : f32 to vector<14x128xf32>
    %61 = arith.select %58, %59, %60 : vector<14x128xi1>, vector<14x128xf32>
    %62 = math.absf %56 : vector<14x128xf32>
    %cst_32 = arith.constant 0.327591091 : f32
    %63 = vector.broadcast %cst_32 : f32 to vector<14x128xf32>
    %64 = arith.mulf %63, %62 : vector<14x128xf32>
    %cst_33 = arith.constant 1.000000e+00 : f32
    %65 = vector.broadcast %cst_33 : f32 to vector<14x128xf32>
    %66 = arith.addf %65, %64 : vector<14x128xf32>
    %cst_34 = arith.constant 1.000000e+00 : f32
    %67 = vector.broadcast %cst_34 : f32 to vector<14x128xf32>
    %68 = arith.divf %67, %66 : vector<14x128xf32>
    %cst_35 = arith.constant 1.06140542 : f32
    %69 = vector.broadcast %cst_35 : f32 to vector<14x128xf32>
    %70 = arith.mulf %69, %68 : vector<14x128xf32>
    %cst_36 = arith.constant -1.45315206 : f32
    %71 = vector.broadcast %cst_36 : f32 to vector<14x128xf32>
    %72 = arith.addf %70, %71 : vector<14x128xf32>
    %73 = arith.mulf %72, %68 : vector<14x128xf32>
    %cst_37 = arith.constant 1.42141378 : f32
    %74 = vector.broadcast %cst_37 : f32 to vector<14x128xf32>
    %75 = arith.addf %73, %74 : vector<14x128xf32>
    %76 = arith.mulf %75, %68 : vector<14x128xf32>
    %cst_38 = arith.constant -0.284496725 : f32
    %77 = vector.broadcast %cst_38 : f32 to vector<14x128xf32>
    %78 = arith.addf %76, %77 : vector<14x128xf32>
    %79 = arith.mulf %78, %68 : vector<14x128xf32>
    %cst_39 = arith.constant 0.254829586 : f32
    %80 = vector.broadcast %cst_39 : f32 to vector<14x128xf32>
    %81 = arith.addf %79, %80 : vector<14x128xf32>
    %82 = arith.mulf %81, %68 : vector<14x128xf32>
    %cst_40 = arith.constant 0.000000e+00 : f32
    %83 = vector.broadcast %cst_40 : f32 to vector<14x128xf32>
    %84 = arith.subf %83, %62 : vector<14x128xf32>
    %85 = arith.mulf %84, %62 : vector<14x128xf32>
    %86 = math.exp %85 : vector<14x128xf32>
    %87 = arith.mulf %82, %86 : vector<14x128xf32>
    %cst_41 = arith.constant 1.000000e+00 : f32
    %88 = vector.broadcast %cst_41 : f32 to vector<14x128xf32>
    %89 = arith.subf %88, %87 : vector<14x128xf32>
    %90 = arith.mulf %61, %89 : vector<14x128xf32>
    %cst_42 = arith.constant 1.000000e+00 : f32
    %91 = vector.broadcast %cst_42 : f32 to vector<14x128xf32>
    %92 = arith.addf %91, %90 : vector<14x128xf32>
    %93 = arith.mulf %54, %92 : vector<14x128xf32>
    %94 = arith.maximumf %47, %93 : vector<14x128xf32>
    %c2 = arith.constant 2 : index
    %c0_43 = arith.constant 0 : index
    %c0_44 = arith.constant 0 : index
    %c0_45 = arith.constant 0 : index
    %95 = vector.load %arg1[%c2, %c0_43, %c0_44, %c0_45] : memref<4x1x14x32xf32, #tpu.memory_space<vmem>>, vector<1x1x14x32xf32>
    %96 = vector.shape_cast %95 : vector<1x1x14x32xf32> to vector<14x32xf32>
    %cst_46 = arith.constant dense<0.000000e+00> : vector<14x128xf32>
    %97 = tpu.matmul %96, %0, %cst_46 {dimension_numbers = #tpu.dot_dimension_numbers<[1], [0], [0], [1], [0, 0, 1, 1], [], []>} : vector<14x32xf32>, vector<32x128xf32>, vector<14x128xf32> -> vector<14x128xf32>
    %98 = vector.broadcast %1 : vector<1x128xf32> to vector<14x128xf32>
    %99 = arith.addf %97, %98 : vector<14x128xf32>
    %cst_47 = arith.constant 5.000000e-01 : f32
    %100 = vector.broadcast %cst_47 : f32 to vector<14x128xf32>
    %101 = arith.mulf %100, %99 : vector<14x128xf32>
    %cst_48 = arith.constant 0.707106769 : f32
    %102 = vector.broadcast %cst_48 : f32 to vector<14x128xf32>
    %103 = arith.mulf %99, %102 : vector<14x128xf32>
    %cst_49 = arith.constant 0.000000e+00 : f32
    %104 = vector.broadcast %cst_49 : f32 to vector<14x128xf32>
    %105 = arith.cmpf oge, %103, %104 : vector<14x128xf32>
    %cst_50 = arith.constant 1.000000e+00 : f32
    %cst_51 = arith.constant -1.000000e+00 : f32
    %106 = vector.broadcast %cst_50 : f32 to vector<14x128xf32>
    %107 = vector.broadcast %cst_51 : f32 to vector<14x128xf32>
    %108 = arith.select %105, %106, %107 : vector<14x128xi1>, vector<14x128xf32>
    %109 = math.absf %103 : vector<14x128xf32>
    %cst_52 = arith.constant 0.327591091 : f32
    %110 = vector.broadcast %cst_52 : f32 to vector<14x128xf32>
    %111 = arith.mulf %110, %109 : vector<14x128xf32>
    %cst_53 = arith.constant 1.000000e+00 : f32
    %112 = vector.broadcast %cst_53 : f32 to vector<14x128xf32>
    %113 = arith.addf %112, %111 : vector<14x128xf32>
    %cst_54 = arith.constant 1.000000e+00 : f32
    %114 = vector.broadcast %cst_54 : f32 to vector<14x128xf32>
    %115 = arith.divf %114, %113 : vector<14x128xf32>
    %cst_55 = arith.constant 1.06140542 : f32
    %116 = vector.broadcast %cst_55 : f32 to vector<14x128xf32>
    %117 = arith.mulf %116, %115 : vector<14x128xf32>
    %cst_56 = arith.constant -1.45315206 : f32
    %118 = vector.broadcast %cst_56 : f32 to vector<14x128xf32>
    %119 = arith.addf %117, %118 : vector<14x128xf32>
    %120 = arith.mulf %119, %115 : vector<14x128xf32>
    %cst_57 = arith.constant 1.42141378 : f32
    %121 = vector.broadcast %cst_57 : f32 to vector<14x128xf32>
    %122 = arith.addf %120, %121 : vector<14x128xf32>
    %123 = arith.mulf %122, %115 : vector<14x128xf32>
    %cst_58 = arith.constant -0.284496725 : f32
    %124 = vector.broadcast %cst_58 : f32 to vector<14x128xf32>
    %125 = arith.addf %123, %124 : vector<14x128xf32>
    %126 = arith.mulf %125, %115 : vector<14x128xf32>
    %cst_59 = arith.constant 0.254829586 : f32
    %127 = vector.broadcast %cst_59 : f32 to vector<14x128xf32>
    %128 = arith.addf %126, %127 : vector<14x128xf32>
    %129 = arith.mulf %128, %115 : vector<14x128xf32>
    %cst_60 = arith.constant 0.000000e+00 : f32
    %130 = vector.broadcast %cst_60 : f32 to vector<14x128xf32>
    %131 = arith.subf %130, %109 : vector<14x128xf32>
    %132 = arith.mulf %131, %109 : vector<14x128xf32>
    %133 = math.exp %132 : vector<14x128xf32>
    %134 = arith.mulf %129, %133 : vector<14x128xf32>
    %cst_61 = arith.constant 1.000000e+00 : f32
    %135 = vector.broadcast %cst_61 : f32 to vector<14x128xf32>
    %136 = arith.subf %135, %134 : vector<14x128xf32>
    %137 = arith.mulf %108, %136 : vector<14x128xf32>
    %cst_62 = arith.constant 1.000000e+00 : f32
    %138 = vector.broadcast %cst_62 : f32 to vector<14x128xf32>
    %139 = arith.addf %138, %137 : vector<14x128xf32>
    %140 = arith.mulf %101, %139 : vector<14x128xf32>
    %141 = arith.maximumf %94, %140 : vector<14x128xf32>
    %c3 = arith.constant 3 : index
    %c0_63 = arith.constant 0 : index
    %c0_64 = arith.constant 0 : index
    %c0_65 = arith.constant 0 : index
    %142 = vector.load %arg1[%c3, %c0_63, %c0_64, %c0_65] : memref<4x1x14x32xf32, #tpu.memory_space<vmem>>, vector<1x1x14x32xf32>
    %143 = vector.shape_cast %142 : vector<1x1x14x32xf32> to vector<14x32xf32>
    %cst_66 = arith.constant dense<0.000000e+00> : vector<14x128xf32>
    %144 = tpu.matmul %143, %0, %cst_66 {dimension_numbers = #tpu.dot_dimension_numbers<[1], [0], [0], [1], [0, 0, 1, 1], [], []>} : vector<14x32xf32>, vector<32x128xf32>, vector<14x128xf32> -> vector<14x128xf32>
    %145 = vector.broadcast %1 : vector<1x128xf32> to vector<14x128xf32>
    %146 = arith.addf %144, %145 : vector<14x128xf32>
    %cst_67 = arith.constant 5.000000e-01 : f32
    %147 = vector.broadcast %cst_67 : f32 to vector<14x128xf32>
    %148 = arith.mulf %147, %146 : vector<14x128xf32>
    %cst_68 = arith.constant 0.707106769 : f32
    %149 = vector.broadcast %cst_68 : f32 to vector<14x128xf32>
    %150 = arith.mulf %146, %149 : vector<14x128xf32>
    %cst_69 = arith.constant 0.000000e+00 : f32
    %151 = vector.broadcast %cst_69 : f32 to vector<14x128xf32>
    %152 = arith.cmpf oge, %150, %151 : vector<14x128xf32>
    %cst_70 = arith.constant 1.000000e+00 : f32
    %cst_71 = arith.constant -1.000000e+00 : f32
    %153 = vector.broadcast %cst_70 : f32 to vector<14x128xf32>
    %154 = vector.broadcast %cst_71 : f32 to vector<14x128xf32>
    %155 = arith.select %152, %153, %154 : vector<14x128xi1>, vector<14x128xf32>
    %156 = math.absf %150 : vector<14x128xf32>
    %cst_72 = arith.constant 0.327591091 : f32
    %157 = vector.broadcast %cst_72 : f32 to vector<14x128xf32>
    %158 = arith.mulf %157, %156 : vector<14x128xf32>
    %cst_73 = arith.constant 1.000000e+00 : f32
    %159 = vector.broadcast %cst_73 : f32 to vector<14x128xf32>
    %160 = arith.addf %159, %158 : vector<14x128xf32>
    %cst_74 = arith.constant 1.000000e+00 : f32
    %161 = vector.broadcast %cst_74 : f32 to vector<14x128xf32>
    %162 = arith.divf %161, %160 : vector<14x128xf32>
    %cst_75 = arith.constant 1.06140542 : f32
    %163 = vector.broadcast %cst_75 : f32 to vector<14x128xf32>
    %164 = arith.mulf %163, %162 : vector<14x128xf32>
    %cst_76 = arith.constant -1.45315206 : f32
    %165 = vector.broadcast %cst_76 : f32 to vector<14x128xf32>
    %166 = arith.addf %164, %165 : vector<14x128xf32>
    %167 = arith.mulf %166, %162 : vector<14x128xf32>
    %cst_77 = arith.constant 1.42141378 : f32
    %168 = vector.broadcast %cst_77 : f32 to vector<14x128xf32>
    %169 = arith.addf %167, %168 : vector<14x128xf32>
    %170 = arith.mulf %169, %162 : vector<14x128xf32>
    %cst_78 = arith.constant -0.284496725 : f32
    %171 = vector.broadcast %cst_78 : f32 to vector<14x128xf32>
    %172 = arith.addf %170, %171 : vector<14x128xf32>
    %173 = arith.mulf %172, %162 : vector<14x128xf32>
    %cst_79 = arith.constant 0.254829586 : f32
    %174 = vector.broadcast %cst_79 : f32 to vector<14x128xf32>
    %175 = arith.addf %173, %174 : vector<14x128xf32>
    %176 = arith.mulf %175, %162 : vector<14x128xf32>
    %cst_80 = arith.constant 0.000000e+00 : f32
    %177 = vector.broadcast %cst_80 : f32 to vector<14x128xf32>
    %178 = arith.subf %177, %156 : vector<14x128xf32>
    %179 = arith.mulf %178, %156 : vector<14x128xf32>
    %180 = math.exp %179 : vector<14x128xf32>
    %181 = arith.mulf %176, %180 : vector<14x128xf32>
    %cst_81 = arith.constant 1.000000e+00 : f32
    %182 = vector.broadcast %cst_81 : f32 to vector<14x128xf32>
    %183 = arith.subf %182, %181 : vector<14x128xf32>
    %184 = arith.mulf %155, %183 : vector<14x128xf32>
    %cst_82 = arith.constant 1.000000e+00 : f32
    %185 = vector.broadcast %cst_82 : f32 to vector<14x128xf32>
    %186 = arith.addf %185, %184 : vector<14x128xf32>
    %187 = arith.mulf %148, %186 : vector<14x128xf32>
    %188 = arith.maximumf %141, %187 : vector<14x128xf32>
    %c0_83 = arith.constant 0 : index
    %c0_84 = arith.constant 0 : index
    %c0_85 = arith.constant 0 : index
    %189 = vector.load %arg4[%c0_83, %c0_84, %c0_85] : memref<1x14x128xf32, #tpu.memory_space<vmem>>, vector<1x14x128xf32>
    %190 = vector.shape_cast %189 : vector<1x14x128xf32> to vector<14x128xf32>
    %191 = vector.shape_cast %188 : vector<14x128xf32> to vector<1x14x128xf32>
    tpu.vector_store %arg4[%c0_83, %c0_84, %c0_85], %191 {strides = array<i32>} : memref<1x14x128xf32, #tpu.memory_space<vmem>>, vector<1x14x128xf32>,
    return
  }
  func.func @transform_0(%arg0: i32) -> (i32, i32, i32, i32) {
    %c0_i32 = arith.constant 0 : i32
    %c0_i32_0 = arith.constant 0 : i32
    %c0_i32_1 = arith.constant 0 : i32
    %c0_i32_2 = arith.constant 0 : i32
    return %c0_i32, %arg0, %c0_i32_0, %c0_i32_1 : i32, i32, i32, i32
  }
  func.func @transform_1(%arg0: i32) -> (i32, i32) {
    %c0_i32 = arith.constant 0 : i32
    %c0_i32_0 = arith.constant 0 : i32
    %c0_i32_1 = arith.constant 0 : i32
    return %c0_i32, %c0_i32_0 : i32, i32
  }
  func.func @transform_2(%arg0: i32) -> (i32, i32) {
    %c0_i32 = arith.constant 0 : i32
    %c0_i32_0 = arith.constant 0 : i32
    %c0_i32_1 = arith.constant 0 : i32
    return %c0_i32, %c0_i32_0 : i32, i32
  }
  func.func @transform_3(%arg0: i32) -> (i32, i32, i32) {
    %c0_i32 = arith.constant 0 : i32
    %c0_i32_0 = arith.constant 0 : i32
    %c0_i32_1 = arith.constant 0 : i32
    return %arg0, %c0_i32, %c0_i32_0 : i32, i32, i32
  }
}

module attributes {stable_mosaic.version = 11 : i64} {
  func.func @_conv_gelu_pool_kernel(%arg0: i32, %arg1: memref<4x1x7x144xf32, #tpu.memory_space<vmem>>, %arg2: memref<144x128xf32, #tpu.memory_space<vmem>>, %arg3: memref<1x128xf32, #tpu.memory_space<vmem>>, %arg4: memref<1x7x128xf32, #tpu.memory_space<vmem>>) attributes {dimension_semantics = [#tpu.dimension_semantics<parallel>], iteration_bounds = array<i64: 14>, scalar_prefetch = 0 : i64, scratch_operands = 0 : i64, tpu.core_type = #tpu.core_type<tc>, window_params = [{transform_indices = @transform_0, window_bounds = array<i64: 4, 1, 7, 144>}, {pipeline_mode = #tpu.pipeline_mode<synchronous>, transform_indices = @transform_1, window_bounds = array<i64: 144, 128>}, {pipeline_mode = #tpu.pipeline_mode<synchronous>, transform_indices = @transform_2, window_bounds = array<i64: 1, 128>}, {transform_indices = @transform_3, window_bounds = array<i64: 1, 7, 128>}]} {
    %c0 = arith.constant 0 : index
    %c0_0 = arith.constant 0 : index
    %0 = vector.load %arg2[%c0, %c0_0] : memref<144x128xf32, #tpu.memory_space<vmem>>, vector<144x128xf32>
    %c0_1 = arith.constant 0 : index
    %c0_2 = arith.constant 0 : index
    %1 = vector.load %arg3[%c0_1, %c0_2] : memref<1x128xf32, #tpu.memory_space<vmem>>, vector<1x128xf32>
    %c0_3 = arith.constant 0 : index
    %c0_4 = arith.constant 0 : index
    %c0_5 = arith.constant 0 : index
    %c0_6 = arith.constant 0 : index
    %2 = vector.load %arg1[%c0_3, %c0_4, %c0_5, %c0_6] : memref<4x1x7x144xf32, #tpu.memory_space<vmem>>, vector<1x1x7x144xf32>
    %3 = vector.shape_cast %2 : vector<1x1x7x144xf32> to vector<7x144xf32>
    %cst = arith.constant dense<0.000000e+00> : vector<7x128xf32>
    %4 = tpu.matmul %3, %0, %cst {dimension_numbers = #tpu.dot_dimension_numbers<[1], [0], [0], [1], [0, 0, 1, 1], [], []>} : vector<7x144xf32>, vector<144x128xf32>, vector<7x128xf32> -> vector<7x128xf32>
    %5 = vector.broadcast %1 : vector<1x128xf32> to vector<7x128xf32>
    %6 = arith.addf %4, %5 : vector<7x128xf32>
    %cst_7 = arith.constant 5.000000e-01 : f32
    %7 = vector.broadcast %cst_7 : f32 to vector<7x128xf32>
    %8 = arith.mulf %7, %6 : vector<7x128xf32>
    %cst_8 = arith.constant 0.707106769 : f32
    %9 = vector.broadcast %cst_8 : f32 to vector<7x128xf32>
    %10 = arith.mulf %6, %9 : vector<7x128xf32>
    %cst_9 = arith.constant 0.000000e+00 : f32
    %11 = vector.broadcast %cst_9 : f32 to vector<7x128xf32>
    %12 = arith.cmpf oge, %10, %11 : vector<7x128xf32>
    %cst_10 = arith.constant 1.000000e+00 : f32
    %cst_11 = arith.constant -1.000000e+00 : f32
    %13 = vector.broadcast %cst_10 : f32 to vector<7x128xf32>
    %14 = vector.broadcast %cst_11 : f32 to vector<7x128xf32>
    %15 = arith.select %12, %13, %14 : vector<7x128xi1>, vector<7x128xf32>
    %16 = math.absf %10 : vector<7x128xf32>
    %cst_12 = arith.constant 0.327591091 : f32
    %17 = vector.broadcast %cst_12 : f32 to vector<7x128xf32>
    %18 = arith.mulf %17, %16 : vector<7x128xf32>
    %cst_13 = arith.constant 1.000000e+00 : f32
    %19 = vector.broadcast %cst_13 : f32 to vector<7x128xf32>
    %20 = arith.addf %19, %18 : vector<7x128xf32>
    %cst_14 = arith.constant 1.000000e+00 : f32
    %21 = vector.broadcast %cst_14 : f32 to vector<7x128xf32>
    %22 = arith.divf %21, %20 : vector<7x128xf32>
    %cst_15 = arith.constant 1.06140542 : f32
    %23 = vector.broadcast %cst_15 : f32 to vector<7x128xf32>
    %24 = arith.mulf %23, %22 : vector<7x128xf32>
    %cst_16 = arith.constant -1.45315206 : f32
    %25 = vector.broadcast %cst_16 : f32 to vector<7x128xf32>
    %26 = arith.addf %24, %25 : vector<7x128xf32>
    %27 = arith.mulf %26, %22 : vector<7x128xf32>
    %cst_17 = arith.constant 1.42141378 : f32
    %28 = vector.broadcast %cst_17 : f32 to vector<7x128xf32>
    %29 = arith.addf %27, %28 : vector<7x128xf32>
    %30 = arith.mulf %29, %22 : vector<7x128xf32>
    %cst_18 = arith.constant -0.284496725 : f32
    %31 = vector.broadcast %cst_18 : f32 to vector<7x128xf32>
    %32 = arith.addf %30, %31 : vector<7x128xf32>
    %33 = arith.mulf %32, %22 : vector<7x128xf32>
    %cst_19 = arith.constant 0.254829586 : f32
    %34 = vector.broadcast %cst_19 : f32 to vector<7x128xf32>
    %35 = arith.addf %33, %34 : vector<7x128xf32>
    %36 = arith.mulf %35, %22 : vector<7x128xf32>
    %cst_20 = arith.constant 0.000000e+00 : f32
    %37 = vector.broadcast %cst_20 : f32 to vector<7x128xf32>
    %38 = arith.subf %37, %16 : vector<7x128xf32>
    %39 = arith.mulf %38, %16 : vector<7x128xf32>
    %40 = math.exp %39 : vector<7x128xf32>
    %41 = arith.mulf %36, %40 : vector<7x128xf32>
    %cst_21 = arith.constant 1.000000e+00 : f32
    %42 = vector.broadcast %cst_21 : f32 to vector<7x128xf32>
    %43 = arith.subf %42, %41 : vector<7x128xf32>
    %44 = arith.mulf %15, %43 : vector<7x128xf32>
    %cst_22 = arith.constant 1.000000e+00 : f32
    %45 = vector.broadcast %cst_22 : f32 to vector<7x128xf32>
    %46 = arith.addf %45, %44 : vector<7x128xf32>
    %47 = arith.mulf %8, %46 : vector<7x128xf32>
    %c1 = arith.constant 1 : index
    %c0_23 = arith.constant 0 : index
    %c0_24 = arith.constant 0 : index
    %c0_25 = arith.constant 0 : index
    %48 = vector.load %arg1[%c1, %c0_23, %c0_24, %c0_25] : memref<4x1x7x144xf32, #tpu.memory_space<vmem>>, vector<1x1x7x144xf32>
    %49 = vector.shape_cast %48 : vector<1x1x7x144xf32> to vector<7x144xf32>
    %cst_26 = arith.constant dense<0.000000e+00> : vector<7x128xf32>
    %50 = tpu.matmul %49, %0, %cst_26 {dimension_numbers = #tpu.dot_dimension_numbers<[1], [0], [0], [1], [0, 0, 1, 1], [], []>} : vector<7x144xf32>, vector<144x128xf32>, vector<7x128xf32> -> vector<7x128xf32>
    %51 = vector.broadcast %1 : vector<1x128xf32> to vector<7x128xf32>
    %52 = arith.addf %50, %51 : vector<7x128xf32>
    %cst_27 = arith.constant 5.000000e-01 : f32
    %53 = vector.broadcast %cst_27 : f32 to vector<7x128xf32>
    %54 = arith.mulf %53, %52 : vector<7x128xf32>
    %cst_28 = arith.constant 0.707106769 : f32
    %55 = vector.broadcast %cst_28 : f32 to vector<7x128xf32>
    %56 = arith.mulf %52, %55 : vector<7x128xf32>
    %cst_29 = arith.constant 0.000000e+00 : f32
    %57 = vector.broadcast %cst_29 : f32 to vector<7x128xf32>
    %58 = arith.cmpf oge, %56, %57 : vector<7x128xf32>
    %cst_30 = arith.constant 1.000000e+00 : f32
    %cst_31 = arith.constant -1.000000e+00 : f32
    %59 = vector.broadcast %cst_30 : f32 to vector<7x128xf32>
    %60 = vector.broadcast %cst_31 : f32 to vector<7x128xf32>
    %61 = arith.select %58, %59, %60 : vector<7x128xi1>, vector<7x128xf32>
    %62 = math.absf %56 : vector<7x128xf32>
    %cst_32 = arith.constant 0.327591091 : f32
    %63 = vector.broadcast %cst_32 : f32 to vector<7x128xf32>
    %64 = arith.mulf %63, %62 : vector<7x128xf32>
    %cst_33 = arith.constant 1.000000e+00 : f32
    %65 = vector.broadcast %cst_33 : f32 to vector<7x128xf32>
    %66 = arith.addf %65, %64 : vector<7x128xf32>
    %cst_34 = arith.constant 1.000000e+00 : f32
    %67 = vector.broadcast %cst_34 : f32 to vector<7x128xf32>
    %68 = arith.divf %67, %66 : vector<7x128xf32>
    %cst_35 = arith.constant 1.06140542 : f32
    %69 = vector.broadcast %cst_35 : f32 to vector<7x128xf32>
    %70 = arith.mulf %69, %68 : vector<7x128xf32>
    %cst_36 = arith.constant -1.45315206 : f32
    %71 = vector.broadcast %cst_36 : f32 to vector<7x128xf32>
    %72 = arith.addf %70, %71 : vector<7x128xf32>
    %73 = arith.mulf %72, %68 : vector<7x128xf32>
    %cst_37 = arith.constant 1.42141378 : f32
    %74 = vector.broadcast %cst_37 : f32 to vector<7x128xf32>
    %75 = arith.addf %73, %74 : vector<7x128xf32>
    %76 = arith.mulf %75, %68 : vector<7x128xf32>
    %cst_38 = arith.constant -0.284496725 : f32
    %77 = vector.broadcast %cst_38 : f32 to vector<7x128xf32>
    %78 = arith.addf %76, %77 : vector<7x128xf32>
    %79 = arith.mulf %78, %68 : vector<7x128xf32>
    %cst_39 = arith.constant 0.254829586 : f32
    %80 = vector.broadcast %cst_39 : f32 to vector<7x128xf32>
    %81 = arith.addf %79, %80 : vector<7x128xf32>
    %82 = arith.mulf %81, %68 : vector<7x128xf32>
    %cst_40 = arith.constant 0.000000e+00 : f32
    %83 = vector.broadcast %cst_40 : f32 to vector<7x128xf32>
    %84 = arith.subf %83, %62 : vector<7x128xf32>
    %85 = arith.mulf %84, %62 : vector<7x128xf32>
    %86 = math.exp %85 : vector<7x128xf32>
    %87 = arith.mulf %82, %86 : vector<7x128xf32>
    %cst_41 = arith.constant 1.000000e+00 : f32
    %88 = vector.broadcast %cst_41 : f32 to vector<7x128xf32>
    %89 = arith.subf %88, %87 : vector<7x128xf32>
    %90 = arith.mulf %61, %89 : vector<7x128xf32>
    %cst_42 = arith.constant 1.000000e+00 : f32
    %91 = vector.broadcast %cst_42 : f32 to vector<7x128xf32>
    %92 = arith.addf %91, %90 : vector<7x128xf32>
    %93 = arith.mulf %54, %92 : vector<7x128xf32>
    %94 = arith.maximumf %47, %93 : vector<7x128xf32>
    %c2 = arith.constant 2 : index
    %c0_43 = arith.constant 0 : index
    %c0_44 = arith.constant 0 : index
    %c0_45 = arith.constant 0 : index
    %95 = vector.load %arg1[%c2, %c0_43, %c0_44, %c0_45] : memref<4x1x7x144xf32, #tpu.memory_space<vmem>>, vector<1x1x7x144xf32>
    %96 = vector.shape_cast %95 : vector<1x1x7x144xf32> to vector<7x144xf32>
    %cst_46 = arith.constant dense<0.000000e+00> : vector<7x128xf32>
    %97 = tpu.matmul %96, %0, %cst_46 {dimension_numbers = #tpu.dot_dimension_numbers<[1], [0], [0], [1], [0, 0, 1, 1], [], []>} : vector<7x144xf32>, vector<144x128xf32>, vector<7x128xf32> -> vector<7x128xf32>
    %98 = vector.broadcast %1 : vector<1x128xf32> to vector<7x128xf32>
    %99 = arith.addf %97, %98 : vector<7x128xf32>
    %cst_47 = arith.constant 5.000000e-01 : f32
    %100 = vector.broadcast %cst_47 : f32 to vector<7x128xf32>
    %101 = arith.mulf %100, %99 : vector<7x128xf32>
    %cst_48 = arith.constant 0.707106769 : f32
    %102 = vector.broadcast %cst_48 : f32 to vector<7x128xf32>
    %103 = arith.mulf %99, %102 : vector<7x128xf32>
    %cst_49 = arith.constant 0.000000e+00 : f32
    %104 = vector.broadcast %cst_49 : f32 to vector<7x128xf32>
    %105 = arith.cmpf oge, %103, %104 : vector<7x128xf32>
    %cst_50 = arith.constant 1.000000e+00 : f32
    %cst_51 = arith.constant -1.000000e+00 : f32
    %106 = vector.broadcast %cst_50 : f32 to vector<7x128xf32>
    %107 = vector.broadcast %cst_51 : f32 to vector<7x128xf32>
    %108 = arith.select %105, %106, %107 : vector<7x128xi1>, vector<7x128xf32>
    %109 = math.absf %103 : vector<7x128xf32>
    %cst_52 = arith.constant 0.327591091 : f32
    %110 = vector.broadcast %cst_52 : f32 to vector<7x128xf32>
    %111 = arith.mulf %110, %109 : vector<7x128xf32>
    %cst_53 = arith.constant 1.000000e+00 : f32
    %112 = vector.broadcast %cst_53 : f32 to vector<7x128xf32>
    %113 = arith.addf %112, %111 : vector<7x128xf32>
    %cst_54 = arith.constant 1.000000e+00 : f32
    %114 = vector.broadcast %cst_54 : f32 to vector<7x128xf32>
    %115 = arith.divf %114, %113 : vector<7x128xf32>
    %cst_55 = arith.constant 1.06140542 : f32
    %116 = vector.broadcast %cst_55 : f32 to vector<7x128xf32>
    %117 = arith.mulf %116, %115 : vector<7x128xf32>
    %cst_56 = arith.constant -1.45315206 : f32
    %118 = vector.broadcast %cst_56 : f32 to vector<7x128xf32>
    %119 = arith.addf %117, %118 : vector<7x128xf32>
    %120 = arith.mulf %119, %115 : vector<7x128xf32>
    %cst_57 = arith.constant 1.42141378 : f32
    %121 = vector.broadcast %cst_57 : f32 to vector<7x128xf32>
    %122 = arith.addf %120, %121 : vector<7x128xf32>
    %123 = arith.mulf %122, %115 : vector<7x128xf32>
    %cst_58 = arith.constant -0.284496725 : f32
    %124 = vector.broadcast %cst_58 : f32 to vector<7x128xf32>
    %125 = arith.addf %123, %124 : vector<7x128xf32>
    %126 = arith.mulf %125, %115 : vector<7x128xf32>
    %cst_59 = arith.constant 0.254829586 : f32
    %127 = vector.broadcast %cst_59 : f32 to vector<7x128xf32>
    %128 = arith.addf %126, %127 : vector<7x128xf32>
    %129 = arith.mulf %128, %115 : vector<7x128xf32>
    %cst_60 = arith.constant 0.000000e+00 : f32
    %130 = vector.broadcast %cst_60 : f32 to vector<7x128xf32>
    %131 = arith.subf %130, %109 : vector<7x128xf32>
    %132 = arith.mulf %131, %109 : vector<7x128xf32>
    %133 = math.exp %132 : vector<7x128xf32>
    %134 = arith.mulf %129, %133 : vector<7x128xf32>
    %cst_61 = arith.constant 1.000000e+00 : f32
    %135 = vector.broadcast %cst_61 : f32 to vector<7x128xf32>
    %136 = arith.subf %135, %134 : vector<7x128xf32>
    %137 = arith.mulf %108, %136 : vector<7x128xf32>
    %cst_62 = arith.constant 1.000000e+00 : f32
    %138 = vector.broadcast %cst_62 : f32 to vector<7x128xf32>
    %139 = arith.addf %138, %137 : vector<7x128xf32>
    %140 = arith.mulf %101, %139 : vector<7x128xf32>
    %141 = arith.maximumf %94, %140 : vector<7x128xf32>
    %c3 = arith.constant 3 : index
    %c0_63 = arith.constant 0 : index
    %c0_64 = arith.constant 0 : index
    %c0_65 = arith.constant 0 : index
    %142 = vector.load %arg1[%c3, %c0_63, %c0_64, %c0_65] : memref<4x1x7x144xf32, #tpu.memory_space<vmem>>, vector<1x1x7x144xf32>
    %143 = vector.shape_cast %142 : vector<1x1x7x144xf32> to vector<7x144xf32>
    %cst_66 = arith.constant dense<0.000000e+00> : vector<7x128xf32>
    %144 = tpu.matmul %143, %0, %cst_66 {dimension_numbers = #tpu.dot_dimension_numbers<[1], [0], [0], [1], [0, 0, 1, 1], [], []>} : vector<7x144xf32>, vector<144x128xf32>, vector<7x128xf32> -> vector<7x128xf32>
    %145 = vector.broadcast %1 : vector<1x128xf32> to vector<7x128xf32>
    %146 = arith.addf %144, %145 : vector<7x128xf32>
    %cst_67 = arith.constant 5.000000e-01 : f32
    %147 = vector.broadcast %cst_67 : f32 to vector<7x128xf32>
    %148 = arith.mulf %147, %146 : vector<7x128xf32>
    %cst_68 = arith.constant 0.707106769 : f32
    %149 = vector.broadcast %cst_68 : f32 to vector<7x128xf32>
    %150 = arith.mulf %146, %149 : vector<7x128xf32>
    %cst_69 = arith.constant 0.000000e+00 : f32
    %151 = vector.broadcast %cst_69 : f32 to vector<7x128xf32>
    %152 = arith.cmpf oge, %150, %151 : vector<7x128xf32>
    %cst_70 = arith.constant 1.000000e+00 : f32
    %cst_71 = arith.constant -1.000000e+00 : f32
    %153 = vector.broadcast %cst_70 : f32 to vector<7x128xf32>
    %154 = vector.broadcast %cst_71 : f32 to vector<7x128xf32>
    %155 = arith.select %152, %153, %154 : vector<7x128xi1>, vector<7x128xf32>
    %156 = math.absf %150 : vector<7x128xf32>
    %cst_72 = arith.constant 0.327591091 : f32
    %157 = vector.broadcast %cst_72 : f32 to vector<7x128xf32>
    %158 = arith.mulf %157, %156 : vector<7x128xf32>
    %cst_73 = arith.constant 1.000000e+00 : f32
    %159 = vector.broadcast %cst_73 : f32 to vector<7x128xf32>
    %160 = arith.addf %159, %158 : vector<7x128xf32>
    %cst_74 = arith.constant 1.000000e+00 : f32
    %161 = vector.broadcast %cst_74 : f32 to vector<7x128xf32>
    %162 = arith.divf %161, %160 : vector<7x128xf32>
    %cst_75 = arith.constant 1.06140542 : f32
    %163 = vector.broadcast %cst_75 : f32 to vector<7x128xf32>
    %164 = arith.mulf %163, %162 : vector<7x128xf32>
    %cst_76 = arith.constant -1.45315206 : f32
    %165 = vector.broadcast %cst_76 : f32 to vector<7x128xf32>
    %166 = arith.addf %164, %165 : vector<7x128xf32>
    %167 = arith.mulf %166, %162 : vector<7x128xf32>
    %cst_77 = arith.constant 1.42141378 : f32
    %168 = vector.broadcast %cst_77 : f32 to vector<7x128xf32>
    %169 = arith.addf %167, %168 : vector<7x128xf32>
    %170 = arith.mulf %169, %162 : vector<7x128xf32>
    %cst_78 = arith.constant -0.284496725 : f32
    %171 = vector.broadcast %cst_78 : f32 to vector<7x128xf32>
    %172 = arith.addf %170, %171 : vector<7x128xf32>
    %173 = arith.mulf %172, %162 : vector<7x128xf32>
    %cst_79 = arith.constant 0.254829586 : f32
    %174 = vector.broadcast %cst_79 : f32 to vector<7x128xf32>
    %175 = arith.addf %173, %174 : vector<7x128xf32>
    %176 = arith.mulf %175, %162 : vector<7x128xf32>
    %cst_80 = arith.constant 0.000000e+00 : f32
    %177 = vector.broadcast %cst_80 : f32 to vector<7x128xf32>
    %178 = arith.subf %177, %156 : vector<7x128xf32>
    %179 = arith.mulf %178, %156 : vector<7x128xf32>
    %180 = math.exp %179 : vector<7x128xf32>
    %181 = arith.mulf %176, %180 : vector<7x128xf32>
    %cst_81 = arith.constant 1.000000e+00 : f32
    %182 = vector.broadcast %cst_81 : f32 to vector<7x128xf32>
    %183 = arith.subf %182, %181 : vector<7x128xf32>
    %184 = arith.mulf %155, %183 : vector<7x128xf32>
    %cst_82 = arith.constant 1.000000e+00 : f32
    %185 = vector.broadcast %cst_82 : f32 to vector<7x128xf32>
    %186 = arith.addf %185, %184 : vector<7x128xf32>
    %187 = arith.mulf %148, %186 : vector<7x128xf32>
    %188 = arith.maximumf %141, %187 : vector<7x128xf32>
    %c0_83 = arith.constant 0 : index
    %c0_84 = arith.constant 0 : index
    %c0_85 = arith.constant 0 : index
    %189 = vector.load %arg4[%c0_83, %c0_84, %c0_85] : memref<1x7x128xf32, #tpu.memory_space<vmem>>, vector<1x7x128xf32>
    %190 = vector.shape_cast %189 : vector<1x7x128xf32> to vector<7x128xf32>
    %191 = vector.shape_cast %188 : vector<7x128xf32> to vector<1x7x128xf32>
    tpu.vector_store %arg4[%c0_83, %c0_84, %c0_85], %191 {strides = array<i32>} : memref<1x7x128xf32, #tpu.memory_space<vmem>>, vector<1x7x128xf32>,
    return
  }
  func.func @transform_0(%arg0: i32) -> (i32, i32, i32, i32) {
    %c0_i32 = arith.constant 0 : i32
    %c0_i32_0 = arith.constant 0 : i32
    %c0_i32_1 = arith.constant 0 : i32
    %c0_i32_2 = arith.constant 0 : i32
    return %c0_i32, %arg0, %c0_i32_0, %c0_i32_1 : i32, i32, i32, i32
  }
  func.func @transform_1(%arg0: i32) -> (i32, i32) {
    %c0_i32 = arith.constant 0 : i32
    %c0_i32_0 = arith.constant 0 : i32
    %c0_i32_1 = arith.constant 0 : i32
    return %c0_i32, %c0_i32_0 : i32, i32
  }
  func.func @transform_2(%arg0: i32) -> (i32, i32) {
    %c0_i32 = arith.constant 0 : i32
    %c0_i32_0 = arith.constant 0 : i32
    %c0_i32_1 = arith.constant 0 : i32
    return %c0_i32, %c0_i32_0 : i32, i32
  }
  func.func @transform_3(%arg0: i32) -> (i32, i32, i32) {
    %c0_i32 = arith.constant 0 : i32
    %c0_i32_0 = arith.constant 0 : i32
    %c0_i32_1 = arith.constant 0 : i32
    return %arg0, %c0_i32, %c0_i32_0 : i32, i32, i32
  }
}

module attributes {stable_mosaic.version = 11 : i64} {
  func.func @_mlp_kernel(%arg0: i32, %arg1: memref<8x1568xf32, #tpu.memory_space<vmem>>, %arg2: memref<1568x768xf32, #tpu.memory_space<vmem>>, %arg3: memref<1x768xf32, #tpu.memory_space<vmem>>, %arg4: memref<768x128xf32, #tpu.memory_space<vmem>>, %arg5: memref<1x128xf32, #tpu.memory_space<vmem>>, %arg6: memref<8x128xf32, #tpu.memory_space<vmem>>) attributes {dimension_semantics = [#tpu.dimension_semantics<parallel>], iteration_bounds = array<i64: 1>, scalar_prefetch = 0 : i64, scratch_operands = 0 : i64, tpu.core_type = #tpu.core_type<tc>, window_params = [{transform_indices = @transform_0, window_bounds = array<i64: 8, 1568>}, {pipeline_mode = #tpu.pipeline_mode<synchronous>, transform_indices = @transform_1, window_bounds = array<i64: 1568, 768>}, {pipeline_mode = #tpu.pipeline_mode<synchronous>, transform_indices = @transform_2, window_bounds = array<i64: 1, 768>}, {pipeline_mode = #tpu.pipeline_mode<synchronous>, transform_indices = @transform_3, window_bounds = array<i64: 768, 128>}, {pipeline_mode = #tpu.pipeline_mode<synchronous>, transform_indices = @transform_4, window_bounds = array<i64: 1, 128>}, {transform_indices = @transform_5, window_bounds = array<i64: 8, 128>}]} {
    %c0 = arith.constant 0 : index
    %c0_0 = arith.constant 0 : index
    %0 = vector.load %arg1[%c0, %c0_0] : memref<8x1568xf32, #tpu.memory_space<vmem>>, vector<8x1568xf32>
    %c0_1 = arith.constant 0 : index
    %c0_2 = arith.constant 0 : index
    %1 = vector.load %arg2[%c0_1, %c0_2] : memref<1568x768xf32, #tpu.memory_space<vmem>>, vector<1568x768xf32>
    %cst = arith.constant dense<0.000000e+00> : vector<8x768xf32>
    %2 = tpu.matmul %0, %1, %cst {dimension_numbers = #tpu.dot_dimension_numbers<[1], [0], [0], [1], [0, 0, 1, 1], [], []>} : vector<8x1568xf32>, vector<1568x768xf32>, vector<8x768xf32> -> vector<8x768xf32>
    %c0_3 = arith.constant 0 : index
    %c0_4 = arith.constant 0 : index
    %3 = vector.load %arg3[%c0_3, %c0_4] : memref<1x768xf32, #tpu.memory_space<vmem>>, vector<1x768xf32>
    %4 = vector.broadcast %3 : vector<1x768xf32> to vector<8x768xf32>
    %5 = arith.addf %2, %4 : vector<8x768xf32>
    %cst_5 = arith.constant 5.000000e-01 : f32
    %6 = vector.broadcast %cst_5 : f32 to vector<8x768xf32>
    %7 = arith.mulf %6, %5 : vector<8x768xf32>
    %cst_6 = arith.constant 0.707106769 : f32
    %8 = vector.broadcast %cst_6 : f32 to vector<8x768xf32>
    %9 = arith.mulf %5, %8 : vector<8x768xf32>
    %cst_7 = arith.constant 0.000000e+00 : f32
    %10 = vector.broadcast %cst_7 : f32 to vector<8x768xf32>
    %11 = arith.cmpf oge, %9, %10 : vector<8x768xf32>
    %cst_8 = arith.constant 1.000000e+00 : f32
    %cst_9 = arith.constant -1.000000e+00 : f32
    %12 = vector.broadcast %cst_8 : f32 to vector<8x768xf32>
    %13 = vector.broadcast %cst_9 : f32 to vector<8x768xf32>
    %14 = arith.select %11, %12, %13 : vector<8x768xi1>, vector<8x768xf32>
    %15 = math.absf %9 : vector<8x768xf32>
    %cst_10 = arith.constant 0.327591091 : f32
    %16 = vector.broadcast %cst_10 : f32 to vector<8x768xf32>
    %17 = arith.mulf %16, %15 : vector<8x768xf32>
    %cst_11 = arith.constant 1.000000e+00 : f32
    %18 = vector.broadcast %cst_11 : f32 to vector<8x768xf32>
    %19 = arith.addf %18, %17 : vector<8x768xf32>
    %cst_12 = arith.constant 1.000000e+00 : f32
    %20 = vector.broadcast %cst_12 : f32 to vector<8x768xf32>
    %21 = arith.divf %20, %19 : vector<8x768xf32>
    %cst_13 = arith.constant 1.06140542 : f32
    %22 = vector.broadcast %cst_13 : f32 to vector<8x768xf32>
    %23 = arith.mulf %22, %21 : vector<8x768xf32>
    %cst_14 = arith.constant -1.45315206 : f32
    %24 = vector.broadcast %cst_14 : f32 to vector<8x768xf32>
    %25 = arith.addf %23, %24 : vector<8x768xf32>
    %26 = arith.mulf %25, %21 : vector<8x768xf32>
    %cst_15 = arith.constant 1.42141378 : f32
    %27 = vector.broadcast %cst_15 : f32 to vector<8x768xf32>
    %28 = arith.addf %26, %27 : vector<8x768xf32>
    %29 = arith.mulf %28, %21 : vector<8x768xf32>
    %cst_16 = arith.constant -0.284496725 : f32
    %30 = vector.broadcast %cst_16 : f32 to vector<8x768xf32>
    %31 = arith.addf %29, %30 : vector<8x768xf32>
    %32 = arith.mulf %31, %21 : vector<8x768xf32>
    %cst_17 = arith.constant 0.254829586 : f32
    %33 = vector.broadcast %cst_17 : f32 to vector<8x768xf32>
    %34 = arith.addf %32, %33 : vector<8x768xf32>
    %35 = arith.mulf %34, %21 : vector<8x768xf32>
    %cst_18 = arith.constant 0.000000e+00 : f32
    %36 = vector.broadcast %cst_18 : f32 to vector<8x768xf32>
    %37 = arith.subf %36, %15 : vector<8x768xf32>
    %38 = arith.mulf %37, %15 : vector<8x768xf32>
    %39 = math.exp %38 : vector<8x768xf32>
    %40 = arith.mulf %35, %39 : vector<8x768xf32>
    %cst_19 = arith.constant 1.000000e+00 : f32
    %41 = vector.broadcast %cst_19 : f32 to vector<8x768xf32>
    %42 = arith.subf %41, %40 : vector<8x768xf32>
    %43 = arith.mulf %14, %42 : vector<8x768xf32>
    %cst_20 = arith.constant 1.000000e+00 : f32
    %44 = vector.broadcast %cst_20 : f32 to vector<8x768xf32>
    %45 = arith.addf %44, %43 : vector<8x768xf32>
    %46 = arith.mulf %7, %45 : vector<8x768xf32>
    %c0_21 = arith.constant 0 : index
    %c0_22 = arith.constant 0 : index
    %47 = vector.load %arg4[%c0_21, %c0_22] : memref<768x128xf32, #tpu.memory_space<vmem>>, vector<768x128xf32>
    %cst_23 = arith.constant dense<0.000000e+00> : vector<8x128xf32>
    %48 = tpu.matmul %46, %47, %cst_23 {dimension_numbers = #tpu.dot_dimension_numbers<[1], [0], [0], [1], [0, 0, 1, 1], [], []>} : vector<8x768xf32>, vector<768x128xf32>, vector<8x128xf32> -> vector<8x128xf32>
    %c0_24 = arith.constant 0 : index
    %c0_25 = arith.constant 0 : index
    %49 = vector.load %arg5[%c0_24, %c0_25] : memref<1x128xf32, #tpu.memory_space<vmem>>, vector<1x128xf32>
    %50 = vector.broadcast %49 : vector<1x128xf32> to vector<8x128xf32>
    %51 = arith.addf %48, %50 : vector<8x128xf32>
    %c0_26 = arith.constant 0 : index
    %c0_27 = arith.constant 0 : index
    %52 = vector.load %arg6[%c0_26, %c0_27] : memref<8x128xf32, #tpu.memory_space<vmem>>, vector<8x128xf32>
    tpu.vector_store %arg6[%c0_26, %c0_27], %51 {strides = array<i32>} : memref<8x128xf32, #tpu.memory_space<vmem>>, vector<8x128xf32>,
    return
  }
  func.func @transform_0(%arg0: i32) -> (i32, i32) {
    %c0_i32 = arith.constant 0 : i32
    %c0_i32_0 = arith.constant 0 : i32
    return %arg0, %c0_i32 : i32, i32
  }
  func.func @transform_1(%arg0: i32) -> (i32, i32) {
    %c0_i32 = arith.constant 0 : i32
    %c0_i32_0 = arith.constant 0 : i32
    %c0_i32_1 = arith.constant 0 : i32
    return %c0_i32, %c0_i32_0 : i32, i32
  }
  func.func @transform_2(%arg0: i32) -> (i32, i32) {
    %c0_i32 = arith.constant 0 : i32
    %c0_i32_0 = arith.constant 0 : i32
    %c0_i32_1 = arith.constant 0 : i32
    return %c0_i32, %c0_i32_0 : i32, i32
  }
  func.func @transform_3(%arg0: i32) -> (i32, i32) {
    %c0_i32 = arith.constant 0 : i32
    %c0_i32_0 = arith.constant 0 : i32
    %c0_i32_1 = arith.constant 0 : i32
    return %c0_i32, %c0_i32_0 : i32, i32
  }
  func.func @transform_4(%arg0: i32) -> (i32, i32) {
    %c0_i32 = arith.constant 0 : i32
    %c0_i32_0 = arith.constant 0 : i32
    %c0_i32_1 = arith.constant 0 : i32
    return %c0_i32, %c0_i32_0 : i32, i32
  }
  func.func @transform_5(%arg0: i32) -> (i32, i32) {
    %c0_i32 = arith.constant 0 : i32
    %c0_i32_0 = arith.constant 0 : i32
    return %arg0, %c0_i32 : i32, i32
  }
}

</mosaic_0001>

<bundles_post_ra>
// kernel: dqn_forward.3
= control target key start
LH: loop header
LB: loop body
LE: loop exit
PB: predicated region body
PF: predicated region fallthrough
CT: control target
= control target key end

     0   :  { %s1098_s12 = smov 0   ;;  %s1100_s13 = smov 0   ;;  %s1303_s0 = inlined_call_operand.vmem [shape: f32[4,28,14,32], index: 0, kind: input, shape index: {}]   ;;  %s1304_s1 = inlined_call_operand.vmem [shape: f32[32,128], index: 1, kind: input, shape index: {}]   ;;  %s1305_s2 = inlined_call_operand.vmem [shape: f32[1,128], index: 2, kind: input, shape index: {}]   ;;  %s1306_s3 = inlined_call_operand.vmem [shape: f32[28,14,128], index: 3, kind: output, shape index: {}]  }
   0x1   :  { %s1102_s14 = smov 0  }
   0x2 LB: > { %s866_s15 = sadd.s32 4294967295, %s1075_s14   ;;  %s1115_s16 = sadd.s32 1, %s1075_s14   ;;  %s1075_s14 = sphi %s1102_s14, %s1310_s14   ;;  %s1071_s13 = sphi %s1100_s13, %s1309_s13   ;;  %s1067_s12 = sphi %s1098_s12, %s1308_s12  }
   0x3   : > { %s17_s17 = ssub.s32 %s1075_s14, %s1115_s16  ;;  %s20_s18 = sadd.s32 1, %s1071_s13 }
   0x4   : > { %p18_p0 = scmp.eq.s32.totalorder %s17_s17, 0  ;;  %p27_p1 = scmp.ne.s32.totalorder %s1071_s13, %s1067_s12 }
   0x5   : > { %p28_p2 = scmp.eq.s32.totalorder %s1075_s14, 0  ;;  %p869_p4 = scmp.ge.s32.totalorder %s1075_s14, 28 }
   0x6   : > { %s1124_s19 = scalar_select %p18_p0, %s1071_s13, %s20_s18  }
   0x7   : > { %p29_p3 = por %p28_p2, %p27_p1  ;;  %127 = sbr.rel (%p869_p4) target bundleno = 22 (0x16), region = 24 }
   0xe   : > { %130 = sbr.rel (!%p29_p3) target bundleno = 22 (0x16), region = 28  ;;  %s132_s20 = sand.u32 (%p29_p3), 1, %s1071_s13  }
   0xf   : > { %s894_s21 = sshll.u32 (%p29_p3), %s1075_s14, 4  ;;  %s870_s22 = sshll.u32 (%p29_p3), %s132_s20, 6 }
  0x10   : > { %s137_s25 = scalar_lea.vmem (%p29_p3), %s1303_s0, %s894_s21  ;;  %s134_s26 = scalar_lea.vmem (%p29_p3), [#allocation2], %s870_s22 }
  0x11   : > { %v179_v0 = vld [vmem:[%s137_s25] sm:$0xff] (%p29_p3)  ;;  %v181_v1 = vld [vmem:[%s137_s25 + $0x8] sm:$0xff] (%p29_p3) }
  0x12   : > { %v183_v2 = vld [vmem:[%s137_s25 + $0x1c0] sm:$0xff] (%p29_p3)  ;;  %180 = vst [vmem:[%s134_s26] sm:$0xff] (%p29_p3), %v179_v0  ;;  %182 = vst [vmem:[%s134_s26 + $0x8] sm:$0xff] (%p29_p3), %v181_v1  ;;  %v185_v3 = vld [vmem:[%s137_s25 + $0x1c8] sm:$0xff] (%p29_p3) }
  0x13   : > { %184 = vst [vmem:[%s134_s26 + $0x10] sm:$0xff] (%p29_p3), %v183_v2  ;;  %v187_v4 = vld [vmem:[%s137_s25 + $0x380] sm:$0xff] (%p29_p3)  ;;  %v189_v5 = vld [vmem:[%s137_s25 + $0x388] sm:$0xff] (%p29_p3)  ;;  %186 = vst [vmem:[%s134_s26 + $0x18] sm:$0xff] (%p29_p3), %v185_v3 }
  0x14   : > { %188 = vst [vmem:[%s134_s26 + $0x20] sm:$0xff] (%p29_p3), %v187_v4  ;;  %190 = vst [vmem:[%s134_s26 + $0x28] sm:$0xff] (%p29_p3), %v189_v5  ;;  %v191_v6 = vld [vmem:[%s137_s25 + $0x540] sm:$0xff] (%p29_p3)  ;;  %v193_v7 = vld [vmem:[%s137_s25 + $0x548] sm:$0xff] (%p29_p3) }
  0x15   : > { %192 = vst [vmem:[%s134_s26 + $0x30] sm:$0xff] %v191_v6  ;;  %194 = vst [vmem:[%s134_s26 + $0x38] sm:$0xff] %v193_v7 }
  0x16 PF: > { %p873_p5 = scmp.ge.s32.totalorder %s1075_s14, 1  ;;  %p199_p6 = scmp.lt.s32.totalorder %s1075_s14, 29 }
  0x18   : > { %p200_p7 = pnand %p873_p5, %p199_p6 }
  0x19   : > { %v234_v8 = vld [vmem:[%s1304_s1] sm:$0xff] (!%p200_p7)  ;;  %v235_v9 = vld [vmem:[%s1304_s1 + $0x8] sm:$0xff] (!%p200_p7)  ;;  %v236_v10 = vld [vmem:[%s1304_s1 + $0x10] sm:$0xff] (!%p200_p7)  ;;  %s206_s6 = sand.u32 (!%p200_p7), 1, %s1067_s12   ;;  %vm247_vm0 = vcmask (!%p200_p7), 261120   ;;  %v1077_v2 = vmov (!%p200_p7), -1.0  }
  0x1a   : > { %203 = sbr.rel (%p200_p7) target bundleno = 317 (0x13d), region = 66  ;;  %v964_v11 = vpack.c.bf16 (!%p200_p7), %v235_v9, %v234_v8  ;;  %v237_v12 = vld [vmem:[%s1304_s1 + $0x18] sm:$0xff] (!%p200_p7)  ;;  %s874_s9 = sshll.u32 (!%p200_p7), %s206_s6, 6  ;;  %v877_v22 = vld [vmem:[%s1305_s2] ss:$0 sm:$0xff] (!%p200_p7) }
  0x1b   : > { %v968_v13 = vpack.c.bf16 (!%p200_p7), %v237_v12, %v236_v10  ;;  %s208_s10 = scalar_lea.vmem (!%p200_p7), [#allocation2], %s874_s9  ;;  %p1261_p8 = scmp.lt.s32.totalorder (!%p200_p7), %s866_s15, 27 }
  0x1c   : > { %965 = vmatprep.subr.bf16.mxu0 (!%p200_p7), %v964_v11  ;;  %973 = vmatprep.subr.bf16.mxu1 (!%p200_p7), %v964_v11  ;;  %v239_v14 = vld [vmem:[%s208_s10] sm:$0xff] (!%p200_p7)  ;;  %v880_v15 = vld [vmem:[%s208_s10 + $0x10] sm:$0xff] (!%p200_p7)  ;;  %v240_v16 = vld [vmem:[%s208_s10 + $0x8] sm:$0x3f] (!%p200_p7) }
  0x1d   : > { %967 = vmatpush3.bf16.msra.mxu0 (!%p200_p7), %v964_v11  ;;  %975 = vmatpush3.bf16.msra.mxu1 (!%p200_p7), %v964_v11  ;;  %v881_v17 = vld [vmem:[%s208_s10 + $0x18] sm:$0x3f] (!%p200_p7)  ;;  %v884_v18 = vld [vmem:[%s208_s10 + $0x20] sm:$0xff] (!%p200_p7)  ;;  %v888_v19 = vld [vmem:[%s208_s10 + $0x30] sm:$0xff] (!%p200_p7) }
  0x1e   : > { %969 = vmatprep.subr.bf16.mxu0 (!%p200_p7), %v968_v13  ;;  %977 = vmatprep.subr.bf16.mxu1 (!%p200_p7), %v968_v13  ;;  %v885_v20 = vld [vmem:[%s208_s10 + $0x28] sm:$0x3f] (!%p200_p7)  ;;  %v889_v21 = vld [vmem:[%s208_s10 + $0x38] sm:$0x3f] (!%p200_p7) }
  0x1f   : > { %928 = vmatprep.mubr.msk.f32.mxu0 (!%p200_p7), %vm247_vm0, %v239_v14  ;;  %939 = vmatprep.mubr.msk.f32.mxu1 (!%p200_p7), %vm247_vm0, %v880_v15 }
  0x21   : > { %971 = vmatpush3.bf16.msra.mxu0 %v968_v13  ;;  %979 = vmatpush3.bf16.msra.mxu1 %v968_v13  ;;  %s1312_s15 = smov (!%p1261_p8, %s866_s15), 27 }
  0x22   : > { %981 = vmatprep.subr.bf16.mxu0 %v964_v11  ;;  %989 = vmatprep.subr.bf16.mxu1 %v964_v11  ;;  %s895_s14 = sshll.u32 %s1312_s15, 4 }
  0x23   : > { %s233_s21 = scalar_lea.vmem %s1306_s3, %s895_s14 }
  0x24   : > { %929 = vmatmul.mubr.msk.f32.vlgmr.msra.gmra.mrb[0].mxu0 %vm247_vm0, %v240_v16  ;;  %940 = vmatmul.mubr.msk.f32.vlgmr.msra.gmra.mrb[0].mxu1 %vm247_vm0, %v881_v17 }
  0x25   : > { %983 = vmatpush3.bf16.msra.mxu0 %v964_v11  ;;  %991 = vmatpush3.bf16.msra.mxu1 %v964_v11 }
  0x26   : > { %985 = vmatprep.subr.bf16.mxu0 %v968_v13  ;;  %993 = vmatprep.subr.bf16.mxu1 %v968_v13 }
  0x27   : > { %950 = vmatprep.mubr.msk.f32.mxu0 %vm247_vm0, %v884_v18  ;;  %961 = vmatprep.mubr.msk.f32.mxu1 %vm247_vm0, %v888_v19 }
  0x29   : > { %987 = vmatpush3.bf16.msra.mxu0 %v968_v13  ;;  %995 = vmatpush3.bf16.msra.mxu1 %v968_v13 }
  0x2c   : > { %951 = vmatmul.mubr.msk.f32.vlgmr.msra.gmra.mrb[2].mxu0 %vm247_vm0, %v885_v20  ;;  %962 = vmatmul.mubr.msk.f32.vlgmr.msra.gmra.mrb[2].mxu1 %vm247_vm0, %v889_v21 }
  0xf7   : > { %v930_v23 = vpop.f32.mrb[0].mxu0  ;;  %v941_v24 = vpop.f32.mrb[0].mxu1 }
  0xf8   : > { %v326_v25 = vadd.f32 %v930_v23, %v877_v22  ;;  %v464_v26 = vadd.f32 %v941_v24, %v877_v22  ;;  %v320_v27 = vpop.f32.mrb[1].mxu0  ;;  %v458_v28 = vpop.f32.mrb[1].mxu1 }
  0xf9   : > { %v321_v29 = vadd.f32 %v877_v22, %v320_v27  ;;  %v459_v30 = vadd.f32 %v877_v22, %v458_v28 }
  0xfa   : > { %v332_v31 = vmul.f32 0.70710677, %v326_v25  ;;  %v470_v32 = vmul.f32 0.70710677, %v464_v26  ;;  %v1160_v51 = vmul.f32 0.5, %v326_v25  ;;  %v1167_v55 = vmul.f32 0.5, %v464_v26 }
  0xfb   : > { %v331_v33 = vmul.f32 0.70710677, %v321_v29  ;;  %v469_v37 = vmul.f32 0.70710677, %v459_v30  ;;  %v1169_v56 = vmul.f32 0.5, %v321_v29  ;;  %v1174_v62 = vmul.f32 0.5, %v459_v30 }
  0xfc   : > { %v338_v34 = vand.u32 2147483647, %v332_v31  ;;  %v476_v35 = vand.u32 2147483647, %v470_v32  ;;  %vm334_vm1 = vcmp.ge.f32.partialorder %v332_v31, 0.0  ;;  %vm472_vm2 = vcmp.ge.f32.partialorder %v470_v32, 0.0 }
  0xfd   : > { %v337_v36 = vand.u32 2147483647, %v331_v33  ;;  %v475_v46 = vand.u32 2147483647, %v469_v37  ;;  %vm333_vm3 = vcmp.ge.f32.partialorder %v331_v33, 0.0  ;;  %v1180_v3 = vsel %vm334_vm1, 1.0, %v1077_v2 }
  0xfe   : > { %v340_v38 = vmul.f32 0.3275911, %v338_v34  ;;  %v478_v39 = vmul.f32 0.3275911, %v476_v35  ;;  %v366_v52 = vsub.f32 0.0, %v338_v34  ;;  %v504_v59 = vsub.f32 0.0, %v476_v35 }
  0xff   : > { %v339_v40 = vmul.f32 0.3275911, %v337_v36  ;;  %v952_v41 = vpop.f32.mrb[2].mxu0  ;;  %v963_v44 = vpop.f32.mrb[2].mxu1  ;;  %v477_v50 = vmul.f32 0.3275911, %v475_v46 }
 0x100   : > { %v342_v42 = vadd.f32 1.0, %v340_v38  ;;  %v480_v43 = vadd.f32 1.0, %v478_v39  ;;  %v598_v45 = vpop.f32.mrb[3].mxu0  ;;  %v738_v47 = vpop.f32.mrb[3].mxu1  ;;  %v1158_v49 = vadd.f32 %v952_v41, %v877_v22  ;;  %v1165_v54 = vadd.f32 %v963_v44, %v877_v22 }
 0x101   : > { %v341_v48 = vadd.f32 1.0, %v339_v40  ;;  %v479_v57 = vadd.f32 1.0, %v477_v50  ;;  %v1171_v58 = vadd.f32 %v877_v22, %v598_v45  ;;  %v365_v61 = vsub.f32 0.0, %v337_v36 }
 0x102   : > { %1021 = vrcp.f32 %v342_v42  ;;  %v1163_v53 = vmul.f32 0.70710677, %v1158_v49  ;;  %v1177_v63 = vmul.f32 0.70710677, %v1165_v54  ;;  %v368_v0 = vmul.f32 %v366_v52, %v338_v34 }
 0x103   : > { %1023 = vrcp.f32 %v480_v43  ;;  %vm471_vm4 = vcmp.ge.f32.partialorder %v469_v37, 0.0  ;;  %v1184_v5 = vmul.f32 0.70710677, %v1171_v58  ;;  %v1187_v6 = vsel %vm472_vm2, 1.0, %v1077_v2 }
 0x104   : > { %1025 = vrcp.f32 %v341_v48  ;;  %v616_v60 = vand.u32 2147483647, %v1163_v53  ;;  %v756_v4 = vand.u32 2147483647, %v1177_v63  ;;  %v506_v7 = vmul.f32 %v504_v59, %v476_v35 }
 0x105   : > { %1027 = vrcp.f32 %v479_v57  ;;  %v1189_v9 = vadd.f32 %v877_v22, %v738_v47  ;;  %v1192_v10 = vsel %vm333_vm3, 1.0, %v1077_v2  ;;  %v367_v11 = vmul.f32 %v365_v61, %v337_v36 }
 0x106   : > { %v618_v1 = vmul.f32 0.3275911, %v616_v60  ;;  %v758_v12 = vmul.f32 0.3275911, %v756_v4  ;;  %v615_v13 = vand.u32 2147483647, %v1184_v5 }
 0x107   : > { %v371_v15 = vmul.f32 1.442695, %v368_v0  ;;  %v1198_v16 = vsel %vm471_vm4, 1.0, %v1077_v2  ;;  %v503_v17 = vsub.f32 0.0, %v475_v46  ;;  %v644_v20 = vsub.f32 0.0, %v616_v60 }
 0x108   : > { %v620_v8 = vadd.f32 1.0, %v618_v1  ;;  %v760_v21 = vadd.f32 1.0, %v758_v12  ;;  %v617_v22 = vmul.f32 0.3275911, %v615_v13  ;;  %v509_v24 = vmul.f32 1.442695, %v506_v7 }
 0x109   : > { %v1205_v25 = vmul.f32 0.70710677, %v1189_v9  ;;  %v369_v27 = vmul.f32 1.442695, %v367_v11  ;;  %v505_v31 = vmul.f32 %v503_v17, %v475_v46  ;;  %v784_v32 = vsub.f32 0.0, %v756_v4 }
 0x10a   : > { %1029 = vrcp.f32 %v620_v8  ;;  %v619_v28 = vadd.f32 1.0, %v617_v22  ;;  %v646_v36 = vmul.f32 %v644_v20, %v616_v60  ;;  %v643_v39 = vsub.f32 0.0, %v615_v13 }
 0x10b   : > { %1031 = vrcp.f32 %v760_v21  ;;  %v755_v33 = vand.u32 2147483647, %v1205_v25  ;;  %v507_v45 = vmul.f32 1.442695, %v505_v31  ;;  %v786_v46 = vmul.f32 %v784_v32, %v756_v4 }
 0x10c   : > { %v1195_v14 = vpop.eup %1021  ;;  %1033 = vpow2.f32 %v371_v15  ;;  %v649_v60 = vmul.f32 1.442695, %v646_v36  ;;  %v645_v61 = vmul.f32 %v643_v39, %v615_v13  ;;  %vm612_vm5 = vcmp.ge.f32.partialorder %v1163_v53, 0.0 }
 0x10d   : > { %v1200_v18 = vpop.eup %1023  ;;  %v348_v19 = vmul.f32 1.0614054, %v1195_v14  ;;  %1035 = vrcp.f32 %v619_v28  ;;  %v757_v40 = vmul.f32 0.3275911, %v755_v33  ;;  %v789_v11 = vmul.f32 1.442695, %v786_v46 }
 0x10e   : > { %v486_v23 = vmul.f32 1.0614054, %v1200_v18  ;;  %v1207_v29 = vpop.eup %1025  ;;  %1037 = vpow2.f32 %v509_v24  ;;  %v783_v12 = vsub.f32 0.0, %v755_v33  ;;  %vm752_vm6 = vcmp.ge.f32.partialorder %v1177_v63, 0.0 }
 0x10f   : > { %v350_v26 = vadd.f32 -1.4531521, %v348_v19  ;;  %v347_v35 = vmul.f32 1.0614054, %v1207_v29  ;;  %v1212_v37 = vpop.eup %1027  ;;  %v759_v47 = vadd.f32 1.0, %v757_v40  ;;  %1039 = vpow2.f32 %v369_v27 }
 0x110   : > { %v488_v30 = vadd.f32 -1.4531521, %v486_v23  ;;  %v485_v43 = vmul.f32 1.0614054, %v1212_v37  ;;  %v647_v23 = vmul.f32 1.442695, %v645_v61 }
 0x111   : > { %v352_v34 = vmul.f32 %v1195_v14, %v350_v26  ;;  %v349_v42 = vadd.f32 -1.4531521, %v347_v35  ;;  %1041 = vrcp.f32 %v759_v47  ;;  %v785_v35 = vmul.f32 %v783_v12, %v755_v33 }
 0x112   : > { %v490_v38 = vmul.f32 %v1200_v18, %v488_v30  ;;  %v487_v52 = vadd.f32 -1.4531521, %v485_v43  ;;  %1043 = vpow2.f32 %v507_v45  ;;  %v608_v53 = vmul.f32 0.5, %v1158_v49 }
 0x113   : > { %v354_v41 = vadd.f32 1.4214138, %v352_v34  ;;  %v351_v50 = vmul.f32 %v1207_v29, %v349_v42  ;;  %1045 = vpow2.f32 %v649_v60  ;;  %v754_v63 = vsel %vm752_vm6, 1.0, %v1077_v2 }
 0x114   : > { %v492_v44 = vadd.f32 1.4214138, %v490_v38  ;;  %v1218_v57 = vpop.eup %1029  ;;  %v489_v7 = vmul.f32 %v1212_v37, %v487_v52  ;;  %1047 = vpow2.f32 %v789_v11  ;;  %vm611_vm7 = vcmp.ge.f32.partialorder %v1184_v5, 0.0 }
 0x115   : > { %v356_v48 = vmul.f32 %v1195_v14, %v354_v41  ;;  %v353_v1 = vadd.f32 1.4214138, %v351_v50  ;;  %v626_v4 = vmul.f32 1.0614054, %v1218_v57  ;;  %v1223_v15 = vpop.eup %1031  ;;  %1049 = vpow2.f32 %v647_v23 }
 0x116   : > { %v494_v59 = vmul.f32 %v1200_v18, %v492_v44  ;;  %v491_v20 = vadd.f32 1.4214138, %v489_v7  ;;  %v766_v22 = vmul.f32 1.0614054, %v1223_v15  ;;  %v1034_v24 = vpop.eup %1033  ;;  %v613_v49 = vsel %vm611_vm7, 1.0, %v1077_v2 }
 0x117   : > { %v358_v0 = vadd.f32 -0.28449672, %v356_v48  ;;  %v355_v19 = vmul.f32 %v1207_v29, %v353_v1  ;;  %v628_v21 = vadd.f32 -1.4531521, %v626_v4  ;;  %v1231_v31 = vpop.eup %1035  ;;  %vm751_vm8 = vcmp.ge.f32.partialorder %v1205_v25, 0.0 }
 0x118   : > { %v496_v8 = vadd.f32 -0.28449672, %v494_v59  ;;  %v493_v28 = vmul.f32 %v1212_v37, %v491_v20  ;;  %v768_v34 = vadd.f32 -1.4531521, %v766_v22  ;;  %v1038_v36 = vpop.eup %1037  ;;  %v625_v44 = vmul.f32 1.0614054, %v1231_v31 }
 0x119   : > { %v360_v17 = vmul.f32 %v1195_v14, %v358_v0  ;;  %v357_v27 = vadd.f32 -0.28449672, %v355_v19  ;;  %v630_v30 = vmul.f32 %v1218_v57, %v628_v21  ;;  %v1040_v45 = vpop.eup %1039 }
 0x11a   : > { %v498_v13 = vmul.f32 %v1200_v18, %v496_v8  ;;  %v495_v40 = vadd.f32 -0.28449672, %v493_v28  ;;  %v770_v43 = vmul.f32 %v1223_v15, %v768_v34  ;;  %v627_v59 = vadd.f32 -1.4531521, %v625_v44 }
 0x11b   : > { %v362_v26 = vadd.f32 0.2548296, %v360_v17  ;;  %v359_v39 = vmul.f32 %v1207_v29, %v357_v27  ;;  %v632_v41 = vadd.f32 1.4214138, %v630_v30  ;;  %v1240_v50 = vpop.eup %1041 }
 0x11c   : > { %v500_v32 = vadd.f32 0.2548296, %v498_v13  ;;  %v497_v48 = vmul.f32 %v1212_v37, %v495_v40  ;;  %v772_v52 = vadd.f32 1.4214138, %v770_v43  ;;  %v1044_v7 = vpop.eup %1043  ;;  %v629_v11 = vmul.f32 %v1231_v31, %v627_v59 }
 0x11d   : > { %v364_v38 = vmul.f32 %v1195_v14, %v362_v26  ;;  %v361_v47 = vadd.f32 0.2548296, %v359_v39  ;;  %v634_v33 = vmul.f32 %v1218_v57, %v632_v41  ;;  %v765_v12 = vmul.f32 1.0614054, %v1240_v50  ;;  %v1046_v13 = vpop.eup %1045 }
 0x11e   : > { %v502_v42 = vmul.f32 %v1200_v18, %v500_v32  ;;  %v787_v18 = vmul.f32 1.442695, %v785_v35  ;;  %v499_v0 = vadd.f32 0.2548296, %v497_v48  ;;  %v774_v8 = vmul.f32 %v1223_v15, %v772_v52  ;;  %v1048_v32 = vpop.eup %1047 }
 0x11f   : > { %v374_v46 = vmul.f32 %v1034_v24, %v364_v38  ;;  %v363_v61 = vmul.f32 %v1207_v29, %v361_v47  ;;  %v636_v1 = vadd.f32 -0.28449672, %v634_v33  ;;  %v631_v23 = vadd.f32 1.4214138, %v629_v11  ;;  %v1050_v40 = vpop.eup %1049 }
 0x120   : > { %v512_v14 = vmul.f32 %v1038_v36, %v502_v42  ;;  %v501_v20 = vmul.f32 %v1212_v37, %v499_v0  ;;  %v776_v22 = vadd.f32 -0.28449672, %v774_v8  ;;  %v767_v24 = vadd.f32 -1.4531521, %v765_v12 }
 0x121   : > { %v376_v60 = vsub.f32 1.0, %v374_v46  ;;  %v373_v19 = vmul.f32 %v1040_v45, %v363_v61  ;;  %v638_v21 = vmul.f32 %v1218_v57, %v636_v1  ;;  %1051 = vpow2.f32 %v787_v18 }
 0x122   : > { %v514_v4 = vsub.f32 1.0, %v512_v14  ;;  %v511_v28 = vmul.f32 %v1044_v7, %v501_v20  ;;  %v778_v35 = vmul.f32 %v1223_v15, %v776_v22  ;;  %v769_v37 = vmul.f32 %v1240_v50, %v767_v24 }
 0x123   : > { %v378_v17 = vmul.f32 %v376_v60, %v1180_v3  ;;  %v375_v27 = vsub.f32 1.0, %v373_v19  ;;  %v640_v30 = vadd.f32 0.2548296, %v638_v21  ;;  %v633_v3 = vmul.f32 %v1231_v31, %v631_v23 }
 0x124   : > { %v516_v29 = vmul.f32 %v514_v4, %v1187_v6  ;;  %v513_v38 = vsub.f32 1.0, %v511_v28  ;;  %v780_v42 = vadd.f32 0.2548296, %v778_v35  ;;  %v771_v44 = vadd.f32 1.4214138, %v769_v37 }
 0x125   : > { %v380_v26 = vadd.f32 1.0, %v378_v17  ;;  %v377_v6 = vmul.f32 %v375_v27, %v1192_v10  ;;  %v642_v39 = vmul.f32 %v1218_v57, %v640_v30  ;;  %v635_v43 = vadd.f32 -0.28449672, %v633_v3 }
 0x126   : > { %v518_v34 = vadd.f32 1.0, %v516_v29  ;;  %v515_v46 = vmul.f32 %v513_v38, %v1198_v16  ;;  %v773_v10 = vmul.f32 %v1240_v50, %v771_v44  ;;  %v614_v16 = vsel %vm612_vm5, 1.0, %v1077_v2 }
 0x127   : > { %v382_v36 = vmul.f32 %v380_v26, %v1160_v51  ;;  %v379_v45 = vadd.f32 1.0, %v377_v6  ;;  %v652_v47 = vmul.f32 %v1046_v13, %v642_v39  ;;  %v782_v51 = vmul.f32 %v1223_v15, %v780_v42 }
 0x128   : > { %v520_v41 = vmul.f32 %v518_v34, %v1167_v55  ;;  %v637_v55 = vmul.f32 %v1231_v31, %v635_v43  ;;  %v517_v33 = vadd.f32 1.0, %v515_v46  ;;  %v775_v18 = vadd.f32 -0.28449672, %v773_v10 }
 0x129   : > { %v381_v57 = vmul.f32 %v379_v45, %v1169_v56  ;;  %v654_v14 = vsub.f32 1.0, %v652_v47  ;;  %v792_v52 = vmul.f32 %v1048_v32, %v782_v51  ;;  %v748_v12 = vmul.f32 0.5, %v1165_v54 }
 0x12a   : > { %v522_v48 = vmax.f32 %v382_v36, %v520_v41  ;;  %v639_v59 = vadd.f32 0.2548296, %v637_v55  ;;  %v519_v60 = vmul.f32 %v517_v33, %v1174_v62  ;;  %v777_v0 = vmul.f32 %v1240_v50, %v775_v18 }
 0x12b   : > { %v656_v15 = vmul.f32 %v654_v14, %v614_v16  ;;  %v794_v61 = vsub.f32 1.0, %v792_v52  ;;  %v1052_v20 = vpop.eup %1051  ;;  %v607_v54 = vmul.f32 0.5, %v1171_v58  ;;  %v747_v30 = vmul.f32 0.5, %v1189_v9 }
 0x12c   : > { %v641_v56 = vmul.f32 %v1231_v31, %v639_v59  ;;  %v521_v1 = vmax.f32 %v381_v57, %v519_v60  ;;  %v779_v62 = vadd.f32 0.2548296, %v777_v0 }
 0x12d   : > { %v658_v7 = vadd.f32 1.0, %v656_v15  ;;  %v796_v4 = vmul.f32 %v794_v61, %v754_v63 }
 0x12e   : > { %v651_v8 = vmul.f32 %v1050_v40, %v641_v56  ;;  %v781_v31 = vmul.f32 %v1240_v50, %v779_v62  ;;  %v753_v50 = vsel %vm751_vm8, 1.0, %v1077_v2 }
 0x12f   : > { %v660_v11 = vmul.f32 %v658_v7, %v608_v53  ;;  %v798_v17 = vadd.f32 1.0, %v796_v4 }
 0x130   : > { %v653_v19 = vsub.f32 1.0, %v651_v8  ;;  %v791_v22 = vmul.f32 %v1052_v20, %v781_v31 }
 0x131   : > { %v662_v21 = vmax.f32 %v522_v48, %v660_v11  ;;  %v800_v13 = vmul.f32 %v798_v17, %v748_v12 }
 0x132   : > { %v655_v29 = vmul.f32 %v653_v19, %v613_v49  ;;  %v793_v24 = vsub.f32 1.0, %v791_v22 }
 0x133   : > { %v802_v5 = vmax.f32 %v662_v21, %v800_v13 }
 0x134   : > { %v657_v23 = vadd.f32 1.0, %v655_v29  ;;  %v795_v27 = vmul.f32 %v793_v24, %v753_v50 }
 0x135   : > { %804 = vst [vmem:[%s233_s21 + $0x8] sm:$0x3f] %v802_v5 }
 0x136   : > { %v659_v26 = vmul.f32 %v657_v23, %v607_v54  ;;  %v797_v32 = vadd.f32 1.0, %v795_v27 }
 0x138   : > { %v661_v28 = vmax.f32 %v521_v1, %v659_v26  ;;  %v799_v25 = vmul.f32 %v797_v32, %v747_v30 }
 0x13a   : > { %v801_v34 = vmax.f32 %v661_v28, %v799_v25 }
 0x13c   : > { %803 = vst [vmem:[%s233_s21] sm:$0xff] %v801_v34 }
 0x13d PF: > { %p10_p9 = scmp.ge.s32.totalorder %s1115_s16, 30   ;;  %s1308_s12 = smov %s1071_s13 }
 0x13e   : > { %s1309_s13 = smov %s1124_s19  ;;  %s1310_s14 = smov %s1115_s16 }
 0x13f   :  { %12 = sbr.rel (!%p10_p9) target bundleno = 2 (0x2), region = 108 }

// kernel: dqn_forward.4
= control target key start
LH: loop header
LB: loop body
LE: loop exit
PB: predicated region body
PF: predicated region fallthrough
CT: control target
= control target key end

     0   :  { %s923_s12 = smov 0   ;;  %s925_s13 = smov 0   ;;  %s1126_s0 = inlined_call_operand.vmem [shape: f32[4,14,7,144], index: 0, kind: input, shape index: {}]   ;;  %s1127_s1 = inlined_call_operand.vmem [shape: f32[144,128], index: 1, kind: input, shape index: {}]   ;;  %s1128_s2 = inlined_call_operand.vmem [shape: f32[1,128], index: 2, kind: input, shape index: {}]   ;;  %s1129_s3 = inlined_call_operand.vmem [shape: f32[14,7,128], index: 3, kind: output, shape index: {}]  }
   0x1   :  { %s927_s14 = smov 0  }
   0x2 LB: > { %s703_s15 = sadd.s32 4294967295, %s899_s14   ;;  %s940_s16 = sadd.s32 1, %s899_s14   ;;  %s899_s14 = sphi %s927_s14, %s1132_s14   ;;  %s895_s13 = sphi %s925_s13, %s1131_s13   ;;  %s891_s12 = sphi %s923_s12, %s1130_s12  }
   0x3   : > { %s17_s17 = ssub.s32 %s899_s14, %s940_s16  ;;  %s20_s18 = sadd.s32 1, %s895_s13 }
   0x4   : > { %p18_p0 = scmp.eq.s32.totalorder %s17_s17, 0  ;;  %p27_p1 = scmp.ne.s32.totalorder %s895_s13, %s891_s12 }
   0x5   : > { %p28_p2 = scmp.eq.s32.totalorder %s899_s14, 0  ;;  %p706_p4 = scmp.ge.s32.totalorder %s899_s14, 14 }
   0x6   : > { %s949_s19 = scalar_select %p18_p0, %s895_s13, %s20_s18  }
   0x7   : > { %p29_p3 = por %p28_p2, %p27_p1  ;;  %127 = sbr.rel (%p706_p4) target bundleno = 22 (0x16), region = 24 }
   0xe   : > { %130 = sbr.rel (!%p29_p3) target bundleno = 22 (0x16), region = 28  ;;  %s132_s20 = sand.u32 (%p29_p3), 1, %s895_s13  }
   0xf   : > { %s726_s21 = sshll.u32 (%p29_p3), %s899_s14, 4  ;;  %s707_s22 = sshll.u32 (%p29_p3), %s132_s20, 6 }
  0x10   : > { %s137_s25 = scalar_lea.vmem (%p29_p3), %s1126_s0, %s726_s21  ;;  %s134_s26 = scalar_lea.vmem (%p29_p3), [#allocation2], %s707_s22 }
  0x11   : > { %v150_v0 = vld [vmem:[%s137_s25] sm:$0xff] (%p29_p3)  ;;  %v152_v1 = vld [vmem:[%s137_s25 + $0x8] sm:$0xff] (%p29_p3) }
  0x12   : > { %v154_v2 = vld [vmem:[%s137_s25 + $0xe0] sm:$0xff] (%p29_p3)  ;;  %151 = vst [vmem:[%s134_s26] sm:$0xff] (%p29_p3), %v150_v0  ;;  %153 = vst [vmem:[%s134_s26 + $0x8] sm:$0xff] (%p29_p3), %v152_v1  ;;  %v156_v3 = vld [vmem:[%s137_s25 + $0xe8] sm:$0xff] (%p29_p3) }
  0x13   : > { %155 = vst [vmem:[%s134_s26 + $0x10] sm:$0xff] (%p29_p3), %v154_v2  ;;  %v158_v4 = vld [vmem:[%s137_s25 + $0x1c0] sm:$0xff] (%p29_p3)  ;;  %v160_v5 = vld [vmem:[%s137_s25 + $0x1c8] sm:$0xff] (%p29_p3)  ;;  %157 = vst [vmem:[%s134_s26 + $0x18] sm:$0xff] (%p29_p3), %v156_v3 }
  0x14   : > { %159 = vst [vmem:[%s134_s26 + $0x20] sm:$0xff] (%p29_p3), %v158_v4  ;;  %161 = vst [vmem:[%s134_s26 + $0x28] sm:$0xff] (%p29_p3), %v160_v5  ;;  %v162_v6 = vld [vmem:[%s137_s25 + $0x2a0] sm:$0xff] (%p29_p3)  ;;  %v164_v7 = vld [vmem:[%s137_s25 + $0x2a8] sm:$0xff] (%p29_p3) }
  0x15   : > { %163 = vst [vmem:[%s134_s26 + $0x30] sm:$0xff] %v162_v6  ;;  %165 = vst [vmem:[%s134_s26 + $0x38] sm:$0xff] %v164_v7 }
  0x16 PF: > { %p710_p5 = scmp.ge.s32.totalorder %s899_s14, 1  ;;  %p170_p6 = scmp.lt.s32.totalorder %s899_s14, 15 }
  0x18   : > { %p171_p7 = pnand %p710_p5, %p170_p6 }
  0x19   : > { %v203_v8 = vld [vmem:[%s1127_s1] sm:$0xff] (!%p171_p7)  ;;  %v204_v9 = vld [vmem:[%s1127_s1 + $0x8] sm:$0xff] (!%p171_p7)  ;;  %v205_v10 = vld [vmem:[%s1127_s1 + $0x10] sm:$0xff] (!%p171_p7)  ;;  %s177_s6 = sand.u32 (!%p171_p7), 1, %s891_s12   ;;  %v901_v11 = vmov (!%p171_p7), 0.0|0.0   ;;  %vm230_vm0 = vcmask (!%p171_p7), 130048  }
  0x1a   : > { %174 = sbr.rel (%p171_p7) target bundleno = 365 (0x16d), region = 51  ;;  %727 = vmatprep.subr.bf16.mxu0 (!%p171_p7), %v901_v11  ;;  %754 = vmatprep.subr.bf16.mxu1 (!%p171_p7), %v901_v11  ;;  %v971_v12 = vpack.c.bf16 (!%p171_p7), %v204_v9, %v203_v8  ;;  %v206_v13 = vld [vmem:[%s1127_s1 + $0x18] sm:$0xff] (!%p171_p7)  ;;  %s711_s9 = sshll.u32 (!%p171_p7), %s177_s6, 6  ;;  %v207_v15 = vld [vmem:[%s1127_s1 + $0x20] sm:$0xff] (!%p171_p7)  ;;  %v208_v16 = vld [vmem:[%s1127_s1 + $0x28] sm:$0xff] (!%p171_p7) }
  0x1b   : > { %v978_v14 = vpack.c.bf16 (!%p171_p7), %v206_v13, %v205_v10  ;;  %s988_s18 = scalar_lea.vmem (!%p171_p7), [#allocation2], %s711_s9  ;;  %v994_v19 = vpack.c.bf16 (!%p171_p7), %v208_v16, %v207_v15  ;;  %v209_v20 = vld [vmem:[%s1127_s1 + $0x30] sm:$0xff] (!%p171_p7)  ;;  %v210_v21 = vld [vmem:[%s1127_s1 + $0x38] sm:$0xff] (!%p171_p7)  ;;  %v211_v23 = vld [vmem:[%s1127_s1 + $0x40] sm:$0xff] (!%p171_p7)  ;;  %p199_p8 = scmp.lt.s32.totalorder (!%p171_p7), %s703_s15, 13 }
  0x1c   : > { %729 = vmatpush1.bf16.msra.mxu0 (!%p171_p7), %v971_v12  ;;  %756 = vmatpush1.bf16.msra.mxu1 (!%p171_p7), %v971_v12  ;;  %v223_v17 = vld [vmem:[%s988_s18 + $0x8] sm:$0x7f] (!%p171_p7)  ;;  %v716_v18 = vld [vmem:[%s988_s18 + $0x18] sm:$0x7f] (!%p171_p7)  ;;  %v737_v22 = vpack.c.bf16 (!%p171_p7), %v210_v21, %v209_v20  ;;  %v213_v26 = vld [vmem:[%s1127_s1 + $0x50] sm:$0xff] (!%p171_p7) }
  0x1d   : > { %730 = vmatprep.subr.bf16.mxu0 (!%p171_p7), %v901_v11  ;;  %757 = vmatprep.subr.bf16.mxu1 (!%p171_p7), %v901_v11  ;;  %v212_v24 = vld [vmem:[%s1127_s1 + $0x48] sm:$0xff] (!%p171_p7)  ;;  %v214_v27 = vld [vmem:[%s1127_s1 + $0x58] sm:$0xff] (!%p171_p7)  ;;  %v215_v29 = vld [vmem:[%s1127_s1 + $0x60] sm:$0xff] (!%p171_p7) }
  0x1e   : > { %714 = vmatprep.mubr.msk.f32.mxu0 (!%p171_p7), %vm230_vm0, %v223_v17  ;;  %717 = vmatprep.mubr.msk.f32.mxu1 (!%p171_p7), %vm230_vm0, %v716_v18  ;;  %v740_v25 = vpack.c.bf16 (!%p171_p7), %v212_v24, %v211_v23  ;;  %v743_v28 = vpack.c.bf16 (!%p171_p7), %v214_v27, %v213_v26  ;;  %v216_v30 = vld [vmem:[%s1127_s1 + $0x68] sm:$0xff] (!%p171_p7)  ;;  %v217_v32 = vld [vmem:[%s1127_s1 + $0x70] sm:$0xff] (!%p171_p7)  ;;  %v218_v33 = vld [vmem:[%s1127_s1 + $0x78] sm:$0xff] (!%p171_p7) }
  0x1f   : > { %v746_v31 = vpack.c.bf16 (!%p171_p7), %v216_v30, %v215_v29  ;;  %v749_v34 = vpack.c.bf16 (!%p171_p7), %v218_v33, %v217_v32  ;;  %v219_v35 = vld [vmem:[%s1127_s1 + $0x80] sm:$0xff] (!%p171_p7)  ;;  %v220_v36 = vld [vmem:[%s1127_s1 + $0x88] sm:$0xff] (!%p171_p7)  ;;  %v715_v39 = vld [vmem:[%s988_s18 + $0x10] sm:$0x7f] (!%p171_p7) }
  0x20   : > { %732 = vmatpush1.bf16.msra.mxu0 (!%p171_p7), %v978_v14  ;;  %759 = vmatpush1.bf16.msra.mxu1 (!%p171_p7), %v978_v14  ;;  %v752_v37 = vpack.c.bf16 (!%p171_p7), %v220_v36, %v219_v35  ;;  %v222_v38 = vld [vmem:[%s988_s18] sm:$0x7f] (!%p171_p7)  ;;  %v719_v40 = vld [vmem:[%s988_s18 + $0x28] sm:$0x7f] (!%p171_p7)  ;;  %v722_v41 = vld [vmem:[%s988_s18 + $0x38] sm:$0x7f] (!%p171_p7) }
  0x21   : > { %733 = vmatprep.subr.bf16.mxu0 %v901_v11  ;;  %760 = vmatprep.subr.bf16.mxu1 %v901_v11  ;;  %v718_v42 = vld [vmem:[%s988_s18 + $0x20] sm:$0x7f]  ;;  %v721_v43 = vld [vmem:[%s988_s18 + $0x30] sm:$0x7f]  ;;  %v902_v36 = vmov -1.0   ;;  %s1134_s15 = smov (!%p199_p8, %s703_s15), 13 }
  0x22   : > { %v713_v44 = vld [vmem:[%s1128_s2] ss:$0 sm:$0xff]  ;;  %s712_s18 = sshll.u32 %s1134_s15, 3 }
  0x23   : > { %s202_s27 = scalar_lea.vmem %s1129_s3, %s712_s18 }
  0x24   : > { %735 = vmatpush1.bf16.msra.mxu0 %v994_v19  ;;  %762 = vmatpush1.bf16.msra.mxu1 %v994_v19 }
  0x25   : > { %736 = vmatprep.subr.bf16.mxu0 %v901_v11  ;;  %763 = vmatprep.subr.bf16.mxu1 %v901_v11 }
  0x28   : > { %738 = vmatpush1.bf16.msra.mxu0 %v737_v22  ;;  %765 = vmatpush1.bf16.msra.mxu1 %v737_v22 }
  0x29   : > { %739 = vmatprep.subr.bf16.mxu0 %v901_v11  ;;  %766 = vmatprep.subr.bf16.mxu1 %v901_v11 }
  0x2c   : > { %741 = vmatpush1.bf16.msra.mxu0 %v740_v25  ;;  %768 = vmatpush1.bf16.msra.mxu1 %v740_v25 }
  0x2d   : > { %742 = vmatprep.subr.bf16.mxu0 %v901_v11  ;;  %769 = vmatprep.subr.bf16.mxu1 %v901_v11 }
  0x30   : > { %744 = vmatpush1.bf16.msra.mxu0 %v743_v28  ;;  %771 = vmatpush1.bf16.msra.mxu1 %v743_v28 }
  0x31   : > { %745 = vmatprep.subr.bf16.mxu0 %v901_v11  ;;  %772 = vmatprep.subr.bf16.mxu1 %v901_v11 }
  0x34   : > { %747 = vmatpush1.bf16.msra.mxu0 %v746_v31  ;;  %774 = vmatpush1.bf16.msra.mxu1 %v746_v31 }
  0x35   : > { %748 = vmatprep.subr.bf16.mxu0 %v901_v11  ;;  %775 = vmatprep.subr.bf16.mxu1 %v901_v11 }
  0x38   : > { %750 = vmatpush1.bf16.msra.mxu0 %v749_v34  ;;  %777 = vmatpush1.bf16.msra.mxu1 %v749_v34 }
  0x39   : > { %751 = vmatprep.subr.bf16.mxu0 %v901_v11  ;;  %778 = vmatprep.subr.bf16.mxu1 %v901_v11 }
  0x3c   : > { %753 = vmatpush1.bf16.msra.mxu0 %v752_v37  ;;  %780 = vmatpush1.bf16.msra.mxu1 %v752_v37 }
  0x3d   : > { %781 = vmatprep.subr.bf16.mxu0 %v901_v11  ;;  %808 = vmatprep.subr.bf16.mxu1 %v901_v11 }
  0x3f   : > { %299 = vmatmul.mubr.f32.vlgmr.msra.gmra.mrb[0].mxu0 %v222_v38  ;;  %402 = vmatmul.mubr.f32.vlgmr.msra.gmra.mrb[0].mxu1 %v715_v39 }
  0x40   : > { %783 = vmatpush1.bf16.msra.mxu0 %v971_v12  ;;  %810 = vmatpush1.bf16.msra.mxu1 %v971_v12 }
  0x41   : > { %784 = vmatprep.subr.bf16.mxu0 %v901_v11  ;;  %811 = vmatprep.subr.bf16.mxu1 %v901_v11 }
  0x42   : > { %720 = vmatprep.mubr.msk.f32.mxu0 %vm230_vm0, %v719_v40  ;;  %723 = vmatprep.mubr.msk.f32.mxu1 %vm230_vm0, %v722_v41 }
  0x44   : > { %786 = vmatpush1.bf16.msra.mxu0 %v978_v14  ;;  %813 = vmatpush1.bf16.msra.mxu1 %v978_v14 }
  0x45   : > { %787 = vmatprep.subr.bf16.mxu0 %v901_v11  ;;  %814 = vmatprep.subr.bf16.mxu1 %v901_v11 }
  0x48   : > { %789 = vmatpush1.bf16.msra.mxu0 %v994_v19  ;;  %816 = vmatpush1.bf16.msra.mxu1 %v994_v19 }
  0x49   : > { %790 = vmatprep.subr.bf16.mxu0 %v901_v11  ;;  %817 = vmatprep.subr.bf16.mxu1 %v901_v11 }
  0x4c   : > { %792 = vmatpush1.bf16.msra.mxu0 %v737_v22  ;;  %819 = vmatpush1.bf16.msra.mxu1 %v737_v22 }
  0x4d   : > { %793 = vmatprep.subr.bf16.mxu0 %v901_v11  ;;  %820 = vmatprep.subr.bf16.mxu1 %v901_v11 }
  0x50   : > { %795 = vmatpush1.bf16.msra.mxu0 %v740_v25  ;;  %822 = vmatpush1.bf16.msra.mxu1 %v740_v25 }
  0x51   : > { %796 = vmatprep.subr.bf16.mxu0 %v901_v11  ;;  %823 = vmatprep.subr.bf16.mxu1 %v901_v11 }
  0x54   : > { %798 = vmatpush1.bf16.msra.mxu0 %v743_v28  ;;  %825 = vmatpush1.bf16.msra.mxu1 %v743_v28 }
  0x55   : > { %799 = vmatprep.subr.bf16.mxu0 %v901_v11  ;;  %826 = vmatprep.subr.bf16.mxu1 %v901_v11 }
  0x58   : > { %801 = vmatpush1.bf16.msra.mxu0 %v746_v31  ;;  %828 = vmatpush1.bf16.msra.mxu1 %v746_v31 }
  0x59   : > { %802 = vmatprep.subr.bf16.mxu0 %v901_v11  ;;  %829 = vmatprep.subr.bf16.mxu1 %v901_v11 }
  0x5c   : > { %804 = vmatpush1.bf16.msra.mxu0 %v749_v34  ;;  %831 = vmatpush1.bf16.msra.mxu1 %v749_v34 }
  0x5d   : > { %805 = vmatprep.subr.bf16.mxu0 %v901_v11  ;;  %832 = vmatprep.subr.bf16.mxu1 %v901_v11 }
  0x60   : > { %807 = vmatpush1.bf16.msra.mxu0 %v752_v37  ;;  %834 = vmatpush1.bf16.msra.mxu1 %v752_v37 }
  0x63   : > { %506 = vmatmul.mubr.f32.vlgmr.msra.gmra.mrb[2].mxu0 %v718_v42  ;;  %610 = vmatmul.mubr.f32.vlgmr.msra.gmra.mrb[2].mxu1 %v721_v43 }
 0x112   : > { %v300_v45 = vpop.f32.mrb[0].mxu0  ;;  %v403_v46 = vpop.f32.mrb[0].mxu1 }
 0x113   : > { %v1085_v47 = vadd.f32 %v713_v44, %v300_v45  ;;  %v1087_v48 = vadd.f32 %v713_v44, %v403_v46  ;;  %v302_v49 = vpop.f32.mrb[1].mxu0  ;;  %v405_v50 = vpop.f32.mrb[1].mxu1 }
 0x115   : > { %v305_v51 = vmul.f32 0.70710677, %v1085_v47  ;;  %v408_v52 = vmul.f32 0.70710677, %v1087_v48  ;;  %v304_v45 = vmul.f32 0.5, %v1085_v47  ;;  %v407_v50 = vmul.f32 0.5, %v1087_v48 }
 0x117   : > { %v308_v53 = vand.u32 2147483647, %v305_v51  ;;  %v411_v54 = vand.u32 2147483647, %v408_v52  ;;  %vm306_vm1 = vcmp.ge.f32.partialorder %v305_v51, 0.0  ;;  %vm409_vm2 = vcmp.ge.f32.partialorder %v408_v52, 0.0 }
 0x118   : > { %v307_v37 = vsel %vm306_vm1, 1.0, %v902_v36  ;;  %v410_v41 = vsel %vm409_vm2, 1.0, %v902_v36 }
 0x119   : > { %v309_v55 = vmul.f32 0.3275911, %v308_v53  ;;  %v412_v56 = vmul.f32 0.3275911, %v411_v54  ;;  %v322_v59 = vsub.f32 0.0, %v308_v53  ;;  %v425_v60 = vsub.f32 0.0, %v411_v54 }
 0x11b   : > { %v310_v57 = vadd.f32 1.0, %v309_v55  ;;  %v413_v58 = vadd.f32 1.0, %v412_v56  ;;  %v323_v62 = vmul.f32 %v322_v59, %v308_v53  ;;  %v426_v1 = vmul.f32 %v425_v60, %v411_v54 }
 0x11d   : > { %861 = vrcp.f32 %v310_v57  ;;  %v324_v4 = vmul.f32 1.442695, %v323_v62  ;;  %v427_v7 = vmul.f32 1.442695, %v426_v1 }
 0x11e   : > { %863 = vrcp.f32 %v413_v58 }
 0x11f   : > { %865 = vpow2.f32 %v324_v4 }
 0x120   : > { %867 = vpow2.f32 %v427_v7 }
 0x127   : > { %v862_v61 = vpop.eup %861 }
 0x128   : > { %v864_v63 = vpop.eup %863  ;;  %v313_v0 = vmul.f32 1.0614054, %v862_v61 }
 0x129   : > { %v416_v2 = vmul.f32 1.0614054, %v864_v63  ;;  %v866_v26 = vpop.eup %865 }
 0x12a   : > { %v314_v3 = vadd.f32 -1.4531521, %v313_v0  ;;  %v868_v29 = vpop.eup %867 }
 0x12b   : > { %v417_v5 = vadd.f32 -1.4531521, %v416_v2 }
 0x12c   : > { %v315_v6 = vmul.f32 %v862_v61, %v314_v3 }
 0x12d   : > { %v418_v8 = vmul.f32 %v864_v63, %v417_v5 }
 0x12e   : > { %v316_v9 = vadd.f32 1.4214138, %v315_v6 }
 0x12f   : > { %v419_v10 = vadd.f32 1.4214138, %v418_v8 }
 0x130   : > { %v317_v11 = vmul.f32 %v862_v61, %v316_v9 }
 0x131   : > { %v420_v12 = vmul.f32 %v864_v63, %v419_v10 }
 0x132   : > { %v318_v13 = vadd.f32 -0.28449672, %v317_v11 }
 0x133   : > { %v421_v14 = vadd.f32 -0.28449672, %v420_v12 }
 0x134   : > { %v319_v15 = vmul.f32 %v862_v61, %v318_v13 }
 0x135   : > { %v422_v16 = vmul.f32 %v864_v63, %v421_v14 }
 0x136   : > { %v320_v17 = vadd.f32 0.2548296, %v319_v15  ;;  %v507_v18 = vpop.f32.mrb[2].mxu0  ;;  %v611_v19 = vpop.f32.mrb[2].mxu1 }
 0x137   : > { %v423_v20 = vadd.f32 0.2548296, %v422_v16  ;;  %v1091_v21 = vadd.f32 %v713_v44, %v507_v18  ;;  %v1093_v22 = vadd.f32 %v713_v44, %v611_v19  ;;  %v509_v23 = vpop.f32.mrb[3].mxu0  ;;  %v613_v24 = vpop.f32.mrb[3].mxu1 }
 0x138   : > { %v321_v25 = vmul.f32 %v862_v61, %v320_v17 }
 0x139   : > { %v424_v27 = vmul.f32 %v864_v63, %v423_v20  ;;  %v1096_v28 = vmul.f32 0.70710677, %v1091_v21  ;;  %v1099_v31 = vmul.f32 0.70710677, %v1093_v22 }
 0x13a   : > { %v326_v30 = vmul.f32 %v866_v26, %v321_v25 }
 0x13b   : > { %v429_v32 = vmul.f32 %v868_v29, %v424_v27  ;;  %v515_v33 = vand.u32 2147483647, %v1096_v28  ;;  %v619_v35 = vand.u32 2147483647, %v1099_v31  ;;  %vm513_vm3 = vcmp.ge.f32.partialorder %v1096_v28, 0.0 }
 0x13c   : > { %v327_v34 = vsub.f32 1.0, %v326_v30  ;;  %vm617_vm4 = vcmp.ge.f32.partialorder %v1099_v31, 0.0  ;;  %v514_v20 = vsel %vm513_vm3, 1.0, %v902_v36  ;;  %v511_v27 = vmul.f32 0.5, %v1091_v21 }
 0x13d   : > { %v430_v38 = vsub.f32 1.0, %v429_v32  ;;  %v516_v39 = vmul.f32 0.3275911, %v515_v33  ;;  %v620_v42 = vmul.f32 0.3275911, %v619_v35  ;;  %v529_v55 = vsub.f32 0.0, %v515_v33 }
 0x13e   : > { %v328_v40 = vmul.f32 %v327_v34, %v307_v37  ;;  %v633_v56 = vsub.f32 0.0, %v619_v35  ;;  %v618_v25 = vsel %vm617_vm4, 1.0, %v902_v36  ;;  %v615_v28 = vmul.f32 0.5, %v1093_v22 }
 0x13f   : > { %v431_v43 = vmul.f32 %v430_v38, %v410_v41  ;;  %v517_v44 = vadd.f32 1.0, %v516_v39  ;;  %v621_v49 = vadd.f32 1.0, %v620_v42  ;;  %v530_v58 = vmul.f32 %v529_v55, %v515_v33 }
 0x140   : > { %v329_v46 = vadd.f32 1.0, %v328_v40  ;;  %v634_v61 = vmul.f32 %v633_v56, %v619_v35 }
 0x141   : > { %v432_v51 = vadd.f32 1.0, %v431_v43  ;;  %869 = vrcp.f32 %v517_v44  ;;  %v531_v47 = vmul.f32 1.442695, %v530_v58 }
 0x142   : > { %v330_v52 = vmul.f32 %v329_v46, %v304_v45  ;;  %871 = vrcp.f32 %v621_v49  ;;  %v635_v2 = vmul.f32 1.442695, %v634_v61 }
 0x143   : > { %v433_v53 = vmul.f32 %v432_v51, %v407_v50  ;;  %873 = vpow2.f32 %v531_v47 }
 0x144   : > { %875 = vpow2.f32 %v635_v2 }
 0x145   : > { %v434_v54 = vmax.f32 %v330_v52, %v433_v53 }
 0x14b   : > { %v870_v57 = vpop.eup %869 }
 0x14c   : > { %v872_v59 = vpop.eup %871  ;;  %v520_v60 = vmul.f32 1.0614054, %v870_v57 }
 0x14d   : > { %v624_v62 = vmul.f32 1.0614054, %v872_v59  ;;  %v874_v14 = vpop.eup %873 }
 0x14e   : > { %v521_v63 = vadd.f32 -1.4531521, %v520_v60  ;;  %v876_v16 = vpop.eup %875 }
 0x14f   : > { %v625_v0 = vadd.f32 -1.4531521, %v624_v62 }
 0x150   : > { %v522_v1 = vmul.f32 %v870_v57, %v521_v63 }
 0x151   : > { %v626_v48 = vmul.f32 %v872_v59, %v625_v0 }
 0x152   : > { %v523_v3 = vadd.f32 1.4214138, %v522_v1 }
 0x153   : > { %v627_v4 = vadd.f32 1.4214138, %v626_v48 }
 0x154   : > { %v524_v5 = vmul.f32 %v870_v57, %v523_v3 }
 0x155   : > { %v628_v6 = vmul.f32 %v872_v59, %v627_v4 }
 0x156   : > { %v525_v7 = vadd.f32 -0.28449672, %v524_v5 }
 0x157   : > { %v629_v8 = vadd.f32 -0.28449672, %v628_v6 }
 0x158   : > { %v526_v9 = vmul.f32 %v870_v57, %v525_v7 }
 0x159   : > { %v630_v10 = vmul.f32 %v872_v59, %v629_v8 }
 0x15a   : > { %v527_v11 = vadd.f32 0.2548296, %v526_v9 }
 0x15b   : > { %v631_v12 = vadd.f32 0.2548296, %v630_v10 }
 0x15c   : > { %v528_v13 = vmul.f32 %v870_v57, %v527_v11 }
 0x15d   : > { %v632_v15 = vmul.f32 %v872_v59, %v631_v12 }
 0x15e   : > { %v533_v17 = vmul.f32 %v874_v14, %v528_v13 }
 0x15f   : > { %v637_v18 = vmul.f32 %v876_v16, %v632_v15 }
 0x160   : > { %v534_v19 = vsub.f32 1.0, %v533_v17 }
 0x161   : > { %v638_v23 = vsub.f32 1.0, %v637_v18 }
 0x162   : > { %v535_v24 = vmul.f32 %v534_v19, %v514_v20 }
 0x163   : > { %v639_v26 = vmul.f32 %v638_v23, %v618_v25 }
 0x164   : > { %v536_v29 = vadd.f32 1.0, %v535_v24 }
 0x165   : > { %v640_v30 = vadd.f32 1.0, %v639_v26 }
 0x166   : > { %v537_v32 = vmul.f32 %v536_v29, %v511_v27 }
 0x167   : > { %v641_v34 = vmul.f32 %v640_v30, %v615_v28 }
 0x168   : > { %v538_v33 = vmax.f32 %v434_v54, %v537_v32 }
 0x16a   : > { %v642_v31 = vmax.f32 %v538_v33, %v641_v34 }
 0x16c   : > { %643 = vst [vmem:[%s202_s27] sm:$0x7f] %v642_v31 }
 0x16d PF: > { %p10_p9 = scmp.ge.s32.totalorder %s940_s16, 16   ;;  %s1130_s12 = smov %s895_s13 }
 0x16e   : > { %s1131_s13 = smov %s949_s19  ;;  %s1132_s14 = smov %s940_s16 }
 0x16f   :  { %12 = sbr.rel (!%p10_p9) target bundleno = 2 (0x2), region = 93 }

// kernel: dqn_forward.5
= control target key start
LH: loop header
LB: loop body
LE: loop exit
PB: predicated region body
PF: predicated region fallthrough
CT: control target
= control target key end

     0   :  { %vm1241_vm0 = vcmask 261120   ;;  %s8760_s1 = inlined_call_operand.vmem [shape: f32[1568,768], index: 1, kind: input, shape index: {}]   ;;  %s8761_s0 = inlined_call_operand.vmem [shape: f32[8,1568], index: 0, kind: input, shape index: {}]   ;;  %s8762_s2 = inlined_call_operand.vmem [shape: f32[1,768], index: 2, kind: input, shape index: {}]   ;;  %s8763_s3 = inlined_call_operand.vmem [shape: f32[768,128], index: 3, kind: input, shape index: {}]   ;;  %s8764_s4 = inlined_call_operand.vmem [shape: f32[1,128], index: 4, kind: input, shape index: {}]   ;;  %s8765_s5 = inlined_call_operand.vmem [shape: f32[8,128], index: 5, kind: output, shape index: {}]  }
   0x1   :  { %v34_v0 = vld [vmem:[%s8760_s1 + $0x8] sm:$0xff]  ;;  %v40_v1 = vld [vmem:[%s8760_s1 + $0x38] sm:$0xff]  ;;  %v33_v5 = vld [vmem:[%s8760_s1] sm:$0xff] }
   0x2   :  { %v418_v2 = vld [vmem:[%s8760_s1 + $0xc08] sm:$0xff]  ;;  %v3325_v3 = vpack.c.bf16 %v40_v1, %v34_v0  ;;  %v424_v4 = vld [vmem:[%s8760_s1 + $0xc38] sm:$0xff]  ;;  %v39_v6 = vld [vmem:[%s8760_s1 + $0x30] sm:$0xff] }
   0x3   :  { %v3453_v7 = vpack.c.bf16 %v424_v4, %v418_v2  ;;  %v3327_v8 = vpack.c.bf16 %v39_v6, %v33_v5  ;;  %v417_v9 = vld [vmem:[%s8760_s1 + $0xc00] sm:$0xff]  ;;  %v423_v10 = vld [vmem:[%s8760_s1 + $0xc30] sm:$0xff]  ;;  %v46_v11 = vld [vmem:[%s8760_s1 + $0x68] sm:$0xff] }
   0x4   :  { %3326 = vmatprep.subr.bf16.mxu1 %v3325_v3  ;;  %v3455_v12 = vpack.c.bf16 %v423_v10, %v417_v9  ;;  %v52_v13 = vld [vmem:[%s8760_s1 + $0x98] sm:$0xff]  ;;  %v430_v14 = vld [vmem:[%s8760_s1 + $0xc68] sm:$0xff]  ;;  %v45_v18 = vld [vmem:[%s8760_s1 + $0x60] sm:$0xff] }
   0x5   :  { %v436_v15 = vld [vmem:[%s8760_s1 + $0xc98] sm:$0xff]  ;;  %3454 = vmatprep.subr.bf16.mxu0 %v3453_v7  ;;  %3328 = vmatpush1.bf16.msra.mxu1 %v3327_v8  ;;  %v3329_v16 = vpack.c.bf16 %v52_v13, %v46_v11  ;;  %v51_v19 = vld [vmem:[%s8760_s1 + $0x90] sm:$0xff]  ;;  %v429_v20 = vld [vmem:[%s8760_s1 + $0xc60] sm:$0xff] }
   0x6   :  { %v3457_v17 = vpack.c.bf16 %v436_v15, %v430_v14  ;;  %3456 = vmatpush1.bf16.msra.mxu0 %v3455_v12  ;;  %v3331_v21 = vpack.c.bf16 %v51_v19, %v45_v18  ;;  %v435_v22 = vld [vmem:[%s8760_s1 + $0xc90] sm:$0xff]  ;;  %v58_v23 = vld [vmem:[%s8760_s1 + $0xc8] sm:$0xff]  ;;  %v64_v24 = vld [vmem:[%s8760_s1 + $0xf8] sm:$0xff] }
   0x7   :  { %3330 = vmatprep.subr.bf16.mxu1 %v3329_v16  ;;  %v3459_v25 = vpack.c.bf16 %v435_v22, %v429_v20  ;;  %v3333_v26 = vpack.c.bf16 %v64_v24, %v58_v23  ;;  %v442_v27 = vld [vmem:[%s8760_s1 + $0xcc8] sm:$0xff]  ;;  %v448_v28 = vld [vmem:[%s8760_s1 + $0xcf8] sm:$0xff]  ;;  %v57_v29 = vld [vmem:[%s8760_s1 + $0xc0] sm:$0xff] }
   0x8   :  { %3458 = vmatprep.subr.bf16.mxu0 %v3457_v17  ;;  %v3461_v30 = vpack.c.bf16 %v448_v28, %v442_v27  ;;  %v63_v31 = vld [vmem:[%s8760_s1 + $0xf0] sm:$0xff]  ;;  %v441_v32 = vld [vmem:[%s8760_s1 + $0xcc0] sm:$0xff]  ;;  %v70_v35 = vld [vmem:[%s8760_s1 + $0x128] sm:$0xff] }
   0x9   :  { %v447_v33 = vld [vmem:[%s8760_s1 + $0xcf0] sm:$0xff]  ;;  %3332 = vmatpush1.bf16.msra.mxu1 %v3331_v21  ;;  %v3335_v34 = vpack.c.bf16 %v63_v31, %v57_v29  ;;  %v76_v36 = vld [vmem:[%s8760_s1 + $0x158] sm:$0xff]  ;;  %v454_v37 = vld [vmem:[%s8760_s1 + $0xd28] sm:$0xff] }
   0xa   :  { %3460 = vmatpush1.bf16.msra.mxu0 %v3459_v25  ;;  %3334 = vmatprep.subr.bf16.mxu1 %v3333_v26  ;;  %v3463_v38 = vpack.c.bf16 %v447_v33, %v441_v32  ;;  %v3337_v39 = vpack.c.bf16 %v76_v36, %v70_v35  ;;  %v460_v40 = vld [vmem:[%s8760_s1 + $0xd58] sm:$0xff]  ;;  %v69_v41 = vld [vmem:[%s8760_s1 + $0x120] sm:$0xff]  ;;  %v75_v42 = vld [vmem:[%s8760_s1 + $0x150] sm:$0xff] }
   0xb   :  { %3462 = vmatprep.subr.bf16.mxu0 %v3461_v30  ;;  %v3465_v43 = vpack.c.bf16 %v460_v40, %v454_v37  ;;  %v453_v44 = vld [vmem:[%s8760_s1 + $0xd20] sm:$0xff]  ;;  %v459_v45 = vld [vmem:[%s8760_s1 + $0xd50] sm:$0xff]  ;;  %v82_v46 = vld [vmem:[%s8760_s1 + $0x188] sm:$0xff]  ;;  %v3339_v50 = vpack.c.bf16 %v75_v42, %v69_v41 }
   0xc   :  { %v88_v47 = vld [vmem:[%s8760_s1 + $0x1b8] sm:$0xff]  ;;  %v466_v48 = vld [vmem:[%s8760_s1 + $0xd88] sm:$0xff]  ;;  %v3467_v51 = vpack.c.bf16 %v459_v45, %v453_v44  ;;  %v81_v53 = vld [vmem:[%s8760_s1 + $0x180] sm:$0xff] }
   0xd   :  { %v472_v49 = vld [vmem:[%s8760_s1 + $0xdb8] sm:$0xff]  ;;  %3336 = vmatpush1.bf16.msra.mxu1 %v3335_v34  ;;  %v3341_v52 = vpack.c.bf16 %v88_v47, %v82_v46  ;;  %v87_v54 = vld [vmem:[%s8760_s1 + $0x1b0] sm:$0xff]  ;;  %v465_v55 = vld [vmem:[%s8760_s1 + $0xd80] sm:$0xff] }
   0xe   :  { %3464 = vmatpush1.bf16.msra.mxu0 %v3463_v38  ;;  %3338 = vmatprep.subr.bf16.mxu1 %v3337_v39  ;;  %v3469_v56 = vpack.c.bf16 %v472_v49, %v466_v48  ;;  %v471_v57 = vld [vmem:[%s8760_s1 + $0xdb0] sm:$0xff]  ;;  %v94_v58 = vld [vmem:[%s8760_s1 + $0x1e8] sm:$0xff]  ;;  %v100_v59 = vld [vmem:[%s8760_s1 + $0x218] sm:$0xff]  ;;  %v3343_v62 = vpack.c.bf16 %v87_v54, %v81_v53 }
   0xf   :  { %3466 = vmatprep.subr.bf16.mxu0 %v3465_v43  ;;  %v478_v60 = vld [vmem:[%s8760_s1 + $0xde8] sm:$0xff]  ;;  %v484_v61 = vld [vmem:[%s8760_s1 + $0xe18] sm:$0xff]  ;;  %v3471_v63 = vpack.c.bf16 %v471_v57, %v465_v55  ;;  %v3345_v0 = vpack.c.bf16 %v100_v59, %v94_v58  ;;  %v93_v1 = vld [vmem:[%s8760_s1 + $0x1e0] sm:$0xff] }
  0x10   :  { %v99_v2 = vld [vmem:[%s8760_s1 + $0x210] sm:$0xff]  ;;  %v477_v3 = vld [vmem:[%s8760_s1 + $0xde0] sm:$0xff]  ;;  %v3473_v4 = vpack.c.bf16 %v484_v61, %v478_v60  ;;  %v106_v6 = vld [vmem:[%s8760_s1 + $0x248] sm:$0xff] }
  0x11   :  { %3340 = vmatpush1.bf16.msra.mxu1 %v3339_v50  ;;  %v483_v5 = vld [vmem:[%s8760_s1 + $0xe10] sm:$0xff]  ;;  %v112_v7 = vld [vmem:[%s8760_s1 + $0x278] sm:$0xff]  ;;  %v490_v8 = vld [vmem:[%s8760_s1 + $0xe48] sm:$0xff]  ;;  %v3347_v10 = vpack.c.bf16 %v99_v2, %v93_v1 }
  0x12   :  { %3468 = vmatpush1.bf16.msra.mxu0 %v3467_v51  ;;  %3342 = vmatprep.subr.bf16.mxu1 %v3341_v52  ;;  %v496_v9 = vld [vmem:[%s8760_s1 + $0xe78] sm:$0xff]  ;;  %v3475_v11 = vpack.c.bf16 %v483_v5, %v477_v3  ;;  %v3349_v12 = vpack.c.bf16 %v112_v7, %v106_v6  ;;  %v105_v13 = vld [vmem:[%s8760_s1 + $0x240] sm:$0xff]  ;;  %v111_v14 = vld [vmem:[%s8760_s1 + $0x270] sm:$0xff] }
  0x13   :  { %3470 = vmatprep.subr.bf16.mxu0 %v3469_v56  ;;  %v489_v15 = vld [vmem:[%s8760_s1 + $0xe40] sm:$0xff]  ;;  %v3477_v16 = vpack.c.bf16 %v496_v9, %v490_v8  ;;  %v495_v17 = vld [vmem:[%s8760_s1 + $0xe70] sm:$0xff]  ;;  %v118_v18 = vld [vmem:[%s8760_s1 + $0x2a8] sm:$0xff]  ;;  %v3351_v22 = vpack.c.bf16 %v111_v14, %v105_v13 }
  0x14   :  { %v124_v19 = vld [vmem:[%s8760_s1 + $0x2d8] sm:$0xff]  ;;  %v502_v20 = vld [vmem:[%s8760_s1 + $0xea8] sm:$0xff]  ;;  %v3479_v23 = vpack.c.bf16 %v495_v17, %v489_v15  ;;  %v117_v25 = vld [vmem:[%s8760_s1 + $0x2a0] sm:$0xff] }
  0x15   :  { %3344 = vmatpush1.bf16.msra.mxu1 %v3343_v62  ;;  %v508_v21 = vld [vmem:[%s8760_s1 + $0xed8] sm:$0xff]  ;;  %v3353_v24 = vpack.c.bf16 %v124_v19, %v118_v18  ;;  %v123_v26 = vld [vmem:[%s8760_s1 + $0x2d0] sm:$0xff]  ;;  %v501_v27 = vld [vmem:[%s8760_s1 + $0xea0] sm:$0xff] }
  0x16   :  { %3472 = vmatpush1.bf16.msra.mxu0 %v3471_v63  ;;  %3346 = vmatprep.subr.bf16.mxu1 %v3345_v0  ;;  %v3481_v28 = vpack.c.bf16 %v508_v21, %v502_v20  ;;  %v507_v29 = vld [vmem:[%s8760_s1 + $0xed0] sm:$0xff]  ;;  %v130_v30 = vld [vmem:[%s8760_s1 + $0x308] sm:$0xff]  ;;  %v136_v31 = vld [vmem:[%s8760_s1 + $0x338] sm:$0xff]  ;;  %v3355_v34 = vpack.c.bf16 %v123_v26, %v117_v25 }
  0x17   :  { %3474 = vmatprep.subr.bf16.mxu0 %v3473_v4  ;;  %v514_v32 = vld [vmem:[%s8760_s1 + $0xf08] sm:$0xff]  ;;  %v520_v33 = vld [vmem:[%s8760_s1 + $0xf38] sm:$0xff]  ;;  %v3483_v35 = vpack.c.bf16 %v507_v29, %v501_v27  ;;  %v3357_v36 = vpack.c.bf16 %v136_v31, %v130_v30  ;;  %v129_v37 = vld [vmem:[%s8760_s1 + $0x300] sm:$0xff] }
  0x18   :  { %v135_v38 = vld [vmem:[%s8760_s1 + $0x330] sm:$0xff]  ;;  %v513_v39 = vld [vmem:[%s8760_s1 + $0xf00] sm:$0xff]  ;;  %v3485_v40 = vpack.c.bf16 %v520_v33, %v514_v32  ;;  %v142_v42 = vld [vmem:[%s8760_s1 + $0x368] sm:$0xff] }
  0x19   :  { %3348 = vmatpush1.bf16.msra.mxu1 %v3347_v10  ;;  %v519_v41 = vld [vmem:[%s8760_s1 + $0xf30] sm:$0xff]  ;;  %v148_v43 = vld [vmem:[%s8760_s1 + $0x398] sm:$0xff]  ;;  %v526_v44 = vld [vmem:[%s8760_s1 + $0xf68] sm:$0xff]  ;;  %v3359_v46 = vpack.c.bf16 %v135_v38, %v129_v37 }
  0x1a   :  { %3476 = vmatpush1.bf16.msra.mxu0 %v3475_v11  ;;  %3350 = vmatprep.subr.bf16.mxu1 %v3349_v12  ;;  %v532_v45 = vld [vmem:[%s8760_s1 + $0xf98] sm:$0xff]  ;;  %v3487_v47 = vpack.c.bf16 %v519_v41, %v513_v39  ;;  %v3361_v48 = vpack.c.bf16 %v148_v43, %v142_v42  ;;  %v141_v49 = vld [vmem:[%s8760_s1 + $0x360] sm:$0xff]  ;;  %v147_v50 = vld [vmem:[%s8760_s1 + $0x390] sm:$0xff] }
  0x1b   :  { %3478 = vmatprep.subr.bf16.mxu0 %v3477_v16  ;;  %v525_v51 = vld [vmem:[%s8760_s1 + $0xf60] sm:$0xff]  ;;  %v3489_v52 = vpack.c.bf16 %v532_v45, %v526_v44  ;;  %v531_v53 = vld [vmem:[%s8760_s1 + $0xf90] sm:$0xff]  ;;  %v154_v54 = vld [vmem:[%s8760_s1 + $0x3c8] sm:$0xff]  ;;  %v3363_v58 = vpack.c.bf16 %v147_v50, %v141_v49 }
  0x1c   :  { %v160_v55 = vld [vmem:[%s8760_s1 + $0x3f8] sm:$0xff]  ;;  %v538_v56 = vld [vmem:[%s8760_s1 + $0xfc8] sm:$0xff]  ;;  %v3491_v59 = vpack.c.bf16 %v531_v53, %v525_v51  ;;  %v153_v61 = vld [vmem:[%s8760_s1 + $0x3c0] sm:$0xff] }
  0x1d   :  { %3352 = vmatpush1.bf16.msra.mxu1 %v3351_v22  ;;  %v544_v57 = vld [vmem:[%s8760_s1 + $0xff8] sm:$0xff]  ;;  %v3365_v60 = vpack.c.bf16 %v160_v55, %v154_v54  ;;  %v159_v62 = vld [vmem:[%s8760_s1 + $0x3f0] sm:$0xff]  ;;  %v537_v63 = vld [vmem:[%s8760_s1 + $0xfc0] sm:$0xff] }
  0x1e   :  { %3480 = vmatpush1.bf16.msra.mxu0 %v3479_v23  ;;  %3354 = vmatprep.subr.bf16.mxu1 %v3353_v24  ;;  %v3493_v0 = vpack.c.bf16 %v544_v57, %v538_v56  ;;  %v543_v1 = vld [vmem:[%s8760_s1 + $0xff0] sm:$0xff]  ;;  %v166_v2 = vld [vmem:[%s8760_s1 + $0x428] sm:$0xff]  ;;  %v172_v3 = vld [vmem:[%s8760_s1 + $0x458] sm:$0xff]  ;;  %v3367_v6 = vpack.c.bf16 %v159_v62, %v153_v61 }
  0x1f   :  { %3482 = vmatprep.subr.bf16.mxu0 %v3481_v28  ;;  %v550_v4 = vld [vmem:[%s8760_s1 + $0x1028] sm:$0xff]  ;;  %v556_v5 = vld [vmem:[%s8760_s1 + $0x1058] sm:$0xff]  ;;  %v165_v7 = vld [vmem:[%s8760_s1 + $0x420] sm:$0xff]  ;;  %v3495_v8 = vpack.c.bf16 %v543_v1, %v537_v63  ;;  %v3369_v9 = vpack.c.bf16 %v172_v3, %v166_v2 }
  0x20   :  { %v171_v10 = vld [vmem:[%s8760_s1 + $0x450] sm:$0xff]  ;;  %v549_v11 = vld [vmem:[%s8760_s1 + $0x1020] sm:$0xff]  ;;  %v3497_v13 = vpack.c.bf16 %v556_v5, %v550_v4  ;;  %v178_v14 = vld [vmem:[%s8760_s1 + $0x488] sm:$0xff] }
  0x21   :  { %3356 = vmatpush1.bf16.msra.mxu1 %v3355_v34  ;;  %v555_v12 = vld [vmem:[%s8760_s1 + $0x1050] sm:$0xff]  ;;  %v184_v15 = vld [vmem:[%s8760_s1 + $0x4b8] sm:$0xff]  ;;  %v5012_v16 = vld [vmem:[%s8761_s0 + $0x8] sm:$0xff]  ;;  %v3371_v20 = vpack.c.bf16 %v171_v10, %v165_v7 }
  0x22   :  { %3484 = vmatpush1.bf16.msra.mxu0 %v3483_v35  ;;  %3358 = vmatprep.subr.bf16.mxu1 %v3357_v36  ;;  %v562_v17 = vld [vmem:[%s8760_s1 + $0x1088] sm:$0xff]  ;;  %v568_v18 = vld [vmem:[%s8760_s1 + $0x10b8] sm:$0xff]  ;;  %v3499_v21 = vpack.c.bf16 %v555_v12, %v549_v11  ;;  %v3373_v22 = vpack.c.bf16 %v184_v15, %v178_v14  ;;  %v177_v23 = vld [vmem:[%s8760_s1 + $0x480] sm:$0xff] }
  0x23   :  { %3486 = vmatprep.subr.bf16.mxu0 %v3485_v40  ;;  %1309 = vmatprep.mubr.f32.mxu1 %v5012_v16  ;;  %v25_v19 = vld [vmem:[%s8761_s0 + $0x28] sm:$0xff]  ;;  %v183_v24 = vld [vmem:[%s8760_s1 + $0x4b0] sm:$0xff]  ;;  %v561_v25 = vld [vmem:[%s8760_s1 + $0x1080] sm:$0xff]  ;;  %v3501_v26 = vpack.c.bf16 %v568_v18, %v562_v17 }
  0x24   :  { %1451 = vmatprep.mubr.f32.mxu0 %v25_v19  ;;  %v567_v27 = vld [vmem:[%s8760_s1 + $0x10b0] sm:$0xff]  ;;  %v190_v28 = vld [vmem:[%s8760_s1 + $0x4e8] sm:$0xff]  ;;  %v196_v29 = vld [vmem:[%s8760_s1 + $0x518] sm:$0xff]  ;;  %v3375_v32 = vpack.c.bf16 %v183_v24, %v177_v23 }
  0x25   :  { %3360 = vmatpush1.bf16.msra.mxu1 %v3359_v46  ;;  %v574_v30 = vld [vmem:[%s8760_s1 + $0x10e8] sm:$0xff]  ;;  %v580_v31 = vld [vmem:[%s8760_s1 + $0x1118] sm:$0xff]  ;;  %v3503_v33 = vpack.c.bf16 %v567_v27, %v561_v25  ;;  %v3377_v34 = vpack.c.bf16 %v196_v29, %v190_v28  ;;  %v189_v35 = vld [vmem:[%s8760_s1 + $0x4e0] sm:$0xff] }
  0x26   :  { %3488 = vmatpush1.bf16.msra.mxu0 %v3487_v47  ;;  %3362 = vmatprep.subr.bf16.mxu1 %v3361_v48  ;;  %v195_v36 = vld [vmem:[%s8760_s1 + $0x510] sm:$0xff]  ;;  %v573_v37 = vld [vmem:[%s8760_s1 + $0x10e0] sm:$0xff]  ;;  %v3505_v38 = vpack.c.bf16 %v580_v31, %v574_v30  ;;  %v202_v40 = vld [vmem:[%s8760_s1 + $0x548] sm:$0xff] }
  0x27   :  { %3490 = vmatprep.subr.bf16.mxu0 %v3489_v52  ;;  %v579_v39 = vld [vmem:[%s8760_s1 + $0x1110] sm:$0xff]  ;;  %v208_v41 = vld [vmem:[%s8760_s1 + $0x578] sm:$0xff]  ;;  %v586_v42 = vld [vmem:[%s8760_s1 + $0x1148] sm:$0xff]  ;;  %v3379_v44 = vpack.c.bf16 %v195_v36, %v189_v35 }
  0x28   :  { %v592_v43 = vld [vmem:[%s8760_s1 + $0x1178] sm:$0xff]  ;;  %v3507_v45 = vpack.c.bf16 %v579_v39, %v573_v37  ;;  %v3381_v46 = vpack.c.bf16 %v208_v41, %v202_v40  ;;  %v201_v47 = vld [vmem:[%s8760_s1 + $0x540] sm:$0xff]  ;;  %v207_v48 = vld [vmem:[%s8760_s1 + $0x570] sm:$0xff] }
  0x29   :  { %3364 = vmatpush1.bf16.msra.mxu1 %v3363_v58  ;;  %v585_v49 = vld [vmem:[%s8760_s1 + $0x1140] sm:$0xff]  ;;  %v3509_v50 = vpack.c.bf16 %v592_v43, %v586_v42  ;;  %v591_v51 = vld [vmem:[%s8760_s1 + $0x1170] sm:$0xff]  ;;  %v214_v52 = vld [vmem:[%s8760_s1 + $0x5a8] sm:$0xff]  ;;  %v3383_v56 = vpack.c.bf16 %v207_v48, %v201_v47 }
  0x2a   :  { %3492 = vmatpush1.bf16.msra.mxu0 %v3491_v59  ;;  %3366 = vmatprep.subr.bf16.mxu1 %v3365_v60  ;;  %v220_v53 = vld [vmem:[%s8760_s1 + $0x5d8] sm:$0xff]  ;;  %v598_v54 = vld [vmem:[%s8760_s1 + $0x11a8] sm:$0xff]  ;;  %v3511_v57 = vpack.c.bf16 %v591_v51, %v585_v49  ;;  %v213_v59 = vld [vmem:[%s8760_s1 + $0x5a0] sm:$0xff] }
  0x2b   :  { %3494 = vmatprep.subr.bf16.mxu0 %v3493_v0  ;;  %v604_v55 = vld [vmem:[%s8760_s1 + $0x11d8] sm:$0xff]  ;;  %v3385_v58 = vpack.c.bf16 %v220_v53, %v214_v52  ;;  %v219_v60 = vld [vmem:[%s8760_s1 + $0x5d0] sm:$0xff]  ;;  %v597_v61 = vld [vmem:[%s8760_s1 + $0x11a0] sm:$0xff] }
  0x2c   :  { %v3513_v62 = vpack.c.bf16 %v604_v55, %v598_v54  ;;  %v603_v63 = vld [vmem:[%s8760_s1 + $0x11d0] sm:$0xff]  ;;  %v226_v0 = vld [vmem:[%s8760_s1 + $0x608] sm:$0xff]  ;;  %v232_v1 = vld [vmem:[%s8760_s1 + $0x638] sm:$0xff]  ;;  %v3387_v4 = vpack.c.bf16 %v219_v60, %v213_v59 }
  0x2d   :  { %3368 = vmatpush1.bf16.msra.mxu1 %v3367_v6  ;;  %v610_v2 = vld [vmem:[%s8760_s1 + $0x1208] sm:$0xff]  ;;  %v616_v3 = vld [vmem:[%s8760_s1 + $0x1238] sm:$0xff]  ;;  %v3515_v5 = vpack.c.bf16 %v603_v63, %v597_v61  ;;  %v3389_v6 = vpack.c.bf16 %v232_v1, %v226_v0  ;;  %v225_v7 = vld [vmem:[%s8760_s1 + $0x600] sm:$0xff] }
  0x2e   :  { %3496 = vmatpush1.bf16.msra.mxu0 %v3495_v8  ;;  %3370 = vmatprep.subr.bf16.mxu1 %v3369_v9  ;;  %v231_v8 = vld [vmem:[%s8760_s1 + $0x630] sm:$0xff]  ;;  %v609_v9 = vld [vmem:[%s8760_s1 + $0x1200] sm:$0xff]  ;;  %v3517_v10 = vpack.c.bf16 %v616_v3, %v610_v2  ;;  %v238_v12 = vld [vmem:[%s8760_s1 + $0x668] sm:$0xff] }
  0x2f   :  { %3498 = vmatprep.subr.bf16.mxu0 %v3497_v13  ;;  %v615_v11 = vld [vmem:[%s8760_s1 + $0x1230] sm:$0xff]  ;;  %v244_v13 = vld [vmem:[%s8760_s1 + $0x698] sm:$0xff]  ;;  %v622_v14 = vld [vmem:[%s8760_s1 + $0x1268] sm:$0xff]  ;;  %v3391_v18 = vpack.c.bf16 %v231_v8, %v225_v7 }
  0x30   :  { %v628_v15 = vld [vmem:[%s8760_s1 + $0x1298] sm:$0xff]  ;;  %v20_v17 = vld [vmem:[%s8761_s0] sm:$0xff]  ;;  %v243_v23 = vld [vmem:[%s8760_s1 + $0x690] sm:$0xff] }
  0x31   :  { %3372 = vmatpush1.bf16.msra.mxu1 %v3371_v20  ;;  %v24_v19 = vld [vmem:[%s8761_s0 + $0x20] sm:$0xff]  ;;  %v3519_v20 = vpack.c.bf16 %v615_v11, %v609_v9  ;;  %v3521_v25 = vpack.c.bf16 %v628_v15, %v622_v14  ;;  %v250_v27 = vld [vmem:[%s8760_s1 + $0x6c8] sm:$0xff]  ;;  %v256_v28 = vld [vmem:[%s8760_s1 + $0x6f8] sm:$0xff] }
  0x32   :  { %3500 = vmatpush1.bf16.msra.mxu0 %v3499_v21  ;;  %3374 = vmatprep.subr.bf16.mxu1 %v3373_v22  ;;  %v3393_v21 = vpack.c.bf16 %v244_v13, %v238_v12  ;;  %v237_v22 = vld [vmem:[%s8760_s1 + $0x660] sm:$0xff]  ;;  %v634_v29 = vld [vmem:[%s8760_s1 + $0x12c8] sm:$0xff]  ;;  %v640_v30 = vld [vmem:[%s8760_s1 + $0x12f8] sm:$0xff] }
  0x33   :  { %3502 = vmatprep.subr.bf16.mxu0 %v3501_v26  ;;  %v621_v24 = vld [vmem:[%s8760_s1 + $0x1260] sm:$0xff]  ;;  %v627_v26 = vld [vmem:[%s8760_s1 + $0x1290] sm:$0xff]  ;;  %v3395_v31 = vpack.c.bf16 %v243_v23, %v237_v22  ;;  %v3525_v37 = vpack.c.bf16 %v640_v30, %v634_v29  ;;  %v262_v39 = vld [vmem:[%s8760_s1 + $0x728] sm:$0xff] }
  0x34   :  { %v255_v35 = vld [vmem:[%s8760_s1 + $0x6f0] sm:$0xff]  ;;  %v633_v36 = vld [vmem:[%s8760_s1 + $0x12c0] sm:$0xff]  ;;  %v268_v40 = vld [vmem:[%s8760_s1 + $0x758] sm:$0xff] }
  0x35   :  { %3376 = vmatpush1.bf16.msra.mxu1 %v3375_v32  ;;  %v3523_v32 = vpack.c.bf16 %v627_v26, %v621_v24  ;;  %v646_v41 = vld [vmem:[%s8760_s1 + $0x1328] sm:$0xff]  ;;  %v652_v42 = vld [vmem:[%s8760_s1 + $0x1358] sm:$0xff]  ;;  %v267_v47 = vld [vmem:[%s8760_s1 + $0x750] sm:$0xff] }
  0x36   :  { %3504 = vmatpush1.bf16.msra.mxu0 %v3503_v33  ;;  %3378 = vmatprep.subr.bf16.mxu1 %v3377_v34  ;;  %v3397_v33 = vpack.c.bf16 %v256_v28, %v250_v27  ;;  %v249_v34 = vld [vmem:[%s8760_s1 + $0x6c0] sm:$0xff]  ;;  %v3529_v49 = vpack.c.bf16 %v652_v42, %v646_v41  ;;  %v274_v51 = vld [vmem:[%s8760_s1 + $0x788] sm:$0xff]  ;;  %v280_v52 = vld [vmem:[%s8760_s1 + $0x7b8] sm:$0xff] }
  0x37   :  { %3506 = vmatprep.subr.bf16.mxu0 %v3505_v38  ;;  %v639_v38 = vld [vmem:[%s8760_s1 + $0x12f0] sm:$0xff]  ;;  %v3399_v43 = vpack.c.bf16 %v255_v35, %v249_v34  ;;  %v645_v48 = vld [vmem:[%s8760_s1 + $0x1320] sm:$0xff]  ;;  %v658_v53 = vld [vmem:[%s8760_s1 + $0x1388] sm:$0xff] }
  0x38   :  { %v664_v54 = vld [vmem:[%s8760_s1 + $0x13b8] sm:$0xff]  ;;  %v279_v59 = vld [vmem:[%s8760_s1 + $0x7b0] sm:$0xff]  ;;  %v657_v60 = vld [vmem:[%s8760_s1 + $0x1380] sm:$0xff] }
  0x39   :  { %3380 = vmatpush1.bf16.msra.mxu1 %v3379_v44  ;;  %v3527_v44 = vpack.c.bf16 %v639_v38, %v633_v36  ;;  %v3533_v61 = vpack.c.bf16 %v664_v54, %v658_v53  ;;  %v286_v63 = vld [vmem:[%s8760_s1 + $0x7e8] sm:$0xff]  ;;  %v292_v0 = vld [vmem:[%s8760_s1 + $0x818] sm:$0xff]  ;;  %v291_v7 = vld [vmem:[%s8760_s1 + $0x810] sm:$0xff] }
  0x3a   :  { %3508 = vmatpush1.bf16.msra.mxu0 %v3507_v45  ;;  %3382 = vmatprep.subr.bf16.mxu1 %v3381_v46  ;;  %v3401_v45 = vpack.c.bf16 %v268_v40, %v262_v39  ;;  %v261_v46 = vld [vmem:[%s8760_s1 + $0x720] sm:$0xff]  ;;  %v670_v1 = vld [vmem:[%s8760_s1 + $0x13e8] sm:$0xff]  ;;  %v676_v2 = vld [vmem:[%s8760_s1 + $0x1418] sm:$0xff] }
  0x3b   :  { %3510 = vmatprep.subr.bf16.mxu0 %v3509_v50  ;;  %v651_v50 = vld [vmem:[%s8760_s1 + $0x1350] sm:$0xff]  ;;  %v3403_v55 = vpack.c.bf16 %v267_v47, %v261_v46  ;;  %v669_v8 = vld [vmem:[%s8760_s1 + $0x13e0] sm:$0xff]  ;;  %v3537_v9 = vpack.c.bf16 %v676_v2, %v670_v1  ;;  %v298_v11 = vld [vmem:[%s8760_s1 + $0x848] sm:$0xff] }
  0x3c   :  { %v304_v12 = vld [vmem:[%s8760_s1 + $0x878] sm:$0xff]  ;;  %v682_v13 = vld [vmem:[%s8760_s1 + $0x1448] sm:$0xff]  ;;  %v687_v22 = vld [vmem:[%s8760_s1 + $0x1470] sm:$0xff] }
  0x3d   :  { %3384 = vmatpush1.bf16.msra.mxu1 %v3383_v56  ;;  %v3531_v56 = vpack.c.bf16 %v651_v50, %v645_v48  ;;  %v688_v14 = vld [vmem:[%s8760_s1 + $0x1478] sm:$0xff]  ;;  %v310_v24 = vld [vmem:[%s8760_s1 + $0x8a8] sm:$0xff]  ;;  %v315_v34 = vld [vmem:[%s8760_s1 + $0x8d0] sm:$0xff] }
  0x3e   :  { %3512 = vmatpush1.bf16.msra.mxu0 %v3511_v57  ;;  %3386 = vmatprep.subr.bf16.mxu1 %v3385_v58  ;;  %v3405_v57 = vpack.c.bf16 %v280_v52, %v274_v51  ;;  %v273_v58 = vld [vmem:[%s8760_s1 + $0x780] sm:$0xff]  ;;  %v3541_v23 = vpack.c.bf16 %v688_v14, %v682_v13  ;;  %v5291_v26 = vld [vmem:[%s8761_s0 + $0x18] sm:$0xff]  ;;  %v694_v27 = vld [vmem:[%s8760_s1 + $0x14a8] sm:$0xff] }
  0x3f   :  { %3514 = vmatprep.subr.bf16.mxu0 %v3513_v62  ;;  %v663_v62 = vld [vmem:[%s8760_s1 + $0x13b0] sm:$0xff]  ;;  %v3407_v3 = vpack.c.bf16 %v279_v59, %v273_v58  ;;  %v700_v28 = vld [vmem:[%s8760_s1 + $0x14d8] sm:$0xff]  ;;  %v693_v35 = vld [vmem:[%s8760_s1 + $0x14a0] sm:$0xff] }
  0x40   :  { %v27_v29 = vld [vmem:[%s8761_s0 + $0x38] sm:$0xff]  ;;  %v3545_v36 = vpack.c.bf16 %v700_v28, %v694_v27  ;;  %v322_v38 = vld [vmem:[%s8760_s1 + $0x908] sm:$0xff]  ;;  %v327_v46 = vld [vmem:[%s8760_s1 + $0x930] sm:$0xff] }
  0x41   :  { %3388 = vmatpush1.bf16.msra.mxu1 %v3387_v4  ;;  %v3535_v4 = vpack.c.bf16 %v663_v62, %v657_v60  ;;  %v328_v39 = vld [vmem:[%s8760_s1 + $0x938] sm:$0xff]  ;;  %v706_v40 = vld [vmem:[%s8760_s1 + $0x1508] sm:$0xff]  ;;  %v705_v47 = vld [vmem:[%s8760_s1 + $0x1500] sm:$0xff] }
  0x42   :  { %3516 = vmatpush1.bf16.msra.mxu0 %v3515_v5  ;;  %3390 = vmatprep.subr.bf16.mxu1 %v3389_v6  ;;  %v3409_v5 = vpack.c.bf16 %v292_v0, %v286_v63  ;;  %v285_v6 = vld [vmem:[%s8760_s1 + $0x7e0] sm:$0xff]  ;;  %v712_v41 = vld [vmem:[%s8760_s1 + $0x1538] sm:$0xff]  ;;  %v334_v50 = vld [vmem:[%s8760_s1 + $0x968] sm:$0xff] }
  0x43   :  { %3518 = vmatprep.subr.bf16.mxu0 %v3517_v10  ;;  %v675_v10 = vld [vmem:[%s8760_s1 + $0x1410] sm:$0xff]  ;;  %v3411_v15 = vpack.c.bf16 %v291_v7, %v285_v6  ;;  %v3549_v48 = vpack.c.bf16 %v712_v41, %v706_v40  ;;  %v340_v51 = vld [vmem:[%s8760_s1 + $0x998] sm:$0xff]  ;;  %v718_v52 = vld [vmem:[%s8760_s1 + $0x1568] sm:$0xff] }
  0x44   :  { %1310 = vmatmul.mubr.f32.vlgmr.msra.gmra.mrb[0].mxu1 %v20_v17  ;;  %v297_v17 = vld [vmem:[%s8760_s1 + $0x840] sm:$0xff]  ;;  %v724_v53 = vld [vmem:[%s8760_s1 + $0x1598] sm:$0xff]  ;;  %v339_v58 = vld [vmem:[%s8760_s1 + $0x990] sm:$0xff] }
  0x45   :  { %3392 = vmatpush1.bf16.msra.mxu1 %v3391_v18  ;;  %1452 = vmatmul.mubr.f32.vlgmr.msra.gmra.mrb[0].mxu0 %v24_v19  ;;  %v3539_v18 = vpack.c.bf16 %v675_v10, %v669_v8  ;;  %v3413_v19 = vpack.c.bf16 %v304_v12, %v298_v11  ;;  %v717_v59 = vld [vmem:[%s8760_s1 + $0x1560] sm:$0xff]  ;;  %v3553_v60 = vpack.c.bf16 %v724_v53, %v718_v52  ;;  %v346_v62 = vld [vmem:[%s8760_s1 + $0x9c8] sm:$0xff]  ;;  %v352_v63 = vld [vmem:[%s8760_s1 + $0x9f8] sm:$0xff] }
  0x46   :  { %3520 = vmatpush1.bf16.msra.mxu0 %v3519_v20  ;;  %3394 = vmatprep.subr.bf16.mxu1 %v3393_v21  ;;  %v303_v20 = vld [vmem:[%s8760_s1 + $0x870] sm:$0xff]  ;;  %v681_v21 = vld [vmem:[%s8760_s1 + $0x1440] sm:$0xff]  ;;  %v730_v0 = vld [vmem:[%s8760_s1 + $0x15c8] sm:$0xff] }
  0x47   :  { %3522 = vmatprep.subr.bf16.mxu0 %v3521_v25  ;;  %v316_v25 = vld [vmem:[%s8760_s1 + $0x8d8] sm:$0xff]  ;;  %1380 = vmatprep.mubr.f32.mxu1 %v5291_v26  ;;  %v3415_v30 = vpack.c.bf16 %v303_v20, %v297_v17  ;;  %v351_v6 = vld [vmem:[%s8760_s1 + $0x9f0] sm:$0xff]  ;;  %v729_v7 = vld [vmem:[%s8760_s1 + $0x15c0] sm:$0xff] }
  0x48   :  { %1522 = vmatprep.mubr.f32.mxu0 %v27_v29  ;;  %v736_v1 = vld [vmem:[%s8760_s1 + $0x15f8] sm:$0xff]  ;;  %v358_v10 = vld [vmem:[%s8760_s1 + $0xa28] sm:$0xff]  ;;  %v741_v20 = vld [vmem:[%s8760_s1 + $0x1620] sm:$0xff] }
  0x49   :  { %3396 = vmatpush1.bf16.msra.mxu1 %v3395_v31  ;;  %v3543_v31 = vpack.c.bf16 %v687_v22, %v681_v21  ;;  %v3557_v8 = vpack.c.bf16 %v736_v1, %v730_v0  ;;  %v364_v11 = vld [vmem:[%s8760_s1 + $0xa58] sm:$0xff]  ;;  %v742_v12 = vld [vmem:[%s8760_s1 + $0x1628] sm:$0xff]  ;;  %v747_v22 = vld [vmem:[%s8760_s1 + $0x1650] sm:$0xff] }
  0x4a   :  { %3524 = vmatpush1.bf16.msra.mxu0 %v3523_v32  ;;  %3398 = vmatprep.subr.bf16.mxu1 %v3397_v33  ;;  %v3417_v32 = vpack.c.bf16 %v316_v25, %v310_v24  ;;  %v309_v33 = vld [vmem:[%s8760_s1 + $0x8a0] sm:$0xff]  ;;  %v748_v13 = vld [vmem:[%s8760_s1 + $0x1658] sm:$0xff]  ;;  %v3433_v17 = vpack.c.bf16 %v364_v11, %v358_v10  ;;  %v754_v25 = vld [vmem:[%s8760_s1 + $0x1688] sm:$0xff]  ;;  %v3563_v29 = vpack.c.bf16 %v747_v22, %v741_v20 }
  0x4b   :  { %3526 = vmatprep.subr.bf16.mxu0 %v3525_v37  ;;  %v699_v37 = vld [vmem:[%s8760_s1 + $0x14d0] sm:$0xff]  ;;  %v3419_v42 = vpack.c.bf16 %v315_v34, %v309_v33  ;;  %v3561_v21 = vpack.c.bf16 %v748_v13, %v742_v12  ;;  %v376_v24 = vld [vmem:[%s8760_s1 + $0xab8] sm:$0xff]  ;;  %v753_v33 = vld [vmem:[%s8760_s1 + $0x1680] sm:$0xff] }
  0x4c   :  { %v760_v27 = vld [vmem:[%s8760_s1 + $0x16b8] sm:$0xff]  ;;  %v802_v10 = vld [vmem:[%s8760_s1 + $0x1808] sm:$0xff]  ;;  %v807_v20 = vld [vmem:[%s8760_s1 + $0x1830] sm:$0xff] }
  0x4d   :  { %3400 = vmatpush1.bf16.msra.mxu1 %v3399_v43  ;;  %v3547_v43 = vpack.c.bf16 %v699_v37, %v693_v35  ;;  %v3565_v34 = vpack.c.bf16 %v760_v27, %v754_v25  ;;  %v759_v35 = vld [vmem:[%s8760_s1 + $0x16b0] sm:$0xff]  ;;  %v388_v37 = vld [vmem:[%s8760_s1 + $0xb18] sm:$0xff] }
  0x4e   :  { %3528 = vmatpush1.bf16.msra.mxu0 %v3527_v44  ;;  %3402 = vmatprep.subr.bf16.mxu1 %v3401_v45  ;;  %v3421_v44 = vpack.c.bf16 %v328_v39, %v322_v38  ;;  %v321_v45 = vld [vmem:[%s8760_s1 + $0x900] sm:$0xff]  ;;  %v766_v38 = vld [vmem:[%s8760_s1 + $0x16e8] sm:$0xff]  ;;  %v772_v39 = vld [vmem:[%s8760_s1 + $0x1718] sm:$0xff]  ;;  %v3567_v41 = vpack.c.bf16 %v759_v35, %v753_v33 }
  0x4f   :  { %3530 = vmatprep.subr.bf16.mxu0 %v3529_v49  ;;  %v711_v49 = vld [vmem:[%s8760_s1 + $0x1530] sm:$0xff]  ;;  %v3423_v54 = vpack.c.bf16 %v327_v46, %v321_v45  ;;  %v765_v45 = vld [vmem:[%s8760_s1 + $0x16e0] sm:$0xff]  ;;  %v3569_v46 = vpack.c.bf16 %v772_v39, %v766_v38  ;;  %v808_v11 = vld [vmem:[%s8760_s1 + $0x1838] sm:$0xff] }
  0x50   :  { %v1204_v22 = vld [vmem:[%s8760_s1 + $0x2498] sm:$0xff]  ;;  %v22_v25 = vld [vmem:[%s8761_s0 + $0x10] sm:$0xff]  ;;  %v826_v38 = vld [vmem:[%s8760_s1 + $0x18c8] sm:$0xff] }
  0x51   :  { %3404 = vmatpush1.bf16.msra.mxu1 %v3403_v55  ;;  %v3551_v55 = vpack.c.bf16 %v711_v49, %v705_v47  ;;  %v771_v47 = vld [vmem:[%s8760_s1 + $0x1710] sm:$0xff]  ;;  %v400_v49 = vld [vmem:[%s8760_s1 + $0xb78] sm:$0xff] }
  0x52   :  { %3532 = vmatpush1.bf16.msra.mxu0 %v3531_v56  ;;  %3406 = vmatprep.subr.bf16.mxu1 %v3405_v57  ;;  %v3425_v56 = vpack.c.bf16 %v340_v51, %v334_v50  ;;  %v333_v57 = vld [vmem:[%s8760_s1 + $0x960] sm:$0xff]  ;;  %v778_v50 = vld [vmem:[%s8760_s1 + $0x1748] sm:$0xff]  ;;  %v784_v51 = vld [vmem:[%s8760_s1 + $0x1778] sm:$0xff]  ;;  %v3571_v53 = vpack.c.bf16 %v771_v47, %v765_v45 }
  0x53   :  { %3534 = vmatprep.subr.bf16.mxu0 %v3533_v61  ;;  %v723_v61 = vld [vmem:[%s8760_s1 + $0x1590] sm:$0xff]  ;;  %v3427_v2 = vpack.c.bf16 %v339_v58, %v333_v57  ;;  %v777_v57 = vld [vmem:[%s8760_s1 + $0x1740] sm:$0xff]  ;;  %v3573_v58 = vpack.c.bf16 %v784_v51, %v778_v50  ;;  %v832_v39 = vld [vmem:[%s8760_s1 + $0x18f8] sm:$0xff] }
  0x54   :  { %v26_v27 = vld [vmem:[%s8761_s0 + $0x30] sm:$0xff]  ;;  %v3589_v47 = vpack.c.bf16 %v832_v39, %v826_v38  ;;  %v48_v50 = vld [vmem:[%s8760_s1 + $0x78] sm:$0xff]  ;;  %v54_v51 = vld [vmem:[%s8760_s1 + $0xa8] sm:$0xff] }
  0x55   :  { %3408 = vmatpush1.bf16.msra.mxu1 %v3407_v3  ;;  %v3555_v3 = vpack.c.bf16 %v723_v61, %v717_v59  ;;  %v783_v59 = vld [vmem:[%s8760_s1 + $0x1770] sm:$0xff]  ;;  %v412_v61 = vld [vmem:[%s8760_s1 + $0xbd8] sm:$0xff]  ;;  %v886_v38 = vld [vmem:[%s8760_s1 + $0x1aa8] sm:$0xff] }
  0x56   :  { %3536 = vmatpush1.bf16.msra.mxu0 %v3535_v4  ;;  %3410 = vmatprep.subr.bf16.mxu1 %v3409_v5  ;;  %v3429_v4 = vpack.c.bf16 %v352_v63, %v346_v62  ;;  %v345_v5 = vld [vmem:[%s8760_s1 + $0x9c0] sm:$0xff]  ;;  %v790_v62 = vld [vmem:[%s8760_s1 + $0x17a8] sm:$0xff]  ;;  %v796_v63 = vld [vmem:[%s8760_s1 + $0x17d8] sm:$0xff]  ;;  %v3575_v1 = vpack.c.bf16 %v783_v59, %v777_v57  ;;  %v3721_v57 = vpack.c.bf16 %v54_v51, %v48_v50 }
  0x57   :  { %3538 = vmatprep.subr.bf16.mxu0 %v3537_v9  ;;  %v735_v9 = vld [vmem:[%s8760_s1 + $0x15f0] sm:$0xff]  ;;  %v3431_v14 = vpack.c.bf16 %v351_v6, %v345_v5  ;;  %v789_v5 = vld [vmem:[%s8760_s1 + $0x17a0] sm:$0xff]  ;;  %v3577_v6 = vpack.c.bf16 %v796_v63, %v790_v62  ;;  %v60_v63 = vld [vmem:[%s8760_s1 + $0xd8] sm:$0xff] }
  0x58   :  { %v1203_v33 = vld [vmem:[%s8760_s1 + $0x2490] sm:$0xff]  ;;  %v892_v39 = vld [vmem:[%s8760_s1 + $0x1ad8] sm:$0xff]  ;;  %v114_v50 = vld [vmem:[%s8760_s1 + $0x288] sm:$0xff] }
  0x59   :  { %3412 = vmatpush1.bf16.msra.mxu1 %v3411_v15  ;;  %v3559_v15 = vpack.c.bf16 %v735_v9, %v729_v7  ;;  %v795_v7 = vld [vmem:[%s8760_s1 + $0x17d0] sm:$0xff]  ;;  %v1192_v9 = vld [vmem:[%s8760_s1 + $0x2438] sm:$0xff]  ;;  %v898_v51 = vld [vmem:[%s8760_s1 + $0x1b08] sm:$0xff] }
  0x5a   :  { %3540 = vmatpush1.bf16.msra.mxu0 %v3539_v18  ;;  %3414 = vmatprep.subr.bf16.mxu1 %v3413_v19  ;;  %v357_v18 = vld [vmem:[%s8760_s1 + $0xa20] sm:$0xff]  ;;  %v363_v19 = vld [vmem:[%s8760_s1 + $0xa50] sm:$0xff]  ;;  %v3579_v13 = vpack.c.bf16 %v795_v7, %v789_v5 }
  0x5b   :  { %3542 = vmatprep.subr.bf16.mxu0 %v3541_v23  ;;  %v370_v23 = vld [vmem:[%s8760_s1 + $0xa88] sm:$0xff]  ;;  %v3435_v28 = vpack.c.bf16 %v363_v19, %v357_v18  ;;  %v1191_v18 = vld [vmem:[%s8760_s1 + $0x2430] sm:$0xff]  ;;  %v3581_v19 = vpack.c.bf16 %v808_v11, %v802_v10  ;;  %v72_v10 = vld [vmem:[%s8760_s1 + $0x138] sm:$0xff] }
  0x5c   :  { %v819_v35 = vld [vmem:[%s8760_s1 + $0x1890] sm:$0xff]  ;;  %v78_v11 = vld [vmem:[%s8760_s1 + $0x168] sm:$0xff] }
  0x5d   :  { %3416 = vmatpush1.bf16.msra.mxu1 %v3415_v30  ;;  %v3437_v30 = vpack.c.bf16 %v376_v24, %v370_v23  ;;  %v814_v23 = vld [vmem:[%s8760_s1 + $0x1868] sm:$0xff]  ;;  %v820_v24 = vld [vmem:[%s8760_s1 + $0x1898] sm:$0xff]  ;;  %v35_v45 = vld [vmem:[%s8760_s1 + $0x10] sm:$0xff] }
  0x5e   :  { %3544 = vmatpush1.bf16.msra.mxu0 %v3543_v31  ;;  %3418 = vmatprep.subr.bf16.mxu1 %v3417_v32  ;;  %v369_v31 = vld [vmem:[%s8760_s1 + $0xa80] sm:$0xff]  ;;  %v375_v32 = vld [vmem:[%s8760_s1 + $0xab0] sm:$0xff] }
  0x5f   :  { %3546 = vmatprep.subr.bf16.mxu0 %v3545_v36  ;;  %v382_v36 = vld [vmem:[%s8760_s1 + $0xae8] sm:$0xff]  ;;  %v3439_v40 = vpack.c.bf16 %v375_v32, %v369_v31  ;;  %v813_v31 = vld [vmem:[%s8760_s1 + $0x1860] sm:$0xff]  ;;  %v47_v59 = vld [vmem:[%s8760_s1 + $0x70] sm:$0xff] }
  0x60   :  { %v1197_v32 = vld [vmem:[%s8760_s1 + $0x2460] sm:$0xff]  ;;  %v843_v62 = vld [vmem:[%s8760_s1 + $0x1950] sm:$0xff] }
  0x61   :  { %3420 = vmatpush1.bf16.msra.mxu1 %v3419_v42  ;;  %v3441_v42 = vpack.c.bf16 %v388_v37, %v382_v36  ;;  %v36_v36 = vld [vmem:[%s8760_s1 + $0x18] sm:$0xff]  ;;  %v42_v37 = vld [vmem:[%s8760_s1 + $0x48] sm:$0xff]  ;;  %v59_v7 = vld [vmem:[%s8760_s1 + $0xd0] sm:$0xff] }
  0x62   :  { %3548 = vmatpush1.bf16.msra.mxu0 %v3547_v43  ;;  %3422 = vmatprep.subr.bf16.mxu1 %v3421_v44  ;;  %v381_v43 = vld [vmem:[%s8760_s1 + $0xae0] sm:$0xff]  ;;  %v387_v44 = vld [vmem:[%s8760_s1 + $0xb10] sm:$0xff] }
  0x63   :  { %3550 = vmatprep.subr.bf16.mxu0 %v3549_v48  ;;  %v394_v48 = vld [vmem:[%s8760_s1 + $0xb48] sm:$0xff]  ;;  %v3443_v52 = vpack.c.bf16 %v387_v44, %v381_v43  ;;  %v3717_v43 = vpack.c.bf16 %v42_v37, %v36_v36  ;;  %v825_v44 = vld [vmem:[%s8760_s1 + $0x18c0] sm:$0xff]  ;;  %v96_v36 = vld [vmem:[%s8760_s1 + $0x1f8] sm:$0xff] }
  0x64   :  { %v102_v37 = vld [vmem:[%s8760_s1 + $0x228] sm:$0xff] }
  0x65   :  { %3424 = vmatpush1.bf16.msra.mxu1 %v3423_v54  ;;  %v3445_v54 = vpack.c.bf16 %v400_v49, %v394_v48  ;;  %v4683_v48 = vmov 0.0   ;;  %v831_v49 = vld [vmem:[%s8760_s1 + $0x18f0] sm:$0xff] }
  0x66   :  { %3552 = vmatpush1.bf16.msra.mxu0 %v3551_v55  ;;  %3426 = vmatprep.subr.bf16.mxu1 %v3425_v56  ;;  %v393_v55 = vld [vmem:[%s8760_s1 + $0xb40] sm:$0xff]  ;;  %v399_v56 = vld [vmem:[%s8760_s1 + $0xb70] sm:$0xff] }
  0x67   :  { %3554 = vmatprep.subr.bf16.mxu0 %v3553_v60  ;;  %v406_v60 = vld [vmem:[%s8760_s1 + $0xba8] sm:$0xff]  ;;  %v3447_v0 = vpack.c.bf16 %v399_v56, %v393_v55  ;;  %v3591_v56 = vpack.c.bf16 %v831_v49, %v825_v44  ;;  %v95_v44 = vld [vmem:[%s8760_s1 + $0x1f0] sm:$0xff]  ;;  %v108_v49 = vld [vmem:[%s8760_s1 + $0x258] sm:$0xff] }
  0x69   :  { %3428 = vmatpush1.bf16.msra.mxu1 %v3427_v2  ;;  %v3449_v2 = vpack.c.bf16 %v412_v61, %v406_v60  ;;  %v53_v60 = vld [vmem:[%s8760_s1 + $0xa0] sm:$0xff] }
  0x6a   :  { %3556 = vmatpush1.bf16.msra.mxu0 %v3555_v3  ;;  %3430 = vmatprep.subr.bf16.mxu1 %v3429_v4  ;;  %v405_v3 = vld [vmem:[%s8760_s1 + $0xba0] sm:$0xff]  ;;  %v411_v4 = vld [vmem:[%s8760_s1 + $0xbd0] sm:$0xff] }
  0x6b   :  { %3558 = vmatprep.subr.bf16.mxu0 %v3557_v8  ;;  %v1186_v8 = vld [vmem:[%s8760_s1 + $0x2408] sm:$0xff]  ;;  %v3451_v12 = vpack.c.bf16 %v411_v4, %v405_v3  ;;  %v3723_v3 = vpack.c.bf16 %v53_v60, %v47_v59  ;;  %v903_v60 = vld [vmem:[%s8760_s1 + $0x1b30] sm:$0xff] }
  0x6d   :  { %3432 = vmatpush1.bf16.msra.mxu1 %v3431_v14  ;;  %v3709_v14 = vpack.c.bf16 %v1192_v9, %v1186_v8  ;;  %v65_v8 = vld [vmem:[%s8760_s1 + $0x100] sm:$0xff] }
  0x6e   :  { %3560 = vmatpush1.bf16.msra.mxu0 %v3559_v15  ;;  %3434 = vmatprep.subr.bf16.mxu1 %v3433_v17  ;;  %v801_v15 = vld [vmem:[%s8760_s1 + $0x1800] sm:$0xff] }
  0x6f   :  { %3562 = vmatprep.subr.bf16.mxu0 %v3561_v21  ;;  %v1185_v17 = vld [vmem:[%s8760_s1 + $0x2400] sm:$0xff]  ;;  %v1198_v21 = vld [vmem:[%s8760_s1 + $0x2468] sm:$0xff] }
  0x71   :  { %3436 = vmatpush1.bf16.msra.mxu1 %v3435_v28  ;;  %v3711_v28 = vpack.c.bf16 %v1191_v18, %v1185_v17  ;;  %v3729_v17 = vpack.c.bf16 %v78_v11, %v72_v10  ;;  %v861_v18 = vld [vmem:[%s8760_s1 + $0x19e0] sm:$0xff]  ;;  %v922_v10 = vld [vmem:[%s8760_s1 + $0x1bc8] sm:$0xff]  ;;  %v928_v11 = vld [vmem:[%s8760_s1 + $0x1bf8] sm:$0xff] }
  0x72   :  { %3564 = vmatpush1.bf16.msra.mxu0 %v3563_v29  ;;  %3438 = vmatprep.subr.bf16.mxu1 %v3437_v30  ;;  %v3583_v29 = vpack.c.bf16 %v807_v20, %v801_v15  ;;  %v3713_v30 = vpack.c.bf16 %v1204_v22, %v1198_v21  ;;  %v77_v20 = vld [vmem:[%s8760_s1 + $0x160] sm:$0xff]  ;;  %v867_v22 = vld [vmem:[%s8760_s1 + $0x1a10] sm:$0xff] }
  0x73   :  { %3566 = vmatprep.subr.bf16.mxu0 %v3565_v34  ;;  %v3585_v34 = vpack.c.bf16 %v820_v24, %v814_v23  ;;  %v84_v23 = vld [vmem:[%s8760_s1 + $0x198] sm:$0xff]  ;;  %v90_v24 = vld [vmem:[%s8760_s1 + $0x1c8] sm:$0xff] }
  0x75   :  { %3440 = vmatpush1.bf16.msra.mxu1 %v3439_v40  ;;  %v3715_v40 = vpack.c.bf16 %v1203_v33, %v1197_v32  ;;  %v83_v32 = vld [vmem:[%s8760_s1 + $0x190] sm:$0xff]  ;;  %v89_v33 = vld [vmem:[%s8760_s1 + $0x1c0] sm:$0xff] }
  0x76   :  { %3568 = vmatpush1.bf16.msra.mxu0 %v3567_v41  ;;  %3442 = vmatprep.subr.bf16.mxu1 %v3441_v42  ;;  %v29_v41 = vld [vmem:[%s8761_s0 + $0x48] sm:$0xff]  ;;  %v3587_v42 = vpack.c.bf16 %v819_v35, %v813_v31  ;;  %v873_v31 = vld [vmem:[%s8760_s1 + $0x1a40] sm:$0xff]  ;;  %v879_v35 = vld [vmem:[%s8760_s1 + $0x1a70] sm:$0xff] }
  0x77   :  { %3570 = vmatprep.subr.bf16.mxu0 %v3569_v46  ;;  %v41_v46 = vld [vmem:[%s8760_s1 + $0x40] sm:$0xff] }
  0x78   :  { %v3719_v55 = vpack.c.bf16 %v41_v46, %v35_v45  ;;  %v101_v45 = vld [vmem:[%s8760_s1 + $0x220] sm:$0xff]  ;;  %v3609_v46 = vpack.c.bf16 %v892_v39, %v886_v38 }
  0x79   :  { %3444 = vmatpush1.bf16.msra.mxu1 %v3443_v52  ;;  %v838_v52 = vld [vmem:[%s8760_s1 + $0x1928] sm:$0xff] }
  0x7a   :  { %3572 = vmatpush1.bf16.msra.mxu0 %v3571_v53  ;;  %3446 = vmatprep.subr.bf16.mxu1 %v3445_v54  ;;  %v844_v53 = vld [vmem:[%s8760_s1 + $0x1958] sm:$0xff]  ;;  %v32_v54 = vld [vmem:[%s8761_s0 + $0x60] sm:$0xff] }
  0x7b   :  { %3574 = vmatprep.subr.bf16.mxu0 %v3573_v58  ;;  %v837_v58 = vld [vmem:[%s8760_s1 + $0x1920] sm:$0xff]  ;;  %v3593_v61 = vpack.c.bf16 %v844_v53, %v838_v52  ;;  %v904_v52 = vld [vmem:[%s8760_s1 + $0x1b38] sm:$0xff]  ;;  %v3739_v53 = vpack.c.bf16 %v101_v45, %v95_v44  ;;  %v951_v45 = vld [vmem:[%s8760_s1 + $0x1cb0] sm:$0xff] }
  0x7c   :  { %v3595_v4 = vpack.c.bf16 %v843_v62, %v837_v58  ;;  %v113_v58 = vld [vmem:[%s8760_s1 + $0x280] sm:$0xff]  ;;  %v3613_v59 = vpack.c.bf16 %v904_v52, %v898_v51  ;;  %v126_v62 = vld [vmem:[%s8760_s1 + $0x2e8] sm:$0xff] }
  0x7d   :  { %3448 = vmatpush1.bf16.msra.mxu1 %v3447_v0  ;;  %v66_v0 = vld [vmem:[%s8760_s1 + $0x108] sm:$0xff] }
  0x7e   :  { %3576 = vmatpush1.bf16.msra.mxu0 %v3575_v1  ;;  %3450 = vmatprep.subr.bf16.mxu1 %v3449_v2  ;;  %v850_v1 = vld [vmem:[%s8760_s1 + $0x1988] sm:$0xff]  ;;  %v856_v2 = vld [vmem:[%s8760_s1 + $0x19b8] sm:$0xff]  ;;  %v3725_v5 = vpack.c.bf16 %v66_v0, %v60_v63 }
  0x7f   :  { %3578 = vmatprep.subr.bf16.mxu0 %v3577_v6  ;;  %v849_v6 = vld [vmem:[%s8760_s1 + $0x1980] sm:$0xff]  ;;  %v3597_v9 = vpack.c.bf16 %v856_v2, %v850_v1  ;;  %v910_v63 = vld [vmem:[%s8760_s1 + $0x1b68] sm:$0xff]  ;;  %v916_v0 = vld [vmem:[%s8760_s1 + $0x1b98] sm:$0xff] }
  0x81   :  { %3452 = vmatpush1.bf16.msra.mxu1 %v3451_v12  ;;  %v862_v12 = vld [vmem:[%s8760_s1 + $0x19e8] sm:$0xff] }
  0x82   :  { %3580 = vmatpush1.bf16.msra.mxu0 %v3579_v13  ;;  %3710 = vmatprep.subr.bf16.mxu1 %v3709_v14  ;;  %v868_v13 = vld [vmem:[%s8760_s1 + $0x1a18] sm:$0xff]  ;;  %v3727_v14 = vpack.c.bf16 %v65_v8, %v59_v7  ;;  %v3617_v7 = vpack.c.bf16 %v916_v0, %v910_v63  ;;  %v915_v8 = vld [vmem:[%s8760_s1 + $0x1b90] sm:$0xff] }
  0x83   :  { %3582 = vmatprep.subr.bf16.mxu0 %v3581_v19  ;;  %v71_v19 = vld [vmem:[%s8760_s1 + $0x130] sm:$0xff]  ;;  %v3601_v21 = vpack.c.bf16 %v868_v13, %v862_v12 }
  0x84   :  { %1381 = vmatmul.mubr.f32.vlgmr.msra.gmra.mrb[0].mxu1 %v22_v25  ;;  %v874_v25 = vld [vmem:[%s8760_s1 + $0x1a48] sm:$0xff] }
  0x85   :  { %1523 = vmatmul.mubr.f32.vlgmr.msra.gmra.mrb[0].mxu0 %v26_v27  ;;  %3712 = vmatpush1.bf16.msra.mxu1 %v3711_v28  ;;  %v880_v27 = vld [vmem:[%s8760_s1 + $0x1a78] sm:$0xff]  ;;  %v3731_v28 = vpack.c.bf16 %v77_v20, %v71_v19  ;;  %v3621_v19 = vpack.c.bf16 %v928_v11, %v922_v10  ;;  %v927_v20 = vld [vmem:[%s8760_s1 + $0x1bf0] sm:$0xff] }
  0x86   :  { %3584 = vmatpush1.bf16.msra.mxu0 %v3583_v29  ;;  %3714 = vmatprep.subr.bf16.mxu1 %v3713_v30  ;;  %v3603_v29 = vpack.c.bf16 %v867_v22, %v861_v18  ;;  %v3733_v30 = vpack.c.bf16 %v90_v24, %v84_v23  ;;  %v137_v18 = vld [vmem:[%s8760_s1 + $0x340] sm:$0xff]  ;;  %v150_v22 = vld [vmem:[%s8760_s1 + $0x3a8] sm:$0xff]  ;;  %v940_v24 = vld [vmem:[%s8760_s1 + $0x1c58] sm:$0xff] }
  0x87   :  { %3586 = vmatprep.subr.bf16.mxu0 %v3585_v34  ;;  %1735 = vmatprep.mubr.f32.mxu1 %v4683_v48  ;;  %v3605_v34 = vpack.c.bf16 %v880_v27, %v874_v25  ;;  %v934_v23 = vld [vmem:[%s8760_s1 + $0x1c28] sm:$0xff] }
  0x88   :  { %1593 = vmatprep.mubr.f32.mxu0 %v29_v41  ;;  %v3607_v41 = vpack.c.bf16 %v879_v35, %v873_v31  ;;  %v149_v31 = vld [vmem:[%s8760_s1 + $0x3a0] sm:$0xff]  ;;  %v162_v35 = vld [vmem:[%s8760_s1 + $0x408] sm:$0xff] }
  0x89   :  { %3716 = vmatpush1.bf16.msra.mxu1 %v3715_v40  ;;  %v3735_v40 = vpack.c.bf16 %v89_v33, %v83_v32  ;;  %v3625_v32 = vpack.c.bf16 %v940_v24, %v934_v23  ;;  %v939_v33 = vld [vmem:[%s8760_s1 + $0x1c50] sm:$0xff] }
  0x8a   :  { %3588 = vmatpush1.bf16.msra.mxu0 %v3587_v42  ;;  %3718 = vmatprep.subr.bf16.mxu1 %v3717_v43  ;;  %v3737_v42 = vpack.c.bf16 %v102_v37, %v96_v36  ;;  %v885_v43 = vld [vmem:[%s8760_s1 + $0x1aa0] sm:$0xff]  ;;  %v946_v36 = vld [vmem:[%s8760_s1 + $0x1c88] sm:$0xff]  ;;  %v952_v37 = vld [vmem:[%s8760_s1 + $0x1cb8] sm:$0xff] }
  0x8b   :  { %3590 = vmatprep.subr.bf16.mxu0 %v3589_v47  ;;  %v891_v47 = vld [vmem:[%s8760_s1 + $0x1ad0] sm:$0xff]  ;;  %v3629_v44 = vpack.c.bf16 %v952_v37, %v946_v36  ;;  %v28_v36 = vld [vmem:[%s8761_s0 + $0x40] sm:$0xff] }
  0x8c   :  { %3216 = vmatmul.mubr.msk.f32.vlgmr.msra.gmra.mrb[2].mxu1 %vm1241_vm0, %v32_v54  ;;  %v3611_v54 = vpack.c.bf16 %v891_v47, %v885_v43  ;;  %v161_v43 = vld [vmem:[%s8760_s1 + $0x400] sm:$0xff]  ;;  %v174_v47 = vld [vmem:[%s8760_s1 + $0x468] sm:$0xff] }
  0x8d   :  { %3720 = vmatpush1.bf16.msra.mxu1 %v3719_v55  ;;  %1806 = vmatprep.mubr.f32.mxu1 %v5012_v16  ;;  %v855_v16 = vld [vmem:[%s8760_s1 + $0x19b0] sm:$0xff]  ;;  %v3741_v55 = vpack.c.bf16 %v114_v50, %v108_v49  ;;  %v958_v49 = vld [vmem:[%s8760_s1 + $0x1ce8] sm:$0xff]  ;;  %v964_v50 = vld [vmem:[%s8760_s1 + $0x1d18] sm:$0xff] }
  0x8e   :  { %3592 = vmatpush1.bf16.msra.mxu0 %v3591_v56  ;;  %3722 = vmatprep.subr.bf16.mxu1 %v3721_v57  ;;  %v3599_v15 = vpack.c.bf16 %v855_v16, %v849_v6  ;;  %v897_v56 = vld [vmem:[%s8760_s1 + $0x1b00] sm:$0xff]  ;;  %v107_v57 = vld [vmem:[%s8760_s1 + $0x250] sm:$0xff]  ;;  %v138_v16 = vld [vmem:[%s8760_s1 + $0x348] sm:$0xff] }
  0x8f   :  { %3594 = vmatprep.subr.bf16.mxu0 %v3593_v61  ;;  %v120_v61 = vld [vmem:[%s8760_s1 + $0x2b8] sm:$0xff]  ;;  %v3743_v1 = vpack.c.bf16 %v113_v58, %v107_v57  ;;  %v3615_v2 = vpack.c.bf16 %v903_v60, %v897_v56  ;;  %v125_v6 = vld [vmem:[%s8760_s1 + $0x2e0] sm:$0xff]  ;;  %v3633_v57 = vpack.c.bf16 %v964_v50, %v958_v49  ;;  %v963_v58 = vld [vmem:[%s8760_s1 + $0x1d10] sm:$0xff] }
  0x90   :  { %v173_v56 = vld [vmem:[%s8760_s1 + $0x460] sm:$0xff]  ;;  %v186_v60 = vld [vmem:[%s8760_s1 + $0x4c8] sm:$0xff]  ;;  %v1024_v49 = vld [vmem:[%s8760_s1 + $0x1ef8] sm:$0xff] }
  0x91   :  { %3724 = vmatpush1.bf16.msra.mxu1 %v3723_v3  ;;  %v3745_v3 = vpack.c.bf16 %v126_v62, %v120_v61  ;;  %v970_v61 = vld [vmem:[%s8760_s1 + $0x1d48] sm:$0xff]  ;;  %v976_v62 = vld [vmem:[%s8760_s1 + $0x1d78] sm:$0xff] }
  0x92   :  { %3596 = vmatpush1.bf16.msra.mxu0 %v3595_v4  ;;  %3726 = vmatprep.subr.bf16.mxu1 %v3725_v5  ;;  %v909_v4 = vld [vmem:[%s8760_s1 + $0x1b60] sm:$0xff]  ;;  %v119_v5 = vld [vmem:[%s8760_s1 + $0x2b0] sm:$0xff]  ;;  %v31_v50 = vld [vmem:[%s8761_s0 + $0x58] sm:$0xff] }
  0x93   :  { %3598 = vmatprep.subr.bf16.mxu0 %v3597_v9  ;;  %v132_v9 = vld [vmem:[%s8760_s1 + $0x318] sm:$0xff]  ;;  %v3747_v12 = vpack.c.bf16 %v125_v6, %v119_v5  ;;  %v3619_v13 = vpack.c.bf16 %v915_v8, %v909_v4  ;;  %v185_v4 = vld [vmem:[%s8760_s1 + $0x4c0] sm:$0xff]  ;;  %v3637_v5 = vpack.c.bf16 %v976_v62, %v970_v61  ;;  %v975_v6 = vld [vmem:[%s8760_s1 + $0x1d70] sm:$0xff] }
  0x94   :  { %v198_v8 = vld [vmem:[%s8760_s1 + $0x528] sm:$0xff]  ;;  %v1036_v62 = vld [vmem:[%s8760_s1 + $0x1f58] sm:$0xff] }
  0x95   :  { %3728 = vmatpush1.bf16.msra.mxu1 %v3727_v14  ;;  %v3749_v14 = vpack.c.bf16 %v138_v16, %v132_v9  ;;  %v982_v9 = vld [vmem:[%s8760_s1 + $0x1da8] sm:$0xff]  ;;  %v988_v16 = vld [vmem:[%s8760_s1 + $0x1dd8] sm:$0xff] }
  0x96   :  { %3600 = vmatpush1.bf16.msra.mxu0 %v3599_v15  ;;  %3730 = vmatprep.subr.bf16.mxu1 %v3729_v17  ;;  %v921_v15 = vld [vmem:[%s8760_s1 + $0x1bc0] sm:$0xff]  ;;  %v131_v17 = vld [vmem:[%s8760_s1 + $0x310] sm:$0xff]  ;;  %v1030_v61 = vld [vmem:[%s8760_s1 + $0x1f28] sm:$0xff] }
  0x97   :  { %3602 = vmatprep.subr.bf16.mxu0 %v3601_v21  ;;  %v144_v21 = vld [vmem:[%s8760_s1 + $0x378] sm:$0xff]  ;;  %v3751_v25 = vpack.c.bf16 %v137_v18, %v131_v17  ;;  %v3623_v27 = vpack.c.bf16 %v927_v20, %v921_v15  ;;  %v197_v15 = vld [vmem:[%s8760_s1 + $0x520] sm:$0xff]  ;;  %v3641_v17 = vpack.c.bf16 %v988_v16, %v982_v9  ;;  %v987_v18 = vld [vmem:[%s8760_s1 + $0x1dd0] sm:$0xff] }
  0x98   :  { %v210_v20 = vld [vmem:[%s8760_s1 + $0x588] sm:$0xff]  ;;  %v6017_v9 = vld [vmem:[%s8761_s0] sm:$0xff] }
  0x99   :  { %3732 = vmatpush1.bf16.msra.mxu1 %v3731_v28  ;;  %v3753_v28 = vpack.c.bf16 %v150_v22, %v144_v21  ;;  %v994_v21 = vld [vmem:[%s8760_s1 + $0x1e08] sm:$0xff]  ;;  %v1000_v22 = vld [vmem:[%s8760_s1 + $0x1e38] sm:$0xff] }
  0x9a   :  { %3604 = vmatpush1.bf16.msra.mxu0 %v3603_v29  ;;  %3734 = vmatprep.subr.bf16.mxu1 %v3733_v30  ;;  %v933_v29 = vld [vmem:[%s8760_s1 + $0x1c20] sm:$0xff]  ;;  %v143_v30 = vld [vmem:[%s8760_s1 + $0x370] sm:$0xff]  ;;  %v1042_v16 = vld [vmem:[%s8760_s1 + $0x1f88] sm:$0xff] }
  0x9b   :  { %3606 = vmatprep.subr.bf16.mxu0 %v3605_v34  ;;  %v156_v34 = vld [vmem:[%s8760_s1 + $0x3d8] sm:$0xff]  ;;  %v3755_v38 = vpack.c.bf16 %v149_v31, %v143_v30  ;;  %v3627_v39 = vpack.c.bf16 %v939_v33, %v933_v29  ;;  %v209_v29 = vld [vmem:[%s8760_s1 + $0x580] sm:$0xff]  ;;  %v3645_v30 = vpack.c.bf16 %v1000_v22, %v994_v21  ;;  %v999_v31 = vld [vmem:[%s8760_s1 + $0x1e30] sm:$0xff] }
  0x9c   :  { %v222_v33 = vld [vmem:[%s8760_s1 + $0x5e8] sm:$0xff]  ;;  %v1060_v22 = vld [vmem:[%s8760_s1 + $0x2018] sm:$0xff] }
  0x9d   :  { %3736 = vmatpush1.bf16.msra.mxu1 %v3735_v40  ;;  %v3757_v40 = vpack.c.bf16 %v162_v35, %v156_v34  ;;  %v1006_v34 = vld [vmem:[%s8760_s1 + $0x1e68] sm:$0xff]  ;;  %v1012_v35 = vld [vmem:[%s8760_s1 + $0x1e98] sm:$0xff] }
  0x9e   :  { %3608 = vmatpush1.bf16.msra.mxu0 %v3607_v41  ;;  %3738 = vmatprep.subr.bf16.mxu1 %v3737_v42  ;;  %v945_v41 = vld [vmem:[%s8760_s1 + $0x1c80] sm:$0xff]  ;;  %v155_v42 = vld [vmem:[%s8760_s1 + $0x3d0] sm:$0xff]  ;;  %v1054_v21 = vld [vmem:[%s8760_s1 + $0x1fe8] sm:$0xff] }
  0x9f   :  { %3610 = vmatprep.subr.bf16.mxu0 %v3609_v46  ;;  %v168_v46 = vld [vmem:[%s8760_s1 + $0x438] sm:$0xff]  ;;  %v3759_v51 = vpack.c.bf16 %v161_v43, %v155_v42  ;;  %v3631_v52 = vpack.c.bf16 %v951_v45, %v945_v41  ;;  %v215_v41 = vld [vmem:[%s8760_s1 + $0x5b0] sm:$0xff]  ;;  %v221_v42 = vld [vmem:[%s8760_s1 + $0x5e0] sm:$0xff]  ;;  %v3649_v43 = vpack.c.bf16 %v1012_v35, %v1006_v34 }
  0xa0   :  { %v228_v45 = vld [vmem:[%s8760_s1 + $0x618] sm:$0xff]  ;;  %v1066_v34 = vld [vmem:[%s8760_s1 + $0x2048] sm:$0xff] }
  0xa1   :  { %3740 = vmatpush1.bf16.msra.mxu1 %v3739_v53  ;;  %v3761_v53 = vpack.c.bf16 %v174_v47, %v168_v46  ;;  %v234_v46 = vld [vmem:[%s8760_s1 + $0x648] sm:$0xff]  ;;  %v1072_v35 = vld [vmem:[%s8760_s1 + $0x2078] sm:$0xff] }
  0xa2   :  { %3612 = vmatpush1.bf16.msra.mxu0 %v3611_v54  ;;  %3742 = vmatprep.subr.bf16.mxu1 %v3741_v55  ;;  %v957_v54 = vld [vmem:[%s8760_s1 + $0x1ce0] sm:$0xff]  ;;  %v167_v55 = vld [vmem:[%s8760_s1 + $0x430] sm:$0xff]  ;;  %v1018_v47 = vld [vmem:[%s8760_s1 + $0x1ec8] sm:$0xff] }
  0xa3   :  { %3614 = vmatprep.subr.bf16.mxu0 %v3613_v59  ;;  %v180_v59 = vld [vmem:[%s8760_s1 + $0x498] sm:$0xff]  ;;  %v3763_v63 = vpack.c.bf16 %v173_v56, %v167_v55  ;;  %v3635_v0 = vpack.c.bf16 %v963_v58, %v957_v54  ;;  %v1017_v54 = vld [vmem:[%s8760_s1 + $0x1ec0] sm:$0xff]  ;;  %v227_v55 = vld [vmem:[%s8760_s1 + $0x610] sm:$0xff] }
  0xa4   :  { %v233_v56 = vld [vmem:[%s8760_s1 + $0x640] sm:$0xff]  ;;  %v1023_v58 = vld [vmem:[%s8760_s1 + $0x1ef0] sm:$0xff] }
  0xa5   :  { %3744 = vmatpush1.bf16.msra.mxu1 %v3743_v1  ;;  %v3765_v1 = vpack.c.bf16 %v186_v60, %v180_v59  ;;  %v240_v59 = vld [vmem:[%s8760_s1 + $0x678] sm:$0xff]  ;;  %v246_v60 = vld [vmem:[%s8760_s1 + $0x6a8] sm:$0xff] }
  0xa6   :  { %3616 = vmatpush1.bf16.msra.mxu0 %v3615_v2  ;;  %3746 = vmatprep.subr.bf16.mxu1 %v3745_v3  ;;  %v969_v2 = vld [vmem:[%s8760_s1 + $0x1d40] sm:$0xff]  ;;  %v179_v3 = vld [vmem:[%s8760_s1 + $0x490] sm:$0xff] }
  0xa7   :  { %3618 = vmatprep.subr.bf16.mxu0 %v3617_v7  ;;  %v192_v7 = vld [vmem:[%s8760_s1 + $0x4f8] sm:$0xff]  ;;  %v3767_v10 = vpack.c.bf16 %v185_v4, %v179_v3  ;;  %v3639_v11 = vpack.c.bf16 %v975_v6, %v969_v2  ;;  %v1029_v2 = vld [vmem:[%s8760_s1 + $0x1f20] sm:$0xff]  ;;  %v239_v3 = vld [vmem:[%s8760_s1 + $0x670] sm:$0xff] }
  0xa8   :  { %v245_v4 = vld [vmem:[%s8760_s1 + $0x6a0] sm:$0xff]  ;;  %v1035_v6 = vld [vmem:[%s8760_s1 + $0x1f50] sm:$0xff] }
  0xa9   :  { %3748 = vmatpush1.bf16.msra.mxu1 %v3747_v12  ;;  %v3769_v12 = vpack.c.bf16 %v198_v8, %v192_v7  ;;  %v252_v7 = vld [vmem:[%s8760_s1 + $0x6d8] sm:$0xff]  ;;  %v258_v8 = vld [vmem:[%s8760_s1 + $0x708] sm:$0xff] }
  0xaa   :  { %3620 = vmatpush1.bf16.msra.mxu0 %v3619_v13  ;;  %3750 = vmatprep.subr.bf16.mxu1 %v3749_v14  ;;  %v981_v13 = vld [vmem:[%s8760_s1 + $0x1da0] sm:$0xff]  ;;  %v191_v14 = vld [vmem:[%s8760_s1 + $0x4f0] sm:$0xff] }
  0xab   :  { %3622 = vmatprep.subr.bf16.mxu0 %v3621_v19  ;;  %v204_v19 = vld [vmem:[%s8760_s1 + $0x558] sm:$0xff]  ;;  %v3771_v23 = vpack.c.bf16 %v197_v15, %v191_v14  ;;  %v3643_v24 = vpack.c.bf16 %v987_v18, %v981_v13  ;;  %v3789_v13 = vpack.c.bf16 %v258_v8, %v252_v7  ;;  %v1041_v14 = vld [vmem:[%s8760_s1 + $0x1f80] sm:$0xff]  ;;  %v251_v15 = vld [vmem:[%s8760_s1 + $0x6d0] sm:$0xff] }
  0xac   :  { %v1102_v7 = vld [vmem:[%s8760_s1 + $0x2168] sm:$0xff]  ;;  %v1108_v8 = vld [vmem:[%s8760_s1 + $0x2198] sm:$0xff] }
  0xad   :  { %3752 = vmatpush1.bf16.msra.mxu1 %v3751_v25  ;;  %v3773_v25 = vpack.c.bf16 %v210_v20, %v204_v19  ;;  %v264_v19 = vld [vmem:[%s8760_s1 + $0x738] sm:$0xff]  ;;  %v270_v20 = vld [vmem:[%s8760_s1 + $0x768] sm:$0xff] }
  0xae   :  { %3624 = vmatpush1.bf16.msra.mxu0 %v3623_v27  ;;  %3754 = vmatprep.subr.bf16.mxu1 %v3753_v28  ;;  %v993_v27 = vld [vmem:[%s8760_s1 + $0x1e00] sm:$0xff]  ;;  %v203_v28 = vld [vmem:[%s8760_s1 + $0x550] sm:$0xff] }
  0xaf   :  { %3626 = vmatprep.subr.bf16.mxu0 %v3625_v32  ;;  %v216_v32 = vld [vmem:[%s8760_s1 + $0x5b8] sm:$0xff]  ;;  %v3775_v37 = vpack.c.bf16 %v209_v29, %v203_v28  ;;  %v263_v28 = vld [vmem:[%s8760_s1 + $0x730] sm:$0xff]  ;;  %v269_v29 = vld [vmem:[%s8760_s1 + $0x760] sm:$0xff] }
  0xb1   :  { %3756 = vmatpush1.bf16.msra.mxu1 %v3755_v38  ;;  %v3647_v38 = vpack.c.bf16 %v999_v31, %v993_v27  ;;  %v1053_v27 = vld [vmem:[%s8760_s1 + $0x1fe0] sm:$0xff]  ;;  %v1059_v31 = vld [vmem:[%s8760_s1 + $0x2010] sm:$0xff] }
  0xb2   :  { %3628 = vmatpush1.bf16.msra.mxu0 %v3627_v39  ;;  %3758 = vmatprep.subr.bf16.mxu1 %v3757_v40  ;;  %v3777_v39 = vpack.c.bf16 %v222_v33, %v216_v32  ;;  %v1005_v40 = vld [vmem:[%s8760_s1 + $0x1e60] sm:$0xff]  ;;  %v276_v32 = vld [vmem:[%s8760_s1 + $0x798] sm:$0xff]  ;;  %v282_v33 = vld [vmem:[%s8760_s1 + $0x7c8] sm:$0xff] }
  0xb3   :  { %3630 = vmatprep.subr.bf16.mxu0 %v3629_v44  ;;  %v1011_v44 = vld [vmem:[%s8760_s1 + $0x1e90] sm:$0xff] }
  0xb5   :  { %3760 = vmatpush1.bf16.msra.mxu1 %v3759_v51  ;;  %v3779_v51 = vpack.c.bf16 %v221_v42, %v215_v41  ;;  %v281_v41 = vld [vmem:[%s8760_s1 + $0x7c0] sm:$0xff]  ;;  %v3669_v42 = vpack.c.bf16 %v1072_v35, %v1066_v34 }
  0xb6   :  { %3632 = vmatpush1.bf16.msra.mxu0 %v3631_v52  ;;  %3762 = vmatprep.subr.bf16.mxu1 %v3761_v53  ;;  %v3651_v52 = vpack.c.bf16 %v1011_v44, %v1005_v40  ;;  %v3781_v53 = vpack.c.bf16 %v234_v46, %v228_v45  ;;  %v275_v40 = vld [vmem:[%s8760_s1 + $0x790] sm:$0xff]  ;;  %v288_v44 = vld [vmem:[%s8760_s1 + $0x7f8] sm:$0xff]  ;;  %v294_v45 = vld [vmem:[%s8760_s1 + $0x828] sm:$0xff] }
  0xb7   :  { %3634 = vmatprep.subr.bf16.mxu0 %v3633_v57  ;;  %v3653_v57 = vpack.c.bf16 %v1024_v49, %v1018_v47  ;;  %v1078_v46 = vld [vmem:[%s8760_s1 + $0x20a8] sm:$0xff]  ;;  %v1084_v47 = vld [vmem:[%s8760_s1 + $0x20d8] sm:$0xff]  ;;  %v3799_v49 = vpack.c.bf16 %v281_v41, %v275_v40  ;;  %v1131_v41 = vld [vmem:[%s8760_s1 + $0x2250] sm:$0xff] }
  0xb9   :  { %3764 = vmatpush1.bf16.msra.mxu1 %v3763_v63  ;;  %v3783_v63 = vpack.c.bf16 %v233_v56, %v227_v55  ;;  %v3673_v55 = vpack.c.bf16 %v1084_v47, %v1078_v46  ;;  %v1083_v56 = vld [vmem:[%s8760_s1 + $0x20d0] sm:$0xff] }
  0xba   :  { %3636 = vmatpush1.bf16.msra.mxu0 %v3635_v0  ;;  %3766 = vmatprep.subr.bf16.mxu1 %v3765_v1  ;;  %v3655_v0 = vpack.c.bf16 %v1023_v58, %v1017_v54  ;;  %v3785_v1 = vpack.c.bf16 %v246_v60, %v240_v59  ;;  %v293_v54 = vld [vmem:[%s8760_s1 + $0x820] sm:$0xff]  ;;  %v306_v58 = vld [vmem:[%s8760_s1 + $0x888] sm:$0xff]  ;;  %v1096_v60 = vld [vmem:[%s8760_s1 + $0x2138] sm:$0xff] }
  0xbb   :  { %3638 = vmatprep.subr.bf16.mxu0 %v3637_v5  ;;  %v3657_v5 = vpack.c.bf16 %v1036_v62, %v1030_v61  ;;  %v1090_v59 = vld [vmem:[%s8760_s1 + $0x2108] sm:$0xff] }
  0xbd   :  { %3768 = vmatpush1.bf16.msra.mxu1 %v3767_v10  ;;  %v1048_v10 = vld [vmem:[%s8760_s1 + $0x1fb8] sm:$0xff] }
  0xbe   :  { %3640 = vmatpush1.bf16.msra.mxu0 %v3639_v11  ;;  %3770 = vmatprep.subr.bf16.mxu1 %v3769_v12  ;;  %v3787_v11 = vpack.c.bf16 %v245_v4, %v239_v3  ;;  %v3659_v12 = vpack.c.bf16 %v1035_v6, %v1029_v2  ;;  %v3661_v18 = vpack.c.bf16 %v1048_v10, %v1042_v16  ;;  %v305_v2 = vld [vmem:[%s8760_s1 + $0x880] sm:$0xff]  ;;  %v1095_v4 = vld [vmem:[%s8760_s1 + $0x2130] sm:$0xff]  ;;  %v318_v6 = vld [vmem:[%s8760_s1 + $0x8e8] sm:$0xff] }
  0xbf   :  { %3642 = vmatprep.subr.bf16.mxu0 %v3641_v17  ;;  %v257_v17 = vld [vmem:[%s8760_s1 + $0x700] sm:$0xff]  ;;  %v3677_v3 = vpack.c.bf16 %v1096_v60, %v1090_v59 }
  0xc1   :  { %3772 = vmatpush1.bf16.msra.mxu1 %v3771_v23  ;;  %v3791_v23 = vpack.c.bf16 %v257_v17, %v251_v15  ;;  %v3681_v15 = vpack.c.bf16 %v1108_v8, %v1102_v7  ;;  %v1107_v17 = vld [vmem:[%s8760_s1 + $0x2190] sm:$0xff] }
  0xc2   :  { %3644 = vmatpush1.bf16.msra.mxu0 %v3643_v24  ;;  %3774 = vmatprep.subr.bf16.mxu1 %v3773_v25  ;;  %v3793_v25 = vpack.c.bf16 %v270_v20, %v264_v19  ;;  %v1114_v19 = vld [vmem:[%s8760_s1 + $0x21c8] sm:$0xff]  ;;  %v1120_v20 = vld [vmem:[%s8760_s1 + $0x21f8] sm:$0xff] }
  0xc3   :  { %3646 = vmatprep.subr.bf16.mxu0 %v3645_v30  ;;  %v3665_v30 = vpack.c.bf16 %v1060_v22, %v1054_v21 }
  0xc5   :  { %1594 = vmatmul.mubr.f32.vlgmr.msra.gmra.mrb[0].mxu0 %v28_v36  ;;  %3776 = vmatpush1.bf16.msra.mxu1 %v3775_v37  ;;  %v3795_v36 = vpack.c.bf16 %v269_v29, %v263_v28  ;;  %v3667_v37 = vpack.c.bf16 %v1059_v31, %v1053_v27  ;;  %v329_v27 = vld [vmem:[%s8760_s1 + $0x940] sm:$0xff]  ;;  %v3685_v28 = vpack.c.bf16 %v1120_v20, %v1114_v19  ;;  %v1119_v29 = vld [vmem:[%s8760_s1 + $0x21f0] sm:$0xff]  ;;  %v342_v31 = vld [vmem:[%s8760_s1 + $0x9a8] sm:$0xff] }
  0xc6   :  { %3648 = vmatpush1.bf16.msra.mxu0 %v3647_v38  ;;  %3778 = vmatprep.subr.bf16.mxu1 %v3777_v39  ;;  %v3797_v38 = vpack.c.bf16 %v282_v33, %v276_v32  ;;  %v1065_v39 = vld [vmem:[%s8760_s1 + $0x2040] sm:$0xff]  ;;  %v1126_v32 = vld [vmem:[%s8760_s1 + $0x2228] sm:$0xff]  ;;  %v1132_v33 = vld [vmem:[%s8760_s1 + $0x2258] sm:$0xff] }
  0xc7   :  { %3650 = vmatprep.subr.bf16.mxu0 %v3649_v43  ;;  %1664 = vmatprep.mubr.f32.mxu0 %v31_v50  ;;  %v1071_v43 = vld [vmem:[%s8760_s1 + $0x2070] sm:$0xff]  ;;  %v3689_v40 = vpack.c.bf16 %v1132_v33, %v1126_v32 }
  0xc8   :  { %v3671_v50 = vpack.c.bf16 %v1071_v43, %v1065_v39  ;;  %v341_v39 = vld [vmem:[%s8760_s1 + $0x9a0] sm:$0xff]  ;;  %v354_v43 = vld [vmem:[%s8760_s1 + $0xa08] sm:$0xff] }
  0xc9   :  { %3780 = vmatpush1.bf16.msra.mxu1 %v3779_v51  ;;  %v3801_v51 = vpack.c.bf16 %v294_v45, %v288_v44  ;;  %v1138_v44 = vld [vmem:[%s8760_s1 + $0x2288] sm:$0xff]  ;;  %v1144_v45 = vld [vmem:[%s8760_s1 + $0x22b8] sm:$0xff] }
  0xca   :  { %3652 = vmatpush1.bf16.msra.mxu0 %v3651_v52  ;;  %3782 = vmatprep.subr.bf16.mxu1 %v3781_v53  ;;  %v1077_v52 = vld [vmem:[%s8760_s1 + $0x20a0] sm:$0xff]  ;;  %v287_v53 = vld [vmem:[%s8760_s1 + $0x7f0] sm:$0xff] }
  0xcb   :  { %3654 = vmatprep.subr.bf16.mxu0 %v3653_v57  ;;  %v300_v57 = vld [vmem:[%s8760_s1 + $0x858] sm:$0xff]  ;;  %v3803_v61 = vpack.c.bf16 %v293_v54, %v287_v53  ;;  %v3675_v62 = vpack.c.bf16 %v1083_v56, %v1077_v52  ;;  %v353_v52 = vld [vmem:[%s8760_s1 + $0xa00] sm:$0xff]  ;;  %v3693_v53 = vpack.c.bf16 %v1144_v45, %v1138_v44  ;;  %v1143_v54 = vld [vmem:[%s8760_s1 + $0x22b0] sm:$0xff] }
  0xcc   :  { %1807 = vmatmul.mubr.f32.vlgmr.msra.gmra.mrb[4].mxu1 %v6017_v9  ;;  %v366_v56 = vld [vmem:[%s8760_s1 + $0xa68] sm:$0xff]  ;;  %v30_v44 = vld [vmem:[%s8761_s0 + $0x50] sm:$0xff] }
  0xcd   :  { %3784 = vmatpush1.bf16.msra.mxu1 %v3783_v63  ;;  %1877 = vmatprep.mubr.f32.mxu1 %v5291_v26  ;;  %v1047_v26 = vld [vmem:[%s8760_s1 + $0x1fb0] sm:$0xff]  ;;  %v3805_v63 = vpack.c.bf16 %v306_v58, %v300_v57  ;;  %v1150_v57 = vld [vmem:[%s8760_s1 + $0x22e8] sm:$0xff]  ;;  %v1156_v58 = vld [vmem:[%s8760_s1 + $0x2318] sm:$0xff] }
  0xce   :  { %3656 = vmatpush1.bf16.msra.mxu0 %v3655_v0  ;;  %3786 = vmatprep.subr.bf16.mxu1 %v3785_v1  ;;  %v3663_v24 = vpack.c.bf16 %v1047_v26, %v1041_v14  ;;  %v1089_v0 = vld [vmem:[%s8760_s1 + $0x2100] sm:$0xff]  ;;  %v299_v1 = vld [vmem:[%s8760_s1 + $0x850] sm:$0xff]  ;;  %v330_v26 = vld [vmem:[%s8760_s1 + $0x948] sm:$0xff] }
  0xcf   :  { %3658 = vmatprep.subr.bf16.mxu0 %v3657_v5  ;;  %v312_v5 = vld [vmem:[%s8760_s1 + $0x8b8] sm:$0xff]  ;;  %v3807_v16 = vpack.c.bf16 %v305_v2, %v299_v1  ;;  %v3679_v10 = vpack.c.bf16 %v1095_v4, %v1089_v0  ;;  %v317_v14 = vld [vmem:[%s8760_s1 + $0x8e0] sm:$0xff]  ;;  %v3697_v1 = vpack.c.bf16 %v1156_v58, %v1150_v57  ;;  %v1155_v2 = vld [vmem:[%s8760_s1 + $0x2310] sm:$0xff] }
  0xd0   :  { %v365_v0 = vld [vmem:[%s8760_s1 + $0xa60] sm:$0xff]  ;;  %v378_v4 = vld [vmem:[%s8760_s1 + $0xac8] sm:$0xff]  ;;  %v68_v57 = vld [vmem:[%s8760_s1 + $0x118] sm:$0xff] }
  0xd1   :  { %3788 = vmatpush1.bf16.msra.mxu1 %v3787_v11  ;;  %v3809_v11 = vpack.c.bf16 %v318_v6, %v312_v5  ;;  %v1162_v5 = vld [vmem:[%s8760_s1 + $0x2348] sm:$0xff]  ;;  %v1168_v6 = vld [vmem:[%s8760_s1 + $0x2378] sm:$0xff] }
  0xd2   :  { %3660 = vmatpush1.bf16.msra.mxu0 %v3659_v12  ;;  %3790 = vmatprep.subr.bf16.mxu1 %v3789_v13  ;;  %v1101_v12 = vld [vmem:[%s8760_s1 + $0x2160] sm:$0xff]  ;;  %v311_v13 = vld [vmem:[%s8760_s1 + $0x8b0] sm:$0xff] }
  0xd3   :  { %3662 = vmatprep.subr.bf16.mxu0 %v3661_v18  ;;  %v324_v18 = vld [vmem:[%s8760_s1 + $0x918] sm:$0xff]  ;;  %v3811_v21 = vpack.c.bf16 %v317_v14, %v311_v13  ;;  %v3683_v22 = vpack.c.bf16 %v1107_v17, %v1101_v12  ;;  %v377_v12 = vld [vmem:[%s8760_s1 + $0xac0] sm:$0xff]  ;;  %v3701_v13 = vpack.c.bf16 %v1168_v6, %v1162_v5  ;;  %v1167_v14 = vld [vmem:[%s8760_s1 + $0x2370] sm:$0xff] }
  0xd4   :  { %v390_v17 = vld [vmem:[%s8760_s1 + $0xb28] sm:$0xff]  ;;  %v80_v6 = vld [vmem:[%s8760_s1 + $0x178] sm:$0xff] }
  0xd5   :  { %3792 = vmatpush1.bf16.msra.mxu1 %v3791_v23  ;;  %v3813_v23 = vpack.c.bf16 %v330_v26, %v324_v18  ;;  %v1174_v18 = vld [vmem:[%s8760_s1 + $0x23a8] sm:$0xff]  ;;  %v1180_v26 = vld [vmem:[%s8760_s1 + $0x23d8] sm:$0xff] }
  0xd6   :  { %3664 = vmatpush1.bf16.msra.mxu0 %v3663_v24  ;;  %3794 = vmatprep.subr.bf16.mxu1 %v3793_v25  ;;  %v1113_v24 = vld [vmem:[%s8760_s1 + $0x21c0] sm:$0xff]  ;;  %v323_v25 = vld [vmem:[%s8760_s1 + $0x910] sm:$0xff]  ;;  %v74_v5 = vld [vmem:[%s8760_s1 + $0x148] sm:$0xff] }
  0xd7   :  { %3666 = vmatprep.subr.bf16.mxu0 %v3665_v30  ;;  %v336_v30 = vld [vmem:[%s8760_s1 + $0x978] sm:$0xff]  ;;  %v3815_v34 = vpack.c.bf16 %v329_v27, %v323_v25  ;;  %v3687_v35 = vpack.c.bf16 %v1119_v29, %v1113_v24  ;;  %v389_v24 = vld [vmem:[%s8760_s1 + $0xb20] sm:$0xff]  ;;  %v3705_v25 = vpack.c.bf16 %v1180_v26, %v1174_v18  ;;  %v1179_v27 = vld [vmem:[%s8760_s1 + $0x23d0] sm:$0xff] }
  0xd8   :  { %v402_v29 = vld [vmem:[%s8760_s1 + $0xb88] sm:$0xff]  ;;  %v6414_v18 = vld [vmem:[%s8761_s0 + $0x10] sm:$0xff] }
  0xd9   :  { %3796 = vmatpush1.bf16.msra.mxu1 %v3795_v36  ;;  %v3817_v36 = vpack.c.bf16 %v342_v31, %v336_v30  ;;  %v38_v30 = vld [vmem:[%s8760_s1 + $0x28] sm:$0xff]  ;;  %v44_v31 = vld [vmem:[%s8760_s1 + $0x58] sm:$0xff] }
  0xda   :  { %3668 = vmatpush1.bf16.msra.mxu0 %v3667_v37  ;;  %3798 = vmatprep.subr.bf16.mxu1 %v3797_v38  ;;  %v1125_v37 = vld [vmem:[%s8760_s1 + $0x2220] sm:$0xff]  ;;  %v335_v38 = vld [vmem:[%s8760_s1 + $0x970] sm:$0xff]  ;;  %v86_v26 = vld [vmem:[%s8760_s1 + $0x1a8] sm:$0xff] }
  0xdb   :  { %3670 = vmatprep.subr.bf16.mxu0 %v3669_v42  ;;  %v348_v42 = vld [vmem:[%s8760_s1 + $0x9d8] sm:$0xff]  ;;  %v3819_v46 = vpack.c.bf16 %v341_v39, %v335_v38  ;;  %v3691_v47 = vpack.c.bf16 %v1131_v41, %v1125_v37  ;;  %v37_v37 = vld [vmem:[%s8760_s1 + $0x20] sm:$0xff]  ;;  %v4109_v38 = vpack.c.bf16 %v44_v31, %v38_v30  ;;  %v43_v39 = vld [vmem:[%s8760_s1 + $0x50] sm:$0xff] }
  0xdc   :  { %v414_v41 = vld [vmem:[%s8760_s1 + $0xbe8] sm:$0xff]  ;;  %v456_v30 = vld [vmem:[%s8760_s1 + $0xd38] sm:$0xff] }
  0xdd   :  { %3800 = vmatpush1.bf16.msra.mxu1 %v3799_v49  ;;  %v3821_v49 = vpack.c.bf16 %v354_v43, %v348_v42  ;;  %v50_v42 = vld [vmem:[%s8760_s1 + $0x88] sm:$0xff]  ;;  %v56_v43 = vld [vmem:[%s8760_s1 + $0xb8] sm:$0xff] }
  0xde   :  { %3672 = vmatpush1.bf16.msra.mxu0 %v3671_v50  ;;  %3802 = vmatprep.subr.bf16.mxu1 %v3801_v51  ;;  %v1137_v50 = vld [vmem:[%s8760_s1 + $0x2280] sm:$0xff]  ;;  %v347_v51 = vld [vmem:[%s8760_s1 + $0x9d0] sm:$0xff]  ;;  %v462_v31 = vld [vmem:[%s8760_s1 + $0xd68] sm:$0xff] }
  0xdf   :  { %3674 = vmatprep.subr.bf16.mxu0 %v3673_v55  ;;  %v360_v55 = vld [vmem:[%s8760_s1 + $0xa38] sm:$0xff]  ;;  %v3823_v59 = vpack.c.bf16 %v353_v52, %v347_v51  ;;  %v3695_v60 = vpack.c.bf16 %v1143_v54, %v1137_v50  ;;  %v413_v50 = vld [vmem:[%s8760_s1 + $0xbe0] sm:$0xff]  ;;  %v4113_v52 = vpack.c.bf16 %v56_v43, %v50_v42  ;;  %v474_v43 = vld [vmem:[%s8760_s1 + $0xdc8] sm:$0xff] }
  0xe0   :  { %v49_v51 = vld [vmem:[%s8760_s1 + $0x80] sm:$0xff]  ;;  %v420_v54 = vld [vmem:[%s8760_s1 + $0xc18] sm:$0xff] }
  0xe1   :  { %3804 = vmatpush1.bf16.msra.mxu1 %v3803_v61  ;;  %v3825_v61 = vpack.c.bf16 %v366_v56, %v360_v55  ;;  %v426_v55 = vld [vmem:[%s8760_s1 + $0xc48] sm:$0xff]  ;;  %v468_v42 = vld [vmem:[%s8760_s1 + $0xd98] sm:$0xff] }
  0xe2   :  { %3676 = vmatpush1.bf16.msra.mxu0 %v3675_v62  ;;  %3806 = vmatprep.subr.bf16.mxu1 %v3805_v63  ;;  %v1149_v62 = vld [vmem:[%s8760_s1 + $0x22e0] sm:$0xff]  ;;  %v359_v63 = vld [vmem:[%s8760_s1 + $0xa30] sm:$0xff]  ;;  %v62_v56 = vld [vmem:[%s8760_s1 + $0xe8] sm:$0xff] }
  0xe3   :  { %3678 = vmatprep.subr.bf16.mxu0 %v3677_v3  ;;  %v372_v3 = vld [vmem:[%s8760_s1 + $0xa98] sm:$0xff]  ;;  %v3827_v7 = vpack.c.bf16 %v365_v0, %v359_v63  ;;  %v3699_v8 = vpack.c.bf16 %v1155_v2, %v1149_v62  ;;  %v425_v62 = vld [vmem:[%s8760_s1 + $0xc40] sm:$0xff]  ;;  %v4117_v0 = vpack.c.bf16 %v68_v57, %v62_v56  ;;  %v486_v56 = vld [vmem:[%s8760_s1 + $0xe28] sm:$0xff] }
  0xe4   :  { %v61_v63 = vld [vmem:[%s8760_s1 + $0xe0] sm:$0xff]  ;;  %v432_v2 = vld [vmem:[%s8760_s1 + $0xc78] sm:$0xff]  ;;  %v122_v57 = vld [vmem:[%s8760_s1 + $0x2c8] sm:$0xff] }
  0xe5   :  { %3808 = vmatpush1.bf16.msra.mxu1 %v3807_v16  ;;  %v3829_v16 = vpack.c.bf16 %v378_v4, %v372_v3  ;;  %v438_v3 = vld [vmem:[%s8760_s1 + $0xca8] sm:$0xff] }
  0xe6   :  { %3680 = vmatpush1.bf16.msra.mxu0 %v3679_v10  ;;  %3810 = vmatprep.subr.bf16.mxu1 %v3809_v11  ;;  %v1161_v10 = vld [vmem:[%s8760_s1 + $0x2340] sm:$0xff]  ;;  %v371_v11 = vld [vmem:[%s8760_s1 + $0xa90] sm:$0xff]  ;;  %v4666_v4 = vld [vmem:[%s8761_s0 + $0x8] sm:$0xff] }
  0xe7   :  { %3682 = vmatprep.subr.bf16.mxu0 %v3681_v15  ;;  %v384_v15 = vld [vmem:[%s8760_s1 + $0xaf8] sm:$0xff]  ;;  %v3831_v19 = vpack.c.bf16 %v377_v12, %v371_v11  ;;  %v3703_v20 = vpack.c.bf16 %v1167_v14, %v1161_v10  ;;  %v431_v10 = vld [vmem:[%s8760_s1 + $0xc70] sm:$0xff]  ;;  %v437_v11 = vld [vmem:[%s8760_s1 + $0xca0] sm:$0xff] }
  0xe8   :  { %v73_v12 = vld [vmem:[%s8760_s1 + $0x140] sm:$0xff]  ;;  %v79_v14 = vld [vmem:[%s8760_s1 + $0x170] sm:$0xff] }
  0xe9   :  { %3812 = vmatpush1.bf16.msra.mxu1 %v3811_v21  ;;  %v3833_v21 = vpack.c.bf16 %v390_v17, %v384_v15  ;;  %v444_v15 = vld [vmem:[%s8760_s1 + $0xcd8] sm:$0xff]  ;;  %v450_v17 = vld [vmem:[%s8760_s1 + $0xd08] sm:$0xff] }
  0xea   :  { %3684 = vmatpush1.bf16.msra.mxu0 %v3683_v22  ;;  %3814 = vmatprep.subr.bf16.mxu1 %v3813_v23  ;;  %v1173_v22 = vld [vmem:[%s8760_s1 + $0x23a0] sm:$0xff]  ;;  %v383_v23 = vld [vmem:[%s8760_s1 + $0xaf0] sm:$0xff] }
  0xeb   :  { %3686 = vmatprep.subr.bf16.mxu0 %v3685_v28  ;;  %v396_v28 = vld [vmem:[%s8760_s1 + $0xb58] sm:$0xff]  ;;  %v3835_v32 = vpack.c.bf16 %v389_v24, %v383_v23  ;;  %v3707_v33 = vpack.c.bf16 %v1179_v27, %v1173_v22  ;;  %v4123_v22 = vpack.c.bf16 %v79_v14, %v73_v12  ;;  %v3853_v23 = vpack.c.bf16 %v450_v17, %v444_v15  ;;  %v443_v24 = vld [vmem:[%s8760_s1 + $0xcd0] sm:$0xff]  ;;  %v85_v27 = vld [vmem:[%s8760_s1 + $0x1a0] sm:$0xff] }
  0xec   :  { %v133_v12 = vld [vmem:[%s8760_s1 + $0x320] sm:$0xff]  ;;  %v139_v14 = vld [vmem:[%s8760_s1 + $0x350] sm:$0xff]  ;;  %v504_v15 = vld [vmem:[%s8760_s1 + $0xeb8] sm:$0xff] }
  0xed   :  { %3816 = vmatpush1.bf16.msra.mxu1 %v3815_v34  ;;  %v3837_v34 = vpack.c.bf16 %v402_v29, %v396_v28  ;;  %v91_v29 = vld [vmem:[%s8760_s1 + $0x1d0] sm:$0xff]  ;;  %v510_v17 = vld [vmem:[%s8760_s1 + $0xee8] sm:$0xff] }
  0xee   :  { %3688 = vmatpush1.bf16.msra.mxu0 %v3687_v35  ;;  %3818 = vmatprep.subr.bf16.mxu1 %v3817_v36  ;;  %v395_v35 = vld [vmem:[%s8760_s1 + $0xb50] sm:$0xff]  ;;  %v401_v36 = vld [vmem:[%s8760_s1 + $0xb80] sm:$0xff] }
  0xef   :  { %3690 = vmatprep.subr.bf16.mxu0 %v3689_v40  ;;  %v408_v40 = vld [vmem:[%s8760_s1 + $0xbb8] sm:$0xff]  ;;  %v3839_v45 = vpack.c.bf16 %v401_v36, %v395_v35  ;;  %v4127_v35 = vpack.c.bf16 %v91_v29, %v85_v27  ;;  %v3857_v36 = vpack.c.bf16 %v462_v31, %v456_v30  ;;  %v145_v27 = vld [vmem:[%s8760_s1 + $0x380] sm:$0xff]  ;;  %v151_v29 = vld [vmem:[%s8760_s1 + $0x3b0] sm:$0xff] }
  0xf0   :  { %v516_v30 = vld [vmem:[%s8760_s1 + $0xf18] sm:$0xff]  ;;  %v522_v31 = vld [vmem:[%s8760_s1 + $0xf48] sm:$0xff] }
  0xf1   :  { %3820 = vmatpush1.bf16.msra.mxu1 %v3819_v46  ;;  %v4111_v46 = vpack.c.bf16 %v43_v39, %v37_v37  ;;  %v455_v37 = vld [vmem:[%s8760_s1 + $0xd30] sm:$0xff]  ;;  %v97_v39 = vld [vmem:[%s8760_s1 + $0x200] sm:$0xff] }
  0xf2   :  { %3692 = vmatpush1.bf16.msra.mxu0 %v3691_v47  ;;  %3822 = vmatprep.subr.bf16.mxu1 %v3821_v49  ;;  %v3841_v47 = vpack.c.bf16 %v414_v41, %v408_v40  ;;  %v407_v49 = vld [vmem:[%s8760_s1 + $0xbb0] sm:$0xff] }
  0xf3   :  { %3694 = vmatprep.subr.bf16.mxu0 %v3693_v53  ;;  %v55_v53 = vld [vmem:[%s8760_s1 + $0xb0] sm:$0xff]  ;;  %v3843_v58 = vpack.c.bf16 %v413_v50, %v407_v49  ;;  %v3861_v49 = vpack.c.bf16 %v474_v43, %v468_v42  ;;  %v528_v42 = vld [vmem:[%s8760_s1 + $0xf78] sm:$0xff]  ;;  %v534_v43 = vld [vmem:[%s8760_s1 + $0xfa8] sm:$0xff] }
  0xf4   :  { %v103_v41 = vld [vmem:[%s8760_s1 + $0x230] sm:$0xff] }
  0xf5   :  { %3824 = vmatpush1.bf16.msra.mxu1 %v3823_v59  ;;  %v4115_v59 = vpack.c.bf16 %v55_v53, %v49_v51  ;;  %v467_v50 = vld [vmem:[%s8760_s1 + $0xd90] sm:$0xff]  ;;  %v473_v51 = vld [vmem:[%s8760_s1 + $0xdc0] sm:$0xff] }
  0xf6   :  { %3696 = vmatpush1.bf16.msra.mxu0 %v3695_v60  ;;  %3826 = vmatprep.subr.bf16.mxu1 %v3825_v61  ;;  %v3845_v60 = vpack.c.bf16 %v426_v55, %v420_v54  ;;  %v419_v61 = vld [vmem:[%s8760_s1 + $0xc10] sm:$0xff]  ;;  %v480_v55 = vld [vmem:[%s8760_s1 + $0xdf8] sm:$0xff] }
  0xf7   :  { %3698 = vmatprep.subr.bf16.mxu0 %v3697_v1  ;;  %v67_v1 = vld [vmem:[%s8760_s1 + $0x110] sm:$0xff] }
  0xf8   :  { %v115_v54 = vld [vmem:[%s8760_s1 + $0x290] sm:$0xff] }
  0xf9   :  { %3828 = vmatpush1.bf16.msra.mxu1 %v3827_v7  ;;  %v3847_v7 = vpack.c.bf16 %v425_v62, %v419_v61  ;;  %v3865_v61 = vpack.c.bf16 %v486_v56, %v480_v55  ;;  %v479_v62 = vld [vmem:[%s8760_s1 + $0xdf0] sm:$0xff]  ;;  %v540_v55 = vld [vmem:[%s8760_s1 + $0xfd8] sm:$0xff]  ;;  %v546_v56 = vld [vmem:[%s8760_s1 + $0x1008] sm:$0xff] }
  0xfa   :  { %3700 = vmatpush1.bf16.msra.mxu0 %v3699_v8  ;;  %3830 = vmatprep.subr.bf16.mxu1 %v3829_v16  ;;  %v4119_v8 = vpack.c.bf16 %v67_v1, %v61_v63  ;;  %v3849_v16 = vpack.c.bf16 %v438_v3, %v432_v2  ;;  %v485_v63 = vld [vmem:[%s8760_s1 + $0xe20] sm:$0xff]  ;;  %v127_v2 = vld [vmem:[%s8760_s1 + $0x2f0] sm:$0xff]  ;;  %v492_v3 = vld [vmem:[%s8760_s1 + $0xe58] sm:$0xff] }
  0xfb   :  { %3702 = vmatprep.subr.bf16.mxu0 %v3701_v13  ;;  %v4121_v13 = vpack.c.bf16 %v80_v6, %v74_v5  ;;  %v134_v5 = vld [vmem:[%s8760_s1 + $0x328] sm:$0xff]  ;;  %v140_v6 = vld [vmem:[%s8760_s1 + $0x358] sm:$0xff] }
  0xfd   :  { %3832 = vmatpush1.bf16.msra.mxu1 %v3831_v19  ;;  %v92_v19 = vld [vmem:[%s8760_s1 + $0x1d8] sm:$0xff] }
  0xfe   :  { %3704 = vmatpush1.bf16.msra.mxu0 %v3703_v20  ;;  %3834 = vmatprep.subr.bf16.mxu1 %v3833_v21  ;;  %v3851_v20 = vpack.c.bf16 %v437_v11, %v431_v10  ;;  %v6426_v21 = vld [vmem:[%s8761_s0 + $0x28] sm:$0xff]  ;;  %v4125_v28 = vpack.c.bf16 %v92_v19, %v86_v26  ;;  %v491_v10 = vld [vmem:[%s8760_s1 + $0xe50] sm:$0xff]  ;;  %v497_v11 = vld [vmem:[%s8760_s1 + $0xe80] sm:$0xff] }
  0xff   :  { %3706 = vmatprep.subr.bf16.mxu0 %v3705_v25  ;;  %v449_v25 = vld [vmem:[%s8760_s1 + $0xd00] sm:$0xff]  ;;  %v146_v26 = vld [vmem:[%s8760_s1 + $0x388] sm:$0xff]  ;;  %v152_v19 = vld [vmem:[%s8760_s1 + $0x3b8] sm:$0xff] }
 0x101   :  { %3836 = vmatpush1.bf16.msra.mxu1 %v3835_v32  ;;  %v98_v32 = vld [vmem:[%s8760_s1 + $0x208] sm:$0xff] }
 0x102   :  { %3708 = vmatpush1.bf16.msra.mxu0 %v3707_v33  ;;  %3838 = vmatprep.subr.bf16.mxu1 %v3837_v34  ;;  %v104_v33 = vld [vmem:[%s8760_s1 + $0x238] sm:$0xff]  ;;  %v3855_v34 = vpack.c.bf16 %v449_v25, %v443_v24  ;;  %v503_v24 = vld [vmem:[%s8760_s1 + $0xeb0] sm:$0xff]  ;;  %v509_v25 = vld [vmem:[%s8760_s1 + $0xee0] sm:$0xff] }
 0x103   :  { %4110 = vmatprep.subr.bf16.mxu0 %v4109_v38  ;;  %v461_v38 = vld [vmem:[%s8760_s1 + $0xd60] sm:$0xff]  ;;  %v4129_v40 = vpack.c.bf16 %v104_v33, %v98_v32  ;;  %v158_v32 = vld [vmem:[%s8760_s1 + $0x3e8] sm:$0xff]  ;;  %v164_v33 = vld [vmem:[%s8760_s1 + $0x418] sm:$0xff] }
 0x105   :  { %1665 = vmatmul.mubr.f32.vlgmr.msra.gmra.mrb[0].mxu0 %v30_v44  ;;  %3840 = vmatpush1.bf16.msra.mxu1 %v3839_v45  ;;  %v110_v44 = vld [vmem:[%s8760_s1 + $0x268] sm:$0xff]  ;;  %v116_v45 = vld [vmem:[%s8760_s1 + $0x298] sm:$0xff] }
 0x106   :  { %4112 = vmatpush1.bf16.msra.mxu0 %v4111_v46  ;;  %3842 = vmatprep.subr.bf16.mxu1 %v3841_v47  ;;  %v3859_v46 = vpack.c.bf16 %v461_v38, %v455_v37  ;;  %v4131_v47 = vpack.c.bf16 %v103_v41, %v97_v39  ;;  %v4133_v53 = vpack.c.bf16 %v116_v45, %v110_v44  ;;  %v515_v37 = vld [vmem:[%s8760_s1 + $0xf10] sm:$0xff]  ;;  %v521_v38 = vld [vmem:[%s8760_s1 + $0xf40] sm:$0xff]  ;;  %v170_v44 = vld [vmem:[%s8760_s1 + $0x448] sm:$0xff] }
 0x107   :  { %4114 = vmatprep.subr.bf16.mxu0 %v4113_v52  ;;  %2303 = vmatprep.mubr.f32.mxu0 %v4666_v4  ;;  %v109_v52 = vld [vmem:[%s8760_s1 + $0x260] sm:$0xff]  ;;  %v498_v4 = vld [vmem:[%s8760_s1 + $0xe88] sm:$0xff]  ;;  %v163_v41 = vld [vmem:[%s8760_s1 + $0x410] sm:$0xff] }
 0x108   :  { %v157_v39 = vld [vmem:[%s8760_s1 + $0x3e0] sm:$0xff]  ;;  %v176_v45 = vld [vmem:[%s8760_s1 + $0x478] sm:$0xff] }
 0x109   :  { %3844 = vmatpush1.bf16.msra.mxu1 %v3843_v58  ;;  %v128_v58 = vld [vmem:[%s8760_s1 + $0x2f8] sm:$0xff] }
 0x10a   :  { %4116 = vmatpush1.bf16.msra.mxu0 %v4115_v59  ;;  %3846 = vmatprep.subr.bf16.mxu1 %v3845_v60  ;;  %v3863_v59 = vpack.c.bf16 %v473_v51, %v467_v50  ;;  %v4135_v60 = vpack.c.bf16 %v115_v54, %v109_v52  ;;  %v4137_v1 = vpack.c.bf16 %v128_v58, %v122_v57  ;;  %v527_v50 = vld [vmem:[%s8760_s1 + $0xf70] sm:$0xff]  ;;  %v533_v51 = vld [vmem:[%s8760_s1 + $0xfa0] sm:$0xff]  ;;  %v182_v57 = vld [vmem:[%s8760_s1 + $0x4a8] sm:$0xff] }
 0x10b   :  { %4118 = vmatprep.subr.bf16.mxu0 %v4117_v0  ;;  %v121_v0 = vld [vmem:[%s8760_s1 + $0x2c0] sm:$0xff]  ;;  %v175_v54 = vld [vmem:[%s8760_s1 + $0x470] sm:$0xff]  ;;  %v188_v58 = vld [vmem:[%s8760_s1 + $0x4d8] sm:$0xff] }
 0x10c   :  { %1878 = vmatmul.mubr.f32.vlgmr.msra.gmra.mrb[4].mxu1 %v6414_v18  ;;  %v169_v52 = vld [vmem:[%s8760_s1 + $0x440] sm:$0xff] }
 0x10d   :  { %3848 = vmatpush1.bf16.msra.mxu1 %v3847_v7  ;;  %1948 = vmatprep.mubr.f32.mxu1 %v6426_v21  ;;  %v3867_v7 = vpack.c.bf16 %v485_v63, %v479_v62  ;;  %v539_v62 = vld [vmem:[%s8760_s1 + $0xfd0] sm:$0xff]  ;;  %v545_v63 = vld [vmem:[%s8760_s1 + $0x1000] sm:$0xff] }
 0x10e   :  { %4120 = vmatpush1.bf16.msra.mxu0 %v4119_v8  ;;  %3850 = vmatprep.subr.bf16.mxu1 %v3849_v16  ;;  %v4139_v8 = vpack.c.bf16 %v127_v2, %v121_v0  ;;  %v3869_v16 = vpack.c.bf16 %v498_v4, %v492_v3  ;;  %v181_v0 = vld [vmem:[%s8760_s1 + $0x4a0] sm:$0xff]  ;;  %v187_v2 = vld [vmem:[%s8760_s1 + $0x4d0] sm:$0xff]  ;;  %v552_v3 = vld [vmem:[%s8760_s1 + $0x1038] sm:$0xff] }
 0x10f   :  { %4122 = vmatprep.subr.bf16.mxu0 %v4121_v13  ;;  %v4141_v13 = vpack.c.bf16 %v140_v6, %v134_v5  ;;  %v558_v4 = vld [vmem:[%s8760_s1 + $0x1068] sm:$0xff]  ;;  %v200_v6 = vld [vmem:[%s8760_s1 + $0x538] sm:$0xff] }
 0x110   :  { %v194_v5 = vld [vmem:[%s8760_s1 + $0x508] sm:$0xff] }
 0x111   :  { %3852 = vmatpush1.bf16.msra.mxu1 %v3851_v20  ;;  %v3871_v20 = vpack.c.bf16 %v497_v11, %v491_v10  ;;  %v551_v10 = vld [vmem:[%s8760_s1 + $0x1030] sm:$0xff]  ;;  %v557_v11 = vld [vmem:[%s8760_s1 + $0x1060] sm:$0xff] }
 0x112   :  { %4124 = vmatpush1.bf16.msra.mxu0 %v4123_v22  ;;  %3854 = vmatprep.subr.bf16.mxu1 %v3853_v23  ;;  %v4143_v22 = vpack.c.bf16 %v139_v14, %v133_v12  ;;  %v3873_v23 = vpack.c.bf16 %v510_v17, %v504_v15  ;;  %v193_v12 = vld [vmem:[%s8760_s1 + $0x500] sm:$0xff]  ;;  %v199_v14 = vld [vmem:[%s8760_s1 + $0x530] sm:$0xff]  ;;  %v564_v15 = vld [vmem:[%s8760_s1 + $0x1098] sm:$0xff] }
 0x113   :  { %4126 = vmatprep.subr.bf16.mxu0 %v4125_v28  ;;  %v4145_v28 = vpack.c.bf16 %v152_v19, %v146_v26  ;;  %v570_v17 = vld [vmem:[%s8760_s1 + $0x10c8] sm:$0xff]  ;;  %v212_v19 = vld [vmem:[%s8760_s1 + $0x598] sm:$0xff] }
 0x114   :  { %v206_v26 = vld [vmem:[%s8760_s1 + $0x568] sm:$0xff] }
 0x115   :  { %3856 = vmatpush1.bf16.msra.mxu1 %v3855_v34  ;;  %v3875_v34 = vpack.c.bf16 %v509_v25, %v503_v24  ;;  %v563_v24 = vld [vmem:[%s8760_s1 + $0x1090] sm:$0xff]  ;;  %v569_v25 = vld [vmem:[%s8760_s1 + $0x10c0] sm:$0xff] }
 0x116   :  { %4128 = vmatpush1.bf16.msra.mxu0 %v4127_v35  ;;  %3858 = vmatprep.subr.bf16.mxu1 %v3857_v36  ;;  %v4147_v35 = vpack.c.bf16 %v151_v29, %v145_v27  ;;  %v3877_v36 = vpack.c.bf16 %v522_v31, %v516_v30  ;;  %v205_v27 = vld [vmem:[%s8760_s1 + $0x560] sm:$0xff]  ;;  %v211_v29 = vld [vmem:[%s8760_s1 + $0x590] sm:$0xff]  ;;  %v576_v30 = vld [vmem:[%s8760_s1 + $0x10f8] sm:$0xff] }
 0x117   :  { %4130 = vmatprep.subr.bf16.mxu0 %v4129_v40  ;;  %v4149_v40 = vpack.c.bf16 %v164_v33, %v158_v32  ;;  %v582_v31 = vld [vmem:[%s8760_s1 + $0x1128] sm:$0xff]  ;;  %v224_v33 = vld [vmem:[%s8760_s1 + $0x5f8] sm:$0xff] }
 0x118   :  { %v218_v32 = vld [vmem:[%s8760_s1 + $0x5c8] sm:$0xff] }
 0x119   :  { %3860 = vmatpush1.bf16.msra.mxu1 %v3859_v46  ;;  %v3879_v46 = vpack.c.bf16 %v521_v38, %v515_v37  ;;  %v575_v37 = vld [vmem:[%s8760_s1 + $0x10f0] sm:$0xff]  ;;  %v581_v38 = vld [vmem:[%s8760_s1 + $0x1120] sm:$0xff] }
 0x11a   :  { %4132 = vmatpush1.bf16.msra.mxu0 %v4131_v47  ;;  %3862 = vmatprep.subr.bf16.mxu1 %v3861_v49  ;;  %v4151_v47 = vpack.c.bf16 %v163_v41, %v157_v39  ;;  %v3881_v49 = vpack.c.bf16 %v534_v43, %v528_v42  ;;  %v217_v39 = vld [vmem:[%s8760_s1 + $0x5c0] sm:$0xff]  ;;  %v223_v41 = vld [vmem:[%s8760_s1 + $0x5f0] sm:$0xff]  ;;  %v588_v42 = vld [vmem:[%s8760_s1 + $0x1158] sm:$0xff] }
 0x11b   :  { %4134 = vmatprep.subr.bf16.mxu0 %v4133_v53  ;;  %v4153_v53 = vpack.c.bf16 %v176_v45, %v170_v44  ;;  %v594_v43 = vld [vmem:[%s8760_s1 + $0x1188] sm:$0xff]  ;;  %v236_v45 = vld [vmem:[%s8760_s1 + $0x658] sm:$0xff] }
 0x11c   :  { %v230_v44 = vld [vmem:[%s8760_s1 + $0x628] sm:$0xff] }
 0x11d   :  { %3864 = vmatpush1.bf16.msra.mxu1 %v3863_v59  ;;  %v3883_v59 = vpack.c.bf16 %v533_v51, %v527_v50  ;;  %v587_v50 = vld [vmem:[%s8760_s1 + $0x1150] sm:$0xff]  ;;  %v593_v51 = vld [vmem:[%s8760_s1 + $0x1180] sm:$0xff] }
 0x11e   :  { %4136 = vmatpush1.bf16.msra.mxu0 %v4135_v60  ;;  %3866 = vmatprep.subr.bf16.mxu1 %v3865_v61  ;;  %v4155_v60 = vpack.c.bf16 %v175_v54, %v169_v52  ;;  %v3885_v61 = vpack.c.bf16 %v546_v56, %v540_v55  ;;  %v229_v52 = vld [vmem:[%s8760_s1 + $0x620] sm:$0xff]  ;;  %v235_v54 = vld [vmem:[%s8760_s1 + $0x650] sm:$0xff]  ;;  %v600_v55 = vld [vmem:[%s8760_s1 + $0x11b8] sm:$0xff] }
 0x11f   :  { %4138 = vmatprep.subr.bf16.mxu0 %v4137_v1  ;;  %v4157_v1 = vpack.c.bf16 %v188_v58, %v182_v57  ;;  %v606_v56 = vld [vmem:[%s8760_s1 + $0x11e8] sm:$0xff]  ;;  %v248_v58 = vld [vmem:[%s8760_s1 + $0x6b8] sm:$0xff] }
 0x120   :  { %v242_v57 = vld [vmem:[%s8760_s1 + $0x688] sm:$0xff] }
 0x121   :  { %3868 = vmatpush1.bf16.msra.mxu1 %v3867_v7  ;;  %v3887_v7 = vpack.c.bf16 %v545_v63, %v539_v62  ;;  %v599_v62 = vld [vmem:[%s8760_s1 + $0x11b0] sm:$0xff]  ;;  %v605_v63 = vld [vmem:[%s8760_s1 + $0x11e0] sm:$0xff] }
 0x122   :  { %4140 = vmatpush1.bf16.msra.mxu0 %v4139_v8  ;;  %3870 = vmatprep.subr.bf16.mxu1 %v3869_v16  ;;  %v4159_v8 = vpack.c.bf16 %v187_v2, %v181_v0  ;;  %v3889_v16 = vpack.c.bf16 %v558_v4, %v552_v3  ;;  %v241_v0 = vld [vmem:[%s8760_s1 + $0x680] sm:$0xff]  ;;  %v247_v2 = vld [vmem:[%s8760_s1 + $0x6b0] sm:$0xff]  ;;  %v612_v3 = vld [vmem:[%s8760_s1 + $0x1218] sm:$0xff] }
 0x123   :  { %4142 = vmatprep.subr.bf16.mxu0 %v4141_v13  ;;  %v4161_v13 = vpack.c.bf16 %v200_v6, %v194_v5  ;;  %v618_v4 = vld [vmem:[%s8760_s1 + $0x1248] sm:$0xff]  ;;  %v260_v6 = vld [vmem:[%s8760_s1 + $0x718] sm:$0xff] }
 0x124   :  { %v254_v5 = vld [vmem:[%s8760_s1 + $0x6e8] sm:$0xff] }
 0x125   :  { %3872 = vmatpush1.bf16.msra.mxu1 %v3871_v20  ;;  %v3891_v20 = vpack.c.bf16 %v557_v11, %v551_v10  ;;  %v611_v10 = vld [vmem:[%s8760_s1 + $0x1210] sm:$0xff]  ;;  %v617_v11 = vld [vmem:[%s8760_s1 + $0x1240] sm:$0xff] }
 0x126   :  { %4144 = vmatpush1.bf16.msra.mxu0 %v4143_v22  ;;  %3874 = vmatprep.subr.bf16.mxu1 %v3873_v23  ;;  %v4163_v22 = vpack.c.bf16 %v199_v14, %v193_v12  ;;  %v3893_v23 = vpack.c.bf16 %v570_v17, %v564_v15  ;;  %v253_v12 = vld [vmem:[%s8760_s1 + $0x6e0] sm:$0xff]  ;;  %v624_v14 = vld [vmem:[%s8760_s1 + $0x1278] sm:$0xff]  ;;  %v630_v15 = vld [vmem:[%s8760_s1 + $0x12a8] sm:$0xff] }
 0x127   :  { %4146 = vmatprep.subr.bf16.mxu0 %v4145_v28  ;;  %v4165_v28 = vpack.c.bf16 %v212_v19, %v206_v26  ;;  %v4669_v17 = vld [vmem:[%s8761_s0 + $0x18] sm:$0xff]  ;;  %v266_v26 = vld [vmem:[%s8760_s1 + $0x748] sm:$0xff] }
 0x128   :  { %v272_v19 = vld [vmem:[%s8760_s1 + $0x778] sm:$0xff] }
 0x129   :  { %3876 = vmatpush1.bf16.msra.mxu1 %v3875_v34  ;;  %v3895_v34 = vpack.c.bf16 %v569_v25, %v563_v24  ;;  %v623_v24 = vld [vmem:[%s8760_s1 + $0x1270] sm:$0xff]  ;;  %v629_v25 = vld [vmem:[%s8760_s1 + $0x12a0] sm:$0xff] }
 0x12a   :  { %4148 = vmatpush1.bf16.msra.mxu0 %v4147_v35  ;;  %3878 = vmatprep.subr.bf16.mxu1 %v3877_v36  ;;  %v4167_v35 = vpack.c.bf16 %v211_v29, %v205_v27  ;;  %v3897_v36 = vpack.c.bf16 %v582_v31, %v576_v30  ;;  %v265_v27 = vld [vmem:[%s8760_s1 + $0x740] sm:$0xff]  ;;  %v271_v29 = vld [vmem:[%s8760_s1 + $0x770] sm:$0xff]  ;;  %v636_v30 = vld [vmem:[%s8760_s1 + $0x12d8] sm:$0xff] }
 0x12b   :  { %4150 = vmatprep.subr.bf16.mxu0 %v4149_v40  ;;  %v4169_v40 = vpack.c.bf16 %v224_v33, %v218_v32  ;;  %v642_v31 = vld [vmem:[%s8760_s1 + $0x1308] sm:$0xff]  ;;  %v6814_v32 = vld [vmem:[%s8761_s0 + $0x20] sm:$0xff] }
 0x12c   :  { %v278_v33 = vld [vmem:[%s8760_s1 + $0x7a8] sm:$0xff] }
 0x12d   :  { %3880 = vmatpush1.bf16.msra.mxu1 %v3879_v46  ;;  %v3899_v46 = vpack.c.bf16 %v581_v38, %v575_v37  ;;  %v4187_v37 = vpack.c.bf16 %v271_v29, %v265_v27  ;;  %v3917_v38 = vpack.c.bf16 %v642_v31, %v636_v30  ;;  %v689_v29 = vld [vmem:[%s8760_s1 + $0x1480] sm:$0xff] }
 0x12e   :  { %4152 = vmatpush1.bf16.msra.mxu0 %v4151_v47  ;;  %3882 = vmatprep.subr.bf16.mxu1 %v3881_v49  ;;  %v4171_v47 = vpack.c.bf16 %v223_v41, %v217_v39  ;;  %v3901_v49 = vpack.c.bf16 %v594_v43, %v588_v42  ;;  %v635_v39 = vld [vmem:[%s8760_s1 + $0x12d0] sm:$0xff]  ;;  %v277_v41 = vld [vmem:[%s8760_s1 + $0x7a0] sm:$0xff] }
 0x12f   :  { %4154 = vmatprep.subr.bf16.mxu0 %v4153_v53  ;;  %v4173_v53 = vpack.c.bf16 %v236_v45, %v230_v44  ;;  %v283_v43 = vld [vmem:[%s8760_s1 + $0x7d0] sm:$0xff]  ;;  %v648_v44 = vld [vmem:[%s8760_s1 + $0x1338] sm:$0xff]  ;;  %v654_v45 = vld [vmem:[%s8760_s1 + $0x1368] sm:$0xff] }
 0x130   :  { %v325_v30 = vld [vmem:[%s8760_s1 + $0x920] sm:$0xff] }
 0x131   :  { %3884 = vmatpush1.bf16.msra.mxu1 %v3883_v59  ;;  %v3903_v59 = vpack.c.bf16 %v593_v51, %v587_v50  ;;  %v4191_v50 = vpack.c.bf16 %v283_v43, %v277_v41  ;;  %v3921_v51 = vpack.c.bf16 %v654_v45, %v648_v44  ;;  %v695_v44 = vld [vmem:[%s8760_s1 + $0x14b0] sm:$0xff]  ;;  %v701_v45 = vld [vmem:[%s8760_s1 + $0x14e0] sm:$0xff] }
 0x132   :  { %4156 = vmatpush1.bf16.msra.mxu0 %v4155_v60  ;;  %3886 = vmatprep.subr.bf16.mxu1 %v3885_v61  ;;  %v4175_v60 = vpack.c.bf16 %v235_v54, %v229_v52  ;;  %v3905_v61 = vpack.c.bf16 %v606_v56, %v600_v55  ;;  %v647_v52 = vld [vmem:[%s8760_s1 + $0x1330] sm:$0xff]  ;;  %v289_v54 = vld [vmem:[%s8760_s1 + $0x800] sm:$0xff] }
 0x133   :  { %4158 = vmatprep.subr.bf16.mxu0 %v4157_v1  ;;  %v4177_v1 = vpack.c.bf16 %v248_v58, %v242_v57  ;;  %v295_v56 = vld [vmem:[%s8760_s1 + $0x830] sm:$0xff]  ;;  %v660_v57 = vld [vmem:[%s8760_s1 + $0x1398] sm:$0xff]  ;;  %v666_v58 = vld [vmem:[%s8760_s1 + $0x13c8] sm:$0xff] }
 0x135   :  { %3888 = vmatpush1.bf16.msra.mxu1 %v3887_v7  ;;  %v3907_v7 = vpack.c.bf16 %v605_v63, %v599_v62  ;;  %v4195_v62 = vpack.c.bf16 %v295_v56, %v289_v54  ;;  %v3925_v63 = vpack.c.bf16 %v666_v58, %v660_v57  ;;  %v3939_v54 = vpack.c.bf16 %v701_v45, %v695_v44  ;;  %v707_v57 = vld [vmem:[%s8760_s1 + $0x1510] sm:$0xff]  ;;  %v713_v58 = vld [vmem:[%s8760_s1 + $0x1540] sm:$0xff]  ;;  %v398_v44 = vld [vmem:[%s8760_s1 + $0xb68] sm:$0xff] }
 0x136   :  { %4160 = vmatpush1.bf16.msra.mxu0 %v4159_v8  ;;  %3890 = vmatprep.subr.bf16.mxu1 %v3889_v16  ;;  %v4179_v8 = vpack.c.bf16 %v247_v2, %v241_v0  ;;  %v3909_v16 = vpack.c.bf16 %v618_v4, %v612_v3  ;;  %v659_v0 = vld [vmem:[%s8760_s1 + $0x1390] sm:$0xff]  ;;  %v301_v2 = vld [vmem:[%s8760_s1 + $0x860] sm:$0xff]  ;;  %v404_v45 = vld [vmem:[%s8760_s1 + $0xb98] sm:$0xff] }
 0x137   :  { %4162 = vmatprep.subr.bf16.mxu0 %v4161_v13  ;;  %v4181_v13 = vpack.c.bf16 %v260_v6, %v254_v5  ;;  %v307_v4 = vld [vmem:[%s8760_s1 + $0x890] sm:$0xff]  ;;  %v672_v5 = vld [vmem:[%s8760_s1 + $0x13f8] sm:$0xff]  ;;  %v678_v6 = vld [vmem:[%s8760_s1 + $0x1428] sm:$0xff] }
 0x139   :  { %3892 = vmatpush1.bf16.msra.mxu1 %v3891_v20  ;;  %v3911_v20 = vpack.c.bf16 %v617_v11, %v611_v10 }
 0x13a   :  { %4164 = vmatpush1.bf16.msra.mxu0 %v4163_v22  ;;  %3894 = vmatprep.subr.bf16.mxu1 %v3893_v23  ;;  %v3913_v23 = vpack.c.bf16 %v630_v15, %v624_v14  ;;  %v677_v14 = vld [vmem:[%s8760_s1 + $0x1420] sm:$0xff] }
 0x13b   :  { %4166 = vmatprep.subr.bf16.mxu0 %v4165_v28  ;;  %v4185_v28 = vpack.c.bf16 %v272_v19, %v266_v26  ;;  %v313_v15 = vld [vmem:[%s8760_s1 + $0x8c0] sm:$0xff]  ;;  %v319_v26 = vld [vmem:[%s8760_s1 + $0x8f0] sm:$0xff]  ;;  %v684_v19 = vld [vmem:[%s8760_s1 + $0x1458] sm:$0xff] }
 0x13d   :  { %3896 = vmatpush1.bf16.msra.mxu1 %v3895_v34  ;;  %v284_v34 = vld [vmem:[%s8760_s1 + $0x7d8] sm:$0xff] }
 0x13e   :  { %4168 = vmatpush1.bf16.msra.mxu0 %v4167_v35  ;;  %3898 = vmatprep.subr.bf16.mxu1 %v3897_v36  ;;  %v3915_v35 = vpack.c.bf16 %v629_v25, %v623_v24  ;;  %v6826_v36 = vld [vmem:[%s8761_s0 + $0x38] sm:$0xff]  ;;  %v4189_v42 = vpack.c.bf16 %v284_v34, %v278_v33  ;;  %v4203_v25 = vpack.c.bf16 %v319_v26, %v313_v15  ;;  %v331_v33 = vld [vmem:[%s8760_s1 + $0x950] sm:$0xff] }
 0x13f   :  { %4170 = vmatprep.subr.bf16.mxu0 %v4169_v40  ;;  %v641_v40 = vld [vmem:[%s8760_s1 + $0x1300] sm:$0xff]  ;;  %v696_v34 = vld [vmem:[%s8760_s1 + $0x14b8] sm:$0xff] }
 0x141   :  { %3900 = vmatpush1.bf16.msra.mxu1 %v3899_v46  ;;  %v290_v46 = vld [vmem:[%s8760_s1 + $0x808] sm:$0xff] }
 0x142   :  { %4172 = vmatpush1.bf16.msra.mxu0 %v4171_v47  ;;  %3902 = vmatprep.subr.bf16.mxu1 %v3901_v49  ;;  %v296_v47 = vld [vmem:[%s8760_s1 + $0x838] sm:$0xff]  ;;  %v3919_v49 = vpack.c.bf16 %v641_v40, %v635_v39 }
 0x143   :  { %4174 = vmatprep.subr.bf16.mxu0 %v4173_v53  ;;  %v653_v53 = vld [vmem:[%s8760_s1 + $0x1360] sm:$0xff]  ;;  %v4193_v55 = vpack.c.bf16 %v296_v47, %v290_v46  ;;  %v344_v39 = vld [vmem:[%s8760_s1 + $0x9b8] sm:$0xff] }
 0x144   :  { %v337_v46 = vld [vmem:[%s8760_s1 + $0x980] sm:$0xff] }
 0x145   :  { %3904 = vmatpush1.bf16.msra.mxu1 %v3903_v59  ;;  %2304 = vmatmul.mubr.f32.vlgmr.msra.gmra.mrb[2].mxu0 %v6017_v9  ;;  %v259_v9 = vld [vmem:[%s8760_s1 + $0x710] sm:$0xff]  ;;  %v302_v59 = vld [vmem:[%s8760_s1 + $0x868] sm:$0xff] }
 0x146   :  { %4176 = vmatpush1.bf16.msra.mxu0 %v4175_v60  ;;  %3906 = vmatprep.subr.bf16.mxu1 %v3905_v61  ;;  %v4183_v22 = vpack.c.bf16 %v259_v9, %v253_v12  ;;  %v308_v60 = vld [vmem:[%s8760_s1 + $0x898] sm:$0xff]  ;;  %v3923_v61 = vpack.c.bf16 %v653_v53, %v647_v52  ;;  %v4199_v12 = vpack.c.bf16 %v307_v4, %v301_v2  ;;  %v671_v9 = vld [vmem:[%s8760_s1 + $0x13f0] sm:$0xff]  ;;  %v350_v52 = vld [vmem:[%s8760_s1 + $0x9e8] sm:$0xff] }
 0x147   :  { %4178 = vmatprep.subr.bf16.mxu0 %v4177_v1  ;;  %2374 = vmatprep.mubr.f32.mxu0 %v4669_v17  ;;  %v665_v1 = vld [vmem:[%s8760_s1 + $0x13c0] sm:$0xff]  ;;  %v4197_v3 = vpack.c.bf16 %v308_v60, %v302_v59  ;;  %v3931_v24 = vpack.c.bf16 %v677_v14, %v671_v9  ;;  %v356_v53 = vld [vmem:[%s8760_s1 + $0xa18] sm:$0xff]  ;;  %v3943_v2 = vpack.c.bf16 %v713_v58, %v707_v57  ;;  %v374_v9 = vld [vmem:[%s8760_s1 + $0xaa8] sm:$0xff] }
 0x148   :  { %v3927_v11 = vpack.c.bf16 %v665_v1, %v659_v0  ;;  %v349_v59 = vld [vmem:[%s8760_s1 + $0x9e0] sm:$0xff]  ;;  %v4213_v60 = vpack.c.bf16 %v356_v53, %v350_v52  ;;  %v362_v0 = vld [vmem:[%s8760_s1 + $0xa48] sm:$0xff]  ;;  %v368_v1 = vld [vmem:[%s8760_s1 + $0xa78] sm:$0xff]  ;;  %v4229_v53 = vpack.c.bf16 %v404_v45, %v398_v44 }
 0x149   :  { %3908 = vmatpush1.bf16.msra.mxu1 %v3907_v7  ;;  %v380_v14 = vld [vmem:[%s8760_s1 + $0xad8] sm:$0xff]  ;;  %v397_v52 = vld [vmem:[%s8760_s1 + $0xb60] sm:$0xff]  ;;  %v410_v57 = vld [vmem:[%s8760_s1 + $0xbc8] sm:$0xff] }
 0x14a   :  { %4180 = vmatpush1.bf16.msra.mxu0 %v4179_v8  ;;  %3910 = vmatprep.subr.bf16.mxu1 %v3909_v16  ;;  %v314_v8 = vld [vmem:[%s8760_s1 + $0x8c8] sm:$0xff]  ;;  %v320_v16 = vld [vmem:[%s8760_s1 + $0x8f8] sm:$0xff]  ;;  %v445_v44 = vld [vmem:[%s8760_s1 + $0xce0] sm:$0xff] }
 0x14b   :  { %4182 = vmatprep.subr.bf16.mxu0 %v4181_v13  ;;  %v3929_v13 = vpack.c.bf16 %v678_v6, %v672_v5  ;;  %v4201_v17 = vpack.c.bf16 %v320_v16, %v314_v8  ;;  %v719_v5 = vld [vmem:[%s8760_s1 + $0x1570] sm:$0xff]  ;;  %v725_v6 = vld [vmem:[%s8760_s1 + $0x15a0] sm:$0xff]  ;;  %v4217_v16 = vpack.c.bf16 %v368_v1, %v362_v0  ;;  %v416_v58 = vld [vmem:[%s8760_s1 + $0xbf8] sm:$0xff] }
 0x14c   :  { %1949 = vmatmul.mubr.f32.vlgmr.msra.gmra.mrb[4].mxu1 %v6814_v32  ;;  %v361_v8 = vld [vmem:[%s8760_s1 + $0xa40] sm:$0xff]  ;;  %v3947_v15 = vpack.c.bf16 %v725_v6, %v719_v5  ;;  %v4233_v1 = vpack.c.bf16 %v416_v58, %v410_v57  ;;  %v422_v5 = vld [vmem:[%s8760_s1 + $0xc28] sm:$0xff]  ;;  %v428_v6 = vld [vmem:[%s8760_s1 + $0xc58] sm:$0xff] }
 0x14d   :  { %3912 = vmatpush1.bf16.msra.mxu1 %v3911_v20  ;;  %2019 = vmatprep.mubr.f32.mxu1 %v6826_v36  ;;  %v690_v20 = vld [vmem:[%s8760_s1 + $0x1488] sm:$0xff]  ;;  %v409_v0 = vld [vmem:[%s8760_s1 + $0xbc0] sm:$0xff]  ;;  %v463_v57 = vld [vmem:[%s8760_s1 + $0xd70] sm:$0xff] }
 0x14e   :  { %4184 = vmatpush1.bf16.msra.mxu0 %v4183_v22  ;;  %3914 = vmatprep.subr.bf16.mxu1 %v3913_v23  ;;  %v326_v22 = vld [vmem:[%s8760_s1 + $0x928] sm:$0xff]  ;;  %v332_v23 = vld [vmem:[%s8760_s1 + $0x958] sm:$0xff]  ;;  %v3933_v27 = vpack.c.bf16 %v690_v20, %v684_v19  ;;  %v731_v19 = vld [vmem:[%s8760_s1 + $0x15d0] sm:$0xff] }
 0x14f   :  { %4186 = vmatprep.subr.bf16.mxu0 %v4185_v28  ;;  %v683_v28 = vld [vmem:[%s8760_s1 + $0x1450] sm:$0xff]  ;;  %v4205_v31 = vpack.c.bf16 %v332_v23, %v326_v22  ;;  %v737_v20 = vld [vmem:[%s8760_s1 + $0x1600] sm:$0xff]  ;;  %v4221_v23 = vpack.c.bf16 %v380_v14, %v374_v9  ;;  %v4237_v14 = vpack.c.bf16 %v428_v6, %v422_v5  ;;  %v828_v58 = vld [vmem:[%s8760_s1 + $0x18d8] sm:$0xff] }
 0x150   :  { %v3935_v41 = vpack.c.bf16 %v689_v29, %v683_v28  ;;  %v373_v22 = vld [vmem:[%s8760_s1 + $0xaa0] sm:$0xff]  ;;  %v386_v28 = vld [vmem:[%s8760_s1 + $0xb08] sm:$0xff]  ;;  %v392_v29 = vld [vmem:[%s8760_s1 + $0xb38] sm:$0xff] }
 0x151   :  { %3916 = vmatpush1.bf16.msra.mxu1 %v3915_v35  ;;  %v702_v35 = vld [vmem:[%s8760_s1 + $0x14e8] sm:$0xff]  ;;  %v421_v9 = vld [vmem:[%s8760_s1 + $0xc20] sm:$0xff] }
 0x152   :  { %4188 = vmatpush1.bf16.msra.mxu0 %v4187_v37  ;;  %3918 = vmatprep.subr.bf16.mxu1 %v3917_v38  ;;  %v338_v38 = vld [vmem:[%s8760_s1 + $0x988] sm:$0xff]  ;;  %v3937_v43 = vpack.c.bf16 %v702_v35, %v696_v34  ;;  %v743_v34 = vld [vmem:[%s8760_s1 + $0x1630] sm:$0xff]  ;;  %v749_v35 = vld [vmem:[%s8760_s1 + $0x1660] sm:$0xff] }
 0x153   :  { %4190 = vmatprep.subr.bf16.mxu0 %v4189_v42  ;;  %v4207_v42 = vpack.c.bf16 %v331_v33, %v325_v30  ;;  %v4209_v47 = vpack.c.bf16 %v344_v39, %v338_v38  ;;  %v3951_v30 = vpack.c.bf16 %v737_v20, %v731_v19  ;;  %v385_v38 = vld [vmem:[%s8760_s1 + $0xb00] sm:$0xff]  ;;  %v4225_v39 = vpack.c.bf16 %v392_v29, %v386_v28  ;;  %v434_v19 = vld [vmem:[%s8760_s1 + $0xc88] sm:$0xff]  ;;  %v440_v20 = vld [vmem:[%s8760_s1 + $0xcb8] sm:$0xff] }
 0x154   :  { %v433_v28 = vld [vmem:[%s8760_s1 + $0xc80] sm:$0xff]  ;;  %v4241_v29 = vpack.c.bf16 %v440_v20, %v434_v19 }
 0x155   :  { %3920 = vmatpush1.bf16.msra.mxu1 %v3919_v49  ;;  %v343_v49 = vld [vmem:[%s8760_s1 + $0x9b0] sm:$0xff]  ;;  %v469_v5 = vld [vmem:[%s8760_s1 + $0xda0] sm:$0xff] }
 0x156   :  { %4192 = vmatpush1.bf16.msra.mxu0 %v4191_v50  ;;  %3922 = vmatprep.subr.bf16.mxu1 %v3921_v51  ;;  %v708_v50 = vld [vmem:[%s8760_s1 + $0x1518] sm:$0xff]  ;;  %v714_v51 = vld [vmem:[%s8760_s1 + $0x1548] sm:$0xff]  ;;  %v481_v19 = vld [vmem:[%s8760_s1 + $0xe00] sm:$0xff] }
 0x157   :  { %4194 = vmatprep.subr.bf16.mxu0 %v4193_v55  ;;  %v6895_v7 = vpop.f32.mrb[0].mxu1  ;;  %v4211_v55 = vpack.c.bf16 %v343_v49, %v337_v46  ;;  %v3941_v56 = vpack.c.bf16 %v714_v51, %v708_v50  ;;  %v3955_v46 = vpack.c.bf16 %v749_v35, %v743_v34  ;;  %v755_v50 = vld [vmem:[%s8760_s1 + $0x1690] sm:$0xff]  ;;  %v761_v51 = vld [vmem:[%s8760_s1 + $0x16c0] sm:$0xff]  ;;  %v446_v34 = vld [vmem:[%s8760_s1 + $0xce8] sm:$0xff] }
 0x158   :  { %v6903_v10 = vpop.f32.mrb[1].mxu1  ;;  %v452_v35 = vld [vmem:[%s8760_s1 + $0xd18] sm:$0xff] }
 0x159   :  { %3924 = vmatpush1.bf16.msra.mxu1 %v3923_v61  ;;  %v355_v61 = vld [vmem:[%s8760_s1 + $0xa10] sm:$0xff]  ;;  %v4245_v45 = vpack.c.bf16 %v452_v35, %v446_v34  ;;  %v493_v34 = vld [vmem:[%s8760_s1 + $0xe60] sm:$0xff] }
 0x15a   :  { %4196 = vmatpush1.bf16.msra.mxu0 %v4195_v62  ;;  %3926 = vmatprep.subr.bf16.mxu1 %v3925_v63  ;;  %v720_v62 = vld [vmem:[%s8760_s1 + $0x1578] sm:$0xff]  ;;  %v726_v63 = vld [vmem:[%s8760_s1 + $0x15a8] sm:$0xff] }
 0x15b   :  { %4198 = vmatprep.subr.bf16.mxu0 %v4197_v3  ;;  %v4215_v3 = vpack.c.bf16 %v355_v61, %v349_v59  ;;  %v3945_v4 = vpack.c.bf16 %v726_v63, %v720_v62  ;;  %v3959_v59 = vpack.c.bf16 %v761_v51, %v755_v50  ;;  %v767_v62 = vld [vmem:[%s8760_s1 + $0x16f0] sm:$0xff]  ;;  %v773_v63 = vld [vmem:[%s8760_s1 + $0x1720] sm:$0xff]  ;;  %v464_v50 = vld [vmem:[%s8760_s1 + $0xd78] sm:$0xff] }
 0x15d   :  { %3928 = vmatpush1.bf16.msra.mxu1 %v3927_v11  ;;  %v367_v11 = vld [vmem:[%s8760_s1 + $0xa70] sm:$0xff] }
 0x15e   :  { %4200 = vmatpush1.bf16.msra.mxu0 %v4199_v12  ;;  %3930 = vmatprep.subr.bf16.mxu1 %v3929_v13  ;;  %v732_v12 = vld [vmem:[%s8760_s1 + $0x15d8] sm:$0xff]  ;;  %v738_v13 = vld [vmem:[%s8760_s1 + $0x1608] sm:$0xff] }
 0x15f   :  { %4202 = vmatprep.subr.bf16.mxu0 %v4201_v17  ;;  %v6947_v37 = vpop.f32.mrb[2].mxu1  ;;  %v4219_v17 = vpack.c.bf16 %v367_v11, %v361_v8  ;;  %v3949_v26 = vpack.c.bf16 %v738_v13, %v732_v12  ;;  %v3963_v8 = vpack.c.bf16 %v773_v63, %v767_v62  ;;  %v779_v12 = vld [vmem:[%s8760_s1 + $0x1750] sm:$0xff]  ;;  %v785_v13 = vld [vmem:[%s8760_s1 + $0x1780] sm:$0xff]  ;;  %v476_v62 = vld [vmem:[%s8760_s1 + $0xdd8] sm:$0xff] }
 0x160   :  { %v6955_v40 = vpop.f32.mrb[3].mxu1 }
 0x161   :  { %3932 = vmatpush1.bf16.msra.mxu1 %v3931_v24  ;;  %v379_v24 = vld [vmem:[%s8760_s1 + $0xad0] sm:$0xff] }
 0x162   :  { %4204 = vmatpush1.bf16.msra.mxu0 %v4203_v25  ;;  %3934 = vmatprep.subr.bf16.mxu1 %v3933_v27  ;;  %v744_v25 = vld [vmem:[%s8760_s1 + $0x1638] sm:$0xff]  ;;  %v750_v27 = vld [vmem:[%s8760_s1 + $0x1668] sm:$0xff] }
 0x163   :  { %4206 = vmatprep.subr.bf16.mxu0 %v4205_v31  ;;  %v4223_v31 = vpack.c.bf16 %v379_v24, %v373_v22  ;;  %v3953_v33 = vpack.c.bf16 %v750_v27, %v744_v25  ;;  %v3967_v22 = vpack.c.bf16 %v785_v13, %v779_v12  ;;  %v791_v25 = vld [vmem:[%s8760_s1 + $0x17b0] sm:$0xff]  ;;  %v797_v27 = vld [vmem:[%s8760_s1 + $0x17e0] sm:$0xff]  ;;  %v482_v12 = vld [vmem:[%s8760_s1 + $0xe08] sm:$0xff] }
 0x164   :  { %v488_v13 = vld [vmem:[%s8760_s1 + $0xe38] sm:$0xff] }
 0x165   :  { %3936 = vmatpush1.bf16.msra.mxu1 %v3935_v41  ;;  %v391_v41 = vld [vmem:[%s8760_s1 + $0xb30] sm:$0xff]  ;;  %v4257_v20 = vpack.c.bf16 %v488_v13, %v482_v12  ;;  %v900_v13 = vld [vmem:[%s8760_s1 + $0x1b18] sm:$0xff] }
 0x166   :  { %4208 = vmatpush1.bf16.msra.mxu0 %v4207_v42  ;;  %3938 = vmatprep.subr.bf16.mxu1 %v3937_v43  ;;  %v756_v42 = vld [vmem:[%s8760_s1 + $0x1698] sm:$0xff]  ;;  %v762_v43 = vld [vmem:[%s8760_s1 + $0x16c8] sm:$0xff]  ;;  %v535_v12 = vld [vmem:[%s8760_s1 + $0xfb0] sm:$0xff] }
 0x167   :  { %4210 = vmatprep.subr.bf16.mxu0 %v4209_v47  ;;  %v4227_v47 = vpack.c.bf16 %v391_v41, %v385_v38  ;;  %v3957_v49 = vpack.c.bf16 %v762_v43, %v756_v42  ;;  %v3971_v38 = vpack.c.bf16 %v797_v27, %v791_v25  ;;  %v803_v42 = vld [vmem:[%s8760_s1 + $0x1810] sm:$0xff]  ;;  %v809_v43 = vld [vmem:[%s8760_s1 + $0x1840] sm:$0xff]  ;;  %v494_v25 = vld [vmem:[%s8760_s1 + $0xe68] sm:$0xff] }
 0x168   :  { %v3975_v51 = vpack.c.bf16 %v809_v43, %v803_v42  ;;  %v500_v27 = vld [vmem:[%s8760_s1 + $0xe98] sm:$0xff]  ;;  %v506_v42 = vld [vmem:[%s8760_s1 + $0xec8] sm:$0xff] }
 0x169   :  { %3940 = vmatpush1.bf16.msra.mxu1 %v3939_v54  ;;  %v403_v54 = vld [vmem:[%s8760_s1 + $0xb90] sm:$0xff]  ;;  %v4261_v35 = vpack.c.bf16 %v500_v27, %v494_v25  ;;  %v512_v43 = vld [vmem:[%s8760_s1 + $0xef8] sm:$0xff] }
 0x16a   :  { %4212 = vmatpush1.bf16.msra.mxu0 %v4211_v55  ;;  %3942 = vmatprep.subr.bf16.mxu1 %v3941_v56  ;;  %v768_v55 = vld [vmem:[%s8760_s1 + $0x16f8] sm:$0xff]  ;;  %v774_v56 = vld [vmem:[%s8760_s1 + $0x1728] sm:$0xff]  ;;  %v547_v25 = vld [vmem:[%s8760_s1 + $0x1010] sm:$0xff] }
 0x16b   :  { %4214 = vmatprep.subr.bf16.mxu0 %v4213_v60  ;;  %v4231_v60 = vpack.c.bf16 %v403_v54, %v397_v52  ;;  %v3961_v61 = vpack.c.bf16 %v774_v56, %v768_v55  ;;  %v815_v54 = vld [vmem:[%s8760_s1 + $0x1870] sm:$0xff]  ;;  %v457_v55 = vld [vmem:[%s8760_s1 + $0xd40] sm:$0xff]  ;;  %v912_v27 = vld [vmem:[%s8760_s1 + $0x1b78] sm:$0xff] }
 0x16d   :  { %3944 = vmatpush1.bf16.msra.mxu1 %v3943_v2  ;;  %v415_v2 = vld [vmem:[%s8760_s1 + $0xbf0] sm:$0xff] }
 0x16e   :  { %4216 = vmatpush1.bf16.msra.mxu0 %v4215_v3  ;;  %3946 = vmatprep.subr.bf16.mxu1 %v3945_v4  ;;  %v780_v3 = vld [vmem:[%s8760_s1 + $0x1758] sm:$0xff]  ;;  %v786_v4 = vld [vmem:[%s8760_s1 + $0x1788] sm:$0xff] }
 0x16f   :  { %4218 = vmatprep.subr.bf16.mxu0 %v4217_v16  ;;  %v4235_v16 = vpack.c.bf16 %v415_v2, %v409_v0  ;;  %v3965_v11 = vpack.c.bf16 %v786_v4, %v780_v3  ;;  %v4673_v0 = vld [vmem:[%s8761_s0 + $0x48] sm:$0xff]  ;;  %v827_v3 = vld [vmem:[%s8760_s1 + $0x18d0] sm:$0xff]  ;;  %v833_v4 = vld [vmem:[%s8760_s1 + $0x1900] sm:$0xff] }
 0x171   :  { %3948 = vmatpush1.bf16.msra.mxu1 %v3947_v15  ;;  %v427_v15 = vld [vmem:[%s8760_s1 + $0xc50] sm:$0xff] }
 0x172   :  { %4220 = vmatpush1.bf16.msra.mxu0 %v4219_v17  ;;  %3950 = vmatprep.subr.bf16.mxu1 %v3949_v26  ;;  %v792_v17 = vld [vmem:[%s8760_s1 + $0x17b8] sm:$0xff]  ;;  %v798_v26 = vld [vmem:[%s8760_s1 + $0x17e8] sm:$0xff] }
 0x173   :  { %4222 = vmatprep.subr.bf16.mxu0 %v4221_v23  ;;  %v4239_v23 = vpack.c.bf16 %v427_v15, %v421_v9  ;;  %v3969_v24 = vpack.c.bf16 %v798_v26, %v792_v17  ;;  %v3983_v9 = vpack.c.bf16 %v833_v4, %v827_v3  ;;  %v839_v17 = vld [vmem:[%s8760_s1 + $0x1930] sm:$0xff]  ;;  %v845_v26 = vld [vmem:[%s8760_s1 + $0x1960] sm:$0xff] }
 0x175   :  { %3952 = vmatpush1.bf16.msra.mxu1 %v3951_v30  ;;  %v439_v30 = vld [vmem:[%s8760_s1 + $0xcb0] sm:$0xff] }
 0x176   :  { %4224 = vmatpush1.bf16.msra.mxu0 %v4223_v31  ;;  %3954 = vmatprep.subr.bf16.mxu1 %v3953_v33  ;;  %v804_v31 = vld [vmem:[%s8760_s1 + $0x1818] sm:$0xff]  ;;  %v810_v33 = vld [vmem:[%s8760_s1 + $0x1848] sm:$0xff] }
 0x177   :  { %4226 = vmatprep.subr.bf16.mxu0 %v4225_v39  ;;  %v4243_v39 = vpack.c.bf16 %v439_v30, %v433_v28  ;;  %v3973_v41 = vpack.c.bf16 %v810_v33, %v804_v31  ;;  %v3987_v28 = vpack.c.bf16 %v845_v26, %v839_v17  ;;  %v851_v31 = vld [vmem:[%s8760_s1 + $0x1990] sm:$0xff]  ;;  %v857_v33 = vld [vmem:[%s8760_s1 + $0x19c0] sm:$0xff] }
 0x179   :  { %3956 = vmatpush1.bf16.msra.mxu1 %v3955_v46  ;;  %v816_v46 = vld [vmem:[%s8760_s1 + $0x1878] sm:$0xff] }
 0x17a   :  { %4228 = vmatpush1.bf16.msra.mxu0 %v4227_v47  ;;  %3958 = vmatprep.subr.bf16.mxu1 %v3957_v49  ;;  %v822_v47 = vld [vmem:[%s8760_s1 + $0x18a8] sm:$0xff] }
 0x17b   :  { %4230 = vmatprep.subr.bf16.mxu0 %v4229_v53  ;;  %v458_v49 = vld [vmem:[%s8760_s1 + $0xd48] sm:$0xff]  ;;  %v3977_v53 = vpack.c.bf16 %v822_v47, %v816_v46  ;;  %v863_v46 = vld [vmem:[%s8760_s1 + $0x19f0] sm:$0xff]  ;;  %v869_v47 = vld [vmem:[%s8760_s1 + $0x1a20] sm:$0xff] }
 0x17c   :  { %v4249_v56 = vpack.c.bf16 %v464_v50, %v458_v49  ;;  %v505_v49 = vld [vmem:[%s8760_s1 + $0xec0] sm:$0xff]  ;;  %v4265_v50 = vpack.c.bf16 %v512_v43, %v506_v42  ;;  %v559_v42 = vld [vmem:[%s8760_s1 + $0x1070] sm:$0xff]  ;;  %v924_v43 = vld [vmem:[%s8760_s1 + $0x1bd8] sm:$0xff] }
 0x17d   :  { %3960 = vmatpush1.bf16.msra.mxu1 %v3959_v59  ;;  %v834_v59 = vld [vmem:[%s8760_s1 + $0x1908] sm:$0xff] }
 0x17e   :  { %4232 = vmatpush1.bf16.msra.mxu0 %v4231_v60  ;;  %3962 = vmatprep.subr.bf16.mxu1 %v3961_v61  ;;  %v4672_v60 = vld [vmem:[%s8761_s0 + $0x30] sm:$0xff]  ;;  %v470_v61 = vld [vmem:[%s8760_s1 + $0xda8] sm:$0xff]  ;;  %v3981_v2 = vpack.c.bf16 %v834_v59, %v828_v58  ;;  %v881_v59 = vld [vmem:[%s8760_s1 + $0x1a80] sm:$0xff] }
 0x17f   :  { %4234 = vmatprep.subr.bf16.mxu0 %v4233_v1  ;;  %v4251_v1 = vpack.c.bf16 %v463_v57, %v457_v55  ;;  %v4253_v6 = vpack.c.bf16 %v476_v62, %v470_v61  ;;  %v3995_v55 = vpack.c.bf16 %v869_v47, %v863_v46  ;;  %v875_v58 = vld [vmem:[%s8760_s1 + $0x1a50] sm:$0xff] }
 0x180   :  { %v523_v62 = vld [vmem:[%s8760_s1 + $0xf50] sm:$0xff]  ;;  %v3999_v3 = vpack.c.bf16 %v881_v59, %v875_v58 }
 0x181   :  { %3964 = vmatpush1.bf16.msra.mxu1 %v3963_v8  ;;  %v475_v8 = vld [vmem:[%s8760_s1 + $0xdd0] sm:$0xff] }
 0x182   :  { %4236 = vmatpush1.bf16.msra.mxu0 %v4235_v16  ;;  %3966 = vmatprep.subr.bf16.mxu1 %v3965_v11  ;;  %v840_v16 = vld [vmem:[%s8760_s1 + $0x1938] sm:$0xff]  ;;  %v846_v11 = vld [vmem:[%s8760_s1 + $0x1968] sm:$0xff] }
 0x183   :  { %4238 = vmatprep.subr.bf16.mxu0 %v4237_v14  ;;  %v4255_v14 = vpack.c.bf16 %v475_v8, %v469_v5  ;;  %v3985_v15 = vpack.c.bf16 %v846_v11, %v840_v16  ;;  %v893_v8 = vld [vmem:[%s8760_s1 + $0x1ae0] sm:$0xff] }
 0x184   :  { %v529_v16 = vld [vmem:[%s8760_s1 + $0xf80] sm:$0xff] }
 0x185   :  { %3968 = vmatpush1.bf16.msra.mxu1 %v3967_v22  ;;  %2375 = vmatmul.mubr.f32.vlgmr.msra.gmra.mrb[2].mxu0 %v6414_v18  ;;  %v451_v18 = vld [vmem:[%s8760_s1 + $0xd10] sm:$0xff]  ;;  %v4275_v26 = vpack.c.bf16 %v535_v12, %v529_v16  ;;  %v953_v12 = vld [vmem:[%s8760_s1 + $0x1cc0] sm:$0xff] }
 0x186   :  { %4240 = vmatpush1.bf16.msra.mxu0 %v4239_v23  ;;  %3970 = vmatprep.subr.bf16.mxu1 %v3969_v24  ;;  %v4247_v52 = vpack.c.bf16 %v451_v18, %v445_v44  ;;  %v487_v22 = vld [vmem:[%s8760_s1 + $0xe30] sm:$0xff]  ;;  %v852_v23 = vld [vmem:[%s8760_s1 + $0x1998] sm:$0xff]  ;;  %v858_v24 = vld [vmem:[%s8760_s1 + $0x19c8] sm:$0xff]  ;;  %v3991_v44 = vpack.c.bf16 %v857_v33, %v851_v31 }
 0x187   :  { %4242 = vmatprep.subr.bf16.mxu0 %v4241_v29  ;;  %2445 = vmatprep.mubr.f32.mxu0 %v6426_v21  ;;  %v821_v21 = vld [vmem:[%s8760_s1 + $0x18a0] sm:$0xff]  ;;  %v4259_v29 = vpack.c.bf16 %v487_v22, %v481_v19  ;;  %v3989_v30 = vpack.c.bf16 %v858_v24, %v852_v23 }
 0x188   :  { %v3979_v63 = vpack.c.bf16 %v821_v21, %v815_v54  ;;  %v518_v54 = vld [vmem:[%s8760_s1 + $0xf28] sm:$0xff]  ;;  %v524_v21 = vld [vmem:[%s8760_s1 + $0xf58] sm:$0xff]  ;;  %v905_v22 = vld [vmem:[%s8760_s1 + $0x1b40] sm:$0xff] }
 0x189   :  { %3972 = vmatpush1.bf16.msra.mxu1 %v3971_v38  ;;  %v499_v38 = vld [vmem:[%s8760_s1 + $0xe90] sm:$0xff]  ;;  %v4269_v61 = vpack.c.bf16 %v524_v21, %v518_v54  ;;  %v541_v23 = vld [vmem:[%s8760_s1 + $0xfe0] sm:$0xff]  ;;  %v936_v21 = vld [vmem:[%s8760_s1 + $0x1c38] sm:$0xff] }
 0x18a   :  { %4244 = vmatpush1.bf16.msra.mxu0 %v4243_v39  ;;  %3974 = vmatprep.subr.bf16.mxu1 %v3973_v41  ;;  %v864_v39 = vld [vmem:[%s8760_s1 + $0x19f8] sm:$0xff]  ;;  %v870_v41 = vld [vmem:[%s8760_s1 + $0x1a28] sm:$0xff]  ;;  %v4279_v33 = vpack.c.bf16 %v547_v25, %v541_v23  ;;  %v571_v54 = vld [vmem:[%s8760_s1 + $0x10d0] sm:$0xff] }
 0x18b   :  { %4246 = vmatprep.subr.bf16.mxu0 %v4245_v45  ;;  %v4263_v45 = vpack.c.bf16 %v499_v38, %v493_v34  ;;  %v3993_v18 = vpack.c.bf16 %v870_v41, %v864_v39  ;;  %v917_v38 = vld [vmem:[%s8760_s1 + $0x1ba0] sm:$0xff] }
 0x18c   :  { %2020 = vmatmul.mubr.f32.vlgmr.msra.gmra.mrb[4].mxu1 %v4672_v60  ;;  %v517_v60 = vld [vmem:[%s8760_s1 + $0xf20] sm:$0xff] }
 0x18d   :  { %3976 = vmatpush1.bf16.msra.mxu1 %v3975_v51  ;;  %2090 = vmatprep.mubr.f32.mxu1 %v4673_v0  ;;  %v511_v51 = vld [vmem:[%s8760_s1 + $0xef0] sm:$0xff]  ;;  %v894_v0 = vld [vmem:[%s8760_s1 + $0x1ae8] sm:$0xff]  ;;  %v4271_v4 = vpack.c.bf16 %v523_v62, %v517_v60  ;;  %v553_v39 = vld [vmem:[%s8760_s1 + $0x1040] sm:$0xff] }
 0x18e   :  { %4248 = vmatpush1.bf16.msra.mxu0 %v4247_v52  ;;  %3978 = vmatprep.subr.bf16.mxu1 %v3977_v53  ;;  %v876_v52 = vld [vmem:[%s8760_s1 + $0x1a58] sm:$0xff]  ;;  %v882_v53 = vld [vmem:[%s8760_s1 + $0x1a88] sm:$0xff]  ;;  %v4283_v47 = vpack.c.bf16 %v559_v42, %v553_v39  ;;  %v941_v62 = vld [vmem:[%s8760_s1 + $0x1c60] sm:$0xff] }
 0x18f   :  { %4250 = vmatprep.subr.bf16.mxu0 %v4249_v56  ;;  %v4267_v56 = vpack.c.bf16 %v511_v51, %v505_v49  ;;  %v3997_v57 = vpack.c.bf16 %v882_v53, %v876_v52  ;;  %v929_v51 = vld [vmem:[%s8760_s1 + $0x1c00] sm:$0xff] }
 0x190   :  { %v565_v52 = vld [vmem:[%s8760_s1 + $0x10a0] sm:$0xff] }
 0x191   :  { %3980 = vmatpush1.bf16.msra.mxu1 %v3979_v63  ;;  %v888_v63 = vld [vmem:[%s8760_s1 + $0x1ab8] sm:$0xff]  ;;  %v4287_v59 = vpack.c.bf16 %v571_v54, %v565_v52  ;;  %v965_v25 = vld [vmem:[%s8760_s1 + $0x1d20] sm:$0xff] }
 0x192   :  { %4252 = vmatpush1.bf16.msra.mxu0 %v4251_v1  ;;  %3982 = vmatprep.subr.bf16.mxu1 %v3981_v2  ;;  %v530_v1 = vld [vmem:[%s8760_s1 + $0xf88] sm:$0xff]  ;;  %v536_v2 = vld [vmem:[%s8760_s1 + $0xfb8] sm:$0xff]  ;;  %v4001_v5 = vpack.c.bf16 %v894_v0, %v888_v63  ;;  %v577_v63 = vld [vmem:[%s8760_s1 + $0x1100] sm:$0xff] }
 0x193   :  { %4254 = vmatprep.subr.bf16.mxu0 %v4253_v6  ;;  %v887_v6 = vld [vmem:[%s8760_s1 + $0x1ab0] sm:$0xff]  ;;  %v4273_v11 = vpack.c.bf16 %v536_v2, %v530_v1  ;;  %v948_v2 = vld [vmem:[%s8760_s1 + $0x1c98] sm:$0xff]  ;;  %v977_v42 = vld [vmem:[%s8760_s1 + $0x1d80] sm:$0xff] }
 0x194   :  { %v4003_v17 = vpack.c.bf16 %v893_v8, %v887_v6  ;;  %v583_v1 = vld [vmem:[%s8760_s1 + $0x1130] sm:$0xff]  ;;  %v989_v54 = vld [vmem:[%s8760_s1 + $0x1de0] sm:$0xff] }
 0x195   :  { %3984 = vmatpush1.bf16.msra.mxu1 %v3983_v9  ;;  %v906_v9 = vld [vmem:[%s8760_s1 + $0x1b48] sm:$0xff]  ;;  %v4291_v8 = vpack.c.bf16 %v583_v1, %v577_v63  ;;  %v1001_v1 = vld [vmem:[%s8760_s1 + $0x1e40] sm:$0xff] }
 0x196   :  { %4256 = vmatpush1.bf16.msra.mxu0 %v4255_v14  ;;  %3986 = vmatprep.subr.bf16.mxu1 %v3985_v15  ;;  %v542_v14 = vld [vmem:[%s8760_s1 + $0xfe8] sm:$0xff]  ;;  %v548_v15 = vld [vmem:[%s8760_s1 + $0x1018] sm:$0xff]  ;;  %v4005_v19 = vpack.c.bf16 %v906_v9, %v900_v13  ;;  %v589_v13 = vld [vmem:[%s8760_s1 + $0x1160] sm:$0xff] }
 0x197   :  { %4258 = vmatprep.subr.bf16.mxu0 %v4257_v20  ;;  %v899_v20 = vld [vmem:[%s8760_s1 + $0x1b10] sm:$0xff]  ;;  %v4277_v24 = vpack.c.bf16 %v548_v15, %v542_v14  ;;  %v960_v15 = vld [vmem:[%s8760_s1 + $0x1cf8] sm:$0xff] }
 0x198   :  { %v4007_v31 = vpack.c.bf16 %v905_v22, %v899_v20  ;;  %v595_v14 = vld [vmem:[%s8760_s1 + $0x1190] sm:$0xff] }
 0x199   :  { %3988 = vmatpush1.bf16.msra.mxu1 %v3987_v28  ;;  %v918_v28 = vld [vmem:[%s8760_s1 + $0x1ba8] sm:$0xff]  ;;  %v4295_v22 = vpack.c.bf16 %v595_v14, %v589_v13  ;;  %v649_v14 = vld [vmem:[%s8760_s1 + $0x1340] sm:$0xff] }
 0x19a   :  { %4260 = vmatpush1.bf16.msra.mxu0 %v4259_v29  ;;  %3990 = vmatprep.subr.bf16.mxu1 %v3989_v30  ;;  %v554_v29 = vld [vmem:[%s8760_s1 + $0x1048] sm:$0xff]  ;;  %v560_v30 = vld [vmem:[%s8760_s1 + $0x1078] sm:$0xff]  ;;  %v4009_v34 = vpack.c.bf16 %v918_v28, %v912_v27  ;;  %v601_v27 = vld [vmem:[%s8760_s1 + $0x11c0] sm:$0xff] }
 0x19b   :  { %4262 = vmatprep.subr.bf16.mxu0 %v4261_v35  ;;  %v911_v35 = vld [vmem:[%s8760_s1 + $0x1b70] sm:$0xff]  ;;  %v4281_v41 = vpack.c.bf16 %v560_v30, %v554_v29  ;;  %v972_v30 = vld [vmem:[%s8760_s1 + $0x1d58] sm:$0xff] }
 0x19c   :  { %v4011_v46 = vpack.c.bf16 %v917_v38, %v911_v35  ;;  %v607_v29 = vld [vmem:[%s8760_s1 + $0x11f0] sm:$0xff] }
 0x19d   :  { %3992 = vmatpush1.bf16.msra.mxu1 %v3991_v44  ;;  %v930_v44 = vld [vmem:[%s8760_s1 + $0x1c08] sm:$0xff]  ;;  %v4299_v38 = vpack.c.bf16 %v607_v29, %v601_v27  ;;  %v4675_v27 = vld [vmem:[%s8761_s0 + $0x58] sm:$0xff] }
 0x19e   :  { %4264 = vmatpush1.bf16.msra.mxu0 %v4263_v45  ;;  %3994 = vmatprep.subr.bf16.mxu1 %v3993_v18  ;;  %v566_v45 = vld [vmem:[%s8760_s1 + $0x10a8] sm:$0xff]  ;;  %v572_v18 = vld [vmem:[%s8760_s1 + $0x10d8] sm:$0xff]  ;;  %v4013_v49 = vpack.c.bf16 %v930_v44, %v924_v43  ;;  %v613_v43 = vld [vmem:[%s8760_s1 + $0x1220] sm:$0xff] }
 0x19f   :  { %4266 = vmatprep.subr.bf16.mxu0 %v4265_v50  ;;  %v923_v50 = vld [vmem:[%s8760_s1 + $0x1bd0] sm:$0xff]  ;;  %v4285_v53 = vpack.c.bf16 %v572_v18, %v566_v45  ;;  %v984_v18 = vld [vmem:[%s8760_s1 + $0x1db8] sm:$0xff] }
 0x1a0   :  { %v4015_v58 = vpack.c.bf16 %v929_v51, %v923_v50  ;;  %v619_v45 = vld [vmem:[%s8760_s1 + $0x1250] sm:$0xff] }
 0x1a1   :  { %3996 = vmatpush1.bf16.msra.mxu1 %v3995_v55  ;;  %v942_v55 = vld [vmem:[%s8760_s1 + $0x1c68] sm:$0xff]  ;;  %v4303_v51 = vpack.c.bf16 %v619_v45, %v613_v43  ;;  %v680_v45 = vld [vmem:[%s8760_s1 + $0x1438] sm:$0xff] }
 0x1a2   :  { %4268 = vmatpush1.bf16.msra.mxu0 %v4267_v56  ;;  %3998 = vmatprep.subr.bf16.mxu1 %v3997_v57  ;;  %v578_v56 = vld [vmem:[%s8760_s1 + $0x1108] sm:$0xff]  ;;  %v584_v57 = vld [vmem:[%s8760_s1 + $0x1138] sm:$0xff]  ;;  %v4017_v60 = vpack.c.bf16 %v942_v55, %v936_v21  ;;  %v625_v21 = vld [vmem:[%s8760_s1 + $0x1280] sm:$0xff] }
 0x1a3   :  { %4270 = vmatprep.subr.bf16.mxu0 %v4269_v61  ;;  %v935_v61 = vld [vmem:[%s8760_s1 + $0x1c30] sm:$0xff]  ;;  %v4289_v0 = vpack.c.bf16 %v584_v57, %v578_v56  ;;  %v996_v57 = vld [vmem:[%s8760_s1 + $0x1e18] sm:$0xff] }
 0x1a4   :  { %v4019_v6 = vpack.c.bf16 %v941_v62, %v935_v61  ;;  %v631_v56 = vld [vmem:[%s8760_s1 + $0x12b0] sm:$0xff] }
 0x1a5   :  { %4000 = vmatpush1.bf16.msra.mxu1 %v3999_v3  ;;  %v954_v3 = vld [vmem:[%s8760_s1 + $0x1cc8] sm:$0xff]  ;;  %v4307_v62 = vpack.c.bf16 %v631_v56, %v625_v21  ;;  %v1044_v21 = vld [vmem:[%s8760_s1 + $0x1f98] sm:$0xff] }
 0x1a6   :  { %4272 = vmatpush1.bf16.msra.mxu0 %v4271_v4  ;;  %4002 = vmatprep.subr.bf16.mxu1 %v4001_v5  ;;  %v590_v4 = vld [vmem:[%s8760_s1 + $0x1168] sm:$0xff]  ;;  %v596_v5 = vld [vmem:[%s8760_s1 + $0x1198] sm:$0xff]  ;;  %v4021_v16 = vpack.c.bf16 %v954_v3, %v948_v2  ;;  %v637_v2 = vld [vmem:[%s8760_s1 + $0x12e0] sm:$0xff]  ;;  %v1211_v3 = vlaneseq }
 0x1a7   :  { %4274 = vmatprep.subr.bf16.mxu0 %v4273_v11  ;;  %v947_v11 = vld [vmem:[%s8760_s1 + $0x1c90] sm:$0xff]  ;;  %v4293_v9 = vpack.c.bf16 %v596_v5, %v590_v4  ;;  %v1008_v5 = vld [vmem:[%s8760_s1 + $0x1e78] sm:$0xff] }
 0x1a8   :  { %v4023_v20 = vpack.c.bf16 %v953_v12, %v947_v11  ;;  %v643_v4 = vld [vmem:[%s8760_s1 + $0x1310] sm:$0xff] }
 0x1a9   :  { %4004 = vmatpush1.bf16.msra.mxu1 %v4003_v17  ;;  %v966_v17 = vld [vmem:[%s8760_s1 + $0x1d28] sm:$0xff]  ;;  %v4311_v12 = vpack.c.bf16 %v643_v4, %v637_v2 }
 0x1aa   :  { %4276 = vmatpush1.bf16.msra.mxu0 %v4275_v26  ;;  %4006 = vmatprep.subr.bf16.mxu1 %v4005_v19  ;;  %v602_v26 = vld [vmem:[%s8760_s1 + $0x11c8] sm:$0xff]  ;;  %v608_v19 = vld [vmem:[%s8760_s1 + $0x11f8] sm:$0xff]  ;;  %v4025_v23 = vpack.c.bf16 %v966_v17, %v960_v15  ;;  %v7600_v15 = vshrl.u32 %v1211_v3, 7  ;;  %v691_v3 = vld [vmem:[%s8760_s1 + $0x1490] sm:$0xff] }
 0x1ab   :  { %4278 = vmatprep.subr.bf16.mxu0 %v4277_v24  ;;  %v959_v24 = vld [vmem:[%s8760_s1 + $0x1cf0] sm:$0xff]  ;;  %v4297_v28 = vpack.c.bf16 %v608_v19, %v602_v26  ;;  %v1020_v19 = vld [vmem:[%s8760_s1 + $0x1ed8] sm:$0xff]  ;;  %v1062_v4 = vld [vmem:[%s8760_s1 + $0x2028] sm:$0xff] }
 0x1ac   :  { %v4027_v35 = vpack.c.bf16 %v965_v25, %v959_v24  ;;  %v655_v26 = vld [vmem:[%s8760_s1 + $0x1370] sm:$0xff]  ;;  %v668_v24 = vld [vmem:[%s8760_s1 + $0x13d8] sm:$0xff]  ;;  %v1217_v43 = vsub.s32 1, %v7600_v15 }
 0x1ad   :  { %4008 = vmatpush1.bf16.msra.mxu1 %v4007_v31  ;;  %v978_v31 = vld [vmem:[%s8760_s1 + $0x1d88] sm:$0xff] }
 0x1ae   :  { %4280 = vmatpush1.bf16.msra.mxu0 %v4279_v33  ;;  %4010 = vmatprep.subr.bf16.mxu1 %v4009_v34  ;;  %v614_v33 = vld [vmem:[%s8760_s1 + $0x1228] sm:$0xff]  ;;  %v620_v34 = vld [vmem:[%s8760_s1 + $0x1258] sm:$0xff]  ;;  %v4029_v39 = vpack.c.bf16 %v978_v31, %v972_v30  ;;  %v1019_v30 = vld [vmem:[%s8760_s1 + $0x1ed0] sm:$0xff] }
 0x1af   :  { %4282 = vmatprep.subr.bf16.mxu0 %v4281_v41  ;;  %v971_v41 = vld [vmem:[%s8760_s1 + $0x1d50] sm:$0xff]  ;;  %v4301_v44 = vpack.c.bf16 %v620_v34, %v614_v33  ;;  %v1025_v31 = vld [vmem:[%s8760_s1 + $0x1f00] sm:$0xff]  ;;  %v1213_v34 = vsub.s32 0, %v7600_v15 }
 0x1b0   :  { %v4031_v50 = vpack.c.bf16 %v977_v42, %v971_v41  ;;  %v661_v33 = vld [vmem:[%s8760_s1 + $0x13a0] sm:$0xff]  ;;  %v1038_v41 = vld [vmem:[%s8760_s1 + $0x1f68] sm:$0xff] }
 0x1b1   :  { %4012 = vmatpush1.bf16.msra.mxu1 %v4011_v46  ;;  %v990_v46 = vld [vmem:[%s8760_s1 + $0x1de8] sm:$0xff]  ;;  %v1209_v42 = vld [vmem:[%s8762_s2] sm:$0x3f] }
 0x1b2   :  { %4284 = vmatpush1.bf16.msra.mxu0 %v4283_v47  ;;  %4014 = vmatprep.subr.bf16.mxu1 %v4013_v49  ;;  %v626_v47 = vld [vmem:[%s8760_s1 + $0x1288] sm:$0xff]  ;;  %v632_v49 = vld [vmem:[%s8760_s1 + $0x12b8] sm:$0xff]  ;;  %v4033_v52 = vpack.c.bf16 %v990_v46, %v984_v18  ;;  %v4047_v18 = vpack.c.bf16 %v1025_v31, %v1019_v30  ;;  %v1218_v56 = vrot.slane %v1209_v42, %v1217_v43  ;;  %v1073_v31 = vld [vmem:[%s8760_s1 + $0x2080] sm:$0xff] }
 0x1b3   :  { %4286 = vmatprep.subr.bf16.mxu0 %v4285_v53  ;;  %v983_v53 = vld [vmem:[%s8760_s1 + $0x1db0] sm:$0xff]  ;;  %v4305_v55 = vpack.c.bf16 %v632_v49, %v626_v47  ;;  %v728_v43 = vld [vmem:[%s8760_s1 + $0x15b8] sm:$0xff] }
 0x1b4   :  { %v4035_v61 = vpack.c.bf16 %v989_v54, %v983_v53  ;;  %v1031_v49 = vld [vmem:[%s8760_s1 + $0x1f30] sm:$0xff] }
 0x1b5   :  { %4016 = vmatpush1.bf16.msra.mxu1 %v4015_v58  ;;  %v1002_v58 = vld [vmem:[%s8760_s1 + $0x1e48] sm:$0xff]  ;;  %v679_v54 = vld [vmem:[%s8760_s1 + $0x1430] sm:$0xff] }
 0x1b6   :  { %4288 = vmatpush1.bf16.msra.mxu0 %v4287_v59  ;;  %4018 = vmatprep.subr.bf16.mxu1 %v4017_v60  ;;  %v638_v59 = vld [vmem:[%s8760_s1 + $0x12e8] sm:$0xff]  ;;  %v644_v60 = vld [vmem:[%s8760_s1 + $0x1318] sm:$0xff]  ;;  %v4037_v63 = vpack.c.bf16 %v1002_v58, %v996_v57 }
 0x1b7   :  { %4290 = vmatprep.subr.bf16.mxu0 %v4289_v0  ;;  %v995_v0 = vld [vmem:[%s8760_s1 + $0x1e10] sm:$0xff]  ;;  %v686_v57 = vld [vmem:[%s8760_s1 + $0x1468] sm:$0xff]  ;;  %v692_v58 = vld [vmem:[%s8760_s1 + $0x1498] sm:$0xff] }
 0x1b8   :  { %v4039_v11 = vpack.c.bf16 %v1001_v1, %v995_v0  ;;  %v685_v0 = vld [vmem:[%s8760_s1 + $0x1460] sm:$0xff]  ;;  %v4325_v2 = vpack.c.bf16 %v692_v58, %v686_v57 }
 0x1b9   :  { %4020 = vmatpush1.bf16.msra.mxu1 %v4019_v6  ;;  %v1014_v6 = vld [vmem:[%s8760_s1 + $0x1ea8] sm:$0xff] }
 0x1ba   :  { %4292 = vmatpush1.bf16.msra.mxu0 %v4291_v8  ;;  %4022 = vmatprep.subr.bf16.mxu1 %v4021_v16  ;;  %v650_v8 = vld [vmem:[%s8760_s1 + $0x1348] sm:$0xff]  ;;  %v656_v16 = vld [vmem:[%s8760_s1 + $0x1378] sm:$0xff]  ;;  %v4041_v13 = vpack.c.bf16 %v1014_v6, %v1008_v5  ;;  %v4600_v5 = vadd.f32 %v6903_v10, %v1218_v56  ;;  %v1055_v10 = vld [vmem:[%s8760_s1 + $0x1ff0] sm:$0xff] }
 0x1bb   :  { %4294 = vmatprep.subr.bf16.mxu0 %v4293_v9  ;;  %v1007_v9 = vld [vmem:[%s8760_s1 + $0x1e70] sm:$0xff]  ;;  %v4313_v17 = vpack.c.bf16 %v656_v16, %v650_v8  ;;  %v704_v8 = vld [vmem:[%s8760_s1 + $0x14f8] sm:$0xff] }
 0x1bc   :  { %v740_v56 = vld [vmem:[%s8760_s1 + $0x1618] sm:$0xff] }
 0x1bd   :  { %4024 = vmatpush1.bf16.msra.mxu1 %v4023_v20  ;;  %v1026_v20 = vld [vmem:[%s8760_s1 + $0x1f08] sm:$0xff] }
 0x1be   :  { %4296 = vmatpush1.bf16.msra.mxu0 %v4295_v22  ;;  %4026 = vmatprep.subr.bf16.mxu1 %v4025_v23  ;;  %v4674_v22 = vld [vmem:[%s8761_s0 + $0x40] sm:$0xff]  ;;  %v662_v23 = vld [vmem:[%s8760_s1 + $0x13a8] sm:$0xff]  ;;  %v4045_v29 = vpack.c.bf16 %v1026_v20, %v1020_v19  ;;  %v703_v20 = vld [vmem:[%s8760_s1 + $0x14f0] sm:$0xff] }
 0x1bf   :  { %4298 = vmatprep.subr.bf16.mxu0 %v4297_v28  ;;  %v4315_v28 = vpack.c.bf16 %v655_v26, %v649_v14  ;;  %v1061_v14 = vld [vmem:[%s8760_s1 + $0x2020] sm:$0xff] }
 0x1c1   :  { %4028 = vmatpush1.bf16.msra.mxu1 %v4027_v35  ;;  %v4317_v35 = vpack.c.bf16 %v668_v24, %v662_v23  ;;  %v1074_v23 = vld [vmem:[%s8760_s1 + $0x2088] sm:$0xff] }
 0x1c2   :  { %4300 = vmatpush1.bf16.msra.mxu0 %v4299_v38  ;;  %4030 = vmatprep.subr.bf16.mxu1 %v4029_v39  ;;  %v667_v38 = vld [vmem:[%s8760_s1 + $0x13d0] sm:$0xff]  ;;  %v1032_v39 = vld [vmem:[%s8760_s1 + $0x1f38] sm:$0xff] }
 0x1c3   :  { %4302 = vmatprep.subr.bf16.mxu0 %v4301_v44  ;;  %v674_v44 = vld [vmem:[%s8760_s1 + $0x1408] sm:$0xff]  ;;  %v4319_v46 = vpack.c.bf16 %v667_v38, %v661_v33  ;;  %v4049_v47 = vpack.c.bf16 %v1038_v41, %v1032_v39  ;;  %v709_v33 = vld [vmem:[%s8760_s1 + $0x1520] sm:$0xff]  ;;  %v1080_v38 = vld [vmem:[%s8760_s1 + $0x20b8] sm:$0xff] }
 0x1c4   :  { %v4321_v53 = vpack.c.bf16 %v680_v45, %v674_v44  ;;  %v1086_v39 = vld [vmem:[%s8760_s1 + $0x20e8] sm:$0xff] }
 0x1c5   :  { %4032 = vmatpush1.bf16.msra.mxu1 %v4031_v50  ;;  %2446 = vmatmul.mubr.f32.vlgmr.msra.gmra.mrb[2].mxu0 %v6814_v32  ;;  %v4309_v32 = vpack.c.bf16 %v644_v60, %v638_v59  ;;  %v1037_v50 = vld [vmem:[%s8760_s1 + $0x1f60] sm:$0xff] }
 0x1c6   :  { %4304 = vmatpush1.bf16.msra.mxu0 %v4303_v51  ;;  %4034 = vmatprep.subr.bf16.mxu1 %v4033_v52  ;;  %v673_v51 = vld [vmem:[%s8760_s1 + $0x1400] sm:$0xff]  ;;  %v1214_v52 = vrot.slane %v1209_v42, %v1213_v34  ;;  %v4051_v59 = vpack.c.bf16 %v1037_v50, %v1031_v49  ;;  %v722_v42 = vld [vmem:[%s8760_s1 + $0x1588] sm:$0xff] }
 0x1c7   :  { %4306 = vmatprep.subr.bf16.mxu0 %v4305_v55  ;;  %2516 = vmatprep.mubr.f32.mxu0 %v6826_v36  ;;  %v1013_v36 = vld [vmem:[%s8760_s1 + $0x1ea0] sm:$0xff]  ;;  %v1050_v55 = vld [vmem:[%s8760_s1 + $0x1fc8] sm:$0xff]  ;;  %v4323_v60 = vpack.c.bf16 %v679_v54, %v673_v51  ;;  %v4337_v51 = vpack.c.bf16 %v728_v43, %v722_v42 }
 0x1c8   :  { %v4043_v25 = vpack.c.bf16 %v1013_v36, %v1007_v9  ;;  %v4597_v1 = vadd.f32 %v6895_v7, %v1214_v52  ;;  %v698_v7 = vld [vmem:[%s8760_s1 + $0x14c8] sm:$0xff]  ;;  %v4327_v9 = vpack.c.bf16 %v691_v3, %v685_v0  ;;  %v1085_v49 = vld [vmem:[%s8760_s1 + $0x20e0] sm:$0xff]  ;;  %v727_v52 = vld [vmem:[%s8760_s1 + $0x15b0] sm:$0xff] }
 0x1c9   :  { %4036 = vmatpush1.bf16.msra.mxu1 %v4035_v61  ;;  %v4053_v61 = vpack.c.bf16 %v1050_v55, %v1044_v21  ;;  %v4329_v19 = vpack.c.bf16 %v704_v8, %v698_v7  ;;  %v721_v50 = vld [vmem:[%s8760_s1 + $0x1580] sm:$0xff]  ;;  %v1098_v54 = vld [vmem:[%s8760_s1 + $0x2148] sm:$0xff]  ;;  %v739_v0 = vld [vmem:[%s8760_s1 + $0x1610] sm:$0xff] }
 0x1ca   :  { %4308 = vmatpush1.bf16.msra.mxu0 %v4307_v62  ;;  %4038 = vmatprep.subr.bf16.mxu1 %v4037_v63  ;;  %v1043_v62 = vld [vmem:[%s8760_s1 + $0x1f90] sm:$0xff]  ;;  %v1049_v63 = vld [vmem:[%s8760_s1 + $0x1fc0] sm:$0xff]  ;;  %v734_v55 = vld [vmem:[%s8760_s1 + $0x15e8] sm:$0xff]  ;;  %v4339_v58 = vpack.c.bf16 %v727_v52, %v721_v50 }
 0x1cb   :  { %4310 = vmatprep.subr.bf16.mxu0 %v4309_v32  ;;  %v1056_v32 = vld [vmem:[%s8760_s1 + $0x1ff8] sm:$0xff]  ;;  %v746_v3 = vld [vmem:[%s8760_s1 + $0x1648] sm:$0xff]  ;;  %v1103_v8 = vld [vmem:[%s8760_s1 + $0x2170] sm:$0xff] }
 0x1cc   :  { %2091 = vmatmul.mubr.f32.vlgmr.msra.gmra.mrb[4].mxu1 %v4674_v22  ;;  %v4057_v36 = vpack.c.bf16 %v1062_v4, %v1056_v32  ;;  %v1068_v22 = vld [vmem:[%s8760_s1 + $0x2058] sm:$0xff]  ;;  %v1146_v50 = vld [vmem:[%s8760_s1 + $0x22c8] sm:$0xff] }
 0x1cd   :  { %4040 = vmatpush1.bf16.msra.mxu1 %v4039_v11  ;;  %2161 = vmatprep.mubr.f32.mxu1 %v4675_v27  ;;  %v4059_v27 = vpack.c.bf16 %v1061_v14, %v1055_v10  ;;  %v4061_v30 = vpack.c.bf16 %v1074_v23, %v1068_v22  ;;  %v752_v32 = vld [vmem:[%s8760_s1 + $0x1678] sm:$0xff]  ;;  %v758_v10 = vld [vmem:[%s8760_s1 + $0x16a8] sm:$0xff]  ;;  %v1115_v23 = vld [vmem:[%s8760_s1 + $0x21d0] sm:$0xff] }
 0x1ce   :  { %4312 = vmatpush1.bf16.msra.mxu0 %v4311_v12  ;;  %4042 = vmatprep.subr.bf16.mxu1 %v4041_v13  ;;  %v4055_v12 = vpack.c.bf16 %v1049_v63, %v1043_v62  ;;  %v733_v62 = vld [vmem:[%s8760_s1 + $0x15e0] sm:$0xff]  ;;  %v4341_v63 = vpack.c.bf16 %v740_v56, %v734_v55  ;;  %v764_v14 = vld [vmem:[%s8760_s1 + $0x16d8] sm:$0xff] }
 0x1cf   :  { %4314 = vmatprep.subr.bf16.mxu0 %v4313_v17  ;;  %v697_v17 = vld [vmem:[%s8760_s1 + $0x14c0] sm:$0xff] }
 0x1d1   :  { %4044 = vmatpush1.bf16.msra.mxu1 %v4043_v25  ;;  %v716_v25 = vld [vmem:[%s8760_s1 + $0x1558] sm:$0xff] }
 0x1d2   :  { %4316 = vmatpush1.bf16.msra.mxu0 %v4315_v28  ;;  %4046 = vmatprep.subr.bf16.mxu1 %v4045_v29  ;;  %v4331_v29 = vpack.c.bf16 %v703_v20, %v697_v17 }
 0x1d3   :  { %4318 = vmatprep.subr.bf16.mxu0 %v4317_v35  ;;  %v715_v35 = vld [vmem:[%s8760_s1 + $0x1550] sm:$0xff] }
 0x1d5   :  { %4048 = vmatpush1.bf16.msra.mxu1 %v4047_v18  ;;  %v4335_v18 = vpack.c.bf16 %v715_v35, %v709_v33  ;;  %v770_v33 = vld [vmem:[%s8760_s1 + $0x1708] sm:$0xff] }
 0x1d6   :  { %4320 = vmatpush1.bf16.msra.mxu0 %v4319_v46  ;;  %4050 = vmatprep.subr.bf16.mxu1 %v4049_v47  ;;  %v4065_v46 = vpack.c.bf16 %v1086_v39, %v1080_v38  ;;  %v1079_v47 = vld [vmem:[%s8760_s1 + $0x20b0] sm:$0xff] }
 0x1d7   :  { %4322 = vmatprep.subr.bf16.mxu0 %v4321_v53  ;;  %v1092_v53 = vld [vmem:[%s8760_s1 + $0x2118] sm:$0xff]  ;;  %v4067_v57 = vpack.c.bf16 %v1085_v49, %v1079_v47  ;;  %v775_v47 = vld [vmem:[%s8760_s1 + $0x1730] sm:$0xff] }
 0x1d8   :  { %v1666_v6 = vpop.f32.mrb[0].mxu0  ;;  %v1140_v49 = vld [vmem:[%s8760_s1 + $0x2298] sm:$0xff] }
 0x1d9   :  { %v4598_v16 = vadd.f32 %v4597_v1, %v1666_v6  ;;  %v1668_v11 = vpop.f32.mrb[1].mxu0  ;;  %4052 = vmatpush1.bf16.msra.mxu1 %v4051_v59  ;;  %v4069_v59 = vpack.c.bf16 %v1098_v54, %v1092_v53  ;;  %v1104_v1 = vld [vmem:[%s8760_s1 + $0x2178] sm:$0xff]  ;;  %v4343_v6 = vpack.c.bf16 %v739_v0, %v733_v62  ;;  %v782_v53 = vld [vmem:[%s8760_s1 + $0x1768] sm:$0xff] }
 0x1da   :  { %v4601_v13 = vadd.f32 %v4600_v5, %v1668_v11  ;;  %4324 = vmatpush1.bf16.msra.mxu0 %v4323_v60  ;;  %4054 = vmatprep.subr.bf16.mxu1 %v4053_v61  ;;  %v1091_v60 = vld [vmem:[%s8760_s1 + $0x2110] sm:$0xff]  ;;  %v1097_v61 = vld [vmem:[%s8760_s1 + $0x2140] sm:$0xff]  ;;  %v788_v54 = vld [vmem:[%s8760_s1 + $0x1798] sm:$0xff] }
 0x1db   :  { %v7712_v26 = vadd.f32 %v4598_v16, %v6947_v37  ;;  %4326 = vmatprep.subr.bf16.mxu0 %v4325_v2  ;;  %v710_v37 = vld [vmem:[%s8760_s1 + $0x1528] sm:$0xff]  ;;  %v4071_v5 = vpack.c.bf16 %v1097_v61, %v1091_v60  ;;  %v1109_v16 = vld [vmem:[%s8760_s1 + $0x21a0] sm:$0xff]  ;;  %v4357_v62 = vpack.c.bf16 %v788_v54, %v782_v53  ;;  %v1152_v0 = vld [vmem:[%s8760_s1 + $0x22f8] sm:$0xff] }
 0x1dc   :  { %v7724_v24 = vadd.f32 %v4601_v13, %v6955_v40  ;;  %v1067_v40 = vld [vmem:[%s8760_s1 + $0x2050] sm:$0xff]  ;;  %v4333_v34 = vpack.c.bf16 %v716_v25, %v710_v37  ;;  %v1110_v2 = vld [vmem:[%s8760_s1 + $0x21a8] sm:$0xff]  ;;  %v745_v11 = vld [vmem:[%s8760_s1 + $0x1640] sm:$0xff] }
 0x1dd   :  { %4056 = vmatpush1.bf16.msra.mxu1 %v4055_v12  ;;  %v4063_v44 = vpack.c.bf16 %v1073_v31, %v1067_v40  ;;  %v7812_v4 = vmul.f32 0.70710677, %v7712_v26  ;;  %v4073_v7 = vpack.c.bf16 %v1110_v2, %v1104_v1  ;;  %v4345_v12 = vpack.c.bf16 %v752_v32, %v746_v3  ;;  %v751_v13 = vld [vmem:[%s8760_s1 + $0x1670] sm:$0xff]  ;;  %v1121_v37 = vld [vmem:[%s8760_s1 + $0x2200] sm:$0xff]  ;;  %v1134_v40 = vld [vmem:[%s8760_s1 + $0x2268] sm:$0xff] }
 0x1de   :  { %v7733_v28 = vmul.f32 0.70710677, %v7724_v24  ;;  %4328 = vmatpush1.bf16.msra.mxu0 %v4327_v9  ;;  %4058 = vmatprep.subr.bf16.mxu1 %v4057_v36  ;;  %v1116_v9 = vld [vmem:[%s8760_s1 + $0x21d8] sm:$0xff]  ;;  %v1122_v36 = vld [vmem:[%s8760_s1 + $0x2208] sm:$0xff]  ;;  %v4347_v20 = vpack.c.bf16 %v751_v13, %v745_v11  ;;  %v757_v25 = vld [vmem:[%s8760_s1 + $0x16a0] sm:$0xff]  ;;  %v4079_v38 = vpack.c.bf16 %v1121_v37, %v1115_v23 }
 0x1df   :  { %4330 = vmatprep.subr.bf16.mxu0 %v4329_v19  ;;  %v7839_v17 = vand.u32 2147483647, %v7812_v4  ;;  %v4075_v19 = vpack.c.bf16 %v1109_v16, %v1103_v8  ;;  %v4077_v22 = vpack.c.bf16 %v1122_v36, %v1116_v9  ;;  %v1145_v60 = vld [vmem:[%s8760_s1 + $0x22c0] sm:$0xff]  ;;  %v1158_v1 = vld [vmem:[%s8760_s1 + $0x2328] sm:$0xff]  ;;  %v799_v9 = vld [vmem:[%s8760_s1 + $0x17f0] sm:$0xff]  ;;  %vm2748_vm2 = vcmp.ge.f32.partialorder %v7812_v4, 0.0 }
 0x1e0   :  { %v7754_v41 = vand.u32 2147483647, %v7733_v28  ;;  %v781_v61 = vld [vmem:[%s8760_s1 + $0x1760] sm:$0xff]  ;;  %v794_v32 = vld [vmem:[%s8760_s1 + $0x17c8] sm:$0xff]  ;;  %v4089_v16 = vpack.c.bf16 %v1158_v1, %v1152_v0  ;;  %v1164_v36 = vld [vmem:[%s8760_s1 + $0x2358] sm:$0xff]  ;;  %vm2749_vm1 = vcmp.ge.f32.partialorder %v7733_v28, 0.0 }
 0x1e1   :  { %4060 = vmatpush1.bf16.msra.mxu1 %v4059_v27  ;;  %v4349_v27 = vpack.c.bf16 %v764_v14, %v758_v10  ;;  %v2766_v35 = vmul.f32 0.3275911, %v7839_v17  ;;  %v1157_v11 = vld [vmem:[%s8760_s1 + $0x2320] sm:$0xff]  ;;  %v1170_v10 = vld [vmem:[%s8760_s1 + $0x2388] sm:$0xff]  ;;  %v835_v1 = vld [vmem:[%s8760_s1 + $0x1910] sm:$0xff] }
 0x1e2   :  { %v2767_v45 = vmul.f32 0.3275911, %v7754_v41  ;;  %4332 = vmatpush1.bf16.msra.mxu0 %v4331_v29  ;;  %4062 = vmatprep.subr.bf16.mxu1 %v4061_v30  ;;  %v763_v29 = vld [vmem:[%s8760_s1 + $0x16d0] sm:$0xff]  ;;  %v1128_v30 = vld [vmem:[%s8760_s1 + $0x2238] sm:$0xff]  ;;  %v2845_v52 = vsub.f32 0.0, %v7754_v41  ;;  %v1194_v53 = vld [vmem:[%s8760_s1 + $0x2448] sm:$0xff] }
 0x1e3   :  { %4334 = vmatprep.subr.bf16.mxu0 %v4333_v34  ;;  %v776_v34 = vld [vmem:[%s8760_s1 + $0x1738] sm:$0xff]  ;;  %v4351_v42 = vpack.c.bf16 %v763_v29, %v757_v25  ;;  %v4081_v43 = vpack.c.bf16 %v1134_v40, %v1128_v30  ;;  %v4093_v25 = vpack.c.bf16 %v1170_v10, %v1164_v36  ;;  %v1169_v29 = vld [vmem:[%s8760_s1 + $0x2380] sm:$0xff]  ;;  %v847_v10 = vld [vmem:[%s8760_s1 + $0x1970] sm:$0xff] }
 0x1e4   :  { %v2773_v21 = vadd.f32 1.0, %v2767_v45  ;;  %v1133_v45 = vld [vmem:[%s8760_s1 + $0x2260] sm:$0xff]  ;;  %v2851_v3 = vmul.f32 %v2845_v52, %v7754_v41  ;;  %v1151_v41 = vld [vmem:[%s8760_s1 + $0x22f0] sm:$0xff]  ;;  %v1188_v52 = vld [vmem:[%s8760_s1 + $0x2418] sm:$0xff] }
 0x1e5   :  { %4064 = vmatpush1.bf16.msra.mxu1 %v4063_v44  ;;  %v1127_v44 = vld [vmem:[%s8760_s1 + $0x2230] sm:$0xff]  ;;  %v4091_v23 = vpack.c.bf16 %v1157_v11, %v1151_v41  ;;  %v805_v30 = vld [vmem:[%s8760_s1 + $0x1820] sm:$0xff] }
 0x1e6   :  { %4641 = vrcp.f32 %v2773_v21  ;;  %4336 = vmatpush1.bf16.msra.mxu0 %v4335_v18  ;;  %4066 = vmatprep.subr.bf16.mxu1 %v4065_v46  ;;  %v769_v18 = vld [vmem:[%s8760_s1 + $0x1700] sm:$0xff]  ;;  %v4353_v46 = vpack.c.bf16 %v776_v34, %v770_v33  ;;  %v2772_v21 = vadd.f32 1.0, %v2766_v35  ;;  %v4083_v55 = vpack.c.bf16 %v1133_v45, %v1127_v44  ;;  %v811_v33 = vld [vmem:[%s8760_s1 + $0x1850] sm:$0xff]  ;;  %v1176_v34 = vld [vmem:[%s8760_s1 + $0x23b8] sm:$0xff] }
 0x1e7   :  { %4338 = vmatprep.subr.bf16.mxu0 %v4337_v51  ;;  %v1182_v35 = vld [vmem:[%s8760_s1 + $0x23e8] sm:$0xff]  ;;  %v4367_v44 = vpack.c.bf16 %v811_v33, %v805_v30  ;;  %v1189_v33 = vld [vmem:[%s8760_s1 + $0x2420] sm:$0xff] }
 0x1e8   :  { %4643 = vrcp.f32 %v2772_v21  ;;  %v4097_v45 = vpack.c.bf16 %v1182_v35, %v1176_v34  ;;  %v830_v21 = vld [vmem:[%s8760_s1 + $0x18e8] sm:$0xff]  ;;  %v1195_v34 = vld [vmem:[%s8760_s1 + $0x2450] sm:$0xff]  ;;  %v4679_v28 = vld [vmem:[%s8761_s0 + $0x60] sm:$0xff] }
 0x1e9   :  { %4068 = vmatpush1.bf16.msra.mxu1 %v4067_v57  ;;  %v4355_v57 = vpack.c.bf16 %v775_v47, %v769_v18  ;;  %v1175_v18 = vld [vmem:[%s8760_s1 + $0x23b0] sm:$0xff]  ;;  %v817_v47 = vld [vmem:[%s8760_s1 + $0x1880] sm:$0xff] }
 0x1ea   :  { %4340 = vmatpush1.bf16.msra.mxu0 %v4339_v58  ;;  %4070 = vmatprep.subr.bf16.mxu1 %v4069_v59  ;;  %v4085_v58 = vpack.c.bf16 %v1146_v50, %v1140_v49  ;;  %v1139_v59 = vld [vmem:[%s8760_s1 + $0x2290] sm:$0xff]  ;;  %v961_v4 = vld [vmem:[%s8760_s1 + $0x1d00] sm:$0xff] }
 0x1eb   :  { %4342 = vmatprep.subr.bf16.mxu0 %v4341_v63  ;;  %v787_v63 = vld [vmem:[%s8760_s1 + $0x1790] sm:$0xff] }
 0x1ec   :  { %v4359_v8 = vpack.c.bf16 %v787_v63, %v781_v61  ;;  %v1187_v61 = vld [vmem:[%s8760_s1 + $0x2410] sm:$0xff]  ;;  %v829_v63 = vld [vmem:[%s8760_s1 + $0x18e0] sm:$0xff] }
 0x1ed   :  { %4072 = vmatpush1.bf16.msra.mxu1 %v4071_v5  ;;  %v800_v5 = vld [vmem:[%s8760_s1 + $0x17f8] sm:$0xff] }
 0x1ee   :  { %4344 = vmatpush1.bf16.msra.mxu0 %v4343_v6  ;;  %4074 = vmatprep.subr.bf16.mxu1 %v4073_v7  ;;  %v4087_v6 = vpack.c.bf16 %v1145_v60, %v1139_v59  ;;  %v4361_v13 = vpack.c.bf16 %v800_v5, %v794_v32  ;;  %v4101_v60 = vpack.c.bf16 %v1194_v53, %v1188_v52  ;;  %v4677_v5 = vld [vmem:[%s8761_s0 + $0x48] sm:$0xff]  ;;  %v1201_v52 = vld [vmem:[%s8760_s1 + $0x2480] sm:$0xff]  ;;  %v1207_v53 = vld [vmem:[%s8760_s1 + $0x24b0] sm:$0xff] }
 0x1ef   :  { %4346 = vmatprep.subr.bf16.mxu0 %v4345_v12  ;;  %v793_v12 = vld [vmem:[%s8760_s1 + $0x17c0] sm:$0xff] }
 0x1f0   :  { %v7859_v31 = vpop.eup %4641  ;;  %v4363_v37 = vpack.c.bf16 %v799_v9, %v793_v12  ;;  %v1199_v12 = vld [vmem:[%s8760_s1 + $0x2470] sm:$0xff]  ;;  %v841_v9 = vld [vmem:[%s8760_s1 + $0x1940] sm:$0xff] }
 0x1f1   :  { %4076 = vmatpush1.bf16.msra.mxu1 %v4075_v19  ;;  %v2791_v39 = vmul.f32 1.0614054, %v7859_v31  ;;  %v2858_v19 = vmul.f32 1.442695, %v2851_v3  ;;  %v1206_v3 = vld [vmem:[%s8760_s1 + $0x24a8] sm:$0xff] }
 0x1f2   :  { %4348 = vmatpush1.bf16.msra.mxu0 %v4347_v20  ;;  %4078 = vmatprep.subr.bf16.mxu1 %v4077_v22  ;;  %v806_v20 = vld [vmem:[%s8760_s1 + $0x1828] sm:$0xff]  ;;  %v812_v22 = vld [vmem:[%s8760_s1 + $0x1858] sm:$0xff]  ;;  %v7979_v49 = vpop.eup %4643 }
 0x1f3   :  { %4350 = vmatprep.subr.bf16.mxu0 %v4349_v27  ;;  %v2797_v51 = vadd.f32 -1.4531521, %v2791_v39  ;;  %v1163_v27 = vld [vmem:[%s8760_s1 + $0x2350] sm:$0xff]  ;;  %v4365_v40 = vpack.c.bf16 %v812_v22, %v806_v20  ;;  %4645 = vpow2.f32 %v2858_v19  ;;  %v818_v39 = vld [vmem:[%s8760_s1 + $0x1888] sm:$0xff]  ;;  %v1196_v19 = vld [vmem:[%s8760_s1 + $0x2458] sm:$0xff] }
 0x1f4   :  { %v8049_v22 = vld [vmem:[%s8761_s0 + $0x50] sm:$0xff] }
 0x1f5   :  { %4080 = vmatpush1.bf16.msra.mxu1 %v4079_v38  ;;  %v2803_v56 = vmul.f32 %v7859_v31, %v2797_v51  ;;  %v823_v51 = vld [vmem:[%s8760_s1 + $0x18b0] sm:$0xff] }
 0x1f6   :  { %4352 = vmatpush1.bf16.msra.mxu0 %v4351_v42  ;;  %4082 = vmatprep.subr.bf16.mxu1 %v4081_v43  ;;  %v824_v42 = vld [vmem:[%s8760_s1 + $0x18b8] sm:$0xff]  ;;  %v4095_v43 = vpack.c.bf16 %v1169_v29, %v1163_v27  ;;  %v4371_v59 = vpack.c.bf16 %v823_v51, %v817_v47  ;;  %v4379_v29 = vpack.c.bf16 %v847_v10, %v841_v9  ;;  %v865_v51 = vld [vmem:[%s8760_s1 + $0x1a00] sm:$0xff] }
 0x1f7   :  { %4354 = vmatprep.subr.bf16.mxu0 %v4353_v46  ;;  %v2809_v2 = vadd.f32 1.4214138, %v2803_v56  ;;  %v1181_v46 = vld [vmem:[%s8760_s1 + $0x23e0] sm:$0xff]  ;;  %v4369_v50 = vpack.c.bf16 %v824_v42, %v818_v39  ;;  %v4676_v56 = vld [vmem:[%s8761_s0 + $0x30] sm:$0xff]  ;;  %v1202_v39 = vld [vmem:[%s8760_s1 + $0x2488] sm:$0xff] }
 0x1f8   :  { %v1208_v42 = vld [vmem:[%s8760_s1 + $0x24b8] sm:$0xff]  ;;  %v889_v10 = vld [vmem:[%s8760_s1 + $0x1ac0] sm:$0xff] }
 0x1f9   :  { %4084 = vmatpush1.bf16.msra.mxu1 %v4083_v55  ;;  %v2815_v7 = vmul.f32 %v7859_v31, %v2809_v2  ;;  %v836_v55 = vld [vmem:[%s8760_s1 + $0x1918] sm:$0xff] }
 0x1fa   :  { %4356 = vmatpush1.bf16.msra.mxu0 %v4355_v57  ;;  %4086 = vmatprep.subr.bf16.mxu1 %v4085_v58  ;;  %v4099_v57 = vpack.c.bf16 %v1181_v46, %v1175_v18  ;;  %v2790_v58 = vmul.f32 1.0614054, %v7979_v49  ;;  %v4373_v0 = vpack.c.bf16 %v836_v55, %v830_v21  ;;  %v1200_v2 = vld [vmem:[%s8760_s1 + $0x2478] sm:$0xff]  ;;  %v4495_v18 = vpack.c.bf16 %v1195_v34, %v1189_v33 }
 0x1fb   :  { %4358 = vmatprep.subr.bf16.mxu0 %v4357_v62  ;;  %v2821_v14 = vadd.f32 -0.28449672, %v2815_v7  ;;  %v1193_v62 = vld [vmem:[%s8760_s1 + $0x2440] sm:$0xff]  ;;  %v848_v7 = vld [vmem:[%s8760_s1 + $0x1978] sm:$0xff]  ;;  %v4105_v11 = vpack.c.bf16 %v1206_v3, %v1200_v2  ;;  %v2844_v55 = vsub.f32 0.0, %v7839_v17 }
 0x1fc   :  { %v2796_v41 = vadd.f32 -1.4531521, %v2790_v58  ;;  %v2914_v58 = vld [vmem:[%s8763_s3 + $0x80] sm:$0xff] }
 0x1fd   :  { %4088 = vmatpush1.bf16.msra.mxu1 %v4087_v6  ;;  %v2827_v38 = vmul.f32 %v7859_v31, %v2821_v14  ;;  %v842_v6 = vld [vmem:[%s8760_s1 + $0x1948] sm:$0xff]  ;;  %v877_v3 = vld [vmem:[%s8760_s1 + $0x1a60] sm:$0xff] }
 0x1fe   :  { %4360 = vmatpush1.bf16.msra.mxu0 %v4359_v8  ;;  %4090 = vmatprep.subr.bf16.mxu1 %v4089_v16  ;;  %v4103_v8 = vpack.c.bf16 %v1193_v62, %v1187_v61  ;;  %v4646_v16 = vpop.eup %4645  ;;  %v4377_v36 = vpack.c.bf16 %v848_v7, %v842_v6  ;;  %v1190_v14 = vld [vmem:[%s8760_s1 + $0x2428] sm:$0xff]  ;;  %v2802_v27 = vmul.f32 %v7979_v49, %v2796_v41  ;;  %v884_v62 = vld [vmem:[%s8760_s1 + $0x1a98] sm:$0xff]  ;;  %v883_v7 = vld [vmem:[%s8760_s1 + $0x1a90] sm:$0xff] }
 0x1ff   :  { %4362 = vmatprep.subr.bf16.mxu0 %v4361_v13  ;;  %v2833_v54 = vadd.f32 0.2548296, %v2827_v38  ;;  %v1205_v13 = vld [vmem:[%s8760_s1 + $0x24a0] sm:$0xff]  ;;  %v4493_v30 = vpack.c.bf16 %v1196_v19, %v1190_v14  ;;  %v859_v38 = vld [vmem:[%s8760_s1 + $0x19d0] sm:$0xff]  ;;  %v878_v61 = vld [vmem:[%s8760_s1 + $0x1a68] sm:$0xff]  ;;  %v4391_v9 = vpack.c.bf16 %v883_v7, %v877_v3 }
 0x200   :  { %v2808_v46 = vadd.f32 1.4214138, %v2802_v27  ;;  %v4389_v6 = vpack.c.bf16 %v884_v62, %v878_v61  ;;  %v2917_v41 = vld [vmem:[%s8763_s3 + $0x98] sm:$0xff]  ;;  %v2900_v14 = vld [vmem:[%s8763_s3 + $0x10] sm:$0xff]  ;;  %v2919_v27 = vld [vmem:[%s8763_s3 + $0xa8] sm:$0xff] }
 0x201   :  { %4092 = vmatpush1.bf16.msra.mxu1 %v4091_v23  ;;  %v2839_v32 = vmul.f32 %v7859_v31, %v2833_v54  ;;  %v4375_v31 = vpack.c.bf16 %v835_v1, %v829_v63  ;;  %v854_v23 = vld [vmem:[%s8760_s1 + $0x19a8] sm:$0xff]  ;;  %v4684_v54 = vmov -1.0   ;;  %v4499_v63 = vpack.c.bf16 %v1207_v53, %v1201_v52  ;;  %v2901_v19 = vld [vmem:[%s8763_s3 + $0x18] sm:$0xff]  ;;  %v2906_v3 = vld [vmem:[%s8763_s3 + $0x40] sm:$0xff] }
 0x202   :  { %4364 = vmatpush1.bf16.msra.mxu0 %v4363_v37  ;;  %4094 = vmatprep.subr.bf16.mxu1 %v4093_v25  ;;  %v860_v37 = vld [vmem:[%s8760_s1 + $0x19d8] sm:$0xff]  ;;  %v4107_v25 = vpack.c.bf16 %v1205_v13, %v1199_v12  ;;  %v2755_v21 = vsel %vm2749_vm1, 1.0, %v4684_v54  ;;  %v938_v7 = vld [vmem:[%s8760_s1 + $0x1c48] sm:$0xff] }
 0x203   :  { %4366 = vmatprep.subr.bf16.mxu0 %v4365_v40  ;;  %v2869_v20 = vmul.f32 %v4646_v16, %v2839_v32  ;;  %v853_v40 = vld [vmem:[%s8760_s1 + $0x19a0] sm:$0xff]  ;;  %v4381_v35 = vpack.c.bf16 %v860_v37, %v854_v23  ;;  %v2916_v16 = vld [vmem:[%s8763_s3 + $0x90] sm:$0xff]  ;;  %v932_v61 = vld [vmem:[%s8760_s1 + $0x1c18] sm:$0xff] }
 0x204   :  { %v4383_v47 = vpack.c.bf16 %v859_v38, %v853_v40  ;;  %v2898_v32 = vld [vmem:[%s8763_s3] sm:$0xff]  ;;  %v895_v37 = vld [vmem:[%s8760_s1 + $0x1af0] sm:$0xff]  ;;  %v4507_v40 = vpack.c.bf16 %v2901_v19, %v2900_v14  ;;  %v2927_v19 = vld [vmem:[%s8763_s3 + $0xe8] sm:$0xff] }
 0x205   :  { %4096 = vmatpush1.bf16.msra.mxu1 %v4095_v43  ;;  %2517 = vmatmul.mubr.f32.vlgmr.msra.gmra.mrb[2].mxu0 %v4676_v56  ;;  %v2875_v43 = vsub.f32 1.0, %v2869_v20  ;;  %v4395_v34 = vpack.c.bf16 %v895_v37, %v889_v10  ;;  %v901_v38 = vld [vmem:[%s8760_s1 + $0x1b20] sm:$0xff]  ;;  %v943_v10 = vld [vmem:[%s8760_s1 + $0x1c70] sm:$0xff] }
 0x206   :  { %4368 = vmatpush1.bf16.msra.mxu0 %v4367_v44  ;;  %4098 = vmatprep.subr.bf16.mxu1 %v4097_v45  ;;  %v866_v44 = vld [vmem:[%s8760_s1 + $0x1a08] sm:$0xff]  ;;  %v872_v45 = vld [vmem:[%s8760_s1 + $0x1a38] sm:$0xff]  ;;  %v2926_v14 = vld [vmem:[%s8763_s3 + $0xe0] sm:$0xff] }
 0x207   :  { %4370 = vmatprep.subr.bf16.mxu0 %v4369_v50  ;;  %2587 = vmatprep.mubr.f32.mxu0 %v4677_v5  ;;  %v4497_v50 = vpack.c.bf16 %v1208_v42, %v1202_v39  ;;  %v4385_v56 = vpack.c.bf16 %v872_v45, %v866_v44  ;;  %v2899_v5 = vld [vmem:[%s8763_s3 + $0x8] sm:$0xff]  ;;  %v2902_v39 = vld [vmem:[%s8763_s3 + $0x20] sm:$0xff]  ;;  %v907_v44 = vld [vmem:[%s8760_s1 + $0x1b50] sm:$0xff] }
 0x208   :  { %v4503_v12 = vpack.c.bf16 %v2899_v5, %v2898_v32  ;;  %v2903_v42 = vld [vmem:[%s8763_s3 + $0x28] sm:$0xff]  ;;  %v2920_v45 = vld [vmem:[%s8763_s3 + $0xb0] sm:$0xff]  ;;  %v4399_v52 = vpack.c.bf16 %v907_v44, %v901_v38  ;;  %v2929_v38 = vld [vmem:[%s8763_s3 + $0xf8] sm:$0xff] }
 0x209   :  { %4100 = vmatpush1.bf16.msra.mxu1 %v4099_v57  ;;  %v871_v57 = vld [vmem:[%s8760_s1 + $0x1a30] sm:$0xff]  ;;  %v2907_v32 = vld [vmem:[%s8763_s3 + $0x48] sm:$0xff] }
 0x20a   :  { %4372 = vmatpush1.bf16.msra.mxu0 %v4371_v59  ;;  %4102 = vmatprep.subr.bf16.mxu1 %v4101_v60  ;;  %v2915_v59 = vld [vmem:[%s8763_s3 + $0x88] sm:$0xff]  ;;  %v2881_v60 = vmul.f32 %v2875_v43, %v2755_v21  ;;  %v4387_v1 = vpack.c.bf16 %v871_v57, %v865_v51  ;;  %v913_v21 = vld [vmem:[%s8760_s1 + $0x1b80] sm:$0xff] }
 0x20b   :  { %4374 = vmatprep.subr.bf16.mxu0 %v4373_v0  ;;  %v2814_v0 = vmul.f32 %v7979_v49, %v2808_v46  ;;  %v4501_v2 = vpack.c.bf16 %v2915_v59, %v2914_v58  ;;  %v914_v46 = vld [vmem:[%s8760_s1 + $0x1b88] sm:$0xff]  ;;  %v919_v58 = vld [vmem:[%s8760_s1 + $0x1bb0] sm:$0xff]  ;;  %v2922_v59 = vld [vmem:[%s8763_s3 + $0xc0] sm:$0xff] }
 0x20c   :  { %2162 = vmatmul.mubr.f32.vlgmr.msra.gmra.mrb[4].mxu1 %v8049_v22 }
 0x20d   :  { %4104 = vmatpush1.bf16.msra.mxu1 %v4103_v8  ;;  %2232 = vmatprep.mubr.f32.mxu1 %v4683_v48  ;;  %v2887_v8 = vadd.f32 1.0, %v2881_v60  ;;  %v2820_v13 = vadd.f32 -0.28449672, %v2814_v0  ;;  %v2923_v60 = vld [vmem:[%s8763_s3 + $0xc8] sm:$0xff]  ;;  %v4403_v0 = vpack.c.bf16 %v919_v58, %v913_v21  ;;  %v980_v21 = vld [vmem:[%s8760_s1 + $0x1d98] sm:$0xff] }
 0x20e   :  { %4376 = vmatpush1.bf16.msra.mxu0 %v4375_v31  ;;  %4106 = vmatprep.subr.bf16.mxu1 %v4105_v11  ;;  %v890_v31 = vld [vmem:[%s8760_s1 + $0x1ac8] sm:$0xff]  ;;  %v2737_v11 = vmul.f32 0.5, %v7724_v24 }
 0x20f   :  { %4378 = vmatprep.subr.bf16.mxu0 %v4377_v36  ;;  %v4505_v36 = vpack.c.bf16 %v2917_v41, %v2916_v16  ;;  %v2826_v33 = vmul.f32 %v7979_v49, %v2820_v13  ;;  %v4519_v41 = vpack.c.bf16 %v2907_v32, %v2906_v3  ;;  %v2908_v13 = vld [vmem:[%s8763_s3 + $0x50] sm:$0xff]  ;;  %v998_v3 = vld [vmem:[%s8760_s1 + $0x1e28] sm:$0xff]  ;;  %v1004_v32 = vld [vmem:[%s8760_s1 + $0x1e58] sm:$0xff] }
 0x210   :  { %v2893_v20 = vmul.f32 %v2887_v8, %v2737_v11  ;;  %v944_v8 = vld [vmem:[%s8760_s1 + $0x1c78] sm:$0xff] }
 0x211   :  { %4108 = vmatpush1.bf16.msra.mxu1 %v4107_v25  ;;  %v2918_v25 = vld [vmem:[%s8763_s3 + $0xa0] sm:$0xff]  ;;  %v2832_v51 = vadd.f32 0.2548296, %v2826_v33 }
 0x212   :  { %4380 = vmatpush1.bf16.msra.mxu0 %v4379_v29  ;;  %4494 = vmatprep.subr.bf16.mxu1 %v4493_v30  ;;  %v902_v29 = vld [vmem:[%s8760_s1 + $0x1b28] sm:$0xff]  ;;  %v908_v30 = vld [vmem:[%s8760_s1 + $0x1b58] sm:$0xff] }
 0x213   :  { %4382 = vmatprep.subr.bf16.mxu0 %v4381_v35  ;;  %v4509_v35 = vpack.c.bf16 %v2919_v27, %v2918_v25  ;;  %v4397_v43 = vpack.c.bf16 %v908_v30, %v902_v29  ;;  %v4525_v27 = vpack.c.bf16 %v2927_v19, %v2926_v14  ;;  %v949_v29 = vld [vmem:[%s8760_s1 + $0x1ca0] sm:$0xff]  ;;  %v1027_v19 = vld [vmem:[%s8760_s1 + $0x1f10] sm:$0xff] }
 0x214   :  { %3217 = vmatmul.mubr.msk.f32.vlgmr.msra.gmra.mrb[4].mxu1 %vm1241_vm0, %v4679_v28  ;;  %v2910_v30 = vld [vmem:[%s8763_s3 + $0x60] sm:$0xff] }
 0x215   :  { %4496 = vmatpush1.bf16.msra.mxu1 %v4495_v18  ;;  %2729 = vmatprep.mubr.f32.mxu1 %v4683_v48  ;;  %v2850_v48 = vmul.f32 %v2844_v55, %v7839_v17  ;;  %v896_v17 = vld [vmem:[%s8760_s1 + $0x1af8] sm:$0xff]  ;;  %v2904_v55 = vld [vmem:[%s8763_s3 + $0x30] sm:$0xff]  ;;  %v1021_v14 = vld [vmem:[%s8760_s1 + $0x1ee0] sm:$0xff] }
 0x216   :  { %4384 = vmatpush1.bf16.msra.mxu0 %v4383_v47  ;;  %4498 = vmatprep.subr.bf16.mxu1 %v4497_v50  ;;  %v4393_v23 = vpack.c.bf16 %v896_v17, %v890_v31  ;;  %v2921_v18 = vld [vmem:[%s8763_s3 + $0xb8] sm:$0xff]  ;;  %v4511_v50 = vpack.c.bf16 %v2903_v42, %v2902_v39  ;;  %v962_v39 = vld [vmem:[%s8760_s1 + $0x1d08] sm:$0xff] }
 0x217   :  { %4386 = vmatprep.subr.bf16.mxu0 %v4385_v56  ;;  %v2856_v24 = vmul.f32 1.442695, %v2850_v48  ;;  %v920_v47 = vld [vmem:[%s8760_s1 + $0x1bb8] sm:$0xff]  ;;  %v4513_v53 = vpack.c.bf16 %v2921_v18, %v2920_v45  ;;  %v2924_v48 = vld [vmem:[%s8763_s3 + $0xd0] sm:$0xff] }
 0x218   :  { %v2905_v56 = vld [vmem:[%s8763_s3 + $0x38] sm:$0xff]  ;;  %v4401_v57 = vpack.c.bf16 %v920_v47, %v914_v46  ;;  %v2912_v47 = vld [vmem:[%s8763_s3 + $0x70] sm:$0xff] }
 0x219   :  { %4500 = vmatpush1.bf16.msra.mxu1 %v4499_v63  ;;  %4647 = vpow2.f32 %v2856_v24  ;;  %v4515_v62 = vpack.c.bf16 %v2905_v56, %v2904_v55  ;;  %v2838_v63 = vmul.f32 %v7979_v49, %v2832_v51  ;;  %v931_v49 = vld [vmem:[%s8760_s1 + $0x1c10] sm:$0xff]  ;;  %v950_v24 = vld [vmem:[%s8760_s1 + $0x1ca8] sm:$0xff]  ;;  %v968_v42 = vld [vmem:[%s8760_s1 + $0x1d38] sm:$0xff] }
 0x21a   :  { %4388 = vmatpush1.bf16.msra.mxu0 %v4387_v1  ;;  %4502 = vmatprep.subr.bf16.mxu1 %v4501_v2  ;;  %v4517_v1 = vpack.c.bf16 %v2923_v60, %v2922_v59  ;;  %v925_v2 = vld [vmem:[%s8760_s1 + $0x1be0] sm:$0xff]  ;;  %v4417_v51 = vpack.c.bf16 %v968_v42, %v962_v39  ;;  %v979_v60 = vld [vmem:[%s8760_s1 + $0x1d90] sm:$0xff]  ;;  %v1064_v39 = vld [vmem:[%s8760_s1 + $0x2038] sm:$0xff] }
 0x21b   :  { %4390 = vmatprep.subr.bf16.mxu0 %v4389_v6  ;;  %v2925_v6 = vld [vmem:[%s8763_s3 + $0xd8] sm:$0xff]  ;;  %v4407_v17 = vpack.c.bf16 %v931_v49, %v925_v2  ;;  %v973_v59 = vld [vmem:[%s8760_s1 + $0x1d60] sm:$0xff]  ;;  %v4429_v49 = vpack.c.bf16 %v1004_v32, %v998_v3  ;;  %v1111_v3 = vld [vmem:[%s8760_s1 + $0x21b0] sm:$0xff] }
 0x21c   :  { %3218 = vmatmul.mubr.msk.f32.vlgmr.msra.gmra.mrb[6].mxu1 %vm1241_vm0, %v4679_v28  ;;  %v926_v28 = vld [vmem:[%s8760_s1 + $0x1be8] sm:$0xff]  ;;  %v4521_v11 = vpack.c.bf16 %v2925_v6, %v2924_v48  ;;  %v985_v2 = vld [vmem:[%s8760_s1 + $0x1dc0] sm:$0xff]  ;;  %v1003_v6 = vld [vmem:[%s8760_s1 + $0x1e50] sm:$0xff] }
 0x21d   :  { %4504 = vmatpush3.bf16.msra.mxu1 %v4503_v12  ;;  %3065 = vmatprep.mubr.f32.mxu1 %v2893_v20  ;;  %v4405_v5 = vpack.c.bf16 %v932_v61, %v926_v28  ;;  %v937_v12 = vld [vmem:[%s8760_s1 + $0x1c40] sm:$0xff]  ;;  %v956_v20 = vld [vmem:[%s8760_s1 + $0x1cd8] sm:$0xff]  ;;  %v2736_v28 = vmul.f32 0.5, %v7712_v26  ;;  %v986_v61 = vld [vmem:[%s8760_s1 + $0x1dc8] sm:$0xff] }
 0x21e   :  { %4392 = vmatpush1.bf16.msra.mxu0 %v4391_v9  ;;  %4506 = vmatprep.subr.bf16.mxu1 %v4505_v36  ;;  %v2909_v9 = vld [vmem:[%s8763_s3 + $0x58] sm:$0xff]  ;;  %v4409_v36 = vpack.c.bf16 %v944_v8, %v938_v7  ;;  %v4411_v25 = vpack.c.bf16 %v943_v10, %v937_v12  ;;  %v4413_v33 = vpack.c.bf16 %v956_v20, %v950_v24  ;;  %v991_v26 = vld [vmem:[%s8760_s1 + $0x1df0] sm:$0xff]  ;;  %v997_v48 = vld [vmem:[%s8760_s1 + $0x1e20] sm:$0xff] }
 0x21f   :  { %4394 = vmatprep.subr.bf16.mxu0 %v4393_v23  ;;  %v4523_v23 = vpack.c.bf16 %v2909_v9, %v2908_v13  ;;  %v1010_v7 = vld [vmem:[%s8760_s1 + $0x1e88] sm:$0xff]  ;;  %v1016_v8 = vld [vmem:[%s8760_s1 + $0x1eb8] sm:$0xff]  ;;  %v4680_v13 = vld [vmem:[%s8761_s0 + $0x40] sm:$0xff] }
 0x220   :  { %v1028_v12 = vld [vmem:[%s8760_s1 + $0x1f18] sm:$0xff]  ;;  %v1034_v24 = vld [vmem:[%s8760_s1 + $0x1f48] sm:$0xff] }
 0x221   :  { %4508 = vmatpush3.bf16.msra.mxu1 %v4507_v40  ;;  %v2911_v40 = vld [vmem:[%s8763_s3 + $0x68] sm:$0xff]  ;;  %v1040_v20 = vld [vmem:[%s8760_s1 + $0x1f78] sm:$0xff] }
 0x222   :  { %4396 = vmatpush1.bf16.msra.mxu0 %v4395_v34  ;;  %4510 = vmatprep.subr.bf16.mxu1 %v4509_v35  ;;  %v955_v34 = vld [vmem:[%s8760_s1 + $0x1cd0] sm:$0xff]  ;;  %v4527_v44 = vpack.c.bf16 %v2911_v40, %v2910_v30  ;;  %v1052_v30 = vld [vmem:[%s8760_s1 + $0x1fd8] sm:$0xff]  ;;  %v1118_v32 = vld [vmem:[%s8760_s1 + $0x21e8] sm:$0xff] }
 0x223   :  { %4398 = vmatprep.subr.bf16.mxu0 %v4397_v43  ;;  %v4648_v16 = vpop.eup %4647  ;;  %v2928_v35 = vld [vmem:[%s8763_s3 + $0xf0] sm:$0xff]  ;;  %v2754_v43 = vsel %vm2748_vm2, 1.0, %v4684_v54  ;;  %v4415_v18 = vpack.c.bf16 %v955_v34, %v949_v29  ;;  %v1046_v29 = vld [vmem:[%s8760_s1 + $0x1fa8] sm:$0xff]  ;;  %v1045_v34 = vld [vmem:[%s8760_s1 + $0x1fa0] sm:$0xff] }
 0x224   :  { %v2868_v31 = vmul.f32 %v4648_v16, %v2838_v63  ;;  %v4529_v46 = vpack.c.bf16 %v2929_v38, %v2928_v35  ;;  %v4431_v16 = vpack.c.bf16 %v1003_v6, %v997_v48  ;;  %v1051_v35 = vld [vmem:[%s8760_s1 + $0x1fd0] sm:$0xff]  ;;  %v1058_v38 = vld [vmem:[%s8760_s1 + $0x2008] sm:$0xff]  ;;  %v1117_v6 = vld [vmem:[%s8760_s1 + $0x21e0] sm:$0xff] }
 0x225   :  { %4512 = vmatpush3.bf16.msra.mxu1 %v4511_v50  ;;  %v2913_v50 = vld [vmem:[%s8763_s3 + $0x78] sm:$0xff]  ;;  %v4447_v42 = vpack.c.bf16 %v1051_v35, %v1045_v34  ;;  %v1171_v34 = vld [vmem:[%s8760_s1 + $0x2390] sm:$0xff]  ;;  %v1178_v35 = vld [vmem:[%s8760_s1 + $0x23c8] sm:$0xff] }
 0x226   :  { %4400 = vmatpush1.bf16.msra.mxu0 %v4399_v52  ;;  %4514 = vmatprep.subr.bf16.mxu1 %v4513_v53  ;;  %v2874_v37 = vsub.f32 1.0, %v2868_v31  ;;  %v967_v52 = vld [vmem:[%s8760_s1 + $0x1d30] sm:$0xff]  ;;  %v974_v53 = vld [vmem:[%s8760_s1 + $0x1d68] sm:$0xff]  ;;  %v4531_v55 = vpack.c.bf16 %v2913_v50, %v2912_v47  ;;  %v1009_v31 = vld [vmem:[%s8760_s1 + $0x1e80] sm:$0xff] }
 0x227   :  { %4402 = vmatprep.subr.bf16.mxu0 %v4401_v57  ;;  %v4419_v57 = vpack.c.bf16 %v967_v52, %v961_v4  ;;  %v4421_v58 = vpack.c.bf16 %v980_v21, %v974_v53  ;;  %v1075_v4 = vld [vmem:[%s8760_s1 + $0x2090] sm:$0xff]  ;;  %v1082_v52 = vld [vmem:[%s8760_s1 + $0x20c8] sm:$0xff]  ;;  %v1088_v53 = vld [vmem:[%s8760_s1 + $0x20f8] sm:$0xff] }
 0x228   :  { %v2880_v45 = vmul.f32 %v2874_v37, %v2754_v43  ;;  %v4441_v37 = vpack.c.bf16 %v1040_v20, %v1034_v24  ;;  %v4449_v43 = vpack.c.bf16 %v1064_v39, %v1058_v38  ;;  %v1160_v24 = vld [vmem:[%s8760_s1 + $0x2338] sm:$0xff]  ;;  %v2946_v39 = vld [vmem:[%s8763_s3 + $0x180] sm:$0xff] }
 0x229   :  { %4516 = vmatpush3.bf16.msra.mxu1 %v4515_v62  ;;  %v992_v62 = vld [vmem:[%s8760_s1 + $0x1df8] sm:$0xff] }
 0x22a   :  { %4404 = vmatpush1.bf16.msra.mxu0 %v4403_v0  ;;  %4518 = vmatprep.subr.bf16.mxu1 %v4517_v1  ;;  %v2886_v56 = vadd.f32 1.0, %v2880_v45  ;;  %v4423_v0 = vpack.c.bf16 %v979_v60, %v973_v59  ;;  %v4425_v1 = vpack.c.bf16 %v992_v62, %v986_v61  ;;  %v1063_v45 = vld [vmem:[%s8760_s1 + $0x2030] sm:$0xff]  ;;  %v1100_v59 = vld [vmem:[%s8760_s1 + $0x2158] sm:$0xff]  ;;  %v1093_v61 = vld [vmem:[%s8760_s1 + $0x2120] sm:$0xff] }
 0x22b   :  { %4406 = vmatprep.subr.bf16.mxu0 %v4405_v5  ;;  %v4427_v5 = vpack.c.bf16 %v991_v26, %v985_v2  ;;  %v1099_v62 = vld [vmem:[%s8760_s1 + $0x2150] sm:$0xff]  ;;  %v1105_v26 = vld [vmem:[%s8760_s1 + $0x2180] sm:$0xff]  ;;  %v1184_v38 = vld [vmem:[%s8760_s1 + $0x23f8] sm:$0xff] }
 0x22c   :  { %v2892_v63 = vmul.f32 %v2886_v56, %v2736_v28  ;;  %v1081_v56 = vld [vmem:[%s8760_s1 + $0x20c0] sm:$0xff] }
 0x22d   :  { %4520 = vmatpush3.bf16.msra.mxu1 %v4519_v41  ;;  %v4433_v41 = vpack.c.bf16 %v1016_v8, %v1010_v7  ;;  %v1123_v7 = vld [vmem:[%s8760_s1 + $0x2210] sm:$0xff]  ;;  %v1130_v8 = vld [vmem:[%s8760_s1 + $0x2248] sm:$0xff] }
 0x22e   :  { %4408 = vmatpush1.bf16.msra.mxu0 %v4407_v17  ;;  %4522 = vmatprep.subr.bf16.mxu1 %v4521_v11  ;;  %v1015_v17 = vld [vmem:[%s8760_s1 + $0x1eb0] sm:$0xff]  ;;  %v1022_v11 = vld [vmem:[%s8760_s1 + $0x1ee8] sm:$0xff] }
 0x22f   :  { %4410 = vmatprep.subr.bf16.mxu0 %v4409_v36  ;;  %v4435_v9 = vpack.c.bf16 %v1015_v17, %v1009_v31  ;;  %v4681_v36 = vld [vmem:[%s8761_s0 + $0x58] sm:$0xff]  ;;  %v4437_v10 = vpack.c.bf16 %v1028_v12, %v1022_v11  ;;  %v1129_v17 = vld [vmem:[%s8760_s1 + $0x2240] sm:$0xff]  ;;  %v1135_v11 = vld [vmem:[%s8760_s1 + $0x2270] sm:$0xff] }
 0x230   :  { %v1142_v12 = vld [vmem:[%s8760_s1 + $0x22a8] sm:$0xff] }
 0x231   :  { %4524 = vmatpush3.bf16.msra.mxu1 %v4523_v23  ;;  %v4439_v23 = vpack.c.bf16 %v1027_v19, %v1021_v14  ;;  %v1147_v14 = vld [vmem:[%s8760_s1 + $0x22d0] sm:$0xff]  ;;  %v1154_v19 = vld [vmem:[%s8760_s1 + $0x2308] sm:$0xff] }
 0x232   :  { %4412 = vmatpush1.bf16.msra.mxu0 %v4411_v25  ;;  %4526 = vmatprep.subr.bf16.mxu1 %v4525_v27  ;;  %v1033_v25 = vld [vmem:[%s8760_s1 + $0x1f40] sm:$0xff]  ;;  %v1039_v27 = vld [vmem:[%s8760_s1 + $0x1f70] sm:$0xff] }
 0x233   :  { %4414 = vmatprep.subr.bf16.mxu0 %v4413_v33  ;;  %v4443_v40 = vpack.c.bf16 %v1039_v27, %v1033_v25  ;;  %v4445_v33 = vpack.c.bf16 %v1052_v30, %v1046_v29  ;;  %v1159_v25 = vld [vmem:[%s8760_s1 + $0x2330] sm:$0xff]  ;;  %v1166_v27 = vld [vmem:[%s8760_s1 + $0x2368] sm:$0xff]  ;;  %v1172_v29 = vld [vmem:[%s8760_s1 + $0x2398] sm:$0xff] }
 0x235   :  { %4528 = vmatpush3.bf16.msra.mxu1 %v4527_v44  ;;  %v1057_v44 = vld [vmem:[%s8760_s1 + $0x2000] sm:$0xff] }
 0x236   :  { %4416 = vmatpush1.bf16.msra.mxu0 %v4415_v18  ;;  %4530 = vmatprep.subr.bf16.mxu1 %v4529_v46  ;;  %v1070_v18 = vld [vmem:[%s8760_s1 + $0x2068] sm:$0xff]  ;;  %v1076_v46 = vld [vmem:[%s8760_s1 + $0x2098] sm:$0xff]  ;;  %v4451_v47 = vpack.c.bf16 %v1063_v45, %v1057_v44  ;;  %v2930_v45 = vld [vmem:[%s8763_s3 + $0x100] sm:$0xff] }
 0x237   :  { %4418 = vmatprep.subr.bf16.mxu0 %v4417_v51  ;;  %v4453_v50 = vpack.c.bf16 %v1076_v46, %v1070_v18  ;;  %v1069_v51 = vld [vmem:[%s8760_s1 + $0x2060] sm:$0xff]  ;;  %v2931_v18 = vld [vmem:[%s8763_s3 + $0x108] sm:$0xff]  ;;  %v4489_v46 = vpack.c.bf16 %v1184_v38, %v1178_v35 }
 0x238   :  { %v4455_v21 = vpack.c.bf16 %v1075_v4, %v1069_v51  ;;  %v4535_v51 = vpack.c.bf16 %v2931_v18, %v2930_v45  ;;  %v2948_v4 = vld [vmem:[%s8763_s3 + $0x190] sm:$0xff] }
 0x239   :  { %4532 = vmatpush3.bf16.msra.mxu1 %v4531_v55  ;;  %v4457_v55 = vpack.c.bf16 %v1088_v53, %v1082_v52  ;;  %v2949_v52 = vld [vmem:[%s8763_s3 + $0x198] sm:$0xff] }
 0x23a   :  { %4420 = vmatpush1.bf16.msra.mxu0 %v4419_v57  ;;  %v1087_v57 = vld [vmem:[%s8760_s1 + $0x20f0] sm:$0xff] }
 0x23b   :  { %4422 = vmatprep.subr.bf16.mxu0 %v4421_v58  ;;  %v1094_v58 = vld [vmem:[%s8760_s1 + $0x2128] sm:$0xff]  ;;  %v4459_v60 = vpack.c.bf16 %v1087_v57, %v1081_v56  ;;  %v2933_v56 = vld [vmem:[%s8763_s3 + $0x118] sm:$0xff] }
 0x23c   :  { %3066 = vmatmul.mubr.f32.vlgmr.msra.gmra.mrb[8].mxu1 %v2892_v63  ;;  %v4461_v28 = vpack.c.bf16 %v1100_v59, %v1094_v58  ;;  %v1106_v63 = vld [vmem:[%s8760_s1 + $0x2188] sm:$0xff]  ;;  %v2950_v58 = vld [vmem:[%s8763_s3 + $0x1a0] sm:$0xff] }
 0x23d   :  { %v2951_v59 = vld [vmem:[%s8763_s3 + $0x1a8] sm:$0xff] }
 0x23e   :  { %4424 = vmatpush1.bf16.msra.mxu0 %v4423_v0  ;;  %v1112_v0 = vld [vmem:[%s8760_s1 + $0x21b8] sm:$0xff] }
 0x23f   :  { %4426 = vmatprep.subr.bf16.mxu0 %v4425_v1  ;;  %v4463_v1 = vpack.c.bf16 %v1099_v62, %v1093_v61  ;;  %v4465_v2 = vpack.c.bf16 %v1112_v0, %v1106_v63  ;;  %v2935_v61 = vld [vmem:[%s8763_s3 + $0x128] sm:$0xff]  ;;  %v2952_v63 = vld [vmem:[%s8763_s3 + $0x1b0] sm:$0xff]  ;;  %v2953_v0 = vld [vmem:[%s8763_s3 + $0x1b8] sm:$0xff] }
 0x242   :  { %4428 = vmatpush1.bf16.msra.mxu0 %v4427_v5  ;;  %v1124_v5 = vld [vmem:[%s8760_s1 + $0x2218] sm:$0xff] }
 0x243   :  { %4430 = vmatprep.subr.bf16.mxu0 %v4429_v49  ;;  %v4467_v49 = vpack.c.bf16 %v1111_v3, %v1105_v26  ;;  %v4469_v48 = vpack.c.bf16 %v1124_v5, %v1118_v32  ;;  %v2937_v26 = vld [vmem:[%s8763_s3 + $0x138] sm:$0xff]  ;;  %v2955_v32 = vld [vmem:[%s8763_s3 + $0x1c8] sm:$0xff] }
 0x245   :  { %2588 = vmatmul.mubr.f32.vlgmr.msra.gmra.mrb[2].mxu0 %v4680_v13  ;;  %v1148_v13 = vld [vmem:[%s8760_s1 + $0x22d8] sm:$0xff] }
 0x246   :  { %4432 = vmatpush1.bf16.msra.mxu0 %v4431_v16  ;;  %2658 = vmatprep.mubr.f32.mxu0 %v4681_v36  ;;  %v1136_v16 = vld [vmem:[%s8760_s1 + $0x2278] sm:$0xff]  ;;  %v4477_v36 = vpack.c.bf16 %v1148_v13, %v1142_v12  ;;  %v2959_v12 = vld [vmem:[%s8763_s3 + $0x1e8] sm:$0xff] }
 0x247   :  { %4434 = vmatprep.subr.bf16.mxu0 %v4433_v41  ;;  %v4471_v41 = vpack.c.bf16 %v1123_v7, %v1117_v6  ;;  %v4473_v31 = vpack.c.bf16 %v1136_v16, %v1130_v8  ;;  %v2956_v7 = vld [vmem:[%s8763_s3 + $0x1d0] sm:$0xff]  ;;  %v2957_v8 = vld [vmem:[%s8763_s3 + $0x1d8] sm:$0xff] }
 0x248   :  { %v4553_v16 = vpack.c.bf16 %v2957_v8, %v2956_v7 }
 0x24a   :  { %4436 = vmatpush1.bf16.msra.mxu0 %v4435_v9  ;;  %v4475_v9 = vpack.c.bf16 %v1135_v11, %v1129_v17  ;;  %v2958_v11 = vld [vmem:[%s8763_s3 + $0x1e0] sm:$0xff] }
 0x24b   :  { %4438 = vmatprep.subr.bf16.mxu0 %v4437_v10  ;;  %v1141_v10 = vld [vmem:[%s8760_s1 + $0x22a0] sm:$0xff]  ;;  %v4557_v13 = vpack.c.bf16 %v2959_v12, %v2958_v11 }
 0x24c   :  { %v4479_v20 = vpack.c.bf16 %v1147_v14, %v1141_v10  ;;  %v2960_v14 = vld [vmem:[%s8763_s3 + $0x1f0] sm:$0xff] }
 0x24e   :  { %4440 = vmatpush1.bf16.msra.mxu0 %v4439_v23  ;;  %v4481_v23 = vpack.c.bf16 %v1160_v24, %v1154_v19  ;;  %v2961_v19 = vld [vmem:[%s8763_s3 + $0x1f8] sm:$0xff] }
 0x24f   :  { %4442 = vmatprep.subr.bf16.mxu0 %v4441_v37  ;;  %v1153_v37 = vld [vmem:[%s8760_s1 + $0x2300] sm:$0xff]  ;;  %v4561_v24 = vpack.c.bf16 %v2961_v19, %v2960_v14 }
 0x250   :  { %v4483_v30 = vpack.c.bf16 %v1159_v25, %v1153_v37  ;;  %v1221_v25 = vsub.s32 2, %v7600_v15 }
 0x252   :  { %4444 = vmatpush1.bf16.msra.mxu0 %v4443_v40  ;;  %v4485_v40 = vpack.c.bf16 %v1172_v29, %v1166_v27  ;;  %v1225_v27 = vsub.s32 3, %v7600_v15  ;;  %v8633_v29 = vld [vmem:[%s8762_s2] sm:$0x3f] }
 0x253   :  { %4446 = vmatprep.subr.bf16.mxu0 %v4445_v33  ;;  %v1165_v33 = vld [vmem:[%s8760_s1 + $0x2360] sm:$0xff] }
 0x256   :  { %4448 = vmatpush1.bf16.msra.mxu0 %v4447_v42  ;;  %v2947_v42 = vld [vmem:[%s8763_s3 + $0x188] sm:$0xff] }
 0x257   :  { %4450 = vmatprep.subr.bf16.mxu0 %v4449_v43  ;;  %v4487_v43 = vpack.c.bf16 %v1171_v34, %v1165_v33  ;;  %v4533_v44 = vpack.c.bf16 %v2947_v42, %v2946_v39 }
 0x259   :  { %4534 = vmatprep.subr.bf16.mxu1 %v4533_v44  ;;  %v2979_v44 = vld [vmem:[%s8763_s3 + $0x288] sm:$0xff] }
 0x25a   :  { %4452 = vmatpush1.bf16.msra.mxu0 %v4451_v47  ;;  %v1177_v47 = vld [vmem:[%s8760_s1 + $0x23c0] sm:$0xff]  ;;  %4536 = vmatpush3.bf16.msra.mxu1 %v4535_v51 }
 0x25b   :  { %4454 = vmatprep.subr.bf16.mxu0 %v4453_v50  ;;  %v1183_v50 = vld [vmem:[%s8760_s1 + $0x23f0] sm:$0xff] }
 0x25c   :  { %v4491_v53 = vpack.c.bf16 %v1183_v50, %v1177_v47 }
 0x25e   :  { %4456 = vmatpush1.bf16.msra.mxu0 %v4455_v21  ;;  %v4537_v21 = vpack.c.bf16 %v2949_v52, %v2948_v4 }
 0x25f   :  { %4458 = vmatprep.subr.bf16.mxu0 %v4457_v55  ;;  %v2932_v55 = vld [vmem:[%s8763_s3 + $0x110] sm:$0xff] }
 0x260   :  { %v4539_v57 = vpack.c.bf16 %v2933_v56, %v2932_v55  ;;  %4538 = vmatprep.subr.bf16.mxu1 %v4537_v21 }
 0x262   :  { %4460 = vmatpush1.bf16.msra.mxu0 %v4459_v60  ;;  %4540 = vmatpush3.bf16.msra.mxu1 %v4539_v57  ;;  %v4541_v60 = vpack.c.bf16 %v2951_v59, %v2950_v58 }
 0x263   :  { %4462 = vmatprep.subr.bf16.mxu0 %v4461_v28  ;;  %v2934_v28 = vld [vmem:[%s8763_s3 + $0x120] sm:$0xff] }
 0x264   :  { %v4543_v62 = vpack.c.bf16 %v2935_v61, %v2934_v28  ;;  %4542 = vmatprep.subr.bf16.mxu1 %v4541_v60 }
 0x266   :  { %4464 = vmatpush1.bf16.msra.mxu0 %v4463_v1  ;;  %4544 = vmatpush3.bf16.msra.mxu1 %v4543_v62  ;;  %v4545_v1 = vpack.c.bf16 %v2953_v0, %v2952_v63 }
 0x267   :  { %4466 = vmatprep.subr.bf16.mxu0 %v4465_v2  ;;  %v2936_v2 = vld [vmem:[%s8763_s3 + $0x130] sm:$0xff] }
 0x268   :  { %v4547_v3 = vpack.c.bf16 %v2937_v26, %v2936_v2  ;;  %4546 = vmatprep.subr.bf16.mxu1 %v4545_v1 }
 0x26a   :  { %4468 = vmatpush1.bf16.msra.mxu0 %v4467_v49  ;;  %4548 = vmatpush3.bf16.msra.mxu1 %v4547_v3  ;;  %v2938_v49 = vld [vmem:[%s8763_s3 + $0x140] sm:$0xff] }
 0x26b   :  { %4470 = vmatprep.subr.bf16.mxu0 %v4469_v48  ;;  %v2939_v48 = vld [vmem:[%s8763_s3 + $0x148] sm:$0xff] }
 0x26c   :  { %v4551_v6 = vpack.c.bf16 %v2939_v48, %v2938_v49 }
 0x26e   :  { %4472 = vmatpush1.bf16.msra.mxu0 %v4471_v41  ;;  %v2940_v41 = vld [vmem:[%s8763_s3 + $0x150] sm:$0xff] }
 0x26f   :  { %4474 = vmatprep.subr.bf16.mxu0 %v4473_v31  ;;  %v2941_v31 = vld [vmem:[%s8763_s3 + $0x158] sm:$0xff] }
 0x270   :  { %v4555_v17 = vpack.c.bf16 %v2941_v31, %v2940_v41 }
 0x272   :  { %4476 = vmatpush1.bf16.msra.mxu0 %v4475_v9  ;;  %v2942_v9 = vld [vmem:[%s8763_s3 + $0x160] sm:$0xff] }
 0x273   :  { %4478 = vmatprep.subr.bf16.mxu0 %v4477_v36  ;;  %v2943_v36 = vld [vmem:[%s8763_s3 + $0x168] sm:$0xff] }
 0x274   :  { %v4559_v10 = vpack.c.bf16 %v2943_v36, %v2942_v9 }
 0x276   :  { %4480 = vmatpush1.bf16.msra.mxu0 %v4479_v20  ;;  %v2944_v20 = vld [vmem:[%s8763_s3 + $0x170] sm:$0xff] }
 0x277   :  { %4482 = vmatprep.subr.bf16.mxu0 %v4481_v23  ;;  %v2945_v23 = vld [vmem:[%s8763_s3 + $0x178] sm:$0xff] }
 0x278   :  { %v4563_v37 = vpack.c.bf16 %v2945_v23, %v2944_v20 }
 0x27a   :  { %4484 = vmatpush1.bf16.msra.mxu0 %v4483_v30  ;;  %v1222_v30 = vrot.slane %v8633_v29, %v1221_v25  ;;  %v2962_v25 = vld [vmem:[%s8763_s3 + $0x200] sm:$0xff] }
 0x27b   :  { %4486 = vmatprep.subr.bf16.mxu0 %v4485_v40  ;;  %v1226_v40 = vrot.slane %v8633_v29, %v1225_v27  ;;  %v2963_v27 = vld [vmem:[%s8763_s3 + $0x208] sm:$0xff] }
 0x27e   :  { %4488 = vmatpush1.bf16.msra.mxu0 %v4487_v43  ;;  %v2978_v43 = vld [vmem:[%s8763_s3 + $0x280] sm:$0xff] }
 0x27f   :  { %4490 = vmatprep.subr.bf16.mxu0 %v4489_v46  ;;  %v4565_v18 = vpack.c.bf16 %v2979_v44, %v2978_v43  ;;  %v4567_v43 = vpack.c.bf16 %v2963_v27, %v2962_v25 }
 0x282   :  { %4492 = vmatpush1.bf16.msra.mxu0 %v4491_v53 }
 0x285   :  { %2659 = vmatmul.mubr.f32.vlgmr.msra.gmra.mrb[2].mxu0 %v8049_v22  ;;  %v2954_v22 = vld [vmem:[%s8763_s3 + $0x1c0] sm:$0xff] }
 0x286   :  { %v4549_v5 = vpack.c.bf16 %v2955_v32, %v2954_v22 }
 0x288   :  { %4550 = vmatprep.subr.bf16.mxu1 %v4549_v5 }
 0x289   :  { %4552 = vmatpush3.bf16.msra.mxu1 %v4551_v6 }
 0x28a   :  { %4554 = vmatprep.subr.bf16.mxu1 %v4553_v16 }
 0x28d   :  { %4556 = vmatpush3.bf16.msra.mxu1 %v4555_v17 }
 0x28e   :  { %4558 = vmatprep.subr.bf16.mxu1 %v4557_v13 }
 0x291   :  { %4560 = vmatpush3.bf16.msra.mxu1 %v4559_v10 }
 0x292   :  { %4562 = vmatprep.subr.bf16.mxu1 %v4561_v24 }
 0x295   :  { %4564 = vmatpush3.bf16.msra.mxu1 %v4563_v37 }
 0x296   :  { %4566 = vmatprep.subr.bf16.mxu1 %v4565_v18  ;;  %v2964_v18 = vld [vmem:[%s8763_s3 + $0x210] sm:$0xff] }
 0x2e7   :  { %v2234_v33 = vpop.f32.mrb[4].mxu1 }
 0x2e8   :  { %v8637_v34 = vadd.f32 %v2234_v33, %v1222_v30  ;;  %v2236_v35 = vpop.f32.mrb[5].mxu1  ;;  %v2980_v33 = vld [vmem:[%s8763_s3 + $0x290] sm:$0xff] }
 0x2e9   :  { %v4604_v38 = vadd.f32 %v2236_v35, %v1226_v40  ;;  %v2981_v35 = vld [vmem:[%s8763_s3 + $0x298] sm:$0xff] }
 0x2ea   :  { %v2744_v39 = vmul.f32 0.70710677, %v8637_v34 }
 0x2eb   :  { %v2745_v42 = vmul.f32 0.70710677, %v4604_v38  ;;  %v2739_v30 = vmul.f32 0.5, %v4604_v38  ;;  %v2965_v38 = vld [vmem:[%s8763_s3 + $0x218] sm:$0xff] }
 0x2ec   :  { %v2762_v45 = vand.u32 2147483647, %v2744_v39  ;;  %vm2750_vm3 = vcmp.ge.f32.partialorder %v2744_v39, 0.0  ;;  %v2738_v39 = vmul.f32 0.5, %v8637_v34  ;;  %v2983_v34 = vld [vmem:[%s8763_s3 + $0x2a8] sm:$0xff] }
 0x2ed   :  { %v2763_v46 = vand.u32 2147483647, %v2745_v42  ;;  %vm2751_vm4 = vcmp.ge.f32.partialorder %v2745_v42, 0.0  ;;  %v2756_v14 = vsel %vm2750_vm3, 1.0, %v4684_v54 }
 0x2ee   :  { %v2768_v47 = vmul.f32 0.3275911, %v2762_v45  ;;  %v2846_v21 = vsub.f32 0.0, %v2762_v45  ;;  %v2757_v20 = vsel %vm2751_vm4, 1.0, %v4684_v54 }
 0x2ef   :  { %v2769_v50 = vmul.f32 0.3275911, %v2763_v46  ;;  %v8646_v51 = vpop.f32.mrb[6].mxu1  ;;  %v2847_v55 = vsub.f32 0.0, %v2763_v46 }
 0x2f0   :  { %v2774_v4 = vadd.f32 1.0, %v2768_v47  ;;  %v8648_v52 = vpop.f32.mrb[7].mxu1  ;;  %v2852_v57 = vmul.f32 %v2846_v21, %v2762_v45  ;;  %v4569_v45 = vpack.c.bf16 %v2981_v35, %v2980_v33  ;;  %v4571_v47 = vpack.c.bf16 %v2965_v38, %v2964_v18  ;;  %v2984_v21 = vld [vmem:[%s8763_s3 + $0x2b0] sm:$0xff] }
 0x2f1   :  { %v2775_v53 = vadd.f32 1.0, %v2769_v50  ;;  %v2853_v60 = vmul.f32 %v2847_v55, %v2763_v46  ;;  %v2982_v46 = vld [vmem:[%s8763_s3 + $0x2a0] sm:$0xff]  ;;  %v2985_v55 = vld [vmem:[%s8763_s3 + $0x2b8] sm:$0xff] }
 0x2f2   :  { %4649 = vrcp.f32 %v2774_v4  ;;  %v2860_v62 = vmul.f32 1.442695, %v2852_v57  ;;  %v4573_v50 = vpack.c.bf16 %v2983_v34, %v2982_v46  ;;  %v2966_v4 = vld [vmem:[%s8763_s3 + $0x220] sm:$0xff]  ;;  %v4577_v57 = vpack.c.bf16 %v2985_v55, %v2984_v21 }
 0x2f3   :  { %4651 = vrcp.f32 %v2775_v53  ;;  %v2862_v1 = vmul.f32 1.442695, %v2853_v60  ;;  %v2967_v53 = vld [vmem:[%s8763_s3 + $0x228] sm:$0xff]  ;;  %v2986_v60 = vld [vmem:[%s8763_s3 + $0x2c0] sm:$0xff] }
 0x2f4   :  { %4653 = vpow2.f32 %v2860_v62 }
 0x2f5   :  { %4655 = vpow2.f32 %v2862_v1  ;;  %v2988_v1 = vld [vmem:[%s8763_s3 + $0x2d0] sm:$0xff] }
 0x2fc   :  { %v4650_v56 = vpop.eup %4649 }
 0x2fd   :  { %v4652_v58 = vpop.eup %4651  ;;  %v2792_v59 = vmul.f32 1.0614054, %v4650_v56 }
 0x2fe   :  { %v2793_v28 = vmul.f32 1.0614054, %v4652_v58  ;;  %v4654_v41 = vpop.eup %4653 }
 0x2ff   :  { %v2798_v61 = vadd.f32 -1.4531521, %v2792_v59  ;;  %v4656_v17 = vpop.eup %4655  ;;  %v2969_v59 = vld [vmem:[%s8763_s3 + $0x238] sm:$0xff] }
 0x300   :  { %v2799_v63 = vadd.f32 -1.4531521, %v2793_v28  ;;  %v2987_v28 = vld [vmem:[%s8763_s3 + $0x2c8] sm:$0xff] }
 0x301   :  { %v2804_v0 = vmul.f32 %v4650_v56, %v2798_v61  ;;  %v4581_v62 = vpack.c.bf16 %v2987_v28, %v2986_v60 }
 0x302   :  { %v2805_v2 = vmul.f32 %v4652_v58, %v2799_v63  ;;  %v2970_v63 = vld [vmem:[%s8763_s3 + $0x240] sm:$0xff] }
 0x303   :  { %v2810_v26 = vadd.f32 1.4214138, %v2804_v0  ;;  %v2971_v0 = vld [vmem:[%s8763_s3 + $0x248] sm:$0xff] }
 0x304   :  { %v2811_v3 = vadd.f32 1.4214138, %v2805_v2  ;;  %v2989_v2 = vld [vmem:[%s8763_s3 + $0x2d8] sm:$0xff] }
 0x305   :  { %v2816_v22 = vmul.f32 %v4650_v56, %v2810_v26  ;;  %v4583_v26 = vpack.c.bf16 %v2971_v0, %v2970_v63 }
 0x306   :  { %v2817_v32 = vmul.f32 %v4652_v58, %v2811_v3  ;;  %v4585_v3 = vpack.c.bf16 %v2989_v2, %v2988_v1 }
 0x307   :  { %v2822_v5 = vadd.f32 -0.28449672, %v2816_v22  ;;  %v2972_v22 = vld [vmem:[%s8763_s3 + $0x250] sm:$0xff] }
 0x308   :  { %v2823_v49 = vadd.f32 -0.28449672, %v2817_v32  ;;  %v2973_v32 = vld [vmem:[%s8763_s3 + $0x258] sm:$0xff] }
 0x309   :  { %v2828_v48 = vmul.f32 %v4650_v56, %v2822_v5  ;;  %v2990_v5 = vld [vmem:[%s8763_s3 + $0x2e0] sm:$0xff] }
 0x30a   :  { %v2829_v6 = vmul.f32 %v4652_v58, %v2823_v49  ;;  %v2991_v49 = vld [vmem:[%s8763_s3 + $0x2e8] sm:$0xff] }
 0x30b   :  { %v2834_v7 = vadd.f32 0.2548296, %v2828_v48  ;;  %v4587_v48 = vpack.c.bf16 %v2973_v32, %v2972_v22 }
 0x30c   :  { %v2835_v8 = vadd.f32 0.2548296, %v2829_v6  ;;  %v4589_v6 = vpack.c.bf16 %v2991_v49, %v2990_v5 }
 0x30d   :  { %v2840_v16 = vmul.f32 %v4650_v56, %v2834_v7  ;;  %v4575_v56 = vpack.c.bf16 %v2967_v53, %v2966_v4  ;;  %v2974_v7 = vld [vmem:[%s8763_s3 + $0x260] sm:$0xff] }
 0x30e   :  { %v2841_v31 = vmul.f32 %v4652_v58, %v2835_v8  ;;  %v2968_v58 = vld [vmem:[%s8763_s3 + $0x230] sm:$0xff]  ;;  %v2975_v8 = vld [vmem:[%s8763_s3 + $0x268] sm:$0xff] }
 0x30f   :  { %v2870_v11 = vmul.f32 %v4654_v41, %v2840_v16  ;;  %v3252_v12 = vpop.f32.mrb[8].mxu1  ;;  %v4579_v61 = vpack.c.bf16 %v2969_v59, %v2968_v58  ;;  %v2992_v16 = vld [vmem:[%s8763_s3 + $0x2f0] sm:$0xff]  ;;  %v2993_v41 = vld [vmem:[%s8763_s3 + $0x2f8] sm:$0xff] }
 0x310   :  { %v3253_v13 = vpop.f32.mrb[9].mxu1  ;;  %v2871_v9 = vmul.f32 %v4656_v17, %v2841_v31  ;;  %v4591_v31 = vpack.c.bf16 %v2975_v8, %v2974_v7  ;;  %v4593_v17 = vpack.c.bf16 %v2993_v41, %v2992_v16 }
 0x311   :  { %v2876_v36 = vsub.f32 1.0, %v2870_v11  ;;  %v8650_v10 = vadd.f32 %v3253_v13, %v3252_v12  ;;  %v2976_v11 = vld [vmem:[%s8763_s3 + $0x270] sm:$0xff]  ;;  %v2977_v12 = vld [vmem:[%s8763_s3 + $0x278] sm:$0xff] }
 0x312   :  { %v2877_v19 = vsub.f32 1.0, %v2871_v9  ;;  %v4595_v13 = vpack.c.bf16 %v2977_v12, %v2976_v11  ;;  %v1229_v9 = vsub.s32 4, %v7600_v15  ;;  %v3219_v12 = vld [vmem:[%s8764_s4] ss:$0 sm:$0xff] }
 0x313   :  { %v2882_v24 = vmul.f32 %v2876_v36, %v2756_v14  ;;  %v1233_v36 = vsub.s32 5, %v7600_v15 }
 0x314   :  { %v2883_v23 = vmul.f32 %v2877_v19, %v2757_v20  ;;  %v1230_v14 = vrot.slane %v8633_v29, %v1229_v9 }
 0x315   :  { %v2888_v37 = vadd.f32 1.0, %v2882_v24  ;;  %v1234_v19 = vrot.slane %v8633_v29, %v1233_v36  ;;  %v3068_v36 = vadd.f32 %v8650_v10, %v3219_v12 }
 0x316   :  { %v2889_v40 = vadd.f32 1.0, %v2883_v23 }
 0x317   :  { %v2894_v44 = vmul.f32 %v2888_v37, %v2738_v39 }
 0x318   :  { %v2895_v42 = vmul.f32 %v2889_v40, %v2739_v30 }
 0x31a   :  { %3135 = vmatprep.mubr.f32.mxu1 %v2895_v42 }
 0x31b   :  { %3136 = vmatmul.mubr.f32.vlgmr.msra.gmra.mrb[10].mxu1 %v2894_v44 }
 0x31c   :  { %4568 = vmatpush3.bf16.msra.mxu1 %v4567_v43 }
 0x31d   :  { %4570 = vmatprep.subr.bf16.mxu1 %v4569_v45 }
 0x320   :  { %4572 = vmatpush3.bf16.msra.mxu1 %v4571_v47 }
 0x321   :  { %4574 = vmatprep.subr.bf16.mxu1 %v4573_v50 }
 0x324   :  { %4576 = vmatpush3.bf16.msra.mxu1 %v4575_v56 }
 0x325   :  { %4578 = vmatprep.subr.bf16.mxu1 %v4577_v57 }
 0x328   :  { %4580 = vmatpush3.bf16.msra.mxu1 %v4579_v61 }
 0x329   :  { %4582 = vmatprep.subr.bf16.mxu1 %v4581_v62 }
 0x32c   :  { %4584 = vmatpush3.bf16.msra.mxu1 %v4583_v26 }
 0x32d   :  { %4586 = vmatprep.subr.bf16.mxu1 %v4585_v3 }
 0x330   :  { %4588 = vmatpush3.bf16.msra.mxu1 %v4587_v48 }
 0x331   :  { %4590 = vmatprep.subr.bf16.mxu1 %v4589_v6 }
 0x334   :  { %4592 = vmatpush3.bf16.msra.mxu1 %v4591_v31 }
 0x335   :  { %4594 = vmatprep.subr.bf16.mxu1 %v4593_v17 }
 0x338   :  { %4596 = vmatpush3.bf16.msra.mxu1 %v4595_v13 }
 0x358   :  { %v2660_v24 = vpop.f32.mrb[2].mxu0 }
 0x359   :  { %v4605_v20 = vadd.f32 %v2660_v24, %v1230_v14  ;;  %v2662_v23 = vpop.f32.mrb[3].mxu0 }
 0x35a   :  { %v4607_v37 = vadd.f32 %v2662_v23, %v1234_v19 }
 0x35b   :  { %v4606_v25 = vadd.f32 %v4605_v20, %v8646_v51 }
 0x35c   :  { %v4608_v27 = vadd.f32 %v4607_v37, %v8648_v52 }
 0x35d   :  { %v2746_v30 = vmul.f32 0.70710677, %v4606_v25  ;;  %v2740_v31 = vmul.f32 0.5, %v4606_v25 }
 0x35e   :  { %v2747_v40 = vmul.f32 0.70710677, %v4608_v27  ;;  %v2741_v16 = vmul.f32 0.5, %v4608_v27 }
 0x35f   :  { %v2764_v33 = vand.u32 2147483647, %v2746_v30  ;;  %vm2752_vm5 = vcmp.ge.f32.partialorder %v2746_v30, 0.0 }
 0x360   :  { %v2765_v35 = vand.u32 2147483647, %v2747_v40  ;;  %vm2753_vm6 = vcmp.ge.f32.partialorder %v2747_v40, 0.0  ;;  %v2758_v5 = vsel %vm2752_vm5, 1.0, %v4684_v54 }
 0x361   :  { %v2770_v39 = vmul.f32 0.3275911, %v2764_v33  ;;  %v2848_v44 = vsub.f32 0.0, %v2764_v33  ;;  %v2759_v6 = vsel %vm2753_vm6, 1.0, %v4684_v54 }
 0x362   :  { %v2771_v42 = vmul.f32 0.3275911, %v2765_v35  ;;  %v2849_v29 = vsub.f32 0.0, %v2765_v35 }
 0x363   :  { %v2776_v43 = vadd.f32 1.0, %v2770_v39  ;;  %v2854_v18 = vmul.f32 %v2848_v44, %v2764_v33 }
 0x364   :  { %v2777_v15 = vadd.f32 1.0, %v2771_v42  ;;  %v2855_v34 = vmul.f32 %v2849_v29, %v2765_v35 }
 0x365   :  { %4657 = vrcp.f32 %v2776_v43  ;;  %v2864_v52 = vmul.f32 1.442695, %v2854_v18 }
 0x366   :  { %4659 = vrcp.f32 %v2777_v15  ;;  %v2866_v53 = vmul.f32 1.442695, %v2855_v34 }
 0x367   :  { %4661 = vpow2.f32 %v2864_v52 }
 0x368   :  { %4663 = vpow2.f32 %v2866_v53 }
 0x36f   :  { %v4658_v45 = vpop.eup %4657 }
 0x370   :  { %v4660_v38 = vpop.eup %4659  ;;  %v2794_v46 = vmul.f32 1.0614054, %v4658_v45 }
 0x371   :  { %v2795_v51 = vmul.f32 1.0614054, %v4660_v38  ;;  %v4662_v1 = vpop.eup %4661 }
 0x372   :  { %v2800_v47 = vadd.f32 -1.4531521, %v2794_v46  ;;  %v4664_v26 = vpop.eup %4663 }
 0x373   :  { %v2801_v50 = vadd.f32 -1.4531521, %v2795_v51 }
 0x374   :  { %v2806_v4 = vmul.f32 %v4658_v45, %v2800_v47 }
 0x375   :  { %v2807_v21 = vmul.f32 %v4660_v38, %v2801_v50 }
 0x376   :  { %v2812_v55 = vadd.f32 1.4214138, %v2806_v4 }
 0x377   :  { %v2813_v56 = vadd.f32 1.4214138, %v2807_v21 }
 0x378   :  { %v2818_v57 = vmul.f32 %v4658_v45, %v2812_v55 }
 0x379   :  { %v2819_v58 = vmul.f32 %v4660_v38, %v2813_v56 }
 0x37a   :  { %v2824_v59 = vadd.f32 -0.28449672, %v2818_v57 }
 0x37b   :  { %v2825_v60 = vadd.f32 -0.28449672, %v2819_v58 }
 0x37c   :  { %v2830_v28 = vmul.f32 %v4658_v45, %v2824_v59 }
 0x37d   :  { %v2831_v61 = vmul.f32 %v4660_v38, %v2825_v60 }
 0x37e   :  { %v2836_v62 = vadd.f32 0.2548296, %v2830_v28 }
 0x37f   :  { %v2837_v63 = vadd.f32 0.2548296, %v2831_v61 }
 0x380   :  { %v2842_v0 = vmul.f32 %v4658_v45, %v2836_v62 }
 0x381   :  { %v2843_v2 = vmul.f32 %v4660_v38, %v2837_v63 }
 0x382   :  { %v2872_v3 = vmul.f32 %v4662_v1, %v2842_v0 }
 0x383   :  { %v2873_v22 = vmul.f32 %v4664_v26, %v2843_v2 }
 0x384   :  { %v2878_v32 = vsub.f32 1.0, %v2872_v3 }
 0x385   :  { %v2879_v49 = vsub.f32 1.0, %v2873_v22 }
 0x386   :  { %v2884_v48 = vmul.f32 %v2878_v32, %v2758_v5 }
 0x387   :  { %v2885_v7 = vmul.f32 %v2879_v49, %v2759_v6 }
 0x388   :  { %v2890_v8 = vadd.f32 1.0, %v2884_v48 }
 0x389   :  { %v2891_v41 = vadd.f32 1.0, %v2885_v7 }
 0x38a   :  { %v2896_v11 = vmul.f32 %v2890_v8, %v2740_v31 }
 0x38b   :  { %v2897_v17 = vmul.f32 %v2891_v41, %v2741_v16 }
 0x38d   :  { %3205 = vmatprep.mubr.f32.mxu1 %v2897_v17 }
 0x38e   :  { %3206 = vmatmul.mubr.f32.vlgmr.msra.gmra.mrb[12].mxu1 %v2896_v11 }
 0x3ee   :  { %v3287_v13 = vpop.f32.mrb[10].mxu1 }
 0x3ef   :  { %v3288_v9 = vpop.f32.mrb[11].mxu1 }
 0x3f0   :  { %v3289_v14 = vadd.f32 %v3288_v9, %v3287_v13 }
 0x3f2   :  { %v3138_v19 = vadd.f32 %v3289_v14, %v3068_v36 }
 0x461   :  { %v3322_v54 = vpop.f32.mrb[12].mxu1 }
 0x462   :  { %v3323_v24 = vpop.f32.mrb[13].mxu1 }
 0x463   :  { %v3324_v20 = vadd.f32 %v3323_v24, %v3322_v54 }
 0x465   :  { %v3208_v23 = vadd.f32 %v3324_v20, %v3138_v19 }
 0x467   :  { %3211 = vst [vmem:[%s8765_s5] sm:$0xff] %v3208_v23 }

</bundles_post_ra>
